<compile_context>
chip_gen: v7x
topology: tpu7x:2x2x1
jax: 0.10.0
libtpu: 0.0.40
codegen_flags: <defaults>
</compile_context>

<pallas_src>
import math
import jax
import jax.numpy as jnp
from jax.experimental import pallas as pl
from jax.experimental.pallas import tpu as pltpu

# ---------------- configuration (mirrors `opt`) ----------------
B        = 2      # batch_size
N_NODES  = 8      # N_nodes
N_WORDS  = 8      # N_words == max_words
D_MODEL  = 32     # opt.embedding_dim
N_HEADS  = 4      # opt.heads
FF_SIZE  = 64     # opt.ff_size
ALPHA    = 0.01   # opt.alpha (LeakyReLU slope in the GAT)
VOCAB    = 50     # src_vocab_size
PAD_IDX  = 0      # padding_idx
D_HEAD   = D_MODEL // N_HEADS
BN       = B * N_NODES            # total number of nodes
T        = N_WORDS * BN           # total number of tokens (word-major layout)
NEG_INF  = -1e9
LN_EPS   = 1e-5
F32      = jnp.float32


# =========================================================================
# The single fused kernel: token MHA -> node linear -> GAT -> FFN
# =========================================================================
def _graph_encoder_kernel(
        x_ref,        # (T, D)   token embeddings, word-major rows: r = w*BN + node
        pad_ref,      # (1, T)   1.0 where the token is padding
        nidr_ref,     # (T, 1)   node id of each token (row form)
        nidc_ref,     # (1, T)   node id of each token (col form)
        pe_ref,       # (T, D)   sinusoidal positional encoding, pre-tiled
        wq_ref, wk_ref, wv_ref, wo_ref,      # (D, D) fused-head MHA projections
        ln1_g_ref, ln1_b_ref,                # (1, D)
        w_lin_ref,                           # (W, D, D) Em_graph.linear per-word slice
        adj_ref,                             # (B, N, N)
        gat_w1_ref,                          # (D, H*FF) fused GAT head weights
        gat_a1_ref, gat_a2_ref,              # (H, D)    W1[h]@a_src[h] / W1[h]@a_dst[h]
        gat_wo_ref,                          # (H*FF, D) GAT output-head weight
        gat_ao1_ref, gat_ao2_ref,            # (1, D)
        ffn_w1_ref, ffn_b1_ref, ffn_w2_ref, ffn_b2_ref,
        ln2_g_ref, ln2_b_ref,
        o_ref):                              # (BN, D)

    scale = 1.0 / math.sqrt(D_HEAD)

    def layer_norm(y, g, b):
        mu = jnp.mean(y, axis=-1, keepdims=True)
        var = jnp.mean((y - mu) ** 2, axis=-1, keepdims=True)
        return (y - mu) * jax.lax.rsqrt(var + LN_EPS) * g + b

    def softmax_lastdim(s):
        s = s - jnp.max(s, axis=-1, keepdims=True)
        p = jnp.exp(s)
        return p * pl.reciprocal(jnp.sum(p, axis=-1, keepdims=True), approx=True)

    def leaky_relu(v):
        return jnp.where(v > 0, v, ALPHA * v)

    def elu(v):
        return jnp.where(v > 0, v, jnp.exp(v) - 1.0)

    # ---------------- Em_graph: token-level multi-head self-attention -------
    x = x_ref[...] + pe_ref[...]                        # (T, D); dropout = identity
    # a token may only attend to non-pad tokens of its own node
    valid = jnp.logical_and(nidr_ref[...] == nidc_ref[...],
                            pad_ref[...] < 0.5)         # (T, T)

    q = jnp.dot(x, wq_ref[...], preferred_element_type=F32)    # (T, D)
    k = jnp.dot(x, wk_ref[...], preferred_element_type=F32)
    v = jnp.dot(x, wv_ref[...], preferred_element_type=F32)
    wo = wo_ref[...]

    attn = jnp.zeros((T, D_MODEL), F32)
    for h in range(N_HEADS):                             # static head loop (4)
        sl = slice(h * D_HEAD, (h + 1) * D_HEAD)
        s = jnp.einsum('qd,kd->qk', q[:, sl], k[:, sl],
                       preferred_element_type=F32) * scale      # (T, T)
        p = softmax_lastdim(jnp.where(valid, s, NEG_INF))
        ctx = jnp.dot(p, v[:, sl], preferred_element_type=F32)  # (T, dk)
        # concat-of-heads folded into the output projection (no relayout)
        attn = attn + jnp.dot(ctx, wo[sl, :], preferred_element_type=F32)
    attn = layer_norm(attn + x, ln1_g_ref[...], ln1_b_ref[...])  # residual incl. PE

    # ---------------- Em_graph.linear : per-node [W*D] -> [D], bias=False ---
    # rows are word-major, so word w of every node is the contiguous row slice
    # [w*BN, (w+1)*BN) — the flatten+matmul becomes a sum of W small matmuls.
    node = jnp.zeros((BN, D_MODEL), F32)
    for w in range(N_WORDS):
        node = node + jnp.dot(attn[w * BN:(w + 1) * BN, :], w_lin_ref[w],
                              preferred_element_type=F32)

    # ---------------- GraphEncoderLayer: multi-head GAT ---------------------
    wh_all = jnp.dot(node, gat_w1_ref[...], preferred_element_type=F32)   # (BN, H*FF)
    # e_h[i,j] = LeakyReLU(Wh_h[i]·a_src_h + Wh_h[j]·a_dst_h), with the
    # attention vectors folded into the node features: Wh_h[i]·a = node[i]·(W1_h a)
    f_src = jnp.einsum('nd,hd->nh', node, gat_a1_ref[...],
                       preferred_element_type=F32)                        # (BN, H)
    f_dst = jnp.einsum('hd,nd->hn', gat_a2_ref[...], node,
                       preferred_element_type=F32)                        # (H, BN)
    g_wo = gat_wo_ref[...]
    ao1 = gat_ao1_ref[...]
    ao2 = gat_ao2_ref[...]

    gat_rows = []
    for b in range(B):                                    # static batch loop (2)
        rows = slice(b * N_NODES, (b + 1) * N_NODES)
        adj_b = adj_ref[b]                                # (N, N)
        wh_b = wh_all[rows, :]                            # (N, H*FF)
        wh2 = jnp.zeros((N_NODES, D_MODEL), F32)
        for h in range(N_HEADS):                          # static head loop (4)
            e = leaky_relu(f_src[rows, h:h + 1] + f_dst[h:h + 1, rows])   # (N, N)
            p = softmax_lastdim(jnp.where(adj_b > 0, e, NEG_INF))
            head = elu(jnp.dot(p, wh_b[:, h * FF_SIZE:(h + 1) * FF_SIZE],
                               preferred_element_type=F32))               # (N, FF)
            # concat of head outputs folded into the output projection
            wh2 = wh2 + jnp.dot(head, g_wo[h * FF_SIZE:(h + 1) * FF_SIZE, :],
                                preferred_element_type=F32)
        # GAT output attention head
        fs2 = jnp.einsum('nd,od->no', wh2, ao1, preferred_element_type=F32)  # (N, 1)
        fd2 = jnp.einsum('od,nd->on', ao2, wh2, preferred_element_type=F32)  # (1, N)
        p2 = softmax_lastdim(jnp.where(adj_b > 0, leaky_relu(fs2 + fd2), NEG_INF))
        # TODO(synk): pyGAT classifier variants end with log_softmax; omitted
        # because this GAT is used as an encoder producing features.
        gat_rows.append(elu(jnp.dot(p2, wh2, preferred_element_type=F32)))   # (N, D)
    gat_out = jnp.concatenate(gat_rows, axis=0)                              # (BN, D)

    # ---------------- position-wise FFN + residual + LayerNorm --------------
    h1 = jnp.maximum(jnp.dot(gat_out, ffn_w1_ref[...], preferred_element_type=F32)
                     + ffn_b1_ref[...], 0.0)
    y = (jnp.dot(h1, ffn_w2_ref[...], preferred_element_type=F32)
         + ffn_b2_ref[...] + gat_out)
    o_ref[...] = layer_norm(y, ln2_g_ref[...], ln2_b_ref[...])


def _full(shape):
    """Whole-array block (single grid point)."""
    zeros = (0,) * len(shape)
    return pl.BlockSpec(shape, lambda *_: zeros)


def graph_encoder_fused(x_flat, pad_col, nid_row, nid_col, adjs, p):
    return pl.pallas_call(
        _graph_encoder_kernel,
        out_shape=jax.ShapeDtypeStruct((BN, D_MODEL), F32),
        grid=(1,),
        in_specs=[
            _full((T, D_MODEL)),                       # x
            _full((1, T)),                             # pad mask (cols)
            _full((T, 1)),                             # node ids (rows)
            _full((1, T)),                             # node ids (cols)
            _full((T, D_MODEL)),                       # positional encoding
            _full((D_MODEL, D_MODEL)),                 # wq
            _full((D_MODEL, D_MODEL)),                 # wk
            _full((D_MODEL, D_MODEL)),                 # wv
            _full((D_MODEL, D_MODEL)),                 # wo
            _full((1, D_MODEL)),                       # ln1 gamma
            _full((1, D_MODEL)),                       # ln1 beta
            _full((N_WORDS, D_MODEL, D_MODEL)),        # Em_graph.linear
            _full((B, N_NODES, N_NODES)),              # adjacency
            _full((D_MODEL, N_HEADS * FF_SIZE)),       # GAT W1 (fused heads)
            _full((N_HEADS, D_MODEL)),                 # GAT a_src folded
            _full((N_HEADS, D_MODEL)),                 # GAT a_dst folded
            _full((N_HEADS * FF_SIZE, D_MODEL)),       # GAT output W
            _full((1, D_MODEL)),                       # GAT ao_src
            _full((1, D_MODEL)),                       # GAT ao_dst
            _full((D_MODEL, FF_SIZE)),                 # ffn w1
            _full((1, FF_SIZE)),                       # ffn b1
            _full((FF_SIZE, D_MODEL)),                 # ffn w2
            _full((1, D_MODEL)),                       # ffn b2
            _full((1, D_MODEL)),                       # ln2 gamma
            _full((1, D_MODEL)),                       # ln2 beta
        ],
        out_specs=_full((BN, D_MODEL)),
        compiler_params=pltpu.CompilerParams(
            dimension_semantics=("arbitrary",)),
    )(x_flat, pad_col, nid_row, nid_col, p['pe_flat'],
      p['wq'], p['wk'], p['wv'], p['wo'], p['ln1_g'], p['ln1_b'],
      p['w_lin'], adjs,
      p['gat_w1'], p['gat_a1w'], p['gat_a2w'], p['gat_wo'],
      p['gat_ao1'], p['gat_ao2'],
      p['ffn_w1'], p['ffn_b1'], p['ffn_w2'], p['ffn_b2'],
      p['ln2_g'], p['ln2_b'])


# =========================================================================
# Parameter construction (deterministic, synthetic)
# =========================================================================
def make_params():
    ks = jax.random.split(jax.random.PRNGKey(42), 16)
    n = lambda k, shape, s=0.02: (jax.random.normal(k, shape) * s).astype(F32)

    emb = (jax.random.normal(ks[0], (VOCAB, D_MODEL)) * D_MODEL ** -0.5).astype(F32)
    emb = emb.at[PAD_IDX].set(0.0)                 # nn.Embedding padding_idx row = 0

    # sinusoidal positional encoding over the word axis, pre-tiled to the
    # word-major token layout (row = w*BN + node  ->  pe[w])
    pos = jnp.arange(N_WORDS, dtype=F32)[:, None]
    div = jnp.exp(jnp.arange(0, D_MODEL, 2, dtype=F32) * (-math.log(10000.0) / D_MODEL))
    pe = jnp.zeros((N_WORDS, D_MODEL), F32)
    pe = pe.at[:, 0::2].set(jnp.sin(pos * div))
    pe = pe.at[:, 1::2].set(jnp.cos(pos * div))
    pe_flat = jnp.repeat(pe, BN, axis=0)           # (T, D)

    # GAT per-head parameters (PyTorch layout), then fused once for the kernel:
    # heads side-by-side along lanes, attention vectors folded into the weights
    gat_w1 = n(ks[6], (N_HEADS, D_MODEL, FF_SIZE), 0.1)     # W1 per head
    gat_a1 = n(ks[7], (N_HEADS, FF_SIZE), 0.1)              # a_src per head
    gat_a2 = n(ks[8], (N_HEADS, FF_SIZE), 0.1)              # a_dst per head
    gat_w1_f = jnp.transpose(gat_w1, (1, 0, 2)).reshape(D_MODEL, N_HEADS * FF_SIZE)
    gat_a1w = jnp.einsum('hdf,hf->hd', gat_w1, gat_a1)      # (H, D) = W1[h] @ a_src[h]
    gat_a2w = jnp.einsum('hdf,hf->hd', gat_w1, gat_a2)      # (H, D) = W1[h] @ a_dst[h]

    return dict(
        emb=emb, pe_flat=pe_flat,
        # token-level MHA: per-head projections fused to (D, D)
        # (columns / rows [h*D_HEAD:(h+1)*D_HEAD] belong to head h; no biases)
        wq=n(ks[1], (D_MODEL, D_MODEL), 0.1),
        wk=n(ks[2], (D_MODEL, D_MODEL), 0.1),
        wv=n(ks[3], (D_MODEL, D_MODEL), 0.1),
        wo=n(ks[4], (D_MODEL, D_MODEL), 0.1),
        ln1_g=jnp.ones((1, D_MODEL), F32),
        ln1_b=jnp.zeros((1, D_MODEL), F32),
        # Em_graph.linear (bias=False): (W*D, D) viewed as (W, D, D)
        w_lin=n(ks[5], (N_WORDS * D_MODEL, D_MODEL), 0.05)
              .reshape(N_WORDS, D_MODEL, D_MODEL),
        gat_w1=gat_w1_f, gat_a1w=gat_a1w, gat_a2w=gat_a2w,
        gat_wo=n(ks[9], (N_HEADS * FF_SIZE, D_MODEL), 0.05),
        gat_ao1=n(ks[10], (1, D_MODEL), 0.1),
        gat_ao2=n(ks[11], (1, D_MODEL), 0.1),
        # position-wise FFN
        ffn_w1=n(ks[12], (D_MODEL, FF_SIZE), 0.1),
        ffn_b1=jnp.zeros((1, FF_SIZE), F32),
        ffn_w2=n(ks[13], (FF_SIZE, D_MODEL), 0.1),
        ffn_b2=jnp.zeros((1, D_MODEL), F32),
        ln2_g=jnp.ones((1, D_MODEL), F32),
        ln2_b=jnp.zeros((1, D_MODEL), F32),
    )


# =========================================================================
# Full forward pass (GraphEncoder.forward)
# =========================================================================
def graph_encoder_forward(p, enc_inputs, adjs):
    # ---- embedding lookup (gather) + layout plumbing (glue, outside kernel) ----
    emb = p['emb'][enc_inputs]                                   # [B, N, W, D]
    # word-major token layout: row = w*BN + (b*N_NODES + n)
    x_flat = jnp.transpose(emb, (2, 0, 1, 3)).reshape(T, D_MODEL).astype(F32)
    pad = (enc_inputs == PAD_IDX).astype(F32)                    # [B, N, W]
    pad_col = jnp.transpose(pad, (2, 0, 1)).reshape(1, T)
    nid = jnp.tile(jnp.arange(BN, dtype=F32), (N_WORDS,))        # node id per token
    nid_row = nid.reshape(T, 1)
    nid_col = nid.reshape(1, T)
    # NOTE: the reference code stacks inside the batch loop (a bug); the
    # intended semantics — per-node flatten then project — are implemented here.
    out = graph_encoder_fused(x_flat, pad_col, nid_row, nid_col,
                              adjs.astype(F32), p)               # (BN, D)
    return out.reshape(B, N_NODES, D_MODEL)


if __name__ == "__main__":
    ik1, ik2 = jax.random.split(jax.random.PRNGKey(0))
    enc_inputs = jax.random.randint(ik1, (B, N_NODES, N_WORDS), 0, VOCAB, dtype=jnp.int32)
    enc_inputs = enc_inputs.at[:, :, -2:].set(PAD_IDX)                 # some padded words
    enc_inputs = enc_inputs.at[:, :, 0].set(jnp.maximum(enc_inputs[:, :, 0], 1))
    adj_rand = jax.random.bernoulli(ik2, 0.4, (B, N_NODES, N_NODES)).astype(F32)
    adjs = jnp.maximum(jnp.maximum(adj_rand, jnp.swapaxes(adj_rand, 1, 2)),
                       jnp.eye(N_NODES, dtype=F32)[None])               # symmetric + self-loops

    params = make_params()
    out = graph_encoder_forward(params, enc_inputs, adjs)
    out = jax.block_until_ready(out)
    assert out.shape == (B, N_NODES, D_MODEL)
    assert bool(jnp.all(jnp.isfinite(out)))
    print("KERNEL_OK")
</pallas_src>

<mosaic_0001>
module attributes {stable_mosaic.version = 11 : i64} {
  func.func @_graph_encoder_kernel(%arg0: i32, %arg1: memref<128x32xf32, #tpu.memory_space<vmem>>, %arg2: memref<1x128xf32, #tpu.memory_space<vmem>>, %arg3: memref<128x1xf32, #tpu.memory_space<vmem>>, %arg4: memref<1x128xf32, #tpu.memory_space<vmem>>, %arg5: memref<128x32xf32, #tpu.memory_space<vmem>>, %arg6: memref<32x32xf32, #tpu.memory_space<vmem>>, %arg7: memref<32x32xf32, #tpu.memory_space<vmem>>, %arg8: memref<32x32xf32, #tpu.memory_space<vmem>>, %arg9: memref<32x32xf32, #tpu.memory_space<vmem>>, %arg10: memref<1x32xf32, #tpu.memory_space<vmem>>, %arg11: memref<1x32xf32, #tpu.memory_space<vmem>>, %arg12: memref<8x32x32xf32, #tpu.memory_space<vmem>>, %arg13: memref<2x8x8xf32, #tpu.memory_space<vmem>>, %arg14: memref<32x256xf32, #tpu.memory_space<vmem>>, %arg15: memref<4x32xf32, #tpu.memory_space<vmem>>, %arg16: memref<4x32xf32, #tpu.memory_space<vmem>>, %arg17: memref<256x32xf32, #tpu.memory_space<vmem>>, %arg18: memref<1x32xf32, #tpu.memory_space<vmem>>, %arg19: memref<1x32xf32, #tpu.memory_space<vmem>>, %arg20: memref<32x64xf32, #tpu.memory_space<vmem>>, %arg21: memref<1x64xf32, #tpu.memory_space<vmem>>, %arg22: memref<64x32xf32, #tpu.memory_space<vmem>>, %arg23: memref<1x32xf32, #tpu.memory_space<vmem>>, %arg24: memref<1x32xf32, #tpu.memory_space<vmem>>, %arg25: memref<1x32xf32, #tpu.memory_space<vmem>>, %arg26: memref<16x32xf32, #tpu.memory_space<vmem>>) attributes {dimension_semantics = [#tpu.dimension_semantics<arbitrary>], iteration_bounds = array<i64: 1>, scalar_prefetch = 0 : i64, scratch_operands = 0 : i64, tpu.core_type = #tpu.core_type<tc>, window_params = [{pipeline_mode = #tpu.pipeline_mode<synchronous>, transform_indices = @transform_0, window_bounds = array<i64: 128, 32>}, {pipeline_mode = #tpu.pipeline_mode<synchronous>, transform_indices = @transform_1, window_bounds = array<i64: 1, 128>}, {pipeline_mode = #tpu.pipeline_mode<synchronous>, transform_indices = @transform_2, window_bounds = array<i64: 128, 1>}, {pipeline_mode = #tpu.pipeline_mode<synchronous>, transform_indices = @transform_3, window_bounds = array<i64: 1, 128>}, {pipeline_mode = #tpu.pipeline_mode<synchronous>, transform_indices = @transform_4, window_bounds = array<i64: 128, 32>}, {pipeline_mode = #tpu.pipeline_mode<synchronous>, transform_indices = @transform_5, window_bounds = array<i64: 32, 32>}, {pipeline_mode = #tpu.pipeline_mode<synchronous>, transform_indices = @transform_6, window_bounds = array<i64: 32, 32>}, {pipeline_mode = #tpu.pipeline_mode<synchronous>, transform_indices = @transform_7, window_bounds = array<i64: 32, 32>}, {pipeline_mode = #tpu.pipeline_mode<synchronous>, transform_indices = @transform_8, window_bounds = array<i64: 32, 32>}, {pipeline_mode = #tpu.pipeline_mode<synchronous>, transform_indices = @transform_9, window_bounds = array<i64: 1, 32>}, {pipeline_mode = #tpu.pipeline_mode<synchronous>, transform_indices = @transform_10, window_bounds = array<i64: 1, 32>}, {pipeline_mode = #tpu.pipeline_mode<synchronous>, transform_indices = @transform_11, window_bounds = array<i64: 8, 32, 32>}, {pipeline_mode = #tpu.pipeline_mode<synchronous>, transform_indices = @transform_12, window_bounds = array<i64: 2, 8, 8>}, {pipeline_mode = #tpu.pipeline_mode<synchronous>, transform_indices = @transform_13, window_bounds = array<i64: 32, 256>}, {pipeline_mode = #tpu.pipeline_mode<synchronous>, transform_indices = @transform_14, window_bounds = array<i64: 4, 32>}, {pipeline_mode = #tpu.pipeline_mode<synchronous>, transform_indices = @transform_15, window_bounds = array<i64: 4, 32>}, {pipeline_mode = #tpu.pipeline_mode<synchronous>, transform_indices = @transform_16, window_bounds = array<i64: 256, 32>}, {pipeline_mode = #tpu.pipeline_mode<synchronous>, transform_indices = @transform_17, window_bounds = array<i64: 1, 32>}, {pipeline_mode = #tpu.pipeline_mode<synchronous>, transform_indices = @transform_18, window_bounds = array<i64: 1, 32>}, {pipeline_mode = #tpu.pipeline_mode<synchronous>, transform_indices = @transform_19, window_bounds = array<i64: 32, 64>}, {pipeline_mode = #tpu.pipeline_mode<synchronous>, transform_indices = @transform_20, window_bounds = array<i64: 1, 64>}, {pipeline_mode = #tpu.pipeline_mode<synchronous>, transform_indices = @transform_21, window_bounds = array<i64: 64, 32>}, {pipeline_mode = #tpu.pipeline_mode<synchronous>, transform_indices = @transform_22, window_bounds = array<i64: 1, 32>}, {pipeline_mode = #tpu.pipeline_mode<synchronous>, transform_indices = @transform_23, window_bounds = array<i64: 1, 32>}, {pipeline_mode = #tpu.pipeline_mode<synchronous>, transform_indices = @transform_24, window_bounds = array<i64: 1, 32>}, {pipeline_mode = #tpu.pipeline_mode<synchronous>, transform_indices = @transform_25, window_bounds = array<i64: 16, 32>}]} {
    %c0 = arith.constant 0 : index
    %c0_0 = arith.constant 0 : index
    %0 = vector.load %arg1[%c0, %c0_0] : memref<128x32xf32, #tpu.memory_space<vmem>>, vector<128x32xf32>
    %c0_1 = arith.constant 0 : index
    %c0_2 = arith.constant 0 : index
    %1 = vector.load %arg5[%c0_1, %c0_2] : memref<128x32xf32, #tpu.memory_space<vmem>>, vector<128x32xf32>
    %2 = arith.addf %0, %1 : vector<128x32xf32>
    %c0_3 = arith.constant 0 : index
    %c0_4 = arith.constant 0 : index
    %3 = vector.load %arg3[%c0_3, %c0_4] : memref<128x1xf32, #tpu.memory_space<vmem>>, vector<128x1xf32>
    %c0_5 = arith.constant 0 : index
    %c0_6 = arith.constant 0 : index
    %4 = vector.load %arg4[%c0_5, %c0_6] : memref<1x128xf32, #tpu.memory_space<vmem>>, vector<1x128xf32>
    %5 = vector.broadcast %3 : vector<128x1xf32> to vector<128x128xf32>
    %6 = vector.broadcast %4 : vector<1x128xf32> to vector<128x128xf32>
    %7 = arith.cmpf oeq, %5, %6 : vector<128x128xf32>
    %c0_7 = arith.constant 0 : index
    %c0_8 = arith.constant 0 : index
    %8 = vector.load %arg2[%c0_7, %c0_8] : memref<1x128xf32, #tpu.memory_space<vmem>>, vector<1x128xf32>
    %cst = arith.constant 5.000000e-01 : f32
    %9 = vector.broadcast %cst : f32 to vector<1x128xf32>
    %10 = arith.cmpf olt, %8, %9 : vector<1x128xf32>
    %11 = vector.broadcast %10 : vector<1x128xi1> to vector<128x128xi1>
    %12 = arith.andi %7, %11 : vector<128x128xi1>
    %c0_9 = arith.constant 0 : index
    %c0_10 = arith.constant 0 : index
    %13 = vector.load %arg6[%c0_9, %c0_10] : memref<32x32xf32, #tpu.memory_space<vmem>>, vector<32x32xf32>
    %cst_11 = arith.constant dense<0.000000e+00> : vector<128x32xf32>
    %14 = tpu.matmul %2, %13, %cst_11 {dimension_numbers = #tpu.dot_dimension_numbers<[1], [0], [0], [1], [0, 0, 1, 1], [], []>} : vector<128x32xf32>, vector<32x32xf32>, vector<128x32xf32> -> vector<128x32xf32>
    %c0_12 = arith.constant 0 : index
    %c0_13 = arith.constant 0 : index
    %15 = vector.load %arg7[%c0_12, %c0_13] : memref<32x32xf32, #tpu.memory_space<vmem>>, vector<32x32xf32>
    %cst_14 = arith.constant dense<0.000000e+00> : vector<128x32xf32>
    %16 = tpu.matmul %2, %15, %cst_14 {dimension_numbers = #tpu.dot_dimension_numbers<[1], [0], [0], [1], [0, 0, 1, 1], [], []>} : vector<128x32xf32>, vector<32x32xf32>, vector<128x32xf32> -> vector<128x32xf32>
    %c0_15 = arith.constant 0 : index
    %c0_16 = arith.constant 0 : index
    %17 = vector.load %arg8[%c0_15, %c0_16] : memref<32x32xf32, #tpu.memory_space<vmem>>, vector<32x32xf32>
    %cst_17 = arith.constant dense<0.000000e+00> : vector<128x32xf32>
    %18 = tpu.matmul %2, %17, %cst_17 {dimension_numbers = #tpu.dot_dimension_numbers<[1], [0], [0], [1], [0, 0, 1, 1], [], []>} : vector<128x32xf32>, vector<32x32xf32>, vector<128x32xf32> -> vector<128x32xf32>
    %c0_18 = arith.constant 0 : index
    %c0_19 = arith.constant 0 : index
    %19 = vector.load %arg9[%c0_18, %c0_19] : memref<32x32xf32, #tpu.memory_space<vmem>>, vector<32x32xf32>
    %cst_20 = arith.constant 0.000000e+00 : f32
    %20 = vector.broadcast %cst_20 : f32 to vector<128x32xf32>
    %21 = vector.extract_strided_slice %14 {offsets = [0, 0], sizes = [128, 8], strides = [1, 1]} : vector<128x32xf32> to vector<128x8xf32>
    %22 = vector.extract_strided_slice %16 {offsets = [0, 0], sizes = [128, 8], strides = [1, 1]} : vector<128x32xf32> to vector<128x8xf32>
    "tpu.trace_start"() <{level = 10 : i32, message = "qd,kd->qk"}> : () -> ()
    %cst_21 = arith.constant dense<0.000000e+00> : vector<128x128xf32>
    %23 = tpu.matmul %21, %22, %cst_21 {dimension_numbers = #tpu.dot_dimension_numbers<[1], [1], [0], [0], [0, 0, 1, 0], [], []>} : vector<128x8xf32>, vector<128x8xf32>, vector<128x128xf32> -> vector<128x128xf32>
    "tpu.trace_stop"() : () -> ()
    %cst_22 = arith.constant 0.353553385 : f32
    %24 = vector.broadcast %cst_22 : f32 to vector<128x128xf32>
    %25 = arith.mulf %23, %24 : vector<128x128xf32>
    %cst_23 = arith.constant -1.000000e+09 : f32
    %26 = vector.broadcast %cst_23 : f32 to vector<128x128xf32>
    %27 = arith.select %12, %25, %26 : vector<128x128xi1>, vector<128x128xf32>
    %cst_24 = arith.constant dense<0xFF800000> : vector<128xf32>
    %28 = vector.multi_reduction <maximumf>, %27, %cst_24 [1] : vector<128x128xf32> to vector<128xf32>
    %29 = vector.shape_cast %28 : vector<128xf32> to vector<128x1xf32>
    %30 = vector.broadcast %29 : vector<128x1xf32> to vector<128x128xf32>
    %31 = arith.subf %27, %30 : vector<128x128xf32>
    %32 = math.exp %31 : vector<128x128xf32>
    %cst_25 = arith.constant dense<0.000000e+00> : vector<128xf32>
    %33 = vector.multi_reduction <add>, %32, %cst_25 [1] : vector<128x128xf32> to vector<128xf32>
    %34 = vector.shape_cast %33 : vector<128xf32> to vector<128x1xf32>
    %35 = tpu.reciprocal %34 {approx = true} : vector<128x1xf32> -> vector<128x1xf32>
    %36 = vector.broadcast %35 : vector<128x1xf32> to vector<128x128xf32>
    %37 = arith.mulf %32, %36 : vector<128x128xf32>
    %38 = vector.extract_strided_slice %18 {offsets = [0, 0], sizes = [128, 8], strides = [1, 1]} : vector<128x32xf32> to vector<128x8xf32>
    %cst_26 = arith.constant dense<0.000000e+00> : vector<128x8xf32>
    %39 = tpu.matmul %37, %38, %cst_26 {dimension_numbers = #tpu.dot_dimension_numbers<[1], [0], [0], [1], [0, 0, 1, 1], [], []>} : vector<128x128xf32>, vector<128x8xf32>, vector<128x8xf32> -> vector<128x8xf32>
    %40 = vector.extract_strided_slice %19 {offsets = [0, 0], sizes = [8, 32], strides = [1, 1]} : vector<32x32xf32> to vector<8x32xf32>
    %cst_27 = arith.constant dense<0.000000e+00> : vector<128x32xf32>
    %41 = tpu.matmul %39, %40, %cst_27 {dimension_numbers = #tpu.dot_dimension_numbers<[1], [0], [0], [1], [0, 0, 1, 1], [], []>} : vector<128x8xf32>, vector<8x32xf32>, vector<128x32xf32> -> vector<128x32xf32>
    %42 = arith.addf %20, %41 : vector<128x32xf32>
    %43 = vector.extract_strided_slice %14 {offsets = [0, 8], sizes = [128, 8], strides = [1, 1]} : vector<128x32xf32> to vector<128x8xf32>
    %44 = vector.extract_strided_slice %16 {offsets = [0, 8], sizes = [128, 8], strides = [1, 1]} : vector<128x32xf32> to vector<128x8xf32>
    "tpu.trace_start"() <{level = 10 : i32, message = "qd,kd->qk"}> : () -> ()
    %cst_28 = arith.constant dense<0.000000e+00> : vector<128x128xf32>
    %45 = tpu.matmul %43, %44, %cst_28 {dimension_numbers = #tpu.dot_dimension_numbers<[1], [1], [0], [0], [0, 0, 1, 0], [], []>} : vector<128x8xf32>, vector<128x8xf32>, vector<128x128xf32> -> vector<128x128xf32>
    "tpu.trace_stop"() : () -> ()
    %cst_29 = arith.constant 0.353553385 : f32
    %46 = vector.broadcast %cst_29 : f32 to vector<128x128xf32>
    %47 = arith.mulf %45, %46 : vector<128x128xf32>
    %cst_30 = arith.constant -1.000000e+09 : f32
    %48 = vector.broadcast %cst_30 : f32 to vector<128x128xf32>
    %49 = arith.select %12, %47, %48 : vector<128x128xi1>, vector<128x128xf32>
    %cst_31 = arith.constant dense<0xFF800000> : vector<128xf32>
    %50 = vector.multi_reduction <maximumf>, %49, %cst_31 [1] : vector<128x128xf32> to vector<128xf32>
    %51 = vector.shape_cast %50 : vector<128xf32> to vector<128x1xf32>
    %52 = vector.broadcast %51 : vector<128x1xf32> to vector<128x128xf32>
    %53 = arith.subf %49, %52 : vector<128x128xf32>
    %54 = math.exp %53 : vector<128x128xf32>
    %cst_32 = arith.constant dense<0.000000e+00> : vector<128xf32>
    %55 = vector.multi_reduction <add>, %54, %cst_32 [1] : vector<128x128xf32> to vector<128xf32>
    %56 = vector.shape_cast %55 : vector<128xf32> to vector<128x1xf32>
    %57 = tpu.reciprocal %56 {approx = true} : vector<128x1xf32> -> vector<128x1xf32>
    %58 = vector.broadcast %57 : vector<128x1xf32> to vector<128x128xf32>
    %59 = arith.mulf %54, %58 : vector<128x128xf32>
    %60 = vector.extract_strided_slice %18 {offsets = [0, 8], sizes = [128, 8], strides = [1, 1]} : vector<128x32xf32> to vector<128x8xf32>
    %cst_33 = arith.constant dense<0.000000e+00> : vector<128x8xf32>
    %61 = tpu.matmul %59, %60, %cst_33 {dimension_numbers = #tpu.dot_dimension_numbers<[1], [0], [0], [1], [0, 0, 1, 1], [], []>} : vector<128x128xf32>, vector<128x8xf32>, vector<128x8xf32> -> vector<128x8xf32>
    %62 = vector.extract_strided_slice %19 {offsets = [8, 0], sizes = [8, 32], strides = [1, 1]} : vector<32x32xf32> to vector<8x32xf32>
    %cst_34 = arith.constant dense<0.000000e+00> : vector<128x32xf32>
    %63 = tpu.matmul %61, %62, %cst_34 {dimension_numbers = #tpu.dot_dimension_numbers<[1], [0], [0], [1], [0, 0, 1, 1], [], []>} : vector<128x8xf32>, vector<8x32xf32>, vector<128x32xf32> -> vector<128x32xf32>
    %64 = arith.addf %42, %63 : vector<128x32xf32>
    %65 = vector.extract_strided_slice %14 {offsets = [0, 16], sizes = [128, 8], strides = [1, 1]} : vector<128x32xf32> to vector<128x8xf32>
    %66 = vector.extract_strided_slice %16 {offsets = [0, 16], sizes = [128, 8], strides = [1, 1]} : vector<128x32xf32> to vector<128x8xf32>
    "tpu.trace_start"() <{level = 10 : i32, message = "qd,kd->qk"}> : () -> ()
    %cst_35 = arith.constant dense<0.000000e+00> : vector<128x128xf32>
    %67 = tpu.matmul %65, %66, %cst_35 {dimension_numbers = #tpu.dot_dimension_numbers<[1], [1], [0], [0], [0, 0, 1, 0], [], []>} : vector<128x8xf32>, vector<128x8xf32>, vector<128x128xf32> -> vector<128x128xf32>
    "tpu.trace_stop"() : () -> ()
    %cst_36 = arith.constant 0.353553385 : f32
    %68 = vector.broadcast %cst_36 : f32 to vector<128x128xf32>
    %69 = arith.mulf %67, %68 : vector<128x128xf32>
    %cst_37 = arith.constant -1.000000e+09 : f32
    %70 = vector.broadcast %cst_37 : f32 to vector<128x128xf32>
    %71 = arith.select %12, %69, %70 : vector<128x128xi1>, vector<128x128xf32>
    %cst_38 = arith.constant dense<0xFF800000> : vector<128xf32>
    %72 = vector.multi_reduction <maximumf>, %71, %cst_38 [1] : vector<128x128xf32> to vector<128xf32>
    %73 = vector.shape_cast %72 : vector<128xf32> to vector<128x1xf32>
    %74 = vector.broadcast %73 : vector<128x1xf32> to vector<128x128xf32>
    %75 = arith.subf %71, %74 : vector<128x128xf32>
    %76 = math.exp %75 : vector<128x128xf32>
    %cst_39 = arith.constant dense<0.000000e+00> : vector<128xf32>
    %77 = vector.multi_reduction <add>, %76, %cst_39 [1] : vector<128x128xf32> to vector<128xf32>
    %78 = vector.shape_cast %77 : vector<128xf32> to vector<128x1xf32>
    %79 = tpu.reciprocal %78 {approx = true} : vector<128x1xf32> -> vector<128x1xf32>
    %80 = vector.broadcast %79 : vector<128x1xf32> to vector<128x128xf32>
    %81 = arith.mulf %76, %80 : vector<128x128xf32>
    %82 = vector.extract_strided_slice %18 {offsets = [0, 16], sizes = [128, 8], strides = [1, 1]} : vector<128x32xf32> to vector<128x8xf32>
    %cst_40 = arith.constant dense<0.000000e+00> : vector<128x8xf32>
    %83 = tpu.matmul %81, %82, %cst_40 {dimension_numbers = #tpu.dot_dimension_numbers<[1], [0], [0], [1], [0, 0, 1, 1], [], []>} : vector<128x128xf32>, vector<128x8xf32>, vector<128x8xf32> -> vector<128x8xf32>
    %84 = vector.extract_strided_slice %19 {offsets = [16, 0], sizes = [8, 32], strides = [1, 1]} : vector<32x32xf32> to vector<8x32xf32>
    %cst_41 = arith.constant dense<0.000000e+00> : vector<128x32xf32>
    %85 = tpu.matmul %83, %84, %cst_41 {dimension_numbers = #tpu.dot_dimension_numbers<[1], [0], [0], [1], [0, 0, 1, 1], [], []>} : vector<128x8xf32>, vector<8x32xf32>, vector<128x32xf32> -> vector<128x32xf32>
    %86 = arith.addf %64, %85 : vector<128x32xf32>
    %87 = vector.extract_strided_slice %14 {offsets = [0, 24], sizes = [128, 8], strides = [1, 1]} : vector<128x32xf32> to vector<128x8xf32>
    %88 = vector.extract_strided_slice %16 {offsets = [0, 24], sizes = [128, 8], strides = [1, 1]} : vector<128x32xf32> to vector<128x8xf32>
    "tpu.trace_start"() <{level = 10 : i32, message = "qd,kd->qk"}> : () -> ()
    %cst_42 = arith.constant dense<0.000000e+00> : vector<128x128xf32>
    %89 = tpu.matmul %87, %88, %cst_42 {dimension_numbers = #tpu.dot_dimension_numbers<[1], [1], [0], [0], [0, 0, 1, 0], [], []>} : vector<128x8xf32>, vector<128x8xf32>, vector<128x128xf32> -> vector<128x128xf32>
    "tpu.trace_stop"() : () -> ()
    %cst_43 = arith.constant 0.353553385 : f32
    %90 = vector.broadcast %cst_43 : f32 to vector<128x128xf32>
    %91 = arith.mulf %89, %90 : vector<128x128xf32>
    %cst_44 = arith.constant -1.000000e+09 : f32
    %92 = vector.broadcast %cst_44 : f32 to vector<128x128xf32>
    %93 = arith.select %12, %91, %92 : vector<128x128xi1>, vector<128x128xf32>
    %cst_45 = arith.constant dense<0xFF800000> : vector<128xf32>
    %94 = vector.multi_reduction <maximumf>, %93, %cst_45 [1] : vector<128x128xf32> to vector<128xf32>
    %95 = vector.shape_cast %94 : vector<128xf32> to vector<128x1xf32>
    %96 = vector.broadcast %95 : vector<128x1xf32> to vector<128x128xf32>
    %97 = arith.subf %93, %96 : vector<128x128xf32>
    %98 = math.exp %97 : vector<128x128xf32>
    %cst_46 = arith.constant dense<0.000000e+00> : vector<128xf32>
    %99 = vector.multi_reduction <add>, %98, %cst_46 [1] : vector<128x128xf32> to vector<128xf32>
    %100 = vector.shape_cast %99 : vector<128xf32> to vector<128x1xf32>
    %101 = tpu.reciprocal %100 {approx = true} : vector<128x1xf32> -> vector<128x1xf32>
    %102 = vector.broadcast %101 : vector<128x1xf32> to vector<128x128xf32>
    %103 = arith.mulf %98, %102 : vector<128x128xf32>
    %104 = vector.extract_strided_slice %18 {offsets = [0, 24], sizes = [128, 8], strides = [1, 1]} : vector<128x32xf32> to vector<128x8xf32>
    %cst_47 = arith.constant dense<0.000000e+00> : vector<128x8xf32>
    %105 = tpu.matmul %103, %104, %cst_47 {dimension_numbers = #tpu.dot_dimension_numbers<[1], [0], [0], [1], [0, 0, 1, 1], [], []>} : vector<128x128xf32>, vector<128x8xf32>, vector<128x8xf32> -> vector<128x8xf32>
    %106 = vector.extract_strided_slice %19 {offsets = [24, 0], sizes = [8, 32], strides = [1, 1]} : vector<32x32xf32> to vector<8x32xf32>
    %cst_48 = arith.constant dense<0.000000e+00> : vector<128x32xf32>
    %107 = tpu.matmul %105, %106, %cst_48 {dimension_numbers = #tpu.dot_dimension_numbers<[1], [0], [0], [1], [0, 0, 1, 1], [], []>} : vector<128x8xf32>, vector<8x32xf32>, vector<128x32xf32> -> vector<128x32xf32>
    %108 = arith.addf %86, %107 : vector<128x32xf32>
    %109 = arith.addf %108, %2 : vector<128x32xf32>
    %c0_49 = arith.constant 0 : index
    %c0_50 = arith.constant 0 : index
    %110 = vector.load %arg10[%c0_49, %c0_50] : memref<1x32xf32, #tpu.memory_space<vmem>>, vector<1x32xf32>
    %c0_51 = arith.constant 0 : index
    %c0_52 = arith.constant 0 : index
    %111 = vector.load %arg11[%c0_51, %c0_52] : memref<1x32xf32, #tpu.memory_space<vmem>>, vector<1x32xf32>
    %cst_53 = arith.constant dense<0.000000e+00> : vector<128xf32>
    %112 = vector.multi_reduction <add>, %109, %cst_53 [1] : vector<128x32xf32> to vector<128xf32>
    %113 = vector.shape_cast %112 : vector<128xf32> to vector<128x1xf32>
    %cst_54 = arith.constant 3.200000e+01 : f32
    %114 = vector.broadcast %cst_54 : f32 to vector<128x1xf32>
    %115 = arith.divf %113, %114 : vector<128x1xf32>
    %116 = vector.broadcast %115 : vector<128x1xf32> to vector<128x32xf32>
    %117 = arith.subf %109, %116 : vector<128x32xf32>
    %118 = arith.mulf %117, %117 : vector<128x32xf32>
    %cst_55 = arith.constant dense<0.000000e+00> : vector<128xf32>
    %119 = vector.multi_reduction <add>, %118, %cst_55 [1] : vector<128x32xf32> to vector<128xf32>
    %120 = vector.shape_cast %119 : vector<128xf32> to vector<128x1xf32>
    %cst_56 = arith.constant 3.200000e+01 : f32
    %121 = vector.broadcast %cst_56 : f32 to vector<128x1xf32>
    %122 = arith.divf %120, %121 : vector<128x1xf32>
    %123 = vector.broadcast %115 : vector<128x1xf32> to vector<128x32xf32>
    %124 = arith.subf %109, %123 : vector<128x32xf32>
    %cst_57 = arith.constant 9.99999974E-6 : f32
    %125 = vector.broadcast %cst_57 : f32 to vector<128x1xf32>
    %126 = arith.addf %122, %125 : vector<128x1xf32>
    %127 = math.rsqrt %126 : vector<128x1xf32>
    %128 = vector.broadcast %127 : vector<128x1xf32> to vector<128x32xf32>
    %129 = arith.mulf %124, %128 : vector<128x32xf32>
    %130 = vector.broadcast %110 : vector<1x32xf32> to vector<128x32xf32>
    %131 = arith.mulf %129, %130 : vector<128x32xf32>
    %132 = vector.broadcast %111 : vector<1x32xf32> to vector<128x32xf32>
    %133 = arith.addf %131, %132 : vector<128x32xf32>
    %cst_58 = arith.constant 0.000000e+00 : f32
    %134 = vector.broadcast %cst_58 : f32 to vector<16x32xf32>
    %135 = vector.extract_strided_slice %133 {offsets = [0, 0], sizes = [16, 32], strides = [1, 1]} : vector<128x32xf32> to vector<16x32xf32>
    %c0_59 = arith.constant 0 : index
    %c0_60 = arith.constant 0 : index
    %c0_61 = arith.constant 0 : index
    %136 = vector.load %arg12[%c0_59, %c0_60, %c0_61] : memref<8x32x32xf32, #tpu.memory_space<vmem>>, vector<1x32x32xf32>
    %137 = vector.shape_cast %136 : vector<1x32x32xf32> to vector<32x32xf32>
    %cst_62 = arith.constant dense<0.000000e+00> : vector<16x32xf32>
    %138 = tpu.matmul %135, %137, %cst_62 {dimension_numbers = #tpu.dot_dimension_numbers<[1], [0], [0], [1], [0, 0, 1, 1], [], []>} : vector<16x32xf32>, vector<32x32xf32>, vector<16x32xf32> -> vector<16x32xf32>
    %139 = arith.addf %134, %138 : vector<16x32xf32>
    %140 = vector.extract_strided_slice %133 {offsets = [16, 0], sizes = [16, 32], strides = [1, 1]} : vector<128x32xf32> to vector<16x32xf32>
    %c1 = arith.constant 1 : index
    %c0_63 = arith.constant 0 : index
    %c0_64 = arith.constant 0 : index
    %141 = vector.load %arg12[%c1, %c0_63, %c0_64] : memref<8x32x32xf32, #tpu.memory_space<vmem>>, vector<1x32x32xf32>
    %142 = vector.shape_cast %141 : vector<1x32x32xf32> to vector<32x32xf32>
    %cst_65 = arith.constant dense<0.000000e+00> : vector<16x32xf32>
    %143 = tpu.matmul %140, %142, %cst_65 {dimension_numbers = #tpu.dot_dimension_numbers<[1], [0], [0], [1], [0, 0, 1, 1], [], []>} : vector<16x32xf32>, vector<32x32xf32>, vector<16x32xf32> -> vector<16x32xf32>
    %144 = arith.addf %139, %143 : vector<16x32xf32>
    %145 = vector.extract_strided_slice %133 {offsets = [32, 0], sizes = [16, 32], strides = [1, 1]} : vector<128x32xf32> to vector<16x32xf32>
    %c2 = arith.constant 2 : index
    %c0_66 = arith.constant 0 : index
    %c0_67 = arith.constant 0 : index
    %146 = vector.load %arg12[%c2, %c0_66, %c0_67] : memref<8x32x32xf32, #tpu.memory_space<vmem>>, vector<1x32x32xf32>
    %147 = vector.shape_cast %146 : vector<1x32x32xf32> to vector<32x32xf32>
    %cst_68 = arith.constant dense<0.000000e+00> : vector<16x32xf32>
    %148 = tpu.matmul %145, %147, %cst_68 {dimension_numbers = #tpu.dot_dimension_numbers<[1], [0], [0], [1], [0, 0, 1, 1], [], []>} : vector<16x32xf32>, vector<32x32xf32>, vector<16x32xf32> -> vector<16x32xf32>
    %149 = arith.addf %144, %148 : vector<16x32xf32>
    %150 = vector.extract_strided_slice %133 {offsets = [48, 0], sizes = [16, 32], strides = [1, 1]} : vector<128x32xf32> to vector<16x32xf32>
    %c3 = arith.constant 3 : index
    %c0_69 = arith.constant 0 : index
    %c0_70 = arith.constant 0 : index
    %151 = vector.load %arg12[%c3, %c0_69, %c0_70] : memref<8x32x32xf32, #tpu.memory_space<vmem>>, vector<1x32x32xf32>
    %152 = vector.shape_cast %151 : vector<1x32x32xf32> to vector<32x32xf32>
    %cst_71 = arith.constant dense<0.000000e+00> : vector<16x32xf32>
    %153 = tpu.matmul %150, %152, %cst_71 {dimension_numbers = #tpu.dot_dimension_numbers<[1], [0], [0], [1], [0, 0, 1, 1], [], []>} : vector<16x32xf32>, vector<32x32xf32>, vector<16x32xf32> -> vector<16x32xf32>
    %154 = arith.addf %149, %153 : vector<16x32xf32>
    %155 = vector.extract_strided_slice %133 {offsets = [64, 0], sizes = [16, 32], strides = [1, 1]} : vector<128x32xf32> to vector<16x32xf32>
    %c4 = arith.constant 4 : index
    %c0_72 = arith.constant 0 : index
    %c0_73 = arith.constant 0 : index
    %156 = vector.load %arg12[%c4, %c0_72, %c0_73] : memref<8x32x32xf32, #tpu.memory_space<vmem>>, vector<1x32x32xf32>
    %157 = vector.shape_cast %156 : vector<1x32x32xf32> to vector<32x32xf32>
    %cst_74 = arith.constant dense<0.000000e+00> : vector<16x32xf32>
    %158 = tpu.matmul %155, %157, %cst_74 {dimension_numbers = #tpu.dot_dimension_numbers<[1], [0], [0], [1], [0, 0, 1, 1], [], []>} : vector<16x32xf32>, vector<32x32xf32>, vector<16x32xf32> -> vector<16x32xf32>
    %159 = arith.addf %154, %158 : vector<16x32xf32>
    %160 = vector.extract_strided_slice %133 {offsets = [80, 0], sizes = [16, 32], strides = [1, 1]} : vector<128x32xf32> to vector<16x32xf32>
    %c5 = arith.constant 5 : index
    %c0_75 = arith.constant 0 : index
    %c0_76 = arith.constant 0 : index
    %161 = vector.load %arg12[%c5, %c0_75, %c0_76] : memref<8x32x32xf32, #tpu.memory_space<vmem>>, vector<1x32x32xf32>
    %162 = vector.shape_cast %161 : vector<1x32x32xf32> to vector<32x32xf32>
    %cst_77 = arith.constant dense<0.000000e+00> : vector<16x32xf32>
    %163 = tpu.matmul %160, %162, %cst_77 {dimension_numbers = #tpu.dot_dimension_numbers<[1], [0], [0], [1], [0, 0, 1, 1], [], []>} : vector<16x32xf32>, vector<32x32xf32>, vector<16x32xf32> -> vector<16x32xf32>
    %164 = arith.addf %159, %163 : vector<16x32xf32>
    %165 = vector.extract_strided_slice %133 {offsets = [96, 0], sizes = [16, 32], strides = [1, 1]} : vector<128x32xf32> to vector<16x32xf32>
    %c6 = arith.constant 6 : index
    %c0_78 = arith.constant 0 : index
    %c0_79 = arith.constant 0 : index
    %166 = vector.load %arg12[%c6, %c0_78, %c0_79] : memref<8x32x32xf32, #tpu.memory_space<vmem>>, vector<1x32x32xf32>
    %167 = vector.shape_cast %166 : vector<1x32x32xf32> to vector<32x32xf32>
    %cst_80 = arith.constant dense<0.000000e+00> : vector<16x32xf32>
    %168 = tpu.matmul %165, %167, %cst_80 {dimension_numbers = #tpu.dot_dimension_numbers<[1], [0], [0], [1], [0, 0, 1, 1], [], []>} : vector<16x32xf32>, vector<32x32xf32>, vector<16x32xf32> -> vector<16x32xf32>
    %169 = arith.addf %164, %168 : vector<16x32xf32>
    %170 = vector.extract_strided_slice %133 {offsets = [112, 0], sizes = [16, 32], strides = [1, 1]} : vector<128x32xf32> to vector<16x32xf32>
    %c7 = arith.constant 7 : index
    %c0_81 = arith.constant 0 : index
    %c0_82 = arith.constant 0 : index
    %171 = vector.load %arg12[%c7, %c0_81, %c0_82] : memref<8x32x32xf32, #tpu.memory_space<vmem>>, vector<1x32x32xf32>
    %172 = vector.shape_cast %171 : vector<1x32x32xf32> to vector<32x32xf32>
    %cst_83 = arith.constant dense<0.000000e+00> : vector<16x32xf32>
    %173 = tpu.matmul %170, %172, %cst_83 {dimension_numbers = #tpu.dot_dimension_numbers<[1], [0], [0], [1], [0, 0, 1, 1], [], []>} : vector<16x32xf32>, vector<32x32xf32>, vector<16x32xf32> -> vector<16x32xf32>
    %174 = arith.addf %169, %173 : vector<16x32xf32>
    %c0_84 = arith.constant 0 : index
    %c0_85 = arith.constant 0 : index
    %175 = vector.load %arg14[%c0_84, %c0_85] : memref<32x256xf32, #tpu.memory_space<vmem>>, vector<32x256xf32>
    %cst_86 = arith.constant dense<0.000000e+00> : vector<16x256xf32>
    %176 = tpu.matmul %174, %175, %cst_86 {dimension_numbers = #tpu.dot_dimension_numbers<[1], [0], [0], [1], [0, 0, 1, 1], [], []>} : vector<16x32xf32>, vector<32x256xf32>, vector<16x256xf32> -> vector<16x256xf32>
    %c0_87 = arith.constant 0 : index
    %c0_88 = arith.constant 0 : index
    %177 = vector.load %arg15[%c0_87, %c0_88] : memref<4x32xf32, #tpu.memory_space<vmem>>, vector<4x32xf32>
    "tpu.trace_start"() <{level = 10 : i32, message = "nd,hd->nh"}> : () -> ()
    %cst_89 = arith.constant dense<0.000000e+00> : vector<16x4xf32>
    %178 = tpu.matmul %174, %177, %cst_89 {dimension_numbers = #tpu.dot_dimension_numbers<[1], [1], [0], [0], [0, 0, 1, 0], [], []>} : vector<16x32xf32>, vector<4x32xf32>, vector<16x4xf32> -> vector<16x4xf32>
    "tpu.trace_stop"() : () -> ()
    %c0_90 = arith.constant 0 : index
    %c0_91 = arith.constant 0 : index
    %179 = vector.load %arg16[%c0_90, %c0_91] : memref<4x32xf32, #tpu.memory_space<vmem>>, vector<4x32xf32>
    "tpu.trace_start"() <{level = 10 : i32, message = "hd,nd->hn"}> : () -> ()
    %cst_92 = arith.constant dense<0.000000e+00> : vector<4x16xf32>
    %180 = tpu.matmul %179, %174, %cst_92 {dimension_numbers = #tpu.dot_dimension_numbers<[1], [1], [0], [0], [0, 0, 1, 0], [], []>} : vector<4x32xf32>, vector<16x32xf32>, vector<4x16xf32> -> vector<4x16xf32>
    "tpu.trace_stop"() : () -> ()
    %c0_93 = arith.constant 0 : index
    %c0_94 = arith.constant 0 : index
    %181 = vector.load %arg17[%c0_93, %c0_94] : memref<256x32xf32, #tpu.memory_space<vmem>>, vector<256x32xf32>
    %c0_95 = arith.constant 0 : index
    %c0_96 = arith.constant 0 : index
    %182 = vector.load %arg18[%c0_95, %c0_96] : memref<1x32xf32, #tpu.memory_space<vmem>>, vector<1x32xf32>
    %c0_97 = arith.constant 0 : index
    %c0_98 = arith.constant 0 : index
    %183 = vector.load %arg19[%c0_97, %c0_98] : memref<1x32xf32, #tpu.memory_space<vmem>>, vector<1x32xf32>
    %c0_99 = arith.constant 0 : index
    %c0_100 = arith.constant 0 : index
    %c0_101 = arith.constant 0 : index
    %184 = vector.load %arg13[%c0_99, %c0_100, %c0_101] : memref<2x8x8xf32, #tpu.memory_space<vmem>>, vector<1x8x8xf32>
    %185 = vector.shape_cast %184 : vector<1x8x8xf32> to vector<8x8xf32>
    %186 = vector.extract_strided_slice %176 {offsets = [0, 0], sizes = [8, 256], strides = [1, 1]} : vector<16x256xf32> to vector<8x256xf32>
    %cst_102 = arith.constant 0.000000e+00 : f32
    %187 = vector.broadcast %cst_102 : f32 to vector<8x32xf32>
    %188 = vector.extract_strided_slice %178 {offsets = [0, 0], sizes = [8, 1], strides = [1, 1]} : vector<16x4xf32> to vector<8x1xf32>
    %189 = vector.extract_strided_slice %180 {offsets = [0, 0], sizes = [1, 8], strides = [1, 1]} : vector<4x16xf32> to vector<1x8xf32>
    %190 = vector.broadcast %188 : vector<8x1xf32> to vector<8x8xf32>
    %191 = vector.broadcast %189 : vector<1x8xf32> to vector<8x8xf32>
    %192 = arith.addf %190, %191 : vector<8x8xf32>
    %cst_103 = arith.constant 0.000000e+00 : f32
    %193 = vector.broadcast %cst_103 : f32 to vector<8x8xf32>
    %194 = arith.cmpf ogt, %192, %193 : vector<8x8xf32>
    %cst_104 = arith.constant 0.00999999977 : f32
    %195 = vector.broadcast %cst_104 : f32 to vector<8x8xf32>
    %196 = arith.mulf %195, %192 : vector<8x8xf32>
    %197 = arith.select %194, %192, %196 : vector<8x8xi1>, vector<8x8xf32>
    %cst_105 = arith.constant 0.000000e+00 : f32
    %198 = vector.broadcast %cst_105 : f32 to vector<8x8xf32>
    %199 = arith.cmpf ogt, %185, %198 : vector<8x8xf32>
    %cst_106 = arith.constant -1.000000e+09 : f32
    %200 = vector.broadcast %cst_106 : f32 to vector<8x8xf32>
    %201 = arith.select %199, %197, %200 : vector<8x8xi1>, vector<8x8xf32>
    %cst_107 = arith.constant dense<0xFF800000> : vector<8xf32>
    %202 = vector.multi_reduction <maximumf>, %201, %cst_107 [1] : vector<8x8xf32> to vector<8xf32>
    %203 = vector.shape_cast %202 : vector<8xf32> to vector<8x1xf32>
    %204 = vector.broadcast %203 : vector<8x1xf32> to vector<8x8xf32>
    %205 = arith.subf %201, %204 : vector<8x8xf32>
    %206 = math.exp %205 : vector<8x8xf32>
    %cst_108 = arith.constant dense<0.000000e+00> : vector<8xf32>
    %207 = vector.multi_reduction <add>, %206, %cst_108 [1] : vector<8x8xf32> to vector<8xf32>
    %208 = vector.shape_cast %207 : vector<8xf32> to vector<8x1xf32>
    %209 = tpu.reciprocal %208 {approx = true} : vector<8x1xf32> -> vector<8x1xf32>
    %210 = vector.broadcast %209 : vector<8x1xf32> to vector<8x8xf32>
    %211 = arith.mulf %206, %210 : vector<8x8xf32>
    %212 = vector.extract_strided_slice %186 {offsets = [0, 0], sizes = [8, 64], strides = [1, 1]} : vector<8x256xf32> to vector<8x64xf32>
    %cst_109 = arith.constant dense<0.000000e+00> : vector<8x64xf32>
    %213 = tpu.matmul %211, %212, %cst_109 {dimension_numbers = #tpu.dot_dimension_numbers<[1], [0], [0], [1], [0, 0, 1, 1], [], []>} : vector<8x8xf32>, vector<8x64xf32>, vector<8x64xf32> -> vector<8x64xf32>
    %cst_110 = arith.constant 0.000000e+00 : f32
    %214 = vector.broadcast %cst_110 : f32 to vector<8x64xf32>
    %215 = arith.cmpf ogt, %213, %214 : vector<8x64xf32>
    %216 = math.exp %213 : vector<8x64xf32>
    %cst_111 = arith.constant 1.000000e+00 : f32
    %217 = vector.broadcast %cst_111 : f32 to vector<8x64xf32>
    %218 = arith.subf %216, %217 : vector<8x64xf32>
    %219 = arith.select %215, %213, %218 : vector<8x64xi1>, vector<8x64xf32>
    %220 = vector.extract_strided_slice %181 {offsets = [0, 0], sizes = [64, 32], strides = [1, 1]} : vector<256x32xf32> to vector<64x32xf32>
    %cst_112 = arith.constant dense<0.000000e+00> : vector<8x32xf32>
    %221 = tpu.matmul %219, %220, %cst_112 {dimension_numbers = #tpu.dot_dimension_numbers<[1], [0], [0], [1], [0, 0, 1, 1], [], []>} : vector<8x64xf32>, vector<64x32xf32>, vector<8x32xf32> -> vector<8x32xf32>
    %222 = arith.addf %187, %221 : vector<8x32xf32>
    %223 = vector.extract_strided_slice %178 {offsets = [0, 1], sizes = [8, 1], strides = [1, 1]} : vector<16x4xf32> to vector<8x1xf32>
    %224 = vector.extract_strided_slice %180 {offsets = [1, 0], sizes = [1, 8], strides = [1, 1]} : vector<4x16xf32> to vector<1x8xf32>
    %225 = vector.broadcast %223 : vector<8x1xf32> to vector<8x8xf32>
    %226 = vector.broadcast %224 : vector<1x8xf32> to vector<8x8xf32>
    %227 = arith.addf %225, %226 : vector<8x8xf32>
    %cst_113 = arith.constant 0.000000e+00 : f32
    %228 = vector.broadcast %cst_113 : f32 to vector<8x8xf32>
    %229 = arith.cmpf ogt, %227, %228 : vector<8x8xf32>
    %cst_114 = arith.constant 0.00999999977 : f32
    %230 = vector.broadcast %cst_114 : f32 to vector<8x8xf32>
    %231 = arith.mulf %230, %227 : vector<8x8xf32>
    %232 = arith.select %229, %227, %231 : vector<8x8xi1>, vector<8x8xf32>
    %cst_115 = arith.constant 0.000000e+00 : f32
    %233 = vector.broadcast %cst_115 : f32 to vector<8x8xf32>
    %234 = arith.cmpf ogt, %185, %233 : vector<8x8xf32>
    %cst_116 = arith.constant -1.000000e+09 : f32
    %235 = vector.broadcast %cst_116 : f32 to vector<8x8xf32>
    %236 = arith.select %234, %232, %235 : vector<8x8xi1>, vector<8x8xf32>
    %cst_117 = arith.constant dense<0xFF800000> : vector<8xf32>
    %237 = vector.multi_reduction <maximumf>, %236, %cst_117 [1] : vector<8x8xf32> to vector<8xf32>
    %238 = vector.shape_cast %237 : vector<8xf32> to vector<8x1xf32>
    %239 = vector.broadcast %238 : vector<8x1xf32> to vector<8x8xf32>
    %240 = arith.subf %236, %239 : vector<8x8xf32>
    %241 = math.exp %240 : vector<8x8xf32>
    %cst_118 = arith.constant dense<0.000000e+00> : vector<8xf32>
    %242 = vector.multi_reduction <add>, %241, %cst_118 [1] : vector<8x8xf32> to vector<8xf32>
    %243 = vector.shape_cast %242 : vector<8xf32> to vector<8x1xf32>
    %244 = tpu.reciprocal %243 {approx = true} : vector<8x1xf32> -> vector<8x1xf32>
    %245 = vector.broadcast %244 : vector<8x1xf32> to vector<8x8xf32>
    %246 = arith.mulf %241, %245 : vector<8x8xf32>
    %247 = vector.extract_strided_slice %186 {offsets = [0, 64], sizes = [8, 64], strides = [1, 1]} : vector<8x256xf32> to vector<8x64xf32>
    %cst_119 = arith.constant dense<0.000000e+00> : vector<8x64xf32>
    %248 = tpu.matmul %246, %247, %cst_119 {dimension_numbers = #tpu.dot_dimension_numbers<[1], [0], [0], [1], [0, 0, 1, 1], [], []>} : vector<8x8xf32>, vector<8x64xf32>, vector<8x64xf32> -> vector<8x64xf32>
    %cst_120 = arith.constant 0.000000e+00 : f32
    %249 = vector.broadcast %cst_120 : f32 to vector<8x64xf32>
    %250 = arith.cmpf ogt, %248, %249 : vector<8x64xf32>
    %251 = math.exp %248 : vector<8x64xf32>
    %cst_121 = arith.constant 1.000000e+00 : f32
    %252 = vector.broadcast %cst_121 : f32 to vector<8x64xf32>
    %253 = arith.subf %251, %252 : vector<8x64xf32>
    %254 = arith.select %250, %248, %253 : vector<8x64xi1>, vector<8x64xf32>
    %255 = vector.extract_strided_slice %181 {offsets = [64, 0], sizes = [64, 32], strides = [1, 1]} : vector<256x32xf32> to vector<64x32xf32>
    %cst_122 = arith.constant dense<0.000000e+00> : vector<8x32xf32>
    %256 = tpu.matmul %254, %255, %cst_122 {dimension_numbers = #tpu.dot_dimension_numbers<[1], [0], [0], [1], [0, 0, 1, 1], [], []>} : vector<8x64xf32>, vector<64x32xf32>, vector<8x32xf32> -> vector<8x32xf32>
    %257 = arith.addf %222, %256 : vector<8x32xf32>
    %258 = vector.extract_strided_slice %178 {offsets = [0, 2], sizes = [8, 1], strides = [1, 1]} : vector<16x4xf32> to vector<8x1xf32>
    %259 = vector.extract_strided_slice %180 {offsets = [2, 0], sizes = [1, 8], strides = [1, 1]} : vector<4x16xf32> to vector<1x8xf32>
    %260 = vector.broadcast %258 : vector<8x1xf32> to vector<8x8xf32>
    %261 = vector.broadcast %259 : vector<1x8xf32> to vector<8x8xf32>
    %262 = arith.addf %260, %261 : vector<8x8xf32>
    %cst_123 = arith.constant 0.000000e+00 : f32
    %263 = vector.broadcast %cst_123 : f32 to vector<8x8xf32>
    %264 = arith.cmpf ogt, %262, %263 : vector<8x8xf32>
    %cst_124 = arith.constant 0.00999999977 : f32
    %265 = vector.broadcast %cst_124 : f32 to vector<8x8xf32>
    %266 = arith.mulf %265, %262 : vector<8x8xf32>
    %267 = arith.select %264, %262, %266 : vector<8x8xi1>, vector<8x8xf32>
    %cst_125 = arith.constant 0.000000e+00 : f32
    %268 = vector.broadcast %cst_125 : f32 to vector<8x8xf32>
    %269 = arith.cmpf ogt, %185, %268 : vector<8x8xf32>
    %cst_126 = arith.constant -1.000000e+09 : f32
    %270 = vector.broadcast %cst_126 : f32 to vector<8x8xf32>
    %271 = arith.select %269, %267, %270 : vector<8x8xi1>, vector<8x8xf32>
    %cst_127 = arith.constant dense<0xFF800000> : vector<8xf32>
    %272 = vector.multi_reduction <maximumf>, %271, %cst_127 [1] : vector<8x8xf32> to vector<8xf32>
    %273 = vector.shape_cast %272 : vector<8xf32> to vector<8x1xf32>
    %274 = vector.broadcast %273 : vector<8x1xf32> to vector<8x8xf32>
    %275 = arith.subf %271, %274 : vector<8x8xf32>
    %276 = math.exp %275 : vector<8x8xf32>
    %cst_128 = arith.constant dense<0.000000e+00> : vector<8xf32>
    %277 = vector.multi_reduction <add>, %276, %cst_128 [1] : vector<8x8xf32> to vector<8xf32>
    %278 = vector.shape_cast %277 : vector<8xf32> to vector<8x1xf32>
    %279 = tpu.reciprocal %278 {approx = true} : vector<8x1xf32> -> vector<8x1xf32>
    %280 = vector.broadcast %279 : vector<8x1xf32> to vector<8x8xf32>
    %281 = arith.mulf %276, %280 : vector<8x8xf32>
    %282 = vector.extract_strided_slice %186 {offsets = [0, 128], sizes = [8, 64], strides = [1, 1]} : vector<8x256xf32> to vector<8x64xf32>
    %cst_129 = arith.constant dense<0.000000e+00> : vector<8x64xf32>
    %283 = tpu.matmul %281, %282, %cst_129 {dimension_numbers = #tpu.dot_dimension_numbers<[1], [0], [0], [1], [0, 0, 1, 1], [], []>} : vector<8x8xf32>, vector<8x64xf32>, vector<8x64xf32> -> vector<8x64xf32>
    %cst_130 = arith.constant 0.000000e+00 : f32
    %284 = vector.broadcast %cst_130 : f32 to vector<8x64xf32>
    %285 = arith.cmpf ogt, %283, %284 : vector<8x64xf32>
    %286 = math.exp %283 : vector<8x64xf32>
    %cst_131 = arith.constant 1.000000e+00 : f32
    %287 = vector.broadcast %cst_131 : f32 to vector<8x64xf32>
    %288 = arith.subf %286, %287 : vector<8x64xf32>
    %289 = arith.select %285, %283, %288 : vector<8x64xi1>, vector<8x64xf32>
    %290 = vector.extract_strided_slice %181 {offsets = [128, 0], sizes = [64, 32], strides = [1, 1]} : vector<256x32xf32> to vector<64x32xf32>
    %cst_132 = arith.constant dense<0.000000e+00> : vector<8x32xf32>
    %291 = tpu.matmul %289, %290, %cst_132 {dimension_numbers = #tpu.dot_dimension_numbers<[1], [0], [0], [1], [0, 0, 1, 1], [], []>} : vector<8x64xf32>, vector<64x32xf32>, vector<8x32xf32> -> vector<8x32xf32>
    %292 = arith.addf %257, %291 : vector<8x32xf32>
    %293 = vector.extract_strided_slice %178 {offsets = [0, 3], sizes = [8, 1], strides = [1, 1]} : vector<16x4xf32> to vector<8x1xf32>
    %294 = vector.extract_strided_slice %180 {offsets = [3, 0], sizes = [1, 8], strides = [1, 1]} : vector<4x16xf32> to vector<1x8xf32>
    %295 = vector.broadcast %293 : vector<8x1xf32> to vector<8x8xf32>
    %296 = vector.broadcast %294 : vector<1x8xf32> to vector<8x8xf32>
    %297 = arith.addf %295, %296 : vector<8x8xf32>
    %cst_133 = arith.constant 0.000000e+00 : f32
    %298 = vector.broadcast %cst_133 : f32 to vector<8x8xf32>
    %299 = arith.cmpf ogt, %297, %298 : vector<8x8xf32>
    %cst_134 = arith.constant 0.00999999977 : f32
    %300 = vector.broadcast %cst_134 : f32 to vector<8x8xf32>
    %301 = arith.mulf %300, %297 : vector<8x8xf32>
    %302 = arith.select %299, %297, %301 : vector<8x8xi1>, vector<8x8xf32>
    %cst_135 = arith.constant 0.000000e+00 : f32
    %303 = vector.broadcast %cst_135 : f32 to vector<8x8xf32>
    %304 = arith.cmpf ogt, %185, %303 : vector<8x8xf32>
    %cst_136 = arith.constant -1.000000e+09 : f32
    %305 = vector.broadcast %cst_136 : f32 to vector<8x8xf32>
    %306 = arith.select %304, %302, %305 : vector<8x8xi1>, vector<8x8xf32>
    %cst_137 = arith.constant dense<0xFF800000> : vector<8xf32>
    %307 = vector.multi_reduction <maximumf>, %306, %cst_137 [1] : vector<8x8xf32> to vector<8xf32>
    %308 = vector.shape_cast %307 : vector<8xf32> to vector<8x1xf32>
    %309 = vector.broadcast %308 : vector<8x1xf32> to vector<8x8xf32>
    %310 = arith.subf %306, %309 : vector<8x8xf32>
    %311 = math.exp %310 : vector<8x8xf32>
    %cst_138 = arith.constant dense<0.000000e+00> : vector<8xf32>
    %312 = vector.multi_reduction <add>, %311, %cst_138 [1] : vector<8x8xf32> to vector<8xf32>
    %313 = vector.shape_cast %312 : vector<8xf32> to vector<8x1xf32>
    %314 = tpu.reciprocal %313 {approx = true} : vector<8x1xf32> -> vector<8x1xf32>
    %315 = vector.broadcast %314 : vector<8x1xf32> to vector<8x8xf32>
    %316 = arith.mulf %311, %315 : vector<8x8xf32>
    %317 = vector.extract_strided_slice %186 {offsets = [0, 192], sizes = [8, 64], strides = [1, 1]} : vector<8x256xf32> to vector<8x64xf32>
    %cst_139 = arith.constant dense<0.000000e+00> : vector<8x64xf32>
    %318 = tpu.matmul %316, %317, %cst_139 {dimension_numbers = #tpu.dot_dimension_numbers<[1], [0], [0], [1], [0, 0, 1, 1], [], []>} : vector<8x8xf32>, vector<8x64xf32>, vector<8x64xf32> -> vector<8x64xf32>
    %cst_140 = arith.constant 0.000000e+00 : f32
    %319 = vector.broadcast %cst_140 : f32 to vector<8x64xf32>
    %320 = arith.cmpf ogt, %318, %319 : vector<8x64xf32>
    %321 = math.exp %318 : vector<8x64xf32>
    %cst_141 = arith.constant 1.000000e+00 : f32
    %322 = vector.broadcast %cst_141 : f32 to vector<8x64xf32>
    %323 = arith.subf %321, %322 : vector<8x64xf32>
    %324 = arith.select %320, %318, %323 : vector<8x64xi1>, vector<8x64xf32>
    %325 = vector.extract_strided_slice %181 {offsets = [192, 0], sizes = [64, 32], strides = [1, 1]} : vector<256x32xf32> to vector<64x32xf32>
    %cst_142 = arith.constant dense<0.000000e+00> : vector<8x32xf32>
    %326 = tpu.matmul %324, %325, %cst_142 {dimension_numbers = #tpu.dot_dimension_numbers<[1], [0], [0], [1], [0, 0, 1, 1], [], []>} : vector<8x64xf32>, vector<64x32xf32>, vector<8x32xf32> -> vector<8x32xf32>
    %327 = arith.addf %292, %326 : vector<8x32xf32>
    "tpu.trace_start"() <{level = 10 : i32, message = "nd,od->no"}> : () -> ()
    %cst_143 = arith.constant dense<0.000000e+00> : vector<8x1xf32>
    %328 = tpu.matmul %327, %182, %cst_143 {dimension_numbers = #tpu.dot_dimension_numbers<[1], [1], [0], [0], [0, 0, 1, 0], [], []>} : vector<8x32xf32>, vector<1x32xf32>, vector<8x1xf32> -> vector<8x1xf32>
    "tpu.trace_stop"() : () -> ()
    "tpu.trace_start"() <{level = 10 : i32, message = "od,nd->on"}> : () -> ()
    %cst_144 = arith.constant dense<0.000000e+00> : vector<1x8xf32>
    %329 = tpu.matmul %183, %327, %cst_144 {dimension_numbers = #tpu.dot_dimension_numbers<[1], [1], [0], [0], [0, 0, 1, 0], [], []>} : vector<1x32xf32>, vector<8x32xf32>, vector<1x8xf32> -> vector<1x8xf32>
    %cst_145 = arith.constant 0.000000e+00 : f32
    "tpu.trace_stop"() : () -> ()
    %330 = vector.broadcast %cst_145 : f32 to vector<8x8xf32>
    %331 = arith.cmpf ogt, %185, %330 : vector<8x8xf32>
    %332 = vector.broadcast %328 : vector<8x1xf32> to vector<8x8xf32>
    %333 = vector.broadcast %329 : vector<1x8xf32> to vector<8x8xf32>
    %334 = arith.addf %332, %333 : vector<8x8xf32>
    %cst_146 = arith.constant 0.000000e+00 : f32
    %335 = vector.broadcast %cst_146 : f32 to vector<8x8xf32>
    %336 = arith.cmpf ogt, %334, %335 : vector<8x8xf32>
    %cst_147 = arith.constant 0.00999999977 : f32
    %337 = vector.broadcast %cst_147 : f32 to vector<8x8xf32>
    %338 = arith.mulf %337, %334 : vector<8x8xf32>
    %339 = arith.select %336, %334, %338 : vector<8x8xi1>, vector<8x8xf32>
    %cst_148 = arith.constant -1.000000e+09 : f32
    %340 = vector.broadcast %cst_148 : f32 to vector<8x8xf32>
    %341 = arith.select %331, %339, %340 : vector<8x8xi1>, vector<8x8xf32>
    %cst_149 = arith.constant dense<0xFF800000> : vector<8xf32>
    %342 = vector.multi_reduction <maximumf>, %341, %cst_149 [1] : vector<8x8xf32> to vector<8xf32>
    %343 = vector.shape_cast %342 : vector<8xf32> to vector<8x1xf32>
    %344 = vector.broadcast %343 : vector<8x1xf32> to vector<8x8xf32>
    %345 = arith.subf %341, %344 : vector<8x8xf32>
    %346 = math.exp %345 : vector<8x8xf32>
    %cst_150 = arith.constant dense<0.000000e+00> : vector<8xf32>
    %347 = vector.multi_reduction <add>, %346, %cst_150 [1] : vector<8x8xf32> to vector<8xf32>
    %348 = vector.shape_cast %347 : vector<8xf32> to vector<8x1xf32>
    %349 = tpu.reciprocal %348 {approx = true} : vector<8x1xf32> -> vector<8x1xf32>
    %350 = vector.broadcast %349 : vector<8x1xf32> to vector<8x8xf32>
    %351 = arith.mulf %346, %350 : vector<8x8xf32>
    %cst_151 = arith.constant dense<0.000000e+00> : vector<8x32xf32>
    %352 = tpu.matmul %351, %327, %cst_151 {dimension_numbers = #tpu.dot_dimension_numbers<[1], [0], [0], [1], [0, 0, 1, 1], [], []>} : vector<8x8xf32>, vector<8x32xf32>, vector<8x32xf32> -> vector<8x32xf32>
    %cst_152 = arith.constant 0.000000e+00 : f32
    %353 = vector.broadcast %cst_152 : f32 to vector<8x32xf32>
    %354 = arith.cmpf ogt, %352, %353 : vector<8x32xf32>
    %355 = math.exp %352 : vector<8x32xf32>
    %cst_153 = arith.constant 1.000000e+00 : f32
    %356 = vector.broadcast %cst_153 : f32 to vector<8x32xf32>
    %357 = arith.subf %355, %356 : vector<8x32xf32>
    %358 = arith.select %354, %352, %357 : vector<8x32xi1>, vector<8x32xf32>
    %c1_154 = arith.constant 1 : index
    %c0_155 = arith.constant 0 : index
    %c0_156 = arith.constant 0 : index
    %359 = vector.load %arg13[%c1_154, %c0_155, %c0_156] : memref<2x8x8xf32, #tpu.memory_space<vmem>>, vector<1x8x8xf32>
    %360 = vector.shape_cast %359 : vector<1x8x8xf32> to vector<8x8xf32>
    %361 = vector.extract_strided_slice %176 {offsets = [8, 0], sizes = [8, 256], strides = [1, 1]} : vector<16x256xf32> to vector<8x256xf32>
    %cst_157 = arith.constant 0.000000e+00 : f32
    %362 = vector.broadcast %cst_157 : f32 to vector<8x32xf32>
    %363 = vector.extract_strided_slice %178 {offsets = [8, 0], sizes = [8, 1], strides = [1, 1]} : vector<16x4xf32> to vector<8x1xf32>
    %364 = vector.extract_strided_slice %180 {offsets = [0, 8], sizes = [1, 8], strides = [1, 1]} : vector<4x16xf32> to vector<1x8xf32>
    %365 = vector.broadcast %363 : vector<8x1xf32> to vector<8x8xf32>
    %366 = vector.broadcast %364 : vector<1x8xf32> to vector<8x8xf32>
    %367 = arith.addf %365, %366 : vector<8x8xf32>
    %cst_158 = arith.constant 0.000000e+00 : f32
    %368 = vector.broadcast %cst_158 : f32 to vector<8x8xf32>
    %369 = arith.cmpf ogt, %367, %368 : vector<8x8xf32>
    %cst_159 = arith.constant 0.00999999977 : f32
    %370 = vector.broadcast %cst_159 : f32 to vector<8x8xf32>
    %371 = arith.mulf %370, %367 : vector<8x8xf32>
    %372 = arith.select %369, %367, %371 : vector<8x8xi1>, vector<8x8xf32>
    %cst_160 = arith.constant 0.000000e+00 : f32
    %373 = vector.broadcast %cst_160 : f32 to vector<8x8xf32>
    %374 = arith.cmpf ogt, %360, %373 : vector<8x8xf32>
    %cst_161 = arith.constant -1.000000e+09 : f32
    %375 = vector.broadcast %cst_161 : f32 to vector<8x8xf32>
    %376 = arith.select %374, %372, %375 : vector<8x8xi1>, vector<8x8xf32>
    %cst_162 = arith.constant dense<0xFF800000> : vector<8xf32>
    %377 = vector.multi_reduction <maximumf>, %376, %cst_162 [1] : vector<8x8xf32> to vector<8xf32>
    %378 = vector.shape_cast %377 : vector<8xf32> to vector<8x1xf32>
    %379 = vector.broadcast %378 : vector<8x1xf32> to vector<8x8xf32>
    %380 = arith.subf %376, %379 : vector<8x8xf32>
    %381 = math.exp %380 : vector<8x8xf32>
    %cst_163 = arith.constant dense<0.000000e+00> : vector<8xf32>
    %382 = vector.multi_reduction <add>, %381, %cst_163 [1] : vector<8x8xf32> to vector<8xf32>
    %383 = vector.shape_cast %382 : vector<8xf32> to vector<8x1xf32>
    %384 = tpu.reciprocal %383 {approx = true} : vector<8x1xf32> -> vector<8x1xf32>
    %385 = vector.broadcast %384 : vector<8x1xf32> to vector<8x8xf32>
    %386 = arith.mulf %381, %385 : vector<8x8xf32>
    %387 = vector.extract_strided_slice %361 {offsets = [0, 0], sizes = [8, 64], strides = [1, 1]} : vector<8x256xf32> to vector<8x64xf32>
    %cst_164 = arith.constant dense<0.000000e+00> : vector<8x64xf32>
    %388 = tpu.matmul %386, %387, %cst_164 {dimension_numbers = #tpu.dot_dimension_numbers<[1], [0], [0], [1], [0, 0, 1, 1], [], []>} : vector<8x8xf32>, vector<8x64xf32>, vector<8x64xf32> -> vector<8x64xf32>
    %cst_165 = arith.constant 0.000000e+00 : f32
    %389 = vector.broadcast %cst_165 : f32 to vector<8x64xf32>
    %390 = arith.cmpf ogt, %388, %389 : vector<8x64xf32>
    %391 = math.exp %388 : vector<8x64xf32>
    %cst_166 = arith.constant 1.000000e+00 : f32
    %392 = vector.broadcast %cst_166 : f32 to vector<8x64xf32>
    %393 = arith.subf %391, %392 : vector<8x64xf32>
    %394 = arith.select %390, %388, %393 : vector<8x64xi1>, vector<8x64xf32>
    %395 = vector.extract_strided_slice %181 {offsets = [0, 0], sizes = [64, 32], strides = [1, 1]} : vector<256x32xf32> to vector<64x32xf32>
    %cst_167 = arith.constant dense<0.000000e+00> : vector<8x32xf32>
    %396 = tpu.matmul %394, %395, %cst_167 {dimension_numbers = #tpu.dot_dimension_numbers<[1], [0], [0], [1], [0, 0, 1, 1], [], []>} : vector<8x64xf32>, vector<64x32xf32>, vector<8x32xf32> -> vector<8x32xf32>
    %397 = arith.addf %362, %396 : vector<8x32xf32>
    %398 = vector.extract_strided_slice %178 {offsets = [8, 1], sizes = [8, 1], strides = [1, 1]} : vector<16x4xf32> to vector<8x1xf32>
    %399 = vector.extract_strided_slice %180 {offsets = [1, 8], sizes = [1, 8], strides = [1, 1]} : vector<4x16xf32> to vector<1x8xf32>
    %400 = vector.broadcast %398 : vector<8x1xf32> to vector<8x8xf32>
    %401 = vector.broadcast %399 : vector<1x8xf32> to vector<8x8xf32>
    %402 = arith.addf %400, %401 : vector<8x8xf32>
    %cst_168 = arith.constant 0.000000e+00 : f32
    %403 = vector.broadcast %cst_168 : f32 to vector<8x8xf32>
    %404 = arith.cmpf ogt, %402, %403 : vector<8x8xf32>
    %cst_169 = arith.constant 0.00999999977 : f32
    %405 = vector.broadcast %cst_169 : f32 to vector<8x8xf32>
    %406 = arith.mulf %405, %402 : vector<8x8xf32>
    %407 = arith.select %404, %402, %406 : vector<8x8xi1>, vector<8x8xf32>
    %cst_170 = arith.constant 0.000000e+00 : f32
    %408 = vector.broadcast %cst_170 : f32 to vector<8x8xf32>
    %409 = arith.cmpf ogt, %360, %408 : vector<8x8xf32>
    %cst_171 = arith.constant -1.000000e+09 : f32
    %410 = vector.broadcast %cst_171 : f32 to vector<8x8xf32>
    %411 = arith.select %409, %407, %410 : vector<8x8xi1>, vector<8x8xf32>
    %cst_172 = arith.constant dense<0xFF800000> : vector<8xf32>
    %412 = vector.multi_reduction <maximumf>, %411, %cst_172 [1] : vector<8x8xf32> to vector<8xf32>
    %413 = vector.shape_cast %412 : vector<8xf32> to vector<8x1xf32>
    %414 = vector.broadcast %413 : vector<8x1xf32> to vector<8x8xf32>
    %415 = arith.subf %411, %414 : vector<8x8xf32>
    %416 = math.exp %415 : vector<8x8xf32>
    %cst_173 = arith.constant dense<0.000000e+00> : vector<8xf32>
    %417 = vector.multi_reduction <add>, %416, %cst_173 [1] : vector<8x8xf32> to vector<8xf32>
    %418 = vector.shape_cast %417 : vector<8xf32> to vector<8x1xf32>
    %419 = tpu.reciprocal %418 {approx = true} : vector<8x1xf32> -> vector<8x1xf32>
    %420 = vector.broadcast %419 : vector<8x1xf32> to vector<8x8xf32>
    %421 = arith.mulf %416, %420 : vector<8x8xf32>
    %422 = vector.extract_strided_slice %361 {offsets = [0, 64], sizes = [8, 64], strides = [1, 1]} : vector<8x256xf32> to vector<8x64xf32>
    %cst_174 = arith.constant dense<0.000000e+00> : vector<8x64xf32>
    %423 = tpu.matmul %421, %422, %cst_174 {dimension_numbers = #tpu.dot_dimension_numbers<[1], [0], [0], [1], [0, 0, 1, 1], [], []>} : vector<8x8xf32>, vector<8x64xf32>, vector<8x64xf32> -> vector<8x64xf32>
    %cst_175 = arith.constant 0.000000e+00 : f32
    %424 = vector.broadcast %cst_175 : f32 to vector<8x64xf32>
    %425 = arith.cmpf ogt, %423, %424 : vector<8x64xf32>
    %426 = math.exp %423 : vector<8x64xf32>
    %cst_176 = arith.constant 1.000000e+00 : f32
    %427 = vector.broadcast %cst_176 : f32 to vector<8x64xf32>
    %428 = arith.subf %426, %427 : vector<8x64xf32>
    %429 = arith.select %425, %423, %428 : vector<8x64xi1>, vector<8x64xf32>
    %430 = vector.extract_strided_slice %181 {offsets = [64, 0], sizes = [64, 32], strides = [1, 1]} : vector<256x32xf32> to vector<64x32xf32>
    %cst_177 = arith.constant dense<0.000000e+00> : vector<8x32xf32>
    %431 = tpu.matmul %429, %430, %cst_177 {dimension_numbers = #tpu.dot_dimension_numbers<[1], [0], [0], [1], [0, 0, 1, 1], [], []>} : vector<8x64xf32>, vector<64x32xf32>, vector<8x32xf32> -> vector<8x32xf32>
    %432 = arith.addf %397, %431 : vector<8x32xf32>
    %433 = vector.extract_strided_slice %178 {offsets = [8, 2], sizes = [8, 1], strides = [1, 1]} : vector<16x4xf32> to vector<8x1xf32>
    %434 = vector.extract_strided_slice %180 {offsets = [2, 8], sizes = [1, 8], strides = [1, 1]} : vector<4x16xf32> to vector<1x8xf32>
    %435 = vector.broadcast %433 : vector<8x1xf32> to vector<8x8xf32>
    %436 = vector.broadcast %434 : vector<1x8xf32> to vector<8x8xf32>
    %437 = arith.addf %435, %436 : vector<8x8xf32>
    %cst_178 = arith.constant 0.000000e+00 : f32
    %438 = vector.broadcast %cst_178 : f32 to vector<8x8xf32>
    %439 = arith.cmpf ogt, %437, %438 : vector<8x8xf32>
    %cst_179 = arith.constant 0.00999999977 : f32
    %440 = vector.broadcast %cst_179 : f32 to vector<8x8xf32>
    %441 = arith.mulf %440, %437 : vector<8x8xf32>
    %442 = arith.select %439, %437, %441 : vector<8x8xi1>, vector<8x8xf32>
    %cst_180 = arith.constant 0.000000e+00 : f32
    %443 = vector.broadcast %cst_180 : f32 to vector<8x8xf32>
    %444 = arith.cmpf ogt, %360, %443 : vector<8x8xf32>
    %cst_181 = arith.constant -1.000000e+09 : f32
    %445 = vector.broadcast %cst_181 : f32 to vector<8x8xf32>
    %446 = arith.select %444, %442, %445 : vector<8x8xi1>, vector<8x8xf32>
    %cst_182 = arith.constant dense<0xFF800000> : vector<8xf32>
    %447 = vector.multi_reduction <maximumf>, %446, %cst_182 [1] : vector<8x8xf32> to vector<8xf32>
    %448 = vector.shape_cast %447 : vector<8xf32> to vector<8x1xf32>
    %449 = vector.broadcast %448 : vector<8x1xf32> to vector<8x8xf32>
    %450 = arith.subf %446, %449 : vector<8x8xf32>
    %451 = math.exp %450 : vector<8x8xf32>
    %cst_183 = arith.constant dense<0.000000e+00> : vector<8xf32>
    %452 = vector.multi_reduction <add>, %451, %cst_183 [1] : vector<8x8xf32> to vector<8xf32>
    %453 = vector.shape_cast %452 : vector<8xf32> to vector<8x1xf32>
    %454 = tpu.reciprocal %453 {approx = true} : vector<8x1xf32> -> vector<8x1xf32>
    %455 = vector.broadcast %454 : vector<8x1xf32> to vector<8x8xf32>
    %456 = arith.mulf %451, %455 : vector<8x8xf32>
    %457 = vector.extract_strided_slice %361 {offsets = [0, 128], sizes = [8, 64], strides = [1, 1]} : vector<8x256xf32> to vector<8x64xf32>
    %cst_184 = arith.constant dense<0.000000e+00> : vector<8x64xf32>
    %458 = tpu.matmul %456, %457, %cst_184 {dimension_numbers = #tpu.dot_dimension_numbers<[1], [0], [0], [1], [0, 0, 1, 1], [], []>} : vector<8x8xf32>, vector<8x64xf32>, vector<8x64xf32> -> vector<8x64xf32>
    %cst_185 = arith.constant 0.000000e+00 : f32
    %459 = vector.broadcast %cst_185 : f32 to vector<8x64xf32>
    %460 = arith.cmpf ogt, %458, %459 : vector<8x64xf32>
    %461 = math.exp %458 : vector<8x64xf32>
    %cst_186 = arith.constant 1.000000e+00 : f32
    %462 = vector.broadcast %cst_186 : f32 to vector<8x64xf32>
    %463 = arith.subf %461, %462 : vector<8x64xf32>
    %464 = arith.select %460, %458, %463 : vector<8x64xi1>, vector<8x64xf32>
    %465 = vector.extract_strided_slice %181 {offsets = [128, 0], sizes = [64, 32], strides = [1, 1]} : vector<256x32xf32> to vector<64x32xf32>
    %cst_187 = arith.constant dense<0.000000e+00> : vector<8x32xf32>
    %466 = tpu.matmul %464, %465, %cst_187 {dimension_numbers = #tpu.dot_dimension_numbers<[1], [0], [0], [1], [0, 0, 1, 1], [], []>} : vector<8x64xf32>, vector<64x32xf32>, vector<8x32xf32> -> vector<8x32xf32>
    %467 = arith.addf %432, %466 : vector<8x32xf32>
    %468 = vector.extract_strided_slice %178 {offsets = [8, 3], sizes = [8, 1], strides = [1, 1]} : vector<16x4xf32> to vector<8x1xf32>
    %469 = vector.extract_strided_slice %180 {offsets = [3, 8], sizes = [1, 8], strides = [1, 1]} : vector<4x16xf32> to vector<1x8xf32>
    %470 = vector.broadcast %468 : vector<8x1xf32> to vector<8x8xf32>
    %471 = vector.broadcast %469 : vector<1x8xf32> to vector<8x8xf32>
    %472 = arith.addf %470, %471 : vector<8x8xf32>
    %cst_188 = arith.constant 0.000000e+00 : f32
    %473 = vector.broadcast %cst_188 : f32 to vector<8x8xf32>
    %474 = arith.cmpf ogt, %472, %473 : vector<8x8xf32>
    %cst_189 = arith.constant 0.00999999977 : f32
    %475 = vector.broadcast %cst_189 : f32 to vector<8x8xf32>
    %476 = arith.mulf %475, %472 : vector<8x8xf32>
    %477 = arith.select %474, %472, %476 : vector<8x8xi1>, vector<8x8xf32>
    %cst_190 = arith.constant 0.000000e+00 : f32
    %478 = vector.broadcast %cst_190 : f32 to vector<8x8xf32>
    %479 = arith.cmpf ogt, %360, %478 : vector<8x8xf32>
    %cst_191 = arith.constant -1.000000e+09 : f32
    %480 = vector.broadcast %cst_191 : f32 to vector<8x8xf32>
    %481 = arith.select %479, %477, %480 : vector<8x8xi1>, vector<8x8xf32>
    %cst_192 = arith.constant dense<0xFF800000> : vector<8xf32>
    %482 = vector.multi_reduction <maximumf>, %481, %cst_192 [1] : vector<8x8xf32> to vector<8xf32>
    %483 = vector.shape_cast %482 : vector<8xf32> to vector<8x1xf32>
    %484 = vector.broadcast %483 : vector<8x1xf32> to vector<8x8xf32>
    %485 = arith.subf %481, %484 : vector<8x8xf32>
    %486 = math.exp %485 : vector<8x8xf32>
    %cst_193 = arith.constant dense<0.000000e+00> : vector<8xf32>
    %487 = vector.multi_reduction <add>, %486, %cst_193 [1] : vector<8x8xf32> to vector<8xf32>
    %488 = vector.shape_cast %487 : vector<8xf32> to vector<8x1xf32>
    %489 = tpu.reciprocal %488 {approx = true} : vector<8x1xf32> -> vector<8x1xf32>
    %490 = vector.broadcast %489 : vector<8x1xf32> to vector<8x8xf32>
    %491 = arith.mulf %486, %490 : vector<8x8xf32>
    %492 = vector.extract_strided_slice %361 {offsets = [0, 192], sizes = [8, 64], strides = [1, 1]} : vector<8x256xf32> to vector<8x64xf32>
    %cst_194 = arith.constant dense<0.000000e+00> : vector<8x64xf32>
    %493 = tpu.matmul %491, %492, %cst_194 {dimension_numbers = #tpu.dot_dimension_numbers<[1], [0], [0], [1], [0, 0, 1, 1], [], []>} : vector<8x8xf32>, vector<8x64xf32>, vector<8x64xf32> -> vector<8x64xf32>
    %cst_195 = arith.constant 0.000000e+00 : f32
    %494 = vector.broadcast %cst_195 : f32 to vector<8x64xf32>
    %495 = arith.cmpf ogt, %493, %494 : vector<8x64xf32>
    %496 = math.exp %493 : vector<8x64xf32>
    %cst_196 = arith.constant 1.000000e+00 : f32
    %497 = vector.broadcast %cst_196 : f32 to vector<8x64xf32>
    %498 = arith.subf %496, %497 : vector<8x64xf32>
    %499 = arith.select %495, %493, %498 : vector<8x64xi1>, vector<8x64xf32>
    %500 = vector.extract_strided_slice %181 {offsets = [192, 0], sizes = [64, 32], strides = [1, 1]} : vector<256x32xf32> to vector<64x32xf32>
    %cst_197 = arith.constant dense<0.000000e+00> : vector<8x32xf32>
    %501 = tpu.matmul %499, %500, %cst_197 {dimension_numbers = #tpu.dot_dimension_numbers<[1], [0], [0], [1], [0, 0, 1, 1], [], []>} : vector<8x64xf32>, vector<64x32xf32>, vector<8x32xf32> -> vector<8x32xf32>
    %502 = arith.addf %467, %501 : vector<8x32xf32>
    "tpu.trace_start"() <{level = 10 : i32, message = "nd,od->no"}> : () -> ()
    %cst_198 = arith.constant dense<0.000000e+00> : vector<8x1xf32>
    %503 = tpu.matmul %502, %182, %cst_198 {dimension_numbers = #tpu.dot_dimension_numbers<[1], [1], [0], [0], [0, 0, 1, 0], [], []>} : vector<8x32xf32>, vector<1x32xf32>, vector<8x1xf32> -> vector<8x1xf32>
    "tpu.trace_stop"() : () -> ()
    "tpu.trace_start"() <{level = 10 : i32, message = "od,nd->on"}> : () -> ()
    %cst_199 = arith.constant dense<0.000000e+00> : vector<1x8xf32>
    %504 = tpu.matmul %183, %502, %cst_199 {dimension_numbers = #tpu.dot_dimension_numbers<[1], [1], [0], [0], [0, 0, 1, 0], [], []>} : vector<1x32xf32>, vector<8x32xf32>, vector<1x8xf32> -> vector<1x8xf32>
    %cst_200 = arith.constant 0.000000e+00 : f32
    "tpu.trace_stop"() : () -> ()
    %505 = vector.broadcast %cst_200 : f32 to vector<8x8xf32>
    %506 = arith.cmpf ogt, %360, %505 : vector<8x8xf32>
    %507 = vector.broadcast %503 : vector<8x1xf32> to vector<8x8xf32>
    %508 = vector.broadcast %504 : vector<1x8xf32> to vector<8x8xf32>
    %509 = arith.addf %507, %508 : vector<8x8xf32>
    %cst_201 = arith.constant 0.000000e+00 : f32
    %510 = vector.broadcast %cst_201 : f32 to vector<8x8xf32>
    %511 = arith.cmpf ogt, %509, %510 : vector<8x8xf32>
    %cst_202 = arith.constant 0.00999999977 : f32
    %512 = vector.broadcast %cst_202 : f32 to vector<8x8xf32>
    %513 = arith.mulf %512, %509 : vector<8x8xf32>
    %514 = arith.select %511, %509, %513 : vector<8x8xi1>, vector<8x8xf32>
    %cst_203 = arith.constant -1.000000e+09 : f32
    %515 = vector.broadcast %cst_203 : f32 to vector<8x8xf32>
    %516 = arith.select %506, %514, %515 : vector<8x8xi1>, vector<8x8xf32>
    %cst_204 = arith.constant dense<0xFF800000> : vector<8xf32>
    %517 = vector.multi_reduction <maximumf>, %516, %cst_204 [1] : vector<8x8xf32> to vector<8xf32>
    %518 = vector.shape_cast %517 : vector<8xf32> to vector<8x1xf32>
    %519 = vector.broadcast %518 : vector<8x1xf32> to vector<8x8xf32>
    %520 = arith.subf %516, %519 : vector<8x8xf32>
    %521 = math.exp %520 : vector<8x8xf32>
    %cst_205 = arith.constant dense<0.000000e+00> : vector<8xf32>
    %522 = vector.multi_reduction <add>, %521, %cst_205 [1] : vector<8x8xf32> to vector<8xf32>
    %523 = vector.shape_cast %522 : vector<8xf32> to vector<8x1xf32>
    %524 = tpu.reciprocal %523 {approx = true} : vector<8x1xf32> -> vector<8x1xf32>
    %525 = vector.broadcast %524 : vector<8x1xf32> to vector<8x8xf32>
    %526 = arith.mulf %521, %525 : vector<8x8xf32>
    %cst_206 = arith.constant dense<0.000000e+00> : vector<8x32xf32>
    %527 = tpu.matmul %526, %502, %cst_206 {dimension_numbers = #tpu.dot_dimension_numbers<[1], [0], [0], [1], [0, 0, 1, 1], [], []>} : vector<8x8xf32>, vector<8x32xf32>, vector<8x32xf32> -> vector<8x32xf32>
    %cst_207 = arith.constant 0.000000e+00 : f32
    %528 = vector.broadcast %cst_207 : f32 to vector<8x32xf32>
    %529 = arith.cmpf ogt, %527, %528 : vector<8x32xf32>
    %530 = math.exp %527 : vector<8x32xf32>
    %cst_208 = arith.constant 1.000000e+00 : f32
    %531 = vector.broadcast %cst_208 : f32 to vector<8x32xf32>
    %532 = arith.subf %530, %531 : vector<8x32xf32>
    %533 = arith.select %529, %527, %532 : vector<8x32xi1>, vector<8x32xf32>
    %534 = tpu.concatenate %358, %533 in 0 : vector<8x32xf32>, vector<8x32xf32> -> vector<16x32xf32>
    %c0_209 = arith.constant 0 : index
    %c0_210 = arith.constant 0 : index
    %535 = vector.load %arg20[%c0_209, %c0_210] : memref<32x64xf32, #tpu.memory_space<vmem>>, vector<32x64xf32>
    %cst_211 = arith.constant dense<0.000000e+00> : vector<16x64xf32>
    %536 = tpu.matmul %534, %535, %cst_211 {dimension_numbers = #tpu.dot_dimension_numbers<[1], [0], [0], [1], [0, 0, 1, 1], [], []>} : vector<16x32xf32>, vector<32x64xf32>, vector<16x64xf32> -> vector<16x64xf32>
    %c0_212 = arith.constant 0 : index
    %c0_213 = arith.constant 0 : index
    %537 = vector.load %arg21[%c0_212, %c0_213] : memref<1x64xf32, #tpu.memory_space<vmem>>, vector<1x64xf32>
    %538 = vector.broadcast %537 : vector<1x64xf32> to vector<16x64xf32>
    %539 = arith.addf %536, %538 : vector<16x64xf32>
    %cst_214 = arith.constant 0.000000e+00 : f32
    %540 = vector.broadcast %cst_214 : f32 to vector<16x64xf32>
    %541 = arith.maximumf %539, %540 : vector<16x64xf32>
    %c0_215 = arith.constant 0 : index
    %c0_216 = arith.constant 0 : index
    %542 = vector.load %arg22[%c0_215, %c0_216] : memref<64x32xf32, #tpu.memory_space<vmem>>, vector<64x32xf32>
    %cst_217 = arith.constant dense<0.000000e+00> : vector<16x32xf32>
    %543 = tpu.matmul %541, %542, %cst_217 {dimension_numbers = #tpu.dot_dimension_numbers<[1], [0], [0], [1], [0, 0, 1, 1], [], []>} : vector<16x64xf32>, vector<64x32xf32>, vector<16x32xf32> -> vector<16x32xf32>
    %c0_218 = arith.constant 0 : index
    %c0_219 = arith.constant 0 : index
    %544 = vector.load %arg23[%c0_218, %c0_219] : memref<1x32xf32, #tpu.memory_space<vmem>>, vector<1x32xf32>
    %545 = vector.broadcast %544 : vector<1x32xf32> to vector<16x32xf32>
    %546 = arith.addf %543, %545 : vector<16x32xf32>
    %547 = arith.addf %546, %534 : vector<16x32xf32>
    %c0_220 = arith.constant 0 : index
    %c0_221 = arith.constant 0 : index
    %548 = vector.load %arg24[%c0_220, %c0_221] : memref<1x32xf32, #tpu.memory_space<vmem>>, vector<1x32xf32>
    %c0_222 = arith.constant 0 : index
    %c0_223 = arith.constant 0 : index
    %549 = vector.load %arg25[%c0_222, %c0_223] : memref<1x32xf32, #tpu.memory_space<vmem>>, vector<1x32xf32>
    %cst_224 = arith.constant dense<0.000000e+00> : vector<16xf32>
    %550 = vector.multi_reduction <add>, %547, %cst_224 [1] : vector<16x32xf32> to vector<16xf32>
    %551 = vector.shape_cast %550 : vector<16xf32> to vector<16x1xf32>
    %cst_225 = arith.constant 3.200000e+01 : f32
    %552 = vector.broadcast %cst_225 : f32 to vector<16x1xf32>
    %553 = arith.divf %551, %552 : vector<16x1xf32>
    %554 = vector.broadcast %553 : vector<16x1xf32> to vector<16x32xf32>
    %555 = arith.subf %547, %554 : vector<16x32xf32>
    %556 = arith.mulf %555, %555 : vector<16x32xf32>
    %cst_226 = arith.constant dense<0.000000e+00> : vector<16xf32>
    %557 = vector.multi_reduction <add>, %556, %cst_226 [1] : vector<16x32xf32> to vector<16xf32>
    %558 = vector.shape_cast %557 : vector<16xf32> to vector<16x1xf32>
    %cst_227 = arith.constant 3.200000e+01 : f32
    %559 = vector.broadcast %cst_227 : f32 to vector<16x1xf32>
    %560 = arith.divf %558, %559 : vector<16x1xf32>
    %561 = vector.broadcast %553 : vector<16x1xf32> to vector<16x32xf32>
    %562 = arith.subf %547, %561 : vector<16x32xf32>
    %cst_228 = arith.constant 9.99999974E-6 : f32
    %563 = vector.broadcast %cst_228 : f32 to vector<16x1xf32>
    %564 = arith.addf %560, %563 : vector<16x1xf32>
    %565 = math.rsqrt %564 : vector<16x1xf32>
    %566 = vector.broadcast %565 : vector<16x1xf32> to vector<16x32xf32>
    %567 = arith.mulf %562, %566 : vector<16x32xf32>
    %568 = vector.broadcast %548 : vector<1x32xf32> to vector<16x32xf32>
    %569 = arith.mulf %567, %568 : vector<16x32xf32>
    %570 = vector.broadcast %549 : vector<1x32xf32> to vector<16x32xf32>
    %571 = arith.addf %569, %570 : vector<16x32xf32>
    %c0_229 = arith.constant 0 : index
    %c0_230 = arith.constant 0 : index
    %572 = vector.load %arg26[%c0_229, %c0_230] : memref<16x32xf32, #tpu.memory_space<vmem>>, vector<16x32xf32>
    tpu.vector_store %arg26[%c0_229, %c0_230], %571 {strides = array<i32>} : memref<16x32xf32, #tpu.memory_space<vmem>>, vector<16x32xf32>,
    return
  }
  func.func @transform_0(%arg0: i32) -> (i32, i32) {
    %c0_i32 = arith.constant 0 : i32
    %c0_i32_0 = arith.constant 0 : i32
    %c0_i32_1 = arith.constant 0 : i32
    return %c0_i32, %c0_i32_0 : i32, i32
  }
  func.func @transform_1(%arg0: i32) -> (i32, i32) {
    %c0_i32 = arith.constant 0 : i32
    %c0_i32_0 = arith.constant 0 : i32
    %c0_i32_1 = arith.constant 0 : i32
    return %c0_i32, %c0_i32_0 : i32, i32
  }
  func.func @transform_2(%arg0: i32) -> (i32, i32) {
    %c0_i32 = arith.constant 0 : i32
    %c0_i32_0 = arith.constant 0 : i32
    %c0_i32_1 = arith.constant 0 : i32
    return %c0_i32, %c0_i32_0 : i32, i32
  }
  func.func @transform_3(%arg0: i32) -> (i32, i32) {
    %c0_i32 = arith.constant 0 : i32
    %c0_i32_0 = arith.constant 0 : i32
    %c0_i32_1 = arith.constant 0 : i32
    return %c0_i32, %c0_i32_0 : i32, i32
  }
  func.func @transform_4(%arg0: i32) -> (i32, i32) {
    %c0_i32 = arith.constant 0 : i32
    %c0_i32_0 = arith.constant 0 : i32
    %c0_i32_1 = arith.constant 0 : i32
    return %c0_i32, %c0_i32_0 : i32, i32
  }
  func.func @transform_5(%arg0: i32) -> (i32, i32) {
    %c0_i32 = arith.constant 0 : i32
    %c0_i32_0 = arith.constant 0 : i32
    %c0_i32_1 = arith.constant 0 : i32
    return %c0_i32, %c0_i32_0 : i32, i32
  }
  func.func @transform_6(%arg0: i32) -> (i32, i32) {
    %c0_i32 = arith.constant 0 : i32
    %c0_i32_0 = arith.constant 0 : i32
    %c0_i32_1 = arith.constant 0 : i32
    return %c0_i32, %c0_i32_0 : i32, i32
  }
  func.func @transform_7(%arg0: i32) -> (i32, i32) {
    %c0_i32 = arith.constant 0 : i32
    %c0_i32_0 = arith.constant 0 : i32
    %c0_i32_1 = arith.constant 0 : i32
    return %c0_i32, %c0_i32_0 : i32, i32
  }
  func.func @transform_8(%arg0: i32) -> (i32, i32) {
    %c0_i32 = arith.constant 0 : i32
    %c0_i32_0 = arith.constant 0 : i32
    %c0_i32_1 = arith.constant 0 : i32
    return %c0_i32, %c0_i32_0 : i32, i32
  }
  func.func @transform_9(%arg0: i32) -> (i32, i32) {
    %c0_i32 = arith.constant 0 : i32
    %c0_i32_0 = arith.constant 0 : i32
    %c0_i32_1 = arith.constant 0 : i32
    return %c0_i32, %c0_i32_0 : i32, i32
  }
  func.func @transform_10(%arg0: i32) -> (i32, i32) {
    %c0_i32 = arith.constant 0 : i32
    %c0_i32_0 = arith.constant 0 : i32
    %c0_i32_1 = arith.constant 0 : i32
    return %c0_i32, %c0_i32_0 : i32, i32
  }
  func.func @transform_11(%arg0: i32) -> (i32, i32, i32) {
    %c0_i32 = arith.constant 0 : i32
    %c0_i32_0 = arith.constant 0 : i32
    %c0_i32_1 = arith.constant 0 : i32
    %c0_i32_2 = arith.constant 0 : i32
    return %c0_i32, %c0_i32_0, %c0_i32_1 : i32, i32, i32
  }
  func.func @transform_12(%arg0: i32) -> (i32, i32, i32) {
    %c0_i32 = arith.constant 0 : i32
    %c0_i32_0 = arith.constant 0 : i32
    %c0_i32_1 = arith.constant 0 : i32
    %c0_i32_2 = arith.constant 0 : i32
    return %c0_i32, %c0_i32_0, %c0_i32_1 : i32, i32, i32
  }
  func.func @transform_13(%arg0: i32) -> (i32, i32) {
    %c0_i32 = arith.constant 0 : i32
    %c0_i32_0 = arith.constant 0 : i32
    %c0_i32_1 = arith.constant 0 : i32
    return %c0_i32, %c0_i32_0 : i32, i32
  }
  func.func @transform_14(%arg0: i32) -> (i32, i32) {
    %c0_i32 = arith.constant 0 : i32
    %c0_i32_0 = arith.constant 0 : i32
    %c0_i32_1 = arith.constant 0 : i32
    return %c0_i32, %c0_i32_0 : i32, i32
  }
  func.func @transform_15(%arg0: i32) -> (i32, i32) {
    %c0_i32 = arith.constant 0 : i32
    %c0_i32_0 = arith.constant 0 : i32
    %c0_i32_1 = arith.constant 0 : i32
    return %c0_i32, %c0_i32_0 : i32, i32
  }
  func.func @transform_16(%arg0: i32) -> (i32, i32) {
    %c0_i32 = arith.constant 0 : i32
    %c0_i32_0 = arith.constant 0 : i32
    %c0_i32_1 = arith.constant 0 : i32
    return %c0_i32, %c0_i32_0 : i32, i32
  }
  func.func @transform_17(%arg0: i32) -> (i32, i32) {
    %c0_i32 = arith.constant 0 : i32
    %c0_i32_0 = arith.constant 0 : i32
    %c0_i32_1 = arith.constant 0 : i32
    return %c0_i32, %c0_i32_0 : i32, i32
  }
  func.func @transform_18(%arg0: i32) -> (i32, i32) {
    %c0_i32 = arith.constant 0 : i32
    %c0_i32_0 = arith.constant 0 : i32
    %c0_i32_1 = arith.constant 0 : i32
    return %c0_i32, %c0_i32_0 : i32, i32
  }
  func.func @transform_19(%arg0: i32) -> (i32, i32) {
    %c0_i32 = arith.constant 0 : i32
    %c0_i32_0 = arith.constant 0 : i32
    %c0_i32_1 = arith.constant 0 : i32
    return %c0_i32, %c0_i32_0 : i32, i32
  }
  func.func @transform_20(%arg0: i32) -> (i32, i32) {
    %c0_i32 = arith.constant 0 : i32
    %c0_i32_0 = arith.constant 0 : i32
    %c0_i32_1 = arith.constant 0 : i32
    return %c0_i32, %c0_i32_0 : i32, i32
  }
  func.func @transform_21(%arg0: i32) -> (i32, i32) {
    %c0_i32 = arith.constant 0 : i32
    %c0_i32_0 = arith.constant 0 : i32
    %c0_i32_1 = arith.constant 0 : i32
    return %c0_i32, %c0_i32_0 : i32, i32
  }
  func.func @transform_22(%arg0: i32) -> (i32, i32) {
    %c0_i32 = arith.constant 0 : i32
    %c0_i32_0 = arith.constant 0 : i32
    %c0_i32_1 = arith.constant 0 : i32
    return %c0_i32, %c0_i32_0 : i32, i32
  }
  func.func @transform_23(%arg0: i32) -> (i32, i32) {
    %c0_i32 = arith.constant 0 : i32
    %c0_i32_0 = arith.constant 0 : i32
    %c0_i32_1 = arith.constant 0 : i32
    return %c0_i32, %c0_i32_0 : i32, i32
  }
  func.func @transform_24(%arg0: i32) -> (i32, i32) {
    %c0_i32 = arith.constant 0 : i32
    %c0_i32_0 = arith.constant 0 : i32
    %c0_i32_1 = arith.constant 0 : i32
    return %c0_i32, %c0_i32_0 : i32, i32
  }
  func.func @transform_25(%arg0: i32) -> (i32, i32) {
    %c0_i32 = arith.constant 0 : i32
    %c0_i32_0 = arith.constant 0 : i32
    %c0_i32_1 = arith.constant 0 : i32
    return %c0_i32, %c0_i32_0 : i32, i32
  }
}

</mosaic_0001>

<bundles_post_ra>
// kernel: tpu_custom_call.1
= control target key start
LH: loop header
LB: loop body
LE: loop exit
PB: predicated region body
PF: predicated region fallthrough
CT: control target
= control target key end

     0   :  { %s13358_s0 = inlined_call_operand.vmem [shape: f32[128,32], index: 0, kind: input, shape index: {}]   ;;  %s13359_s1 = inlined_call_operand.vmem [shape: f32[1,128], index: 1, kind: input, shape index: {}]   ;;  %s13360_s2 = inlined_call_operand.vmem [shape: f32[128,1], index: 2, kind: input, shape index: {}]   ;;  %s13361_s3 = inlined_call_operand.vmem [shape: f32[1,128], index: 3, kind: input, shape index: {}]   ;;  %s13362_s4 = inlined_call_operand.vmem [shape: f32[128,32], index: 4, kind: input, shape index: {}]   ;;  %s13363_s5 = inlined_call_operand.vmem [shape: f32[32,32], index: 5, kind: input, shape index: {}]   ;;  %s13364_s6 = inlined_call_operand.vmem [shape: f32[32,32], index: 6, kind: input, shape index: {}]   ;;  %s13365_s7 = inlined_call_operand.vmem [shape: f32[32,32], index: 7, kind: input, shape index: {}]   ;;  %s13366_s8 = inlined_call_operand.vmem [shape: f32[32,32], index: 8, kind: input, shape index: {}]   ;;  %s13367_s9 = inlined_call_operand.vmem [shape: f32[1,32], index: 9, kind: input, shape index: {}]   ;;  %s13368_s10 = inlined_call_operand.vmem [shape: f32[1,32], index: 10, kind: input, shape index: {}]   ;;  %s13369_s11 = inlined_call_operand.vmem [shape: f32[8,32,32], index: 11, kind: input, shape index: {}]   ;;  %s13370_s12 = inlined_call_operand.vmem [shape: f32[2,8,8], index: 12, kind: input, shape index: {}]   ;;  %s13371_s13 = inlined_call_operand.vmem [shape: f32[32,256], index: 13, kind: input, shape index: {}]   ;;  %s13372_s14 = inlined_call_operand.vmem [shape: f32[4,32], index: 14, kind: input, shape index: {}]   ;;  %s13373_s15 = inlined_call_operand.vmem [shape: f32[4,32], index: 15, kind: input, shape index: {}]   ;;  %s13374_s16 = inlined_call_operand.vmem [shape: f32[256,32], index: 16, kind: input, shape index: {}]   ;;  %s13375_s17 = inlined_call_operand.vmem [shape: f32[1,32], index: 17, kind: input, shape index: {}]   ;;  %s13376_s18 = inlined_call_operand.vmem [shape: f32[1,32], index: 18, kind: input, shape index: {}]   ;;  %s13377_s19 = inlined_call_operand.vmem [shape: f32[32,64], index: 19, kind: input, shape index: {}]   ;;  %s13378_s20 = inlined_call_operand.vmem [shape: f32[1,64], index: 20, kind: input, shape index: {}]   ;;  %s13379_s21 = inlined_call_operand.vmem [shape: f32[64,32], index: 21, kind: input, shape index: {}]   ;;  %s13380_s22 = inlined_call_operand.vmem [shape: f32[1,32], index: 22, kind: input, shape index: {}]   ;;  %s13381_s23 = inlined_call_operand.vmem [shape: f32[1,32], index: 23, kind: input, shape index: {}]   ;;  %s13382_s24 = inlined_call_operand.vmem [shape: f32[1,32], index: 24, kind: input, shape index: {}]   ;;  %s13383_s25 = inlined_call_operand.hbm [shape: f32[16,32], index: 25, kind: output, shape index: {}]  }
   0x1   :  { %13481 = sst [smem:[#allocation62_spill]] %s13358_s0 }
   0x2   :  { %13482 = sst [smem:[#allocation63_spill]] %s13359_s1 }
   0x3   :  { %13483 = sst [smem:[#allocation64_spill]] %s13360_s2 }
   0x4   :  { %13484 = sst [smem:[#allocation65_spill]] %s13361_s3 }
   0x5   :  { %13485 = sst [smem:[#allocation66_spill]] %s13362_s4 }
   0x6   :  { %13486 = sst [smem:[#allocation67_spill]] %s13363_s5 }
   0x7   :  { %13487 = sst [smem:[#allocation68_spill]] %s13364_s6 }
   0x8   :  { %13488 = sst [smem:[#allocation69_spill]] %s13365_s7 }
   0x9   :  { %13489 = sst [smem:[#allocation70_spill]] %s13366_s8 }
   0xa   :  { %13490 = sst [smem:[#allocation71_spill]] %s13367_s9 }
   0xb   :  { %s13491_s6 = sld [smem:[#allocation68_spill]]  ;;  %s13492_s28 = sld [smem:[#allocation62_spill]]  ;;  %vm13420_vm0 = vcmask 261120   ;;  %v13391_v7 = vmov 0  }
   0xc   :  { %s13493_s0 = sld [smem:[#allocation66_spill]]  ;;  %9876 = vset.pattern.permute.xlu1 %v13391_v7  ;;  %9875 = vset.pattern.permute.xlu0 %v13391_v7  ;;  %s13497_s3 = sld [smem:[#allocation67_spill]] }
   0xd   :  { %s13500_s27 = sld [smem:[#allocation69_spill]]  ;;  %s13502_s2 = sld [smem:[#allocation64_spill]] }
  0x11   :  { %v470_v0 = vld [vmem:[%s13491_s6] sm:$0xff]  ;;  %v471_v1 = vld [vmem:[%s13491_s6 + $0x8] sm:$0xff]  ;;  %v472_v2 = vld [vmem:[%s13491_s6 + $0x10] sm:$0xff] }
  0x12   :  { %v9255_v3 = vpack.c.bf16 %v471_v1, %v470_v0  ;;  %v473_v4 = vld [vmem:[%s13491_s6 + $0x18] sm:$0xff]  ;;  %v81_v5 = vld [vmem:[%s13492_s28] sm:$0xff]  ;;  %v82_v10 = vld [vmem:[%s13492_s28 + $0x8] sm:$0xff] }
  0x13   :  { %v97_v6 = vld [vmem:[%s13493_s0] sm:$0xff]  ;;  %v9259_v8 = vpack.c.bf16 %v473_v4, %v472_v2  ;;  %v98_v11 = vld [vmem:[%s13493_s0 + $0x8] sm:$0xff]  ;;  %v83_v12 = vld [vmem:[%s13492_s28 + $0x10] sm:$0xff] }
  0x14   :  { %v10664_v9 = vadd.f32 %v97_v6, %v81_v5  ;;  %9256 = vmatprep.subr.bf16.mxu1 %v9255_v3  ;;  %v99_v13 = vld [vmem:[%s13493_s0 + $0x10] sm:$0xff]  ;;  %v10682_v14 = vadd.f32 %v98_v11, %v82_v10  ;;  %v84_v16 = vld [vmem:[%s13492_s28 + $0x18] sm:$0xff]  ;;  %v85_v18 = vld [vmem:[%s13492_s28 + $0x20] sm:$0xff] }
  0x15   :  { %9258 = vmatpush3.bf16.msra.mxu1 %v9255_v3  ;;  %v10684_v15 = vadd.f32 %v99_v13, %v83_v12  ;;  %v100_v17 = vld [vmem:[%s13493_s0 + $0x18] sm:$0xff]  ;;  %v101_v19 = vld [vmem:[%s13493_s0 + $0x20] sm:$0xff]  ;;  %v273_v22 = vld [vmem:[%s13497_s3 + $0x8] sm:$0xff] }
  0x16   :  { %13494 = vst [vmem:[#allocation5_spill] sm:$0xff] %v10664_v9  ;;  %8297 = vmatprep.mubr.msk.f32.mxu1 %vm13420_vm0, %v10664_v9  ;;  %9260 = vmatprep.subr.bf16.mxu1 %v9259_v8  ;;  %13495 = vst [vmem:[#allocation6_spill] sm:$0xff] %v10682_v14  ;;  %v272_v20 = vld [vmem:[%s13497_s3] sm:$0xff]  ;;  %v10703_v21 = vadd.f32 %v100_v17, %v84_v16  ;;  %v274_v23 = vld [vmem:[%s13497_s3 + $0x10] sm:$0xff]  ;;  %v10716_v25 = vadd.f32 %v101_v19, %v85_v18 }
  0x17   :  { %8265 = vmatprep.mubr.msk.f32.mxu0 %vm13420_vm0, %v10664_v9  ;;  %13496 = vst [vmem:[#allocation7_spill] sm:$0xff] %v10684_v15  ;;  %v275_v24 = vld [vmem:[%s13497_s3 + $0x18] sm:$0xff]  ;;  %v86_v26 = vld [vmem:[%s13492_s28 + $0x28] sm:$0xff]  ;;  %v87_v28 = vld [vmem:[%s13492_s28 + $0x30] sm:$0xff]  ;;  %v9247_v29 = vpack.c.bf16 %v273_v22, %v272_v20 }
  0x18   :  { %13498 = vst [vmem:[#allocation8_spill] sm:$0xff] %v10703_v21  ;;  %13499 = vst [vmem:[#allocation9_spill] sm:$0xff] %v10716_v25  ;;  %v102_v27 = vld [vmem:[%s13493_s0 + $0x28] sm:$0xff]  ;;  %v9251_v30 = vpack.c.bf16 %v275_v24, %v274_v23  ;;  %v103_v31 = vld [vmem:[%s13493_s0 + $0x30] sm:$0xff] }
  0x19   :  { %9262 = vmatpush3.bf16.msra.mxu1 %v9259_v8  ;;  %v619_v32 = vld [vmem:[%s13500_s27] sm:$0xff]  ;;  %v620_v33 = vld [vmem:[%s13500_s27 + $0x8] sm:$0xff]  ;;  %9248 = vmatprep.subr.bf16.mxu0 %v9247_v29  ;;  %v10738_v34 = vadd.f32 %v102_v27, %v86_v26  ;;  %v131_v35 = vld [vmem:[%s13502_s2 + $0x10] sm:$0xff]  ;;  %v10745_v36 = vadd.f32 %v103_v31, %v87_v28 }
  0x1a   :  { %9250 = vmatpush3.bf16.msra.mxu0 %v9247_v29  ;;  %v88_v37 = vld [vmem:[%s13492_s28 + $0x38] sm:$0xff]  ;;  %v9263_v39 = vpack.c.bf16 %v620_v33, %v619_v32  ;;  %v89_v40 = vld [vmem:[%s13492_s28 + $0x40] sm:$0xff]  ;;  %158 = vperm.xlu1 %9876, %v131_v35  }
  0x1b   :  { %13501 = vst [vmem:[#allocation10_spill] sm:$0xff] %v10738_v34  ;;  %13503 = vst [vmem:[#allocation11_spill] sm:$0xff] %v10745_v36  ;;  %v104_v38 = vld [vmem:[%s13493_s0 + $0x38] sm:$0xff]  ;;  %9252 = vmatprep.subr.bf16.mxu0 %v9251_v30  ;;  %v105_v41 = vld [vmem:[%s13493_s0 + $0x40] sm:$0xff] }
  0x1c   :  { %8298 = vmatmul.mubr.msk.f32.vlgmr.msra.gmra.mrb[0].mxu1 %vm13420_vm0, %v10682_v14 }
  0x1d   :  { %8300 = vmatprep.mubr.msk.f32.mxu1 %vm13420_vm0, %v10684_v15 }
  0x20   :  { %8301 = vmatmul.mubr.msk.f32.gmra.mrb[2].mxu1 %vm13420_vm0, %v10703_v21 }
  0x21   :  { %8303 = vmatprep.mubr.msk.f32.mxu1 %vm13420_vm0, %v10716_v25 }
  0x22   :  { %30 = vsyncpa [#allocation3], 0  ;;  %v621_v42 = vld [vmem:[%s13500_s27 + $0x10] sm:$0xff]  ;;  %v622_v43 = vld [vmem:[%s13500_s27 + $0x18] sm:$0xff]  ;;  %v10770_v45 = vadd.f32 %v104_v38, %v88_v37  ;;  %9254 = vmatpush3.bf16.msra.mxu0 %v9251_v30  ;;  %v10774_v46 = vadd.f32 %v105_v41, %v89_v40  ;;  %vm13423_vm1 = vcmask 64512   ;;  %s10501_s29 = smov 120  }
  0x23   :  { %v132_v44 = vld [vmem:[%s13502_s2 + $0x18] sm:$0xff]  ;;  %v90_v47 = vld [vmem:[%s13492_s28 + $0x48] sm:$0xff]  ;;  %9264 = vmatprep.subr.bf16.mxu0 %v9263_v39  ;;  %v91_v49 = vld [vmem:[%s13492_s28 + $0x50] sm:$0xff]  ;;  %v9267_v51 = vpack.c.bf16 %v622_v43, %v621_v42  ;;  %s13523_s9 = sld [smem:[#allocation63_spill]]  ;;  %s13527_s30 = sld [smem:[#allocation65_spill]] }
  0x24   :  { %8304 = vmatmul.mubr.msk.f32.gmra.mrb[4].mxu1 %vm13420_vm0, %v10738_v34  ;;  %13504 = vst [vmem:[#allocation12_spill] sm:$0xff] %v10770_v45  ;;  %13505 = vst [vmem:[#allocation13_spill] sm:$0xff] %v10774_v46  ;;  %v106_v48 = vld [vmem:[%s13493_s0 + $0x48] sm:$0xff]  ;;  %v107_v50 = vld [vmem:[%s13493_s0 + $0x50] sm:$0xff]  ;;  %163 = vperm.xlu1 %9876, %v132_v44   ;;  %s10502_s7 = smov 112   ;;  %s13661_s26 = sld [smem:[#allocation70_spill]] }
  0x25   :  { %8306 = vmatprep.mubr.msk.f32.mxu1 %vm13420_vm0, %v10745_v36  ;;  %8266 = vmatmul.mubr.msk.f32.vlgmr.msra.gmra.mrb[0].mxu0 %vm13420_vm0, %v10682_v14  ;;  %v134_v52 = vld [vmem:[%s13502_s2 + $0x28] sm:$0xff]  ;;  %v10795_v53 = vadd.f32 %v106_v48, %v90_v47  ;;  %v10801_v54 = vadd.f32 %v107_v50, %v91_v49  ;;  %v92_v55 = vld [vmem:[%s13492_s28 + $0x58] sm:$0xff]  ;;  %v93_v57 = vld [vmem:[%s13492_s28 + $0x60] sm:$0xff]  ;;  %s13804_s6 = sld [smem:[#allocation71_spill]]  ;;  %s10510_s8 = smov 64  }
  0x26   :  { %8268 = vmatprep.mubr.msk.f32.mxu0 %vm13420_vm0, %v10684_v15  ;;  %v108_v56 = vld [vmem:[%s13493_s0 + $0x58] sm:$0xff]  ;;  %9266 = vmatpush3.bf16.msra.mxu0 %v9263_v39  ;;  %v109_v58 = vld [vmem:[%s13493_s0 + $0x60] sm:$0xff]  ;;  %v94_v62 = vld [vmem:[%s13492_s28 + $0x68] sm:$0xff] }
  0x27   :  { %13506 = vst [vmem:[#allocation14_spill] sm:$0xff] %v10795_v53  ;;  %13507 = vst [vmem:[#allocation15_spill] sm:$0xff] %v10801_v54  ;;  %9268 = vmatprep.subr.bf16.mxu0 %v9267_v51  ;;  %v136_v59 = vld [vmem:[%s13502_s2 + $0x38] sm:$0xff]  ;;  %v10822_v60 = vadd.f32 %v108_v56, %v92_v55  ;;  %v10828_v61 = vadd.f32 %v109_v58, %v93_v57  ;;  %v110_v63 = vld [vmem:[%s13493_s0 + $0x68] sm:$0xff] }
  0x28   :  { %8307 = vmatmul.mubr.msk.f32.gmra.mrb[6].mxu1 %vm13420_vm0, %v10770_v45  ;;  %173 = vperm.xlu1 %9876, %v134_v52   ;;  %v95_v0 = vld [vmem:[%s13492_s28 + $0x70] sm:$0xff]  ;;  %v138_v2 = vld [vmem:[%s13502_s2 + $0x48] sm:$0xff]  ;;  %v10849_v3 = vadd.f32 %v110_v63, %v94_v62  ;;  %v96_v5 = vld [vmem:[%s13492_s28 + $0x78] sm:$0xff]  ;;  %s10503_s28 = smov 104  }
  0x29   :  { %8309 = vmatprep.mubr.msk.f32.mxu1 %vm13420_vm0, %v10774_v46  ;;  %8269 = vmatmul.mubr.msk.f32.gmra.mrb[2].mxu0 %vm13420_vm0, %v10703_v21  ;;  %13508 = vst [vmem:[#allocation16_spill] sm:$0xff] %v10822_v60  ;;  %13509 = vst [vmem:[#allocation17_spill] sm:$0xff] %v10828_v61  ;;  %v111_v1 = vld [vmem:[%s13493_s0 + $0x70] sm:$0xff]  ;;  %v112_v6 = vld [vmem:[%s13493_s0 + $0x78] sm:$0xff] }
  0x2a   :  { %8271 = vmatprep.mubr.msk.f32.mxu0 %vm13420_vm0, %v10716_v25  ;;  %9270 = vmatpush3.bf16.msra.mxu0 %v9267_v51  ;;  %13510 = vst [vmem:[#allocation18_spill] sm:$0xff] %v10849_v3  ;;  %v10855_v4 = vadd.f32 %v111_v1, %v95_v0  ;;  %v140_v8 = vld [vmem:[%s13502_s2 + $0x58] sm:$0xff]  ;;  %v10870_v10 = vadd.f32 %v112_v6, %v96_v5  ;;  %v142_v11 = vld [vmem:[%s13502_s2 + $0x68] sm:$0xff]  ;;  %v129_v13 = vld [vmem:[%s13502_s2] sm:$0xff] }
  0x2b   :  { %v144_v12 = vld [vmem:[%s13502_s2 + $0x78] sm:$0xff]  ;;  %148 = vperm.xlu0 %9875, %v129_v13   ;;  %v130_v16 = vld [vmem:[%s13502_s2 + $0x8] sm:$0xff]  ;;  %vm10938_vm2 = vmpackc.low %vm13423_vm1, %vm13423_vm1 }
  0x2c   :  { %8310 = vmatmul.mubr.msk.f32.gmra.mrb[8].mxu1 %vm13420_vm0, %v10795_v53  ;;  %183 = vperm.xlu1 %9876, %v136_v59   ;;  %13511 = vst [vmem:[#allocation19_spill] sm:$0xff] %v10855_v4  ;;  %13512 = vst [vmem:[#allocation20_spill] sm:$0xff] %v10870_v10  ;;  %v133_v23 = vld [vmem:[%s13502_s2 + $0x20] sm:$0xff]  ;;  %v135_v28 = vld [vmem:[%s13502_s2 + $0x30] sm:$0xff] }
  0x2d   :  { %8312 = vmatprep.mubr.msk.f32.mxu1 %vm13420_vm0, %v10801_v54  ;;  %8272 = vmatmul.mubr.msk.f32.gmra.mrb[4].mxu0 %vm13420_vm0, %v10738_v34  ;;  %v137_v37 = vld [vmem:[%s13502_s2 + $0x40] sm:$0xff]  ;;  %v139_v44 = vld [vmem:[%s13502_s2 + $0x50] sm:$0xff] }
  0x2e   :  { %8274 = vmatprep.mubr.msk.f32.mxu0 %vm13420_vm0, %v10745_v36  ;;  %v141_v55 = vld [vmem:[%s13502_s2 + $0x60] sm:$0xff]  ;;  %v143_v0 = vld [vmem:[%s13502_s2 + $0x70] sm:$0xff] }
  0x2f   :  { %153 = vperm.xlu0 %9875, %v130_v16  }
  0x30   :  { %8313 = vmatmul.mubr.msk.f32.gmra.mrb[10].mxu1 %vm13420_vm0, %v10822_v60  ;;  %193 = vperm.xlu1 %9876, %v138_v2  }
  0x31   :  { %8315 = vmatprep.mubr.msk.f32.mxu1 %vm13420_vm0, %v10828_v61  ;;  %8275 = vmatmul.mubr.msk.f32.gmra.mrb[6].mxu0 %vm13420_vm0, %v10770_v45 }
  0x32   :  { %8277 = vmatprep.mubr.msk.f32.mxu0 %vm13420_vm0, %v10774_v46 }
  0x33   :  { %168 = vperm.xlu0 %9875, %v133_v23  }
  0x34   :  { %8316 = vmatmul.mubr.msk.f32.gmra.mrb[12].mxu1 %vm13420_vm0, %v10849_v3  ;;  %203 = vperm.xlu1 %9876, %v140_v8  }
  0x35   :  { %8318 = vmatprep.mubr.msk.f32.mxu1 %vm13420_vm0, %v10855_v4  ;;  %8278 = vmatmul.mubr.msk.f32.gmra.mrb[8].mxu0 %vm13420_vm0, %v10795_v53 }
  0x36   :  { %8280 = vmatprep.mubr.msk.f32.mxu0 %vm13420_vm0, %v10801_v54 }
  0x37   :  { %178 = vperm.xlu0 %9875, %v135_v28  }
  0x38   :  { %8319 = vmatmul.mubr.msk.f32.gmra.mrb[14].mxu1 %vm13420_vm0, %v10870_v10  ;;  %213 = vperm.xlu1 %9876, %v142_v11  }
  0x39   :  { %8281 = vmatmul.mubr.msk.f32.gmra.mrb[10].mxu0 %vm13420_vm0, %v10822_v60 }
  0x3a   :  { %8283 = vmatprep.mubr.msk.f32.mxu0 %vm13420_vm0, %v10828_v61 }
  0x3b   :  { %188 = vperm.xlu0 %9875, %v137_v37  }
  0x3c   :  { %223 = vperm.xlu1 %9876, %v144_v12  }
  0x3d   :  { %8284 = vmatmul.mubr.msk.f32.gmra.mrb[12].mxu0 %vm13420_vm0, %v10849_v3 }
  0x3e   :  { %8286 = vmatprep.mubr.msk.f32.mxu0 %vm13420_vm0, %v10855_v4 }
  0x3f   :  { %198 = vperm.xlu0 %9875, %v139_v44  }
  0x41   :  { %8287 = vmatmul.mubr.msk.f32.gmra.mrb[14].mxu0 %vm13420_vm0, %v10870_v10 }
  0x42   :  { %8329 = vmatprep.mubr.msk.f32.mxu0 %vm13420_vm0, %v10664_v9 }
  0x43   :  { %208 = vperm.xlu0 %9875, %v141_v55  }
  0x45   :  { %8330 = vmatmul.mubr.msk.f32.vlgmr.msra.gmra.mrb[16].mxu0 %vm13420_vm0, %v10682_v14 }
  0x46   :  { %8332 = vmatprep.mubr.msk.f32.mxu0 %vm13420_vm0, %v10684_v15 }
  0x47   :  { %218 = vperm.xlu0 %9875, %v143_v0  }
  0x49   :  { %8333 = vmatmul.mubr.msk.f32.gmra.mrb[18].mxu0 %vm13420_vm0, %v10703_v21 }
  0x4a   :  { %8335 = vmatprep.mubr.msk.f32.mxu0 %vm13420_vm0, %v10716_v25 }
  0x4d   :  { %8336 = vmatmul.mubr.msk.f32.gmra.mrb[20].mxu0 %vm13420_vm0, %v10738_v34 }
  0x4e   :  { %8338 = vmatprep.mubr.msk.f32.mxu0 %vm13420_vm0, %v10745_v36 }
  0x51   :  { %8339 = vmatmul.mubr.msk.f32.gmra.mrb[22].mxu0 %vm13420_vm0, %v10770_v45 }
  0x52   :  { %8341 = vmatprep.mubr.msk.f32.mxu0 %vm13420_vm0, %v10774_v46 }
  0x55   :  { %8342 = vmatmul.mubr.msk.f32.gmra.mrb[24].mxu0 %vm13420_vm0, %v10795_v53 }
  0x56   :  { %8344 = vmatprep.mubr.msk.f32.mxu0 %vm13420_vm0, %v10801_v54 }
  0x59   :  { %8345 = vmatmul.mubr.msk.f32.gmra.mrb[26].mxu0 %vm13420_vm0, %v10822_v60 }
  0x5a   :  { %8347 = vmatprep.mubr.msk.f32.mxu0 %vm13420_vm0, %v10828_v61 }
  0x5d   :  { %8348 = vmatmul.mubr.msk.f32.gmra.mrb[28].mxu0 %vm13420_vm0, %v10849_v3 }
  0x5e   :  { %8350 = vmatprep.mubr.msk.f32.mxu0 %vm13420_vm0, %v10855_v4 }
  0x61   :  { %8351 = vmatmul.mubr.msk.f32.gmra.mrb[30].mxu0 %vm13420_vm0, %v10870_v10  ;;  %v13526_v10 = vmov 0  }
  0xef   :  { %v8299_v17 = vpop.f32.mrb[0].mxu1 }
  0xf0   :  { %v540_v18 = vpop.f32.mrb[1].mxu1 }
  0xf1   :  { %v10942_v20 = vpack.i.bf16 %v8299_v17, %v540_v18  ;;  %v9271_v22 = vpack.c.bf16 %v8299_v17, %v540_v18 }
  0xf3   :  { %9878 = vrot.lane.b32.xlu1 %v10942_v20, %s10501_s29  ;;  %9273 = vmatprep.subr.msk.bf16.mxu1 %vm10938_vm2, %v9271_v22  ;;  %v8302_v24 = vpop.f32.mrb[2].mxu1 }
  0xf4   :  { %9276 = vmatpush3.bf16.xpose.msk.msra.mxu1 %vm10938_vm2, %v9271_v22  ;;  %v550_v26 = vpop.f32.mrb[3].mxu1 }
  0xf5   :  { %v9277_v27 = vpack.c.bf16 %v8302_v24, %v550_v26  ;;  %v10956_v29 = vpack.i.bf16 %v8302_v24, %v550_v26 }
  0xf7   :  { %9279 = vmatprep.subr.msk.bf16.mxu1 %vm10938_vm2, %v9277_v27  ;;  %v8305_v30 = vpop.f32.mrb[4].mxu1 }
  0xf8   :  { %v560_v31 = vpop.f32.mrb[5].mxu1  ;;  %v10962_v35 = vpop.f32.mrb[0].mxu0 }
  0xf9   :  { %v10960_v32 = vpack.i.bf16 %v8305_v30, %v560_v31  ;;  %v9283_v33 = vpack.c.bf16 %v8305_v30, %v560_v31  ;;  %v10967_v39 = vpop.f32.mrb[1].mxu0 }
  0xfa   :  { %8385 = vmatprep.mubr.msk.f32.mxu1 %vm13423_vm1, %v10967_v39 }
  0xfb   :  { %v8308_v38 = vpop.f32.mrb[6].mxu1 }
  0xfc   :  { %9282 = vmatpush3.bf16.xpose.msk.msra.mxu1 %vm10938_vm2, %v9277_v27  ;;  %v570_v40 = vpop.f32.mrb[7].mxu1  ;;  %v10977_v43 = vpop.f32.mrb[2].mxu0 }
  0xfd   :  { %9285 = vmatprep.subr.msk.bf16.mxu1 %vm10938_vm2, %v9283_v33  ;;  %v10975_v41 = vpack.i.bf16 %v8308_v38, %v570_v40  ;;  %v9289_v42 = vpack.c.bf16 %v8308_v38, %v570_v40  ;;  %v10982_v48 = vpop.f32.mrb[3].mxu0 }
  0xff   :  { %v8311_v47 = vpop.f32.mrb[8].mxu1 }
 0x100   :  { %v580_v49 = vpop.f32.mrb[9].mxu1  ;;  %v10986_v52 = vpop.f32.mrb[4].mxu0 }
 0x101   :  { %v10984_v50 = vpack.i.bf16 %v8311_v47, %v580_v49  ;;  %v9295_v51 = vpack.c.bf16 %v8311_v47, %v580_v49  ;;  %v10991_v57 = vpop.f32.mrb[5].mxu0 }
 0x103   :  { %v8314_v56 = vpop.f32.mrb[10].mxu1 }
 0x104   :  { %9288 = vmatpush3.bf16.xpose.msk.msra.mxu1 %vm10938_vm2, %v9283_v33  ;;  %v590_v58 = vpop.f32.mrb[11].mxu1  ;;  %v10999_v63 = vpop.f32.mrb[6].mxu0 }
 0x105   :  { %9291 = vmatprep.subr.msk.bf16.mxu1 %vm10938_vm2, %v9289_v42  ;;  %v10997_v59 = vpack.i.bf16 %v8314_v56, %v590_v58  ;;  %v9301_v62 = vpack.c.bf16 %v8314_v56, %v590_v58  ;;  %v11004_v2 = vpop.f32.mrb[7].mxu0 }
 0x107   :  { %v8317_v1 = vpop.f32.mrb[12].mxu1 }
 0x108   :  { %v600_v5 = vpop.f32.mrb[13].mxu1  ;;  %v11008_v11 = vpop.f32.mrb[8].mxu0 }
 0x109   :  { %v11006_v6 = vpack.i.bf16 %v8317_v1, %v600_v5  ;;  %v9307_v8 = vpack.c.bf16 %v8317_v1, %v600_v5  ;;  %v11010_v13 = vpop.f32.mrb[9].mxu0 }
 0x10b   :  { %v8320_v12 = vpop.f32.mrb[14].mxu1 }
 0x10c   :  { %9294 = vmatpush3.bf16.xpose.msk.msra.mxu1 %vm10938_vm2, %v9289_v42  ;;  %v610_v16 = vpop.f32.mrb[15].mxu1  ;;  %v11018_v22 = vpop.f32.mrb[10].mxu0 }
 0x10d   :  { %9297 = vmatprep.subr.msk.bf16.mxu1 %vm10938_vm2, %v9295_v51  ;;  %v11016_v17 = vpack.i.bf16 %v8320_v12, %v610_v16  ;;  %v9313_v18 = vpack.c.bf16 %v8320_v12, %v610_v16  ;;  %v11020_v23 = vpop.f32.mrb[11].mxu0 }
 0x110   :  { %v11022_v24 = vpop.f32.mrb[12].mxu0 }
 0x111   :  { %v11024_v26 = vpop.f32.mrb[13].mxu0 }
 0x114   :  { %9300 = vmatpush3.bf16.xpose.msk.msra.mxu1 %vm10938_vm2, %v9295_v51  ;;  %v11030_v27 = vpop.f32.mrb[14].mxu0 }
 0x115   :  { %9303 = vmatprep.subr.msk.bf16.mxu1 %vm10938_vm2, %v9301_v62  ;;  %13515 = vst [vmem:[#allocation21_spill] sm:$0xff] %v11030_v27  ;;  %v11032_v28 = vpop.f32.mrb[15].mxu0 }
 0x118   :  { %v8331_v30 = vpop.f32.mrb[16].mxu0 }
 0x119   :  { %v689_v31 = vpop.f32.mrb[17].mxu0 }
 0x11a   :  { %v11036_v33 = vpack.i.bf16 %v8331_v30, %v689_v31  ;;  %v9319_v37 = vpack.c.bf16 %v8331_v30, %v689_v31 }
 0x11c   :  { %9306 = vmatpush3.bf16.xpose.msk.msra.mxu1 %vm10938_vm2, %v9301_v62  ;;  %v8334_v38 = vpop.f32.mrb[18].mxu0  ;;  %9320 = vmatprep.subr.bf16.mxu0 %v9319_v37 }
 0x11d   :  { %9309 = vmatprep.subr.msk.bf16.mxu1 %vm10938_vm2, %v9307_v8  ;;  %v699_v40 = vpop.f32.mrb[19].mxu0  ;;  %9322 = vmatpush3.bf16.msra.mxu0 %v9319_v37 }
 0x11e   :  { %v11040_v42 = vpack.i.bf16 %v8334_v38, %v699_v40  ;;  %v9323_v44 = vpack.c.bf16 %v8334_v38, %v699_v40 }
 0x120   :  { %13516 = vst [vmem:[#allocation22_spill] sm:$0xff] %v11040_v42  ;;  %v8337_v47 = vpop.f32.mrb[20].mxu0  ;;  %9324 = vmatprep.subr.bf16.mxu0 %v9323_v44 }
 0x121   :  { %v709_v49 = vpop.f32.mrb[21].mxu0  ;;  %9326 = vmatpush3.bf16.msra.mxu0 %v9323_v44 }
 0x122   :  { %v11044_v51 = vpack.i.bf16 %v8337_v47, %v709_v49  ;;  %v9327_v55 = vpack.c.bf16 %v8337_v47, %v709_v49  ;;  %v11062_v47 = vpop.permute.xlu1 %158 }
 0x124   :  { %9312 = vmatpush3.bf16.xpose.msk.msra.mxu1 %vm10938_vm2, %v9307_v8  ;;  %13517 = vst [vmem:[#allocation23_spill] sm:$0xff] %v11044_v51  ;;  %v8340_v56 = vpop.f32.mrb[22].mxu0  ;;  %9328 = vmatprep.subr.bf16.mxu0 %v9327_v55 }
 0x125   :  { %9315 = vmatprep.subr.msk.bf16.mxu1 %vm10938_vm2, %v9313_v18  ;;  %v719_v58 = vpop.f32.mrb[23].mxu0  ;;  %9330 = vmatpush3.bf16.msra.mxu0 %v9327_v55 }
 0x126   :  { %v11048_v62 = vpack.i.bf16 %v8340_v56, %v719_v58  ;;  %v9331_v0 = vpack.c.bf16 %v8340_v56, %v719_v58 }
 0x128   :  { %13518 = vst [vmem:[#allocation24_spill] sm:$0xff] %v11048_v62  ;;  %v8343_v1 = vpop.f32.mrb[24].mxu0  ;;  %9332 = vmatprep.subr.bf16.mxu0 %v9331_v0 }
 0x129   :  { %v729_v5 = vpop.f32.mrb[25].mxu0  ;;  %9334 = vmatpush3.bf16.msra.mxu0 %v9331_v0  ;;  %v11072_v0 = vpop.permute.xlu1 %163 }
 0x12a   :  { %v11052_v8 = vpack.i.bf16 %v8343_v1, %v729_v5  ;;  %v9335_v12 = vpack.c.bf16 %v8343_v1, %v729_v5 }
 0x12c   :  { %9318 = vmatpush3.bf16.xpose.msk.msra.mxu1 %vm10938_vm2, %v9313_v18  ;;  %13519 = vst [vmem:[#allocation25_spill] sm:$0xff] %v11052_v8  ;;  %v8346_v16 = vpop.f32.mrb[26].mxu0  ;;  %9336 = vmatprep.subr.bf16.mxu0 %v9335_v12 }
 0x12d   :  { %v739_v30 = vpop.f32.mrb[27].mxu0  ;;  %9338 = vmatpush3.bf16.msra.mxu0 %v9335_v12  ;;  %v11080_v1 = vpop.permute.xlu1 %173 }
 0x12e   :  { %v11054_v31 = vpack.i.bf16 %v8346_v16, %v739_v30  ;;  %v9339_v37 = vpack.c.bf16 %v8346_v16, %v739_v30 }
 0x130   :  { %13520 = vst [vmem:[#allocation26_spill] sm:$0xff] %v11054_v31  ;;  %v8349_v38 = vpop.f32.mrb[28].mxu0  ;;  %9340 = vmatprep.subr.bf16.mxu0 %v9339_v37 }
 0x131   :  { %v749_v40 = vpop.f32.mrb[29].mxu0  ;;  %9342 = vmatpush3.bf16.msra.mxu0 %v9339_v37  ;;  %v11088_v5 = vpop.permute.xlu1 %183 }
 0x132   :  { %v11060_v18 = vpack.i.bf16 %v8349_v38, %v749_v40  ;;  %v9343_v44 = vpack.c.bf16 %v8349_v38, %v749_v40 }
 0x133   :  { %8386 = vmatmul.mubr.msk.f32.vlgmr.msra.gmra.mrb[16].mxu1 %vm13423_vm1, %v10962_v35 }
 0x134   :  { %8388 = vmatprep.mubr.msk.f32.mxu1 %vm13423_vm1, %v10982_v48  ;;  %13521 = vst [vmem:[#allocation27_spill] sm:$0xff] %v11060_v18  ;;  %v8352_v49 = vpop.f32.mrb[30].mxu0  ;;  %9344 = vmatprep.subr.bf16.mxu0 %v9343_v44 }
 0x135   :  { %v759_v55 = vpop.f32.mrb[31].mxu0  ;;  %9346 = vmatpush3.bf16.msra.mxu0 %v9343_v44  ;;  %v11096_v12 = vpop.permute.xlu1 %193 }
 0x136   :  { %v11068_v56 = vpack.i.bf16 %v8352_v49, %v759_v55  ;;  %v9347_v58 = vpack.c.bf16 %v8352_v49, %v759_v55  ;;  %v251_v55 = vlaneseq }
 0x137   :  { %8389 = vmatmul.mubr.msk.f32.gmra.mrb[18].mxu1 %vm13423_vm1, %v10977_v43 }
 0x138   :  { %8391 = vmatprep.mubr.msk.f32.mxu1 %vm13423_vm1, %v10991_v57  ;;  %13522 = vst [vmem:[#allocation28_spill] sm:$0xff] %v11068_v56  ;;  %9348 = vmatprep.subr.bf16.mxu0 %v9347_v58  ;;  %v11114_v7 = vshrl.u32 %v251_v55, 7  ;;  %v13533_v55 = vmov 0 }
 0x139   :  { %9350 = vmatpush3.bf16.msra.mxu0 %v9347_v58  ;;  %v11100_v16 = vpop.permute.xlu1 %203  ;;  %v248_v58 = vld [vmem:[%s13523_s9] sm:$0x1] }
 0x13a   :  { %13524 = vst [vmem:[#allocation29_spill] sm:$0xff] %v11114_v7  ;;  %vm249_vm3 = vcmp.lt.f32.partialorder %v248_v58, 0.5  ;;  %v11117_v4 = vsub.s32 0, %v11114_v7 }
 0x13b   :  { %8392 = vmatmul.mubr.msk.f32.gmra.mrb[20].mxu1 %vm13423_vm1, %v10986_v52  ;;  %v250_v61 = vsel %vm249_vm3, 1, %v13526_v10  ;;  %v13530_v10 = vmov 0 }
 0x13c   :  { %8394 = vmatprep.mubr.msk.f32.mxu1 %vm13423_vm1, %v11004_v2  ;;  %13525 = vst [vmem:[#allocation30_spill] sm:$0xff] %v11117_v4 }
 0x13d   :  { %v11102_v30 = vpop.permute.xlu1 %213 }
 0x13f   :  { %8395 = vmatmul.mubr.msk.f32.gmra.mrb[22].mxu1 %vm13423_vm1, %v10999_v63 }
 0x140   :  { %8397 = vmatprep.mubr.msk.f32.mxu1 %vm13423_vm1, %v11010_v13 }
 0x141   :  { %v11104_v37 = vpop.permute.xlu1 %223 }
 0x143   :  { %8398 = vmatmul.mubr.msk.f32.gmra.mrb[24].mxu1 %vm13423_vm1, %v11008_v11 }
 0x144   :  { %8400 = vmatprep.mubr.msk.f32.mxu1 %vm13423_vm1, %v11020_v23 }
 0x147   :  { %8401 = vmatmul.mubr.msk.f32.gmra.mrb[26].mxu1 %vm13423_vm1, %v11018_v22 }
 0x148   :  { %8403 = vmatprep.mubr.msk.f32.mxu1 %vm13423_vm1, %v11024_v26 }
 0x14b   :  { %8404 = vmatmul.mubr.msk.f32.gmra.mrb[28].mxu1 %vm13423_vm1, %v11022_v24 }
 0x14c   :  { %8406 = vmatprep.mubr.msk.f32.mxu1 %vm13423_vm1, %v11032_v28 }
 0x14f   :  { %8407 = vmatmul.mubr.msk.f32.gmra.mrb[30].mxu1 %vm13423_vm1, %v11030_v27 }
 0x165   :  { %v9879_v38 = vpop.permute.xlu1 %9878 }
 0x166   :  { %v9881_v40 = vunpack.i.h.bf16 %v9879_v38  ;;  %v9880_v44 = vunpack.i.l.bf16 %v9879_v38  ;;  %v149_v38 = vpop.permute.xlu0 %148 }
 0x168   :  { %v11106_v49 = vpack.c.bf16 %v9881_v40, %v9880_v44  ;;  %v254_v40 = vrot.slane %v250_v61, %v11117_v4  ;;  %v11124_v44 = vld [vmem:[%s13527_s30] ss:$0 sm:$0xff] }
 0x169   :  { %vm232_vm6 = vcmp.eq.f32.partialorder %v149_v38, %v11124_v44  ;;  %vm235_vm9 = vcmp.eq.f32.partialorder %v11072_v0, %v11124_v44  ;;  %vm234_vm11 = vcmp.eq.f32.partialorder %v11062_v47, %v11124_v44  ;;  %vm237_vm14 = vcmp.eq.f32.partialorder %v11080_v1, %v11124_v44 }
 0x16a   :  { %9353 = vmatprep.subr.msk.bf16.mxu0 %vm10938_vm2, %v11106_v49  ;;  %v154_v3 = vpop.permute.xlu0 %153  ;;  %vm11126_vm4 = vcmp.eq.s32.totalorder %v254_v40, 1 }
 0x16b   :  { %vm233_vm5 = vcmp.eq.f32.partialorder %v154_v3, %v11124_v44  ;;  %vm11140_vm8 = vmand %vm232_vm6, %vm11126_vm4  ;;  %vm239_vm6 = vcmp.eq.f32.partialorder %v11088_v5, %v11124_v44  ;;  %v13551_v5 = vmov 0 }
 0x16c   :  { %vm11134_vm7 = vmand %vm233_vm5, %vm11126_vm4  ;;  %v13534_v55 = vsel %vm11140_vm8, 4294967295, %v13533_v55 }
 0x16d   :  { %v13531_v10 = vsel %vm11134_vm7, 4294967295, %v13530_v10  ;;  %13535 = vst [vmem:[#allocation32_spill] sm:$0xff] %v13534_v55  ;;  %vm11168_vm10 = vmand %vm235_vm9, %vm11126_vm4 }
 0x16e   :  { %13532 = vst [vmem:[#allocation31_spill] sm:$0xff] %v13531_v10  ;;  %v169_v21 = vpop.permute.xlu0 %168  ;;  %v13536_v10 = vmov 0  ;;  %vm11181_vm13 = vmand %vm234_vm11, %vm11126_vm4 }
 0x16f   :  { %v13537_v10 = vsel %vm11168_vm10, 4294967295, %v13536_v10  ;;  %vm236_vm12 = vcmp.eq.f32.partialorder %v169_v21, %v11124_v44  ;;  %v13542_v21 = vmov 0  ;;  %vm11206_vm5 = vmand %vm237_vm14, %vm11126_vm4  ;;  %vm241_vm14 = vcmp.eq.f32.partialorder %v11096_v12, %v11124_v44 }
 0x170   :  { %13538 = vst [vmem:[#allocation33_spill] sm:$0xff] %v13537_v10  ;;  %vm11190_vm15 = vmand %vm236_vm12, %vm11126_vm4 }
 0x171   :  { %v13543_v21 = vsel %vm11190_vm15, 4294967295, %v13542_v21  ;;  %vm11231_vm12 = vmand %vm239_vm6, %vm11126_vm4 }
 0x172   :  { %v179_v15 = vpop.permute.xlu0 %178  ;;  %13544 = vst [vmem:[#allocation35_spill] sm:$0xff] %v13543_v21  ;;  %v13552_v5 = vsel %vm11231_vm12, 4294967295, %v13551_v5  ;;  %vm11256_vm6 = vmand %vm241_vm14, %vm11126_vm4  ;;  %vm245_vm14 = vcmp.eq.f32.partialorder %v11102_v30, %v11124_v44 }
 0x173   :  { %vm238_vm3 = vcmp.eq.f32.partialorder %v179_v15, %v11124_v44  ;;  %v13548_v15 = vmov 0  ;;  %13553 = vst [vmem:[#allocation38_spill] sm:$0xff] %v13552_v5 }
 0x174   :  { %vm11215_vm9 = vmand %vm238_vm3, %vm11126_vm4 }
 0x175   :  { %v13549_v15 = vsel %vm11215_vm9, 4294967295, %v13548_v15 }
 0x176   :  { %v189_v18 = vpop.permute.xlu0 %188  ;;  %13550 = vst [vmem:[#allocation37_spill] sm:$0xff] %v13549_v15  ;;  %v13557_v15 = vmov 0 }
 0x177   :  { %vm240_vm11 = vcmp.eq.f32.partialorder %v189_v18, %v11124_v44  ;;  %v13558_v15 = vsel %vm11256_vm6, 4294967295, %v13557_v15 }
 0x178   :  { %vm11240_vm3 = vmand %vm240_vm11, %vm11126_vm4  ;;  %13559 = vst [vmem:[#allocation40_spill] sm:$0xff] %v13558_v15  ;;  %vm243_vm11 = vcmp.eq.f32.partialorder %v11100_v16, %v11124_v44 }
 0x17a   :  { %v199_v47 = vpop.permute.xlu0 %198 }
 0x17b   :  { %vm242_vm0 = vcmp.eq.f32.partialorder %v199_v47, %v11124_v44 }
 0x17c   :  { %vm11265_vm1 = vmand %vm242_vm0, %vm11126_vm4 }
 0x17d   :  { %vm11281_vm0 = vmand %vm243_vm11, %vm11126_vm4  ;;  %vm247_vm11 = vcmp.eq.f32.partialorder %v11104_v37, %v11124_v44  ;;  %v13575_v37 = vmov 0 }
 0x17e   :  { %v209_v18 = vpop.permute.xlu0 %208 }
 0x206   :  { %v8387_v61 = vpop.f32.mrb[16].mxu1 }
 0x207   :  { %v1015_v58 = vmul.f32 0.35355338, %v8387_v61  ;;  %v935_v40 = vpop.f32.mrb[17].mxu1 }
 0x208   :  { %v1014_v4 = vmul.f32 0.35355338, %v935_v40 }
 0x209   :  { %v11146_v3 = vsel %vm11134_vm7, %v1015_v58, -1e+09 }
 0x20a   :  { %1048 = vmax.xlane.f32.xlu1 %v11146_v3  ;;  %v11151_v38 = vsel %vm11140_vm8, %v1014_v4, -1e+09  ;;  %v8390_v7 = vpop.f32.mrb[18].mxu1 }
 0x20b   :  { %1046 = vmax.xlane.f32.xlu0 %v11151_v38  ;;  %v945_v60 = vpop.f32.mrb[19].mxu1  ;;  %v1017_v55 = vmul.f32 0.35355338, %v8390_v7  ;;  %v13539_v7 = vmov 0 }
 0x20c   :  { %v1016_v51 = vmul.f32 0.35355338, %v945_v60  ;;  %v13540_v7 = vsel %vm11181_vm13, 4294967295, %v13539_v7 }
 0x20d   :  { %v11177_v42 = vsel %vm11168_vm10, %v1017_v55, -1e+09  ;;  %13541 = vst [vmem:[#allocation34_spill] sm:$0xff] %v13540_v7  ;;  %v13545_v55 = vmov 0 }
 0x20e   :  { %v8393_v46 = vpop.f32.mrb[20].mxu1  ;;  %v11202_v1 = vsel %vm11181_vm13, %v1016_v51, -1e+09  ;;  %v13546_v55 = vsel %vm11206_vm5, 4294967295, %v13545_v55 }
 0x20f   :  { %v955_v53 = vpop.f32.mrb[21].mxu1  ;;  %v1019_v0 = vmul.f32 0.35355338, %v8393_v46  ;;  %13547 = vst [vmem:[#allocation36_spill] sm:$0xff] %v13546_v55 }
 0x210   :  { %v1018_v8 = vmul.f32 0.35355338, %v955_v53 }
 0x212   :  { %v8396_v36 = vpop.f32.mrb[22].mxu1  ;;  %v11197_v60 = vsel %vm11190_vm15, %v1018_v8, -1e+09 }
 0x213   :  { %v965_v61 = vpop.f32.mrb[23].mxu1  ;;  %v1021_v8 = vmul.f32 0.35355338, %v8396_v36  ;;  %v13554_v36 = vmov 0 }
 0x214   :  { %v1020_v53 = vmul.f32 0.35355338, %v965_v61  ;;  %v11227_v61 = vsel %vm11206_vm5, %v1019_v0, -1e+09  ;;  %v13555_v36 = vsel %vm11240_vm3, 4294967295, %v13554_v36 }
 0x215   :  { %13556 = vst [vmem:[#allocation39_spill] sm:$0xff] %v13555_v36  ;;  %v11252_v12 = vsel %vm11231_vm12, %v1021_v8, -1e+09  ;;  %v13563_v36 = vmov 0 }
 0x216   :  { %v8399_v45 = vpop.f32.mrb[24].mxu1  ;;  %v11222_v51 = vsel %vm11215_vm9, %v1020_v53, -1e+09  ;;  %v13564_v36 = vsel %vm11281_vm0, 4294967295, %v13563_v36 }
 0x217   :  { %v975_v40 = vpop.f32.mrb[25].mxu1  ;;  %v1023_v0 = vmul.f32 0.35355338, %v8399_v45  ;;  %v13560_v45 = vmov 0  ;;  %13565 = vst [vmem:[#allocation42_spill] sm:$0xff] %v13564_v36 }
 0x218   :  { %v1022_v46 = vmul.f32 0.35355338, %v975_v40  ;;  %v13561_v45 = vsel %vm11265_vm1, 4294967295, %v13560_v45 }
 0x219   :  { %13562 = vst [vmem:[#allocation41_spill] sm:$0xff] %v13561_v45  ;;  %v11277_v16 = vsel %vm11256_vm6, %v1023_v0, -1e+09  ;;  %v13569_v0 = vmov 0 }
 0x21a   :  { %v8402_v25 = vpop.f32.mrb[26].mxu1  ;;  %v11247_v53 = vsel %vm11240_vm3, %v1022_v46, -1e+09  ;;  %vm244_vm3 = vcmp.eq.f32.partialorder %v209_v18, %v11124_v44  ;;  %v219_v46 = vpop.permute.xlu0 %218 }
 0x21b   :  { %9888 = vrot.lane.b32.xlu1 %v10960_v32, %s10501_s29  ;;  %v985_v58 = vpop.f32.mrb[27].mxu1  ;;  %v1025_v8 = vmul.f32 0.35355338, %v8402_v25  ;;  %v13566_v25 = vmov 0  ;;  %vm246_vm6 = vcmp.eq.f32.partialorder %v219_v46, %v11124_v44 }
 0x21c   :  { %v1024_v40 = vmul.f32 0.35355338, %v985_v58 }
 0x21d   :  { %v11303_v30 = vsel %vm11281_vm0, %v1025_v8, -1e+09 }
 0x21e   :  { %v11156_v34 = vpop.f32.mrb[28].mxu1  ;;  %v11272_v47 = vsel %vm11265_vm1, %v1024_v40, -1e+09  ;;  %vm11290_vm1 = vmand %vm244_vm3, %vm11126_vm4 }
 0x21f   :  { %9893 = vrot.lane.b32.xlu1 %v10975_v41, %s10501_s29  ;;  %v995_v4 = vpop.f32.mrb[29].mxu1  ;;  %v13567_v25 = vsel %vm11290_vm1, 4294967295, %v13566_v25  ;;  %v1027_v40 = vmul.f32 0.35355338, %v11156_v34  ;;  %vm11307_vm3 = vmand %vm245_vm14, %vm11126_vm4 }
 0x220   :  { %v1026_v58 = vmul.f32 0.35355338, %v995_v4  ;;  %13568 = vst [vmem:[#allocation43_spill] sm:$0xff] %v13567_v25  ;;  %v13570_v0 = vsel %vm11307_vm3, 4294967295, %v13569_v0  ;;  %vm11332_vm14 = vmand %vm247_vm11, %vm11126_vm4 }
 0x221   :  { %9883 = vrot.lane.b32.xlu0 %v10956_v29, %s10501_s29  ;;  %13571 = vst [vmem:[#allocation44_spill] sm:$0xff] %v13570_v0  ;;  %v11328_v46 = vsel %vm11307_vm3, %v1027_v40, -1e+09  ;;  %v13576_v37 = vsel %vm11332_vm14, 4294967295, %v13575_v37 }
 0x222   :  { %v11162_v14 = vpop.f32.mrb[30].mxu1  ;;  %v11297_v18 = vsel %vm11290_vm1, %v1026_v58, -1e+09  ;;  %vm11316_vm1 = vmand %vm246_vm6, %vm11126_vm4  ;;  %13577 = vst [vmem:[#allocation46_spill] sm:$0xff] %v13576_v37  ;;  %vm13582_vm4 = vcmask 64512  }
 0x223   :  { %v1005_v9 = vpop.f32.mrb[31].mxu1  ;;  %v1029_v58 = vmul.f32 0.35355338, %v11162_v14  ;;  %vm13583_vm6 = vmmov %vm13582_vm4 }
 0x224   :  { %v1028_v4 = vmul.f32 0.35355338, %v1005_v9  ;;  %v13572_v9 = vmov 0  ;;  %vm13584_vm11 = vmmov %vm13582_vm4 }
 0x225   :  { %v13573_v9 = vsel %vm11316_vm1, 4294967295, %v13572_v9  ;;  %v11339_v44 = vsel %vm11332_vm14, %v1029_v58, -1e+09 }
 0x226   :  { %13574 = vst [vmem:[#allocation45_spill] sm:$0xff] %v13573_v9  ;;  %v11322_v34 = vsel %vm11316_vm1, %v1028_v4, -1e+09  ;;  %vm13585_vm1 = vmmov %vm13582_vm4 }
 0x227   :  { %vm13586_vm14 = vmmov %vm13585_vm1 }
 0x228   :  { %vm13587_vm3 = vmmov %vm13585_vm1 }
 0x240   :  { %1052 = vmax.xlane.f32.xlu0 %v11177_v42 }
 0x243   :  { %1054 = vmax.xlane.f32.xlu1 %v11197_v60 }
 0x244   :  { %1050 = vmax.xlane.f32.xlu0 %v11202_v1 }
 0x247   :  { %1058 = vmax.xlane.f32.xlu1 %v11222_v51 }
 0x248   :  { %1056 = vmax.xlane.f32.xlu0 %v11227_v61 }
 0x24b   :  { %1062 = vmax.xlane.f32.xlu1 %v11247_v53 }
 0x24c   :  { %1060 = vmax.xlane.f32.xlu0 %v11252_v12 }
 0x24f   :  { %1066 = vmax.xlane.f32.xlu1 %v11272_v47 }
 0x250   :  { %1064 = vmax.xlane.f32.xlu0 %v11277_v16 }
 0x253   :  { %1070 = vmax.xlane.f32.xlu1 %v11297_v18 }
 0x254   :  { %1068 = vmax.xlane.f32.xlu0 %v11303_v30 }
 0x257   :  { %1074 = vmax.xlane.f32.xlu1 %v11322_v34 }
 0x258   :  { %1072 = vmax.xlane.f32.xlu0 %v11328_v46 }
 0x25c   :  { %1076 = vmax.xlane.f32.xlu0 %v11339_v44 }
 0x268   :  { %9903 = vrot.lane.b32.xlu1 %v10997_v59, %s10501_s29 }
 0x26c   :  { %9908 = vrot.lane.b32.xlu1 %v11006_v6, %s10501_s29 }
 0x297   :  { %v1049_v14 = vpop.xlane.xlu1 %1048 }
 0x298   :  { %v1079_v54 = vsub.f32 %v11146_v3, %v1049_v14  ;;  %v1047_v8 = vpop.xlane.xlu0 %1046 }
 0x299   :  { %v1078_v4 = vsub.f32 %v11151_v38, %v1047_v8 }
 0x29a   :  { %v1096_v40 = vmul.f32 1.442695, %v1079_v54 }
 0x29b   :  { %v1094_v9 = vmul.f32 1.442695, %v1078_v4  ;;  %v11358_v3 = vpop.permute.xlu1 %9888 }
 0x29c   :  { %10124 = vpow2.f32 %v1096_v40  ;;  %v11360_v38 = vpop.permute.xlu0 %9883 }
 0x29d   :  { %10126 = vpow2.f32 %v1094_v9 }
 0x29f   :  { %v11362_v14 = vpop.permute.xlu1 %9893 }
 0x2a6   :  { %v11348_v58 = vpop.eup %10124 }
 0x2a7   :  { %v11350_v37 = vpop.eup %10126  ;;  %1128 = vadd.xlane.f32.xlu0 %v11348_v58 }
 0x2a8   :  { %1126 = vadd.xlane.f32.xlu1 %v11350_v37 }
 0x2b9   :  { %9913 = vrot.lane.b32.xlu1 %v11016_v17, %s10501_s29 }
 0x2bd   :  { %9898 = vrot.lane.b32.xlu0 %v10984_v50, %s10501_s29 }
 0x2cd   :  { %v1053_v9 = vpop.xlane.xlu0 %1052 }
 0x2ce   :  { %v1081_v54 = vsub.f32 %v11177_v42, %v1053_v9 }
 0x2d0   :  { %v1100_v8 = vmul.f32 1.442695, %v1081_v54  ;;  %v1055_v4 = vpop.xlane.xlu1 %1054 }
 0x2d1   :  { %v1082_v40 = vsub.f32 %v11197_v60, %v1055_v4  ;;  %v1051_v25 = vpop.xlane.xlu0 %1050 }
 0x2d2   :  { %10128 = vpow2.f32 %v1100_v8  ;;  %v1080_v0 = vsub.f32 %v11202_v1, %v1051_v25 }
 0x2d3   :  { %v1102_v36 = vmul.f32 1.442695, %v1082_v40 }
 0x2d4   :  { %v1098_v45 = vmul.f32 1.442695, %v1080_v0  ;;  %v1059_v5 = vpop.xlane.xlu1 %1058 }
 0x2d5   :  { %v1057_v15 = vpop.xlane.xlu0 %1056  ;;  %v1084_v42 = vsub.f32 %v11222_v51, %v1059_v5 }
 0x2d6   :  { %10130 = vpow2.f32 %v1098_v45  ;;  %v1083_v21 = vsub.f32 %v11227_v61, %v1057_v15 }
 0x2d7   :  { %10132 = vpow2.f32 %v1102_v36  ;;  %v1106_v25 = vmul.f32 1.442695, %v1084_v42 }
 0x2d8   :  { %v1104_v55 = vmul.f32 1.442695, %v1083_v21  ;;  %v1063_v54 = vpop.xlane.xlu1 %1062 }
 0x2d9   :  { %v1061_v7 = vpop.xlane.xlu0 %1060 }
 0x2da   :  { %10134 = vpow2.f32 %v1104_v55  ;;  %v1085_v9 = vsub.f32 %v11252_v12, %v1061_v7  ;;  %v1086_v7 = vsub.f32 %v11247_v53, %v1063_v54 }
 0x2dc   :  { %v11370_v60 = vpop.eup %10128  ;;  %v1108_v8 = vmul.f32 1.442695, %v1085_v9  ;;  %v1067_v55 = vpop.xlane.xlu1 %1066  ;;  %v1110_v4 = vmul.f32 1.442695, %v1086_v7 }
 0x2dd   :  { %v1065_v1 = vpop.xlane.xlu0 %1064  ;;  %1132 = vadd.xlane.f32.xlu0 %v11370_v60  ;;  %v1088_v0 = vsub.f32 %v11272_v47, %v1067_v55 }
 0x2de   :  { %10136 = vpow2.f32 %v1108_v8  ;;  %v1087_v45 = vsub.f32 %v11277_v16, %v1065_v1 }
 0x2df   :  { %10138 = vpow2.f32 %v1106_v25  ;;  %v1114_v53 = vmul.f32 1.442695, %v1088_v0 }
 0x2e0   :  { %v11374_v15 = vpop.eup %10130  ;;  %v1112_v21 = vmul.f32 1.442695, %v1087_v45  ;;  %v1071_v42 = vpop.xlane.xlu1 %1070 }
 0x2e1   :  { %v1069_v61 = vpop.xlane.xlu0 %1068  ;;  %1130 = vadd.xlane.f32.xlu1 %v11374_v15  ;;  %v11379_v5 = vpop.eup %10132  ;;  %v1090_v1 = vsub.f32 %v11297_v18, %v1071_v42 }
 0x2e2   :  { %v1089_v51 = vsub.f32 %v11303_v30, %v1069_v61  ;;  %10140 = vpow2.f32 %v1112_v21 }
 0x2e4   :  { %v11381_v36 = vpop.eup %10134  ;;  %v1116_v12 = vmul.f32 1.442695, %v1089_v51  ;;  %v1075_v21 = vpop.xlane.xlu1 %1074 }
 0x2e5   :  { %v1073_v16 = vpop.xlane.xlu0 %1072  ;;  %1136 = vadd.xlane.f32.xlu0 %v11381_v36  ;;  %1134 = vadd.xlane.f32.xlu1 %v11379_v5 }
 0x2e6   :  { %10142 = vpow2.f32 %v1116_v12  ;;  %v1091_v9 = vsub.f32 %v11328_v46, %v1073_v16  ;;  %v1118_v46 = vmul.f32 1.442695, %v1090_v1 }
 0x2e7   :  { %10144 = vpow2.f32 %v1110_v4 }
 0x2e8   :  { %v11386_v40 = vpop.eup %10136  ;;  %10146 = vpow2.f32 %v1114_v53  ;;  %v1120_v25 = vmul.f32 1.442695, %v1091_v9  ;;  %v11446_v16 = vpop.permute.xlu1 %9903 }
 0x2e9   :  { %1140 = vadd.xlane.f32.xlu0 %v11386_v40  ;;  %v1077_v30 = vpop.xlane.xlu0 %1076  ;;  %v11391_v54 = vpop.eup %10138 }
 0x2ea   :  { %v1093_v47 = vsub.f32 %v11339_v44, %v1077_v30  ;;  %v1092_v44 = vsub.f32 %v11322_v34, %v1075_v21 }
 0x2ec   :  { %v1124_v8 = vmul.f32 1.442695, %v1093_v47  ;;  %v11395_v45 = vpop.eup %10140  ;;  %v1122_v18 = vmul.f32 1.442695, %v1092_v44  ;;  %v11454_v4 = vpop.permute.xlu1 %9908  ;;  %v9886_v47 = vunpack.i.h.bf16 %v11360_v38 }
 0x2ed   :  { %1138 = vadd.xlane.f32.xlu0 %v11391_v54 }
 0x2ee   :  { %10148 = vpow2.f32 %v1124_v8  ;;  %v9885_v8 = vunpack.i.l.bf16 %v11360_v38  ;;  %v9895_v38 = vunpack.i.l.bf16 %v11362_v14 }
 0x2ef   :  { %10150 = vpow2.f32 %v1120_v25 }
 0x2f0   :  { %v11397_v61 = vpop.eup %10142  ;;  %10152 = vpow2.f32 %v1118_v46  ;;  %v9357_v21 = vpack.c.bf16 %v9886_v47, %v9885_v8 }
 0x2f1   :  { %1144 = vadd.xlane.f32.xlu0 %v11395_v45  ;;  %1148 = vadd.xlane.f32.xlu1 %v11397_v61  ;;  %v11402_v7 = vpop.eup %10144  ;;  %10154 = vpow2.f32 %v1122_v18 }
 0x2f2   :  { %v11405_v55 = vpop.eup %10146 }
 0x2f5   :  { %1142 = vadd.xlane.f32.xlu0 %v11402_v7 }
 0x2f8   :  { %v11407_v51 = vpop.eup %10148 }
 0x2f9   :  { %1146 = vadd.xlane.f32.xlu0 %v11405_v55  ;;  %1156 = vadd.xlane.f32.xlu1 %v11407_v51  ;;  %v11411_v12 = vpop.eup %10150 }
 0x2fa   :  { %v11414_v34 = vpop.eup %10152 }
 0x2fb   :  { %v11417_v0 = vpop.eup %10154 }
 0x2fd   :  { %1152 = vadd.xlane.f32.xlu0 %v11411_v12 }
 0x301   :  { %1150 = vadd.xlane.f32.xlu0 %v11414_v34 }
 0x305   :  { %1154 = vadd.xlane.f32.xlu0 %v11417_v0 }
 0x30a   :  { %1337 = vrot.lane.b32.xlu1 %v10962_v35, %s10501_s29 }
 0x30e   :  { %1339 = vrot.lane.b32.xlu1 %v10982_v48, %s10501_s29 }
 0x312   :  { %1341 = vrot.lane.b32.xlu1 %v10977_v43, %s10501_s29 }
 0x316   :  { %1343 = vrot.lane.b32.xlu1 %v10991_v57, %s10501_s29 }
 0x31a   :  { %1345 = vrot.lane.b32.xlu1 %v10986_v52, %s10501_s29 }
 0x31b   :  { %1335 = vrot.lane.b32.xlu0 %v10967_v39, %s10501_s29 }
 0x31e   :  { %1349 = vrot.lane.b32.xlu1 %v10999_v63, %s10501_s29 }
 0x31f   :  { %1347 = vrot.lane.b32.xlu0 %v11004_v2, %s10501_s29 }
 0x322   :  { %1353 = vrot.lane.b32.xlu1 %v11008_v11, %s10501_s29 }
 0x323   :  { %1351 = vrot.lane.b32.xlu0 %v11010_v13, %s10501_s29 }
 0x326   :  { %1357 = vrot.lane.b32.xlu1 %v11018_v22, %s10501_s29 }
 0x327   :  { %1355 = vrot.lane.b32.xlu0 %v11020_v23, %s10501_s29 }
 0x32a   :  { %1361 = vrot.lane.b32.xlu1 %v11022_v24, %s10501_s29 }
 0x32b   :  { %1359 = vrot.lane.b32.xlu0 %v11024_v26, %s10501_s29 }
 0x32e   :  { %1365 = vrot.lane.b32.xlu1 %v11030_v27, %s10501_s29 }
 0x32f   :  { %1363 = vrot.lane.b32.xlu0 %v11032_v28, %s10501_s29 }
 0x332   :  { %9923 = vrot.lane.b32.xlu1 %v10956_v29, %s10502_s7 }
 0x333   :  { %9918 = vrot.lane.b32.xlu0 %v10942_v20, %s10502_s7 }
 0x334   :  { %v1129_v53 = vpop.xlane.xlu0 %1128 }
 0x335   :  { %10156 = vrcp.f32 %v1129_v53  ;;  %v1127_v42 = vpop.xlane.xlu1 %1126 }
 0x336   :  { %10158 = vrcp.f32 %v1127_v42  ;;  %9933 = vrot.lane.b32.xlu1 %v10975_v41, %s10502_s7  ;;  %v9906_v42 = vunpack.i.h.bf16 %v11446_v16 }
 0x337   :  { %9928 = vrot.lane.b32.xlu0 %v10960_v32, %s10502_s7 }
 0x338   :  { %v9899_v44 = vpop.permute.xlu0 %9898 }
 0x339   :  { %v9900_v18 = vunpack.i.l.bf16 %v9899_v44  ;;  %v9914_v47 = vpop.permute.xlu1 %9913 }
 0x33a   :  { %9943 = vrot.lane.b32.xlu1 %v10997_v59, %s10502_s7 }
 0x33b   :  { %9938 = vrot.lane.b32.xlu0 %v10984_v50, %s10502_s7 }
 0x33e   :  { %9953 = vrot.lane.b32.xlu1 %v11016_v17, %s10502_s7 }
 0x33f   :  { %v10157_v30 = vpop.eup %10156  ;;  %9948 = vrot.lane.b32.xlu0 %v11006_v6, %s10502_s7 }
 0x340   :  { %v10159_v9 = vpop.eup %10158  ;;  %v1175_v25 = vmul.f32 %v10157_v30, %v11348_v58  ;;  %v9890_v58 = vunpack.i.l.bf16 %v11358_v3  ;;  %v9905_v30 = vunpack.i.l.bf16 %v11446_v16  ;;  %v9911_v16 = vunpack.i.h.bf16 %v11454_v4 }
 0x341   :  { %v1174_v1 = vmul.f32 %v10159_v9, %v11350_v37  ;;  %v9891_v37 = vunpack.i.h.bf16 %v11358_v3  ;;  %v9896_v3 = vunpack.i.h.bf16 %v11362_v14  ;;  %v9901_v14 = vunpack.i.h.bf16 %v9899_v44  ;;  %v13580_v44 = vld [vmem:[#allocation25_spill] sm:$0xff] }
 0x342   :  { %2381 = vrot.lane.b32.xlu1 %v10962_v35, %s10502_s7  ;;  %v9381_v9 = vpack.c.bf16 %v9906_v42, %v9905_v30  ;;  %v13581_v30 = vld [vmem:[#allocation27_spill] sm:$0xff] }
 0x343   :  { %2379 = vrot.lane.b32.xlu0 %v10967_v39, %s10502_s7  ;;  %8441 = vmatprep.mubr.f32.mxu0 %v1174_v1  ;;  %v9369_v46 = vpack.c.bf16 %v9896_v3, %v9895_v38  ;;  %v9375_v53 = vpack.c.bf16 %v9901_v14, %v9900_v18 }
 0x344   :  { %8442 = vmatmul.mubr.f32.vlgmr.msra.gmra.mrb[32].mxu0 %v1175_v25 }
 0x345   :  { %9356 = vmatpush3.bf16.xpose.msk.msra.mxu0 %vm10938_vm2, %v11106_v49  ;;  %v9363_v49 = vpack.c.bf16 %v9891_v37, %v9890_v58  ;;  %v13578_v37 = vld [vmem:[#allocation22_spill] sm:$0xff] }
 0x346   :  { %9359 = vmatprep.subr.msk.bf16.mxu0 %vm10938_vm2, %v9357_v21  ;;  %2383 = vrot.lane.b32.xlu1 %v10982_v48, %s10502_s7 }
 0x347   :  { %2385 = vrot.lane.b32.xlu0 %v10977_v43, %s10502_s7 }
 0x34a   :  { %2387 = vrot.lane.b32.xlu1 %v10991_v57, %s10502_s7 }
 0x34b   :  { %2391 = vrot.lane.b32.xlu0 %v11004_v2, %s10502_s7 }
 0x34d   :  { %9362 = vmatpush3.bf16.xpose.msk.msra.mxu0 %vm10938_vm2, %v9357_v21 }
 0x34e   :  { %9365 = vmatprep.subr.msk.bf16.mxu0 %vm10938_vm2, %v9363_v49  ;;  %2389 = vrot.lane.b32.xlu1 %v10986_v52, %s10502_s7 }
 0x34f   :  { %2393 = vrot.lane.b32.xlu0 %v10999_v63, %s10502_s7 }
 0x352   :  { %2409 = vrot.lane.b32.xlu1 %v11030_v27, %s10502_s7 }
 0x353   :  { %2395 = vrot.lane.b32.xlu0 %v11010_v13, %s10502_s7 }
 0x355   :  { %9368 = vmatpush3.bf16.xpose.msk.msra.mxu0 %vm10938_vm2, %v9363_v49  ;;  %v13579_v49 = vld [vmem:[#allocation23_spill] sm:$0xff] }
 0x356   :  { %9371 = vmatprep.subr.msk.bf16.mxu0 %vm10938_vm2, %v9369_v46  ;;  %9973 = vrot.lane.b32.xlu1 %v11048_v62, %s10501_s29 }
 0x357   :  { %2397 = vrot.lane.b32.xlu0 %v11008_v11, %s10502_s7 }
 0x35a   :  { %9983 = vrot.lane.b32.xlu1 %v11054_v31, %s10501_s29 }
 0x35b   :  { %2399 = vrot.lane.b32.xlu0 %v11020_v23, %s10502_s7 }
 0x35d   :  { %9374 = vmatpush3.bf16.xpose.msk.msra.mxu0 %vm10938_vm2, %v9369_v46 }
 0x35e   :  { %9377 = vmatprep.subr.msk.bf16.mxu0 %vm10938_vm2, %v9375_v53  ;;  %9993 = vrot.lane.b32.xlu1 %v11068_v56, %s10501_s29 }
 0x35f   :  { %2401 = vrot.lane.b32.xlu0 %v11018_v22, %s10502_s7 }
 0x362   :  { %10003 = vrot.lane.b32.xlu1 %v10956_v29, %s10503_s28  ;;  %v9910_v29 = vunpack.i.l.bf16 %v11454_v4  ;;  %v9915_v4 = vunpack.i.l.bf16 %v9914_v47 }
 0x363   :  { %2403 = vrot.lane.b32.xlu0 %v11024_v26, %s10502_s7 }
 0x364   :  { %v9387_v1 = vpack.c.bf16 %v9911_v16, %v9910_v29 }
 0x365   :  { %9380 = vmatpush3.bf16.xpose.msk.msra.mxu0 %vm10938_vm2, %v9375_v53 }
 0x366   :  { %9383 = vmatprep.subr.msk.bf16.mxu0 %vm10938_vm2, %v9381_v9  ;;  %10023 = vrot.lane.b32.xlu1 %v10997_v59, %s10503_s28 }
 0x367   :  { %2405 = vrot.lane.b32.xlu0 %v11022_v24, %s10502_s7 }
 0x36a   :  { %10033 = vrot.lane.b32.xlu1 %v11016_v17, %s10503_s28  ;;  %v1133_v8 = vpop.xlane.xlu0 %1132  ;;  %v9916_v17 = vunpack.i.h.bf16 %v9914_v47 }
 0x36b   :  { %2407 = vrot.lane.b32.xlu0 %v11032_v28, %s10502_s7  ;;  %10160 = vrcp.f32 %v1133_v8 }
 0x36c   :  { %v9393_v58 = vpack.c.bf16 %v9916_v17, %v9915_v4 }
 0x36d   :  { %9386 = vmatpush3.bf16.xpose.msk.msra.mxu0 %vm10938_vm2, %v9381_v9 }
 0x36e   :  { %9389 = vmatprep.subr.msk.bf16.mxu0 %vm10938_vm2, %v9387_v1  ;;  %v1131_v59 = vpop.xlane.xlu1 %1130  ;;  %3232 = vrot.lane.b32.xlu1 %v10962_v35, %s10503_s28 }
 0x36f   :  { %10162 = vrcp.f32 %v1131_v59  ;;  %9958 = vrot.lane.b32.xlu0 %v11036_v33, %s10501_s29 }
 0x372   :  { %v1137_v25 = vpop.xlane.xlu0 %1136  ;;  %v1135_v21 = vpop.xlane.xlu1 %1134  ;;  %3236 = vrot.lane.b32.xlu1 %v10977_v43, %s10503_s28 }
 0x373   :  { %10164 = vrcp.f32 %v1137_v25  ;;  %9963 = vrot.lane.b32.xlu0 %v13578_v37, %s10501_s29 }
 0x374   :  { %10166 = vrcp.f32 %v1135_v21 }
 0x375   :  { %9392 = vmatpush3.bf16.xpose.msk.msra.mxu0 %vm10938_vm2, %v9387_v1  ;;  %v10161_v43 = vpop.eup %10160 }
 0x376   :  { %9395 = vmatprep.subr.msk.bf16.mxu0 %vm10938_vm2, %v9393_v58  ;;  %v1141_v35 = vpop.xlane.xlu0 %1140  ;;  %3240 = vrot.lane.b32.xlu1 %v10986_v52, %s10503_s28  ;;  %v1177_v14 = vmul.f32 %v10161_v43, %v11370_v60 }
 0x377   :  { %9968 = vrot.lane.b32.xlu0 %v13579_v49, %s10501_s29  ;;  %10168 = vrcp.f32 %v1141_v35 }
 0x379   :  { %v10163_v3 = vpop.eup %10162 }
 0x37a   :  { %v1139_v38 = vpop.xlane.xlu0 %1138  ;;  %v1176_v46 = vmul.f32 %v10163_v3, %v11374_v15 }
 0x37b   :  { %10170 = vrcp.f32 %v1139_v38  ;;  %9978 = vrot.lane.b32.xlu0 %v13580_v44, %s10501_s29 }
 0x37c   :  { %8444 = vmatprep.mubr.f32.mxu0 %v1176_v46 }
 0x37d   :  { %v10165_v18 = vpop.eup %10164  ;;  %9398 = vmatpush3.bf16.xpose.msk.msra.mxu0 %vm10938_vm2, %v9393_v58 }
 0x37e   :  { %v10167_v52 = vpop.eup %10166  ;;  %8445 = vmatmul.mubr.f32.gmra.mrb[34].mxu0 %v1177_v14  ;;  %v1145_v53 = vpop.xlane.xlu0 %1144  ;;  %v1179_v42 = vmul.f32 %v10165_v18, %v11381_v36 }
 0x37f   :  { %9988 = vrot.lane.b32.xlu0 %v13581_v30, %s10501_s29  ;;  %v1178_v15 = vmul.f32 %v10167_v52, %v11379_v5  ;;  %10172 = vrcp.f32 %v1145_v53  ;;  %v1149_v9 = vpop.xlane.xlu1 %1148 }
 0x381   :  { %8447 = vmatprep.mubr.f32.mxu0 %v1178_v15  ;;  %v10169_v60 = vpop.eup %10168 }
 0x382   :  { %8448 = vmatmul.mubr.f32.gmra.mrb[36].mxu0 %v1179_v42  ;;  %v1143_v16 = vpop.xlane.xlu0 %1142  ;;  %v1181_v5 = vmul.f32 %v10169_v60, %v11386_v40 }
 0x383   :  { %10174 = vrcp.f32 %v1143_v16  ;;  %9998 = vrot.lane.b32.xlu0 %v10942_v20, %s10503_s28 }
 0x384   :  { %10176 = vrcp.f32 %v1149_v9 }
 0x385   :  { %v10171_v29 = vpop.eup %10170 }
 0x386   :  { %v1147_v47 = vpop.xlane.xlu0 %1146  ;;  %v1157_v8 = vpop.xlane.xlu1 %1156  ;;  %v1180_v36 = vmul.f32 %v10171_v29, %v11391_v54 }
 0x387   :  { %10178 = vrcp.f32 %v1147_v47  ;;  %10008 = vrot.lane.b32.xlu0 %v10960_v32, %s10503_s28 }
 0x388   :  { %8450 = vmatprep.mubr.f32.mxu0 %v1180_v36 }
 0x389   :  { %8451 = vmatmul.mubr.f32.gmra.mrb[38].mxu0 %v1181_v5  ;;  %v10173_v20 = vpop.eup %10172 }
 0x38a   :  { %v1153_v1 = vpop.xlane.xlu0 %1152  ;;  %v1338_v59 = vpop.permute.xlu1 %1337  ;;  %v1183_v32 = vmul.f32 %v10173_v20, %v11395_v45 }
 0x38b   :  { %10013 = vrot.lane.b32.xlu0 %v10975_v41, %s10503_s28  ;;  %10180 = vrcp.f32 %v1153_v1 }
 0x38d   :  { %v10175_v17 = vpop.eup %10174 }
 0x38e   :  { %v1151_v4 = vpop.xlane.xlu0 %1150  ;;  %v1340_v25 = vpop.permute.xlu1 %1339  ;;  %v1182_v54 = vmul.f32 %v10175_v17, %v11402_v7 }
 0x38f   :  { %10182 = vrcp.f32 %v1151_v4  ;;  %10018 = vrot.lane.b32.xlu0 %v10984_v50, %s10503_s28  ;;  %v10177_v40 = vpop.eup %10176 }
 0x390   :  { %8453 = vmatprep.mubr.f32.mxu0 %v1182_v54  ;;  %10184 = vrcp.f32 %v1157_v8  ;;  %v1185_v7 = vmul.f32 %v10177_v40, %v11397_v61 }
 0x391   :  { %v10179_v21 = vpop.eup %10178  ;;  %8454 = vmatmul.mubr.f32.gmra.mrb[40].mxu0 %v1183_v32 }
 0x392   :  { %v1155_v58 = vpop.xlane.xlu0 %1154  ;;  %v1342_v41 = vpop.permute.xlu1 %1341  ;;  %v1184_v35 = vmul.f32 %v10179_v21, %v11405_v55 }
 0x393   :  { %10186 = vrcp.f32 %v1155_v58  ;;  %10028 = vrot.lane.b32.xlu0 %v11006_v6, %s10503_s28 }
 0x394   :  { %8456 = vmatprep.mubr.f32.mxu0 %v1184_v35 }
 0x395   :  { %8457 = vmatmul.mubr.f32.gmra.mrb[42].mxu0 %v1185_v7  ;;  %v10181_v45 = vpop.eup %10180 }
 0x396   :  { %v1336_v50 = vpop.permute.xlu0 %1335  ;;  %v1344_v43 = vpop.permute.xlu1 %1343  ;;  %v1187_v6 = vmul.f32 %v10181_v45, %v11411_v12 }
 0x397   :  { %3230 = vrot.lane.b32.xlu0 %v10967_v39, %s10503_s28 }
 0x399   :  { %v10183_v3 = vpop.eup %10182 }
 0x39a   :  { %v1348_v38 = vpop.permute.xlu0 %1347  ;;  %v1346_v46 = vpop.permute.xlu1 %1345  ;;  %v1186_v14 = vmul.f32 %v10183_v3, %v11414_v34 }
 0x39b   :  { %3234 = vrot.lane.b32.xlu0 %v10982_v48, %s10503_s28  ;;  %v10185_v55 = vpop.eup %10184 }
 0x39c   :  { %8459 = vmatprep.mubr.f32.mxu0 %v1186_v14  ;;  %v1189_v39 = vmul.f32 %v10185_v55, %v11407_v51 }
 0x39d   :  { %v10187_v61 = vpop.eup %10186  ;;  %8460 = vmatmul.mubr.f32.gmra.mrb[44].mxu0 %v1187_v6 }
 0x39e   :  { %v1352_v18 = vpop.permute.xlu0 %1351  ;;  %v1350_v52 = vpop.permute.xlu1 %1349  ;;  %v1188_v53 = vmul.f32 %v10187_v61, %v11417_v0 }
 0x39f   :  { %3238 = vrot.lane.b32.xlu0 %v10991_v57, %s10503_s28 }
 0x3a0   :  { %8462 = vmatprep.mubr.f32.mxu0 %v1188_v53 }
 0x3a1   :  { %8463 = vmatmul.mubr.f32.gmra.mrb[46].mxu0 %v1189_v39 }
 0x3a2   :  { %v1356_v34 = vpop.permute.xlu0 %1355  ;;  %v1354_v42 = vpop.permute.xlu1 %1353  ;;  %8497 = vmatprep.mubr.msk.f32.mxu0 %vm13582_vm4, %v1336_v50  ;;  %vm13588_vm4 = vmmov %vm13585_vm1 }
 0x3a3   :  { %3242 = vrot.lane.b32.xlu0 %v11004_v2, %s10503_s28 }
 0x3a5   :  { %8498 = vmatmul.mubr.msk.f32.vlgmr.msra.gmra.mrb[48].mxu0 %vm13583_vm6, %v1338_v59  ;;  %vm13589_vm6 = vmmov %vm13585_vm1 }
 0x3a6   :  { %v1360_v48 = vpop.permute.xlu0 %1359  ;;  %v1358_v12 = vpop.permute.xlu1 %1357  ;;  %8500 = vmatprep.mubr.msk.f32.mxu0 %vm13584_vm11, %v1340_v25  ;;  %vm13590_vm11 = vmmov %vm13585_vm1 }
 0x3a9   :  { %8501 = vmatmul.mubr.msk.f32.gmra.mrb[50].mxu0 %vm13585_vm1, %v1342_v41 }
 0x3aa   :  { %v1364_v57 = vpop.permute.xlu0 %1363  ;;  %v1362_v0 = vpop.permute.xlu1 %1361  ;;  %8503 = vmatprep.mubr.msk.f32.mxu0 %vm13586_vm14, %v1344_v43  ;;  %vm13592_vm14 = vmmov %vm13585_vm1 }
 0x3ad   :  { %8504 = vmatmul.mubr.msk.f32.gmra.mrb[52].mxu0 %vm13587_vm3, %v1346_v46  ;;  %vm13591_vm3 = vmmov %vm13585_vm1 }
 0x3ae   :  { %v9919_v51 = vpop.permute.xlu0 %9918  ;;  %v1366_v15 = vpop.permute.xlu1 %1365  ;;  %8506 = vmatprep.mubr.msk.f32.mxu0 %vm13588_vm4, %v1348_v38  ;;  %vm13593_vm4 = vmmov %vm13585_vm1 }
 0x3af   :  { %v9921_v9 = vunpack.i.h.bf16 %v9919_v51  ;;  %v9920_v2 = vunpack.i.l.bf16 %v9919_v51 }
 0x3b1   :  { %v9431_v16 = vpack.c.bf16 %v9921_v9, %v9920_v2  ;;  %8507 = vmatmul.mubr.msk.f32.gmra.mrb[54].mxu0 %vm13589_vm6, %v1350_v52  ;;  %vm13594_vm6 = vmmov %vm13585_vm1 }
 0x3b2   :  { %v9929_v60 = vpop.permute.xlu0 %9928  ;;  %v9924_v29 = vpop.permute.xlu1 %9923  ;;  %8509 = vmatprep.mubr.msk.f32.mxu0 %vm13590_vm11, %v1352_v18  ;;  %vm13595_vm11 = vmmov %vm13585_vm1 }
 0x3b3   :  { %v9926_v47 = vunpack.i.h.bf16 %v9924_v29  ;;  %v9925_v8 = vunpack.i.l.bf16 %v9924_v29  ;;  %9433 = vmatprep.subr.msk.bf16.mxu0 %vm10938_vm2, %v9431_v16  ;;  %v9931_v1 = vunpack.i.h.bf16 %v9929_v60  ;;  %v9930_v59 = vunpack.i.l.bf16 %v9929_v60 }
 0x3b4   :  { %9436 = vmatpush3.bf16.xpose.msk.msra.mxu0 %vm10938_vm2, %v9431_v16 }
 0x3b5   :  { %v9437_v36 = vpack.c.bf16 %v9926_v47, %v9925_v8  ;;  %8510 = vmatmul.mubr.msk.f32.gmra.mrb[56].mxu0 %vm13585_vm1, %v1354_v42  ;;  %v9443_v17 = vpack.c.bf16 %v9931_v1, %v9930_v59 }
 0x3b6   :  { %v9939_v5 = vpop.permute.xlu0 %9938  ;;  %8512 = vmatprep.mubr.msk.f32.mxu0 %vm13591_vm3, %v1356_v34  ;;  %v9934_v4 = vpop.permute.xlu1 %9933  ;;  %vm13596_vm3 = vmmov %vm13585_vm1 }
 0x3b7   :  { %9439 = vmatprep.subr.msk.bf16.mxu0 %vm10938_vm2, %v9437_v36  ;;  %v9936_v54 = vunpack.i.h.bf16 %v9934_v4  ;;  %v9935_v32 = vunpack.i.l.bf16 %v9934_v4  ;;  %v9941_v35 = vunpack.i.h.bf16 %v9939_v5  ;;  %v9940_v7 = vunpack.i.l.bf16 %v9939_v5 }
 0x3b9   :  { %8513 = vmatmul.mubr.msk.f32.gmra.mrb[58].mxu0 %vm13592_vm14, %v1358_v12  ;;  %v9449_v58 = vpack.c.bf16 %v9936_v54, %v9935_v32  ;;  %v9455_v45 = vpack.c.bf16 %v9941_v35, %v9940_v7  ;;  %vm13597_vm14 = vmmov %vm13585_vm1 }
 0x3ba   :  { %v9949_v20 = vpop.permute.xlu0 %9948  ;;  %8515 = vmatprep.mubr.msk.f32.mxu0 %vm13593_vm4, %v1360_v48  ;;  %v9944_v40 = vpop.permute.xlu1 %9943  ;;  %vm13598_vm4 = vmmov %vm13585_vm1 }
 0x3bb   :  { %v9946_v46 = vunpack.i.h.bf16 %v9944_v40  ;;  %v9945_v14 = vunpack.i.l.bf16 %v9944_v40  ;;  %v9951_v52 = vunpack.i.h.bf16 %v9949_v20  ;;  %v9950_v53 = vunpack.i.l.bf16 %v9949_v20 }
 0x3bc   :  { %9442 = vmatpush3.bf16.xpose.msk.msra.mxu0 %vm10938_vm2, %v9437_v36 }
 0x3bd   :  { %8516 = vmatmul.mubr.msk.f32.gmra.mrb[60].mxu0 %vm13594_vm6, %v1362_v0  ;;  %9445 = vmatprep.subr.msk.bf16.mxu0 %vm10938_vm2, %v9443_v17  ;;  %v9461_v55 = vpack.c.bf16 %v9946_v46, %v9945_v14  ;;  %v9467_v42 = vpack.c.bf16 %v9951_v52, %v9950_v53  ;;  %vm13599_vm6 = vmmov %vm13585_vm1 }
 0x3be   :  { %v2380_v25 = vpop.permute.xlu0 %2379  ;;  %8518 = vmatprep.mubr.msk.f32.mxu0 %vm13595_vm11, %v1364_v57  ;;  %v9954_v50 = vpop.permute.xlu1 %9953  ;;  %vm13600_vm11 = vmmov %vm13585_vm1 }
 0x3bf   :  { %v9956_v12 = vunpack.i.h.bf16 %v9954_v50  ;;  %v9955_v57 = vunpack.i.l.bf16 %v9954_v50 }
 0x3c1   :  { %8519 = vmatmul.mubr.msk.f32.gmra.mrb[62].mxu0 %vm13585_vm1, %v1366_v15  ;;  %v9473_v15 = vpack.c.bf16 %v9956_v12, %v9955_v57 }
 0x3c2   :  { %v11633_v21 = vpop.permute.xlu0 %2385  ;;  %8661 = vmatprep.mubr.msk.f32.mxu0 %vm13596_vm3, %v2380_v25  ;;  %v2382_v3 = vpop.permute.xlu1 %2381  ;;  %vm13601_vm3 = vmmov %vm13585_vm1 }
 0x3c4   :  { %9448 = vmatpush3.bf16.xpose.msk.msra.mxu0 %vm10938_vm2, %v9443_v17 }
 0x3c5   :  { %9451 = vmatprep.subr.msk.bf16.mxu0 %vm10938_vm2, %v9449_v58 }
 0x3c6   :  { %v11640_v41 = vpop.permute.xlu0 %2391  ;;  %v2384_v61 = vpop.permute.xlu1 %2383 }
 0x3ca   :  { %v11642_v43 = vpop.permute.xlu0 %2393  ;;  %v2388_v39 = vpop.permute.xlu1 %2387 }
 0x3cc   :  { %9454 = vmatpush3.bf16.xpose.msk.msra.mxu0 %vm10938_vm2, %v9449_v58 }
 0x3cd   :  { %9457 = vmatprep.subr.msk.bf16.mxu0 %vm10938_vm2, %v9455_v45 }
 0x3ce   :  { %v11648_v38 = vpop.permute.xlu0 %2395  ;;  %v2390_v0 = vpop.permute.xlu1 %2389 }
 0x3d2   :  { %v11650_v6 = vpop.permute.xlu0 %2397  ;;  %v11670_v9 = vpop.permute.xlu1 %2409 }
 0x3d4   :  { %9460 = vmatpush3.bf16.xpose.msk.msra.mxu0 %vm10938_vm2, %v9455_v45 }
 0x3d5   :  { %9463 = vmatprep.subr.msk.bf16.mxu0 %vm10938_vm2, %v9461_v55 }
 0x3d6   :  { %v11656_v18 = vpop.permute.xlu0 %2399  ;;  %v9974_v60 = vpop.permute.xlu1 %9973 }
 0x3d7   :  { %v9976_v4 = vunpack.i.h.bf16 %v9974_v60  ;;  %v9975_v25 = vunpack.i.l.bf16 %v9974_v60 }
 0x3d9   :  { %v9411_v45 = vpack.c.bf16 %v9976_v4, %v9975_v25 }
 0x3da   :  { %v11658_v34 = vpop.permute.xlu0 %2401  ;;  %v9984_v59 = vpop.permute.xlu1 %9983 }
 0x3db   :  { %v9986_v46 = vunpack.i.h.bf16 %v9984_v59  ;;  %v9985_v14 = vunpack.i.l.bf16 %v9984_v59 }
 0x3dc   :  { %9466 = vmatpush3.bf16.xpose.msk.msra.mxu0 %vm10938_vm2, %v9461_v55 }
 0x3dd   :  { %9469 = vmatprep.subr.msk.bf16.mxu0 %vm10938_vm2, %v9467_v42  ;;  %v9419_v53 = vpack.c.bf16 %v9986_v46, %v9985_v14 }
 0x3de   :  { %v11664_v48 = vpop.permute.xlu0 %2403  ;;  %v9994_v35 = vpop.permute.xlu1 %9993 }
 0x3df   :  { %v9995_v60 = vunpack.i.l.bf16 %v9994_v35 }
 0x3e2   :  { %v11666_v51 = vpop.permute.xlu0 %2405 }
 0x3e4   :  { %9472 = vmatpush3.bf16.xpose.msk.msra.mxu0 %vm10938_vm2, %v9467_v42 }
 0x3e5   :  { %9475 = vmatprep.subr.msk.bf16.mxu0 %vm10938_vm2, %v9473_v15 }
 0x3e6   :  { %v11674_v2 = vpop.permute.xlu0 %2407 }
 0x3ea   :  { %v9959_v16 = vpop.permute.xlu0 %9958 }
 0x3eb   :  { %v9961_v29 = vunpack.i.h.bf16 %v9959_v16  ;;  %v9960_v47 = vunpack.i.l.bf16 %v9959_v16  ;;  %v9996_v16 = vunpack.i.h.bf16 %v9994_v35 }
 0x3ec   :  { %9478 = vmatpush3.bf16.xpose.msk.msra.mxu0 %vm10938_vm2, %v9473_v15 }
 0x3ed   :  { %v9399_v8 = vpack.c.bf16 %v9961_v29, %v9960_v47 }
 0x3ee   :  { %v9964_v36 = vpop.permute.xlu0 %9963 }
 0x3ef   :  { %v9966_v5 = vunpack.i.h.bf16 %v9964_v36  ;;  %v9965_v1 = vunpack.i.l.bf16 %v9964_v36  ;;  %9400 = vmatprep.subr.bf16.mxu1 %v9399_v8 }
 0x3f0   :  { %9402 = vmatpush3.bf16.msra.mxu1 %v9399_v8 }
 0x3f1   :  { %v9403_v20 = vpack.c.bf16 %v9966_v5, %v9965_v1 }
 0x3f2   :  { %v9969_v17 = vpop.permute.xlu0 %9968 }
 0x3f3   :  { %v9971_v54 = vunpack.i.h.bf16 %v9969_v17  ;;  %v9970_v32 = vunpack.i.l.bf16 %v9969_v17  ;;  %9404 = vmatprep.subr.bf16.mxu1 %v9403_v20  ;;  %8662 = vmatmul.mubr.msk.f32.vlgmr.msra.gmra.mrb[64].mxu0 %vm13597_vm14, %v2382_v3  ;;  %vm13602_vm14 = vmmov %vm13585_vm1 }
 0x3f4   :  { %9406 = vmatpush3.bf16.msra.mxu1 %v9403_v20  ;;  %8664 = vmatprep.mubr.msk.f32.mxu0 %vm13598_vm4, %v2384_v61  ;;  %v10004_v61 = vpop.permute.xlu1 %10003  ;;  %vm13603_vm4 = vmmov %vm13585_vm1 }
 0x3f5   :  { %v9407_v40 = vpack.c.bf16 %v9971_v54, %v9970_v32  ;;  %v10005_v15 = vunpack.i.l.bf16 %v10004_v61 }
 0x3f6   :  { %v9979_v58 = vpop.permute.xlu0 %9978 }
 0x3f7   :  { %v9981_v7 = vunpack.i.h.bf16 %v9979_v58  ;;  %v9980_v50 = vunpack.i.l.bf16 %v9979_v58  ;;  %9408 = vmatprep.subr.bf16.mxu1 %v9407_v40  ;;  %8665 = vmatmul.mubr.msk.f32.gmra.mrb[66].mxu0 %vm13599_vm6, %v11633_v21  ;;  %vm13604_vm6 = vmmov %vm13585_vm1 }
 0x3f8   :  { %9410 = vmatpush3.bf16.msra.mxu1 %v9407_v40  ;;  %8667 = vmatprep.mubr.msk.f32.mxu0 %vm13600_vm11, %v2388_v39  ;;  %v10006_v39 = vunpack.i.h.bf16 %v10004_v61  ;;  %vm13605_vm11 = vmmov %vm13585_vm1 }
 0x3f9   :  { %9412 = vmatprep.subr.bf16.mxu1 %v9411_v45  ;;  %v9415_v55 = vpack.c.bf16 %v9981_v7, %v9980_v50 }
 0x3fa   :  { %v9989_v3 = vpop.permute.xlu0 %9988  ;;  %v9517_v47 = vpack.c.bf16 %v10006_v39, %v10005_v15 }
 0x3fb   :  { %8668 = vmatmul.mubr.msk.f32.gmra.mrb[68].mxu0 %vm13585_vm1, %v2390_v0  ;;  %v9991_v21 = vunpack.i.h.bf16 %v9989_v3  ;;  %v9990_v42 = vunpack.i.l.bf16 %v9989_v3 }
 0x3fc   :  { %9414 = vmatpush3.bf16.msra.mxu1 %v9411_v45  ;;  %8670 = vmatprep.mubr.msk.f32.mxu0 %vm13601_vm3, %v11640_v41  ;;  %vm13606_vm3 = vmmov %vm13585_vm1 }
 0x3fd   :  { %9416 = vmatprep.subr.bf16.mxu1 %v9415_v55  ;;  %v9423_v29 = vpack.c.bf16 %v9991_v21, %v9990_v42 }
 0x3fe   :  { %v9999_v52 = vpop.permute.xlu0 %9998 }
 0x3ff   :  { %v10001_v12 = vunpack.i.h.bf16 %v9999_v52  ;;  %v10000_v57 = vunpack.i.l.bf16 %v9999_v52  ;;  %8671 = vmatmul.mubr.msk.f32.gmra.mrb[70].mxu0 %vm13602_vm14, %v11642_v43  ;;  %vm13607_vm14 = vmmov %vm13585_vm1 }
 0x400   :  { %9418 = vmatpush3.bf16.msra.mxu1 %v9415_v55  ;;  %8673 = vmatprep.mubr.msk.f32.mxu0 %vm13603_vm4, %v11648_v38  ;;  %v9427_v38 = vpack.c.bf16 %v9996_v16, %v9995_v60  ;;  %vm13608_vm4 = vmmov %vm13585_vm1 }
 0x401   :  { %v9511_v0 = vpack.c.bf16 %v10001_v12, %v10000_v57  ;;  %9420 = vmatprep.subr.bf16.mxu1 %v9419_v53 }
 0x402   :  { %v10009_v41 = vpop.permute.xlu0 %10008 }
 0x403   :  { %8674 = vmatmul.mubr.msk.f32.gmra.mrb[72].mxu0 %vm13604_vm6, %v11650_v6  ;;  %9513 = vmatprep.subr.msk.bf16.mxu0 %vm10938_vm2, %v9511_v0  ;;  %v10011_v6 = vunpack.i.h.bf16 %v10009_v41  ;;  %v10010_v8 = vunpack.i.l.bf16 %v10009_v41  ;;  %vm13609_vm6 = vmmov %vm13585_vm1 }
 0x404   :  { %9422 = vmatpush3.bf16.msra.mxu1 %v9419_v53  ;;  %8676 = vmatprep.mubr.msk.f32.mxu0 %vm13605_vm11, %v11656_v18  ;;  %vm13610_vm11 = vmmov %vm13585_vm1 }
 0x405   :  { %9516 = vmatpush3.bf16.xpose.msk.msra.mxu0 %vm10938_vm2, %v9511_v0  ;;  %9424 = vmatprep.subr.bf16.mxu1 %v9423_v29  ;;  %v9523_v36 = vpack.c.bf16 %v10011_v6, %v10010_v8 }
 0x406   :  { %9519 = vmatprep.subr.msk.bf16.mxu0 %vm10938_vm2, %v9517_v47  ;;  %v10014_v43 = vpop.permute.xlu0 %10013 }
 0x407   :  { %8677 = vmatmul.mubr.msk.f32.gmra.mrb[74].mxu0 %vm13585_vm1, %v11658_v34  ;;  %v10015_v5 = vunpack.i.l.bf16 %v10014_v43 }
 0x408   :  { %9426 = vmatpush3.bf16.msra.mxu1 %v9423_v29  ;;  %8679 = vmatprep.mubr.msk.f32.mxu0 %vm13606_vm3, %v11664_v48  ;;  %v10016_v48 = vunpack.i.h.bf16 %v10014_v43  ;;  %vm13613_vm3 = vmmov %vm13585_vm1 }
 0x409   :  { %9428 = vmatprep.subr.bf16.mxu1 %v9427_v38 }
 0x40a   :  { %v10019_v18 = vpop.permute.xlu0 %10018 }
 0x40b   :  { %8680 = vmatmul.mubr.msk.f32.gmra.mrb[76].mxu0 %vm13607_vm14, %v11666_v51  ;;  %v9529_v51 = vpack.c.bf16 %v10016_v48, %v10015_v5  ;;  %v10021_v59 = vunpack.i.h.bf16 %v10019_v18  ;;  %v10020_v20 = vunpack.i.l.bf16 %v10019_v18  ;;  %vm13614_vm14 = vmmov %vm13585_vm1 }
 0x40c   :  { %9430 = vmatpush3.bf16.msra.mxu1 %v9427_v38  ;;  %8682 = vmatprep.mubr.msk.f32.mxu0 %vm13608_vm4, %v11674_v2  ;;  %vm13615_vm4 = vmmov %vm13585_vm1 }
 0x40d   :  { %9522 = vmatpush3.bf16.xpose.msk.msra.mxu0 %vm10938_vm2, %v9517_v47  ;;  %v9535_v4 = vpack.c.bf16 %v10021_v59, %v10020_v20 }
 0x40e   :  { %9525 = vmatprep.subr.msk.bf16.mxu0 %vm10938_vm2, %v9523_v36  ;;  %v10029_v34 = vpop.permute.xlu0 %10028 }
 0x40f   :  { %8683 = vmatmul.mubr.msk.f32.gmra.mrb[78].mxu0 %vm13609_vm6, %v11670_v9  ;;  %v10024_v9 = vpop.permute.xlu1 %10023  ;;  %v10031_v40 = vunpack.i.h.bf16 %v10029_v34  ;;  %v10030_v58 = vunpack.i.l.bf16 %v10029_v34  ;;  %vm13616_vm6 = vmmov %vm13585_vm1 }
 0x410   :  { %v10026_v25 = vunpack.i.h.bf16 %v10024_v9  ;;  %v10025_v54 = vunpack.i.l.bf16 %v10024_v9 }
 0x411   :  { %v9547_v35 = vpack.c.bf16 %v10031_v40, %v10030_v58 }
 0x412   :  { %v3231_v1 = vpop.permute.xlu0 %3230  ;;  %v9541_v32 = vpack.c.bf16 %v10026_v25, %v10025_v54 }
 0x413   :  { %8799 = vmatprep.mubr.msk.f32.mxu0 %vm13610_vm11, %v3231_v1  ;;  %v10034_v7 = vpop.permute.xlu1 %10033  ;;  %vm13617_vm11 = vmmov %vm13585_vm1 }
 0x414   :  { %v10036_v50 = vunpack.i.h.bf16 %v10034_v7  ;;  %v10035_v45 = vunpack.i.l.bf16 %v10034_v7 }
 0x415   :  { %9528 = vmatpush3.bf16.xpose.msk.msra.mxu0 %vm10938_vm2, %v9523_v36 }
 0x416   :  { %9531 = vmatprep.subr.msk.bf16.mxu0 %vm10938_vm2, %v9529_v51  ;;  %v9553_v46 = vpack.c.bf16 %v10036_v50, %v10035_v45  ;;  %v3235_v3 = vpop.permute.xlu0 %3234 }
 0x417   :  { %v11719_v2 = vpop.f32.mrb[32].mxu0  ;;  %v3233_v14 = vpop.permute.xlu1 %3232 }
 0x418   :  { %13611 = vst [vmem:[#allocation22_spill] sm:$0xff] %v11719_v2  ;;  %v11721_v17 = vpop.f32.mrb[33].mxu0 }
 0x419   :  { %13612 = vst [vmem:[#allocation47_spill] sm:$0xff] %v11721_v17 }
 0x41a   :  { %v3239_v61 = vpop.permute.xlu0 %3238 }
 0x41b   :  { %v3237_v55 = vpop.permute.xlu1 %3236 }
 0x41d   :  { %9534 = vmatpush3.bf16.xpose.msk.msra.mxu0 %vm10938_vm2, %v9529_v51 }
 0x41e   :  { %9537 = vmatprep.subr.msk.bf16.mxu0 %vm10938_vm2, %v9535_v4  ;;  %v3243_v53 = vpop.permute.xlu0 %3242 }
 0x41f   :  { %v3241_v52 = vpop.permute.xlu1 %3240 }
 0x425   :  { %9540 = vmatpush3.bf16.xpose.msk.msra.mxu0 %vm10938_vm2, %v9535_v4 }
 0x426   :  { %9543 = vmatprep.subr.msk.bf16.mxu0 %vm10938_vm2, %v9541_v32 }
 0x42d   :  { %9546 = vmatpush3.bf16.xpose.msk.msra.mxu0 %vm10938_vm2, %v9541_v32 }
 0x42e   :  { %9549 = vmatprep.subr.msk.bf16.mxu0 %vm10938_vm2, %v9547_v35 }
 0x435   :  { %9552 = vmatpush3.bf16.xpose.msk.msra.mxu0 %vm10938_vm2, %v9547_v35 }
 0x436   :  { %9555 = vmatprep.subr.msk.bf16.mxu0 %vm10938_vm2, %v9553_v46 }
 0x43d   :  { %9558 = vmatpush3.bf16.xpose.msk.msra.mxu0 %vm10938_vm2, %v9553_v46 }
 0x444   :  { %8800 = vmatmul.mubr.msk.f32.vlgmr.msra.gmra.mrb[80].mxu0 %vm13585_vm1, %v3233_v14 }
 0x445   :  { %8802 = vmatprep.mubr.msk.f32.mxu0 %vm13613_vm3, %v3235_v3 }
 0x448   :  { %8803 = vmatmul.mubr.msk.f32.gmra.mrb[82].mxu0 %vm13614_vm14, %v3237_v55 }
 0x449   :  { %8805 = vmatprep.mubr.msk.f32.mxu0 %vm13615_vm4, %v3239_v61 }
 0x44c   :  { %8806 = vmatmul.mubr.msk.f32.gmra.mrb[84].mxu0 %vm13616_vm6, %v3241_v52 }
 0x44d   :  { %8808 = vmatprep.mubr.msk.f32.mxu0 %vm13617_vm11, %v3243_v53 }
 0x451   :  { %v11747_v19 = vpop.f32.mrb[34].mxu0 }
 0x452   :  { %13618 = vst [vmem:[#allocation48_spill] sm:$0xff] %v11747_v19  ;;  %v11749_v21 = vpop.f32.mrb[35].mxu0 }
 0x453   :  { %13619 = vst [vmem:[#allocation49_spill] sm:$0xff] %v11749_v21 }
 0x455   :  { %v11751_v42 = vpop.f32.mrb[36].mxu0 }
 0x456   :  { %13620 = vst [vmem:[#allocation50_spill] sm:$0xff] %v11751_v42  ;;  %v11753_v12 = vpop.f32.mrb[37].mxu0 }
 0x457   :  { %13621 = vst [vmem:[#allocation51_spill] sm:$0xff] %v11753_v12 }
 0x45c   :  { %v11755_v57 = vpop.f32.mrb[38].mxu0 }
 0x45d   :  { %13622 = vst [vmem:[#allocation52_spill] sm:$0xff] %v11755_v57  ;;  %v11757_v39 = vpop.f32.mrb[39].mxu0 }
 0x45e   :  { %13623 = vst [vmem:[#allocation53_spill] sm:$0xff] %v11757_v39 }
 0x464   :  { %v11759_v15 = vpop.f32.mrb[40].mxu0 }
 0x465   :  { %13624 = vst [vmem:[#allocation54_spill] sm:$0xff] %v11759_v15  ;;  %v11761_v0 = vpop.f32.mrb[41].mxu0 }
 0x466   :  { %13625 = vst [vmem:[#allocation55_spill] sm:$0xff] %v11761_v0 }
 0x468   :  { %v11763_v41 = vpop.f32.mrb[42].mxu0 }
 0x469   :  { %13626 = vst [vmem:[#allocation56_spill] sm:$0xff] %v11763_v41  ;;  %v11765_v16 = vpop.f32.mrb[43].mxu0  ;;  %v13650_v41 = vld [vmem:[#allocation46_spill] sm:$0xff] }
 0x46a   :  { %13627 = vst [vmem:[#allocation57_spill] sm:$0xff] %v11765_v16  ;;  %vm13651_vm6 = vnez %v13650_v41 }
 0x470   :  { %v11767_v60 = vpop.f32.mrb[44].mxu0 }
 0x471   :  { %13628 = vst [vmem:[#allocation58_spill] sm:$0xff] %v11767_v60  ;;  %v11769_v29 = vpop.f32.mrb[45].mxu0 }
 0x472   :  { %13629 = vst [vmem:[#allocation59_spill] sm:$0xff] %v11769_v29  ;;  %v13648_v29 = vld [vmem:[#allocation43_spill] sm:$0xff] }
 0x473   :  { %vm13649_vm4 = vnez %v13648_v29 }
 0x474   :  { %v11771_v47 = vpop.f32.mrb[46].mxu0 }
 0x475   :  { %13630 = vst [vmem:[#allocation60_spill] sm:$0xff] %v11771_v47  ;;  %v11773_v43 = vpop.f32.mrb[47].mxu0 }
 0x476   :  { %13631 = vst [vmem:[#allocation61_spill] sm:$0xff] %v11773_v43  ;;  %v13644_v43 = vld [vmem:[#allocation41_spill] sm:$0xff] }
 0x477   :  { %vm13645_vm3 = vnez %v13644_v43 }
 0x478   :  { %v8499_v38 = vpop.f32.mrb[48].mxu0 }
 0x479   :  { %v1609_v6 = vmul.f32 0.35355338, %v8499_v38  ;;  %v1529_v8 = vpop.f32.mrb[49].mxu0 }
 0x47a   :  { %v1608_v18 = vmul.f32 0.35355338, %v1529_v8 }
 0x47b   :  { %v11777_v34 = vsel %vm11134_vm7, %v1609_v6, -1e+09 }
 0x47c   :  { %1642 = vmax.xlane.f32.xlu1 %v11777_v34  ;;  %v8502_v48 = vpop.f32.mrb[50].mxu0  ;;  %v11782_v1 = vsel %vm11140_vm8, %v1608_v18, -1e+09 }
 0x47d   :  { %v1611_v51 = vmul.f32 0.35355338, %v8502_v48  ;;  %1640 = vmax.xlane.f32.xlu0 %v11782_v1  ;;  %v1539_v59 = vpop.f32.mrb[51].mxu0 }
 0x47e   :  { %v1610_v20 = vmul.f32 0.35355338, %v1539_v59 }
 0x47f   :  { %v11787_v4 = vsel %vm11168_vm10, %v1611_v51, -1e+09 }
 0x480   :  { %v8505_v9 = vpop.f32.mrb[52].mxu0  ;;  %v11791_v54 = vsel %vm11181_vm13, %v1610_v20, -1e+09 }
 0x481   :  { %v1613_v32 = vmul.f32 0.35355338, %v8505_v9  ;;  %1646 = vmax.xlane.f32.xlu0 %v11787_v4  ;;  %1644 = vmax.xlane.f32.xlu1 %v11791_v54  ;;  %v1549_v40 = vpop.f32.mrb[53].mxu0  ;;  %v13639_v9 = vld [vmem:[#allocation40_spill] sm:$0xff] }
 0x482   :  { %v1612_v58 = vmul.f32 0.35355338, %v1549_v40  ;;  %vm13640_vm2 = vnez %v13639_v9 }
 0x483   :  { %v11797_v7 = vsel %vm11206_vm5, %v1613_v32, -1e+09 }
 0x484   :  { %v8508_v50 = vpop.f32.mrb[54].mxu0  ;;  %v11802_v3 = vsel %vm11190_vm15, %v1612_v58, -1e+09 }
 0x485   :  { %1650 = vmax.xlane.f32.xlu1 %v11797_v7  ;;  %v1559_v45 = vpop.f32.mrb[55].mxu0  ;;  %v1615_v55 = vmul.f32 0.35355338, %v8508_v50 }
 0x486   :  { %v1614_v46 = vmul.f32 0.35355338, %v1559_v45  ;;  %v13641_v45 = vld [vmem:[#allocation39_spill] sm:$0xff] }
 0x487   :  { %v11812_v48 = vsel %vm11231_vm12, %v1615_v55, -1e+09  ;;  %vm13642_vm1 = vnez %v13641_v45 }
 0x488   :  { %v8511_v61 = vpop.f32.mrb[56].mxu0  ;;  %v11806_v53 = vsel %vm11215_vm9, %v1614_v46, -1e+09 }
 0x489   :  { %1648 = vmax.xlane.f32.xlu1 %v11802_v3  ;;  %1652 = vmax.xlane.f32.xlu0 %v11806_v53  ;;  %v1569_v38 = vpop.f32.mrb[57].mxu0  ;;  %v1617_v6 = vmul.f32 0.35355338, %v8511_v61 }
 0x48a   :  { %v1616_v59 = vmul.f32 0.35355338, %v1569_v38 }
 0x48b   :  { %v11817_v32 = vsel %vm13640_vm2, %v1617_v6, -1e+09 }
 0x48c   :  { %v8514_v8 = vpop.f32.mrb[58].mxu0  ;;  %v11822_v46 = vsel %vm13642_vm1, %v1616_v59, -1e+09  ;;  %v13646_v59 = vld [vmem:[#allocation44_spill] sm:$0xff] }
 0x48d   :  { %1654 = vmax.xlane.f32.xlu1 %v11812_v48  ;;  %v1579_v51 = vpop.f32.mrb[59].mxu0  ;;  %v1619_v58 = vmul.f32 0.35355338, %v8514_v8  ;;  %vm13647_vm14 = vnez %v13646_v59  ;;  %v770_v59 = vld [vmem:[%s13661_s26 + $0x10] sm:$0xff] }
 0x48e   :  { %v1618_v61 = vmul.f32 0.35355338, %v1579_v51 }
 0x48f   :  { %v11827_v38 = vsel %vm11281_vm0, %v1619_v58, -1e+09 }
 0x490   :  { %v8517_v20 = vpop.f32.mrb[60].mxu0  ;;  %v11832_v60 = vsel %vm13645_vm3, %v1618_v61, -1e+09 }
 0x491   :  { %1658 = vmax.xlane.f32.xlu1 %v11817_v32  ;;  %v1589_v40 = vpop.f32.mrb[61].mxu0  ;;  %v1621_v6 = vmul.f32 0.35355338, %v8517_v20 }
 0x492   :  { %v1620_v8 = vmul.f32 0.35355338, %v1589_v40 }
 0x493   :  { %v11839_v51 = vsel %vm13647_vm14, %v1621_v6, -1e+09 }
 0x494   :  { %v8520_v50 = vpop.f32.mrb[62].mxu0  ;;  %v11844_v20 = vsel %vm13649_vm4, %v1620_v8, -1e+09 }
 0x495   :  { %1656 = vmax.xlane.f32.xlu1 %v11822_v46  ;;  %v1599_v55 = vpop.f32.mrb[63].mxu0  ;;  %v1623_v58 = vmul.f32 0.35355338, %v8520_v50 }
 0x496   :  { %v1622_v61 = vmul.f32 0.35355338, %v1599_v55 }
 0x497   :  { %v11849_v16 = vsel %vm13651_vm6, %v1623_v58, -1e+09 }
 0x499   :  { %1662 = vmax.xlane.f32.xlu1 %v11827_v38 }
 0x49d   :  { %1660 = vmax.xlane.f32.xlu1 %v11832_v60 }
 0x49f   :  { %3244 = vrot.lane.b32.xlu0 %v10999_v63, %s10503_s28  ;;  %v13652_v63 = vld [vmem:[#allocation45_spill] sm:$0xff] }
 0x4a0   :  { %vm13653_vm11 = vnez %v13652_v63 }
 0x4a1   :  { %1666 = vmax.xlane.f32.xlu1 %v11839_v51  ;;  %v11854_v40 = vsel %vm13653_vm11, %v1622_v61, -1e+09 }
 0x4a5   :  { %1664 = vmax.xlane.f32.xlu1 %v11844_v20 }
 0x4a9   :  { %1670 = vmax.xlane.f32.xlu1 %v11849_v16 }
 0x4ad   :  { %1668 = vmax.xlane.f32.xlu1 %v11854_v40 }
 0x4c6   :  { %v8663_v50 = vpop.f32.mrb[64].mxu0 }
 0x4c7   :  { %v2653_v6 = vmul.f32 0.35355338, %v8663_v50  ;;  %v2573_v15 = vpop.f32.mrb[65].mxu0 }
 0x4c8   :  { %v2652_v8 = vmul.f32 0.35355338, %v2573_v15 }
 0x4c9   :  { %v11859_v0 = vsel %vm11134_vm7, %v2653_v6, -1e+09 }
 0x4ca   :  { %13654 = vst [vmem:[#allocation36_spill] sm:$0xff] %v11859_v0  ;;  %2686 = vmax.xlane.f32.xlu0 %v11859_v0  ;;  %v8666_v55 = vpop.f32.mrb[66].mxu0  ;;  %v11864_v58 = vsel %vm11140_vm8, %v2652_v8, -1e+09 }
 0x4cb   :  { %13655 = vst [vmem:[#allocation35_spill] sm:$0xff] %v11864_v58  ;;  %v2655_v57 = vmul.f32 0.35355338, %v8666_v55  ;;  %v2583_v61 = vpop.f32.mrb[67].mxu0  ;;  %2684 = vmax.xlane.f32.xlu1 %v11864_v58 }
 0x4cc   :  { %v2654_v39 = vmul.f32 0.35355338, %v2583_v61 }
 0x4cd   :  { %v11869_v50 = vsel %vm11168_vm10, %v2655_v57, -1e+09  ;;  %vm13658_vm10 = vcmask 64512  }
 0x4ce   :  { %13656 = vst [vmem:[#allocation37_spill] sm:$0xff] %v11869_v50  ;;  %2690 = vmax.xlane.f32.xlu0 %v11869_v50  ;;  %v11872_v15 = vpop.f32.mrb[68].mxu0  ;;  %v11876_v6 = vsel %vm11181_vm13, %v2654_v39, -1e+09 }
 0x4cf   :  { %13657 = vst [vmem:[#allocation38_spill] sm:$0xff] %v11876_v6  ;;  %v11878_v42 = vpop.f32.mrb[69].mxu0  ;;  %2688 = vmax.xlane.f32.xlu1 %v11876_v6 }
 0x4d2   :  { %v11881_v8 = vpop.f32.mrb[70].mxu0 }
 0x4d3   :  { %v11883_v55 = vpop.f32.mrb[71].mxu0 }
 0x4d6   :  { %v11885_v61 = vpop.f32.mrb[72].mxu0 }
 0x4d7   :  { %v11887_v57 = vpop.f32.mrb[73].mxu0 }
 0x4da   :  { %v11889_v12 = vpop.f32.mrb[74].mxu0 }
 0x4db   :  { %v11891_v19 = vpop.f32.mrb[75].mxu0 }
 0x4de   :  { %v11893_v21 = vpop.f32.mrb[76].mxu0 }
 0x4df   :  { %v11895_v39 = vpop.f32.mrb[77].mxu0 }
 0x4e2   :  { %v11897_v2 = vpop.f32.mrb[78].mxu0 }
 0x4e3   :  { %v11899_v17 = vpop.f32.mrb[79].mxu0 }
 0x509   :  { %v1643_v10 = vpop.xlane.xlu1 %1642 }
 0x50a   :  { %v1673_v25 = vsub.f32 %v11777_v34, %v1643_v10  ;;  %v1641_v36 = vpop.xlane.xlu0 %1640 }
 0x50b   :  { %v1672_v5 = vsub.f32 %v11782_v1, %v1641_v36 }
 0x50c   :  { %v1690_v56 = vmul.f32 1.442695, %v1673_v25 }
 0x50d   :  { %v1688_v30 = vmul.f32 1.442695, %v1672_v5 }
 0x50e   :  { %10188 = vpow2.f32 %v1690_v56  ;;  %v1647_v6 = vpop.xlane.xlu0 %1646  ;;  %v1645_v50 = vpop.xlane.xlu1 %1644 }
 0x50f   :  { %10190 = vpow2.f32 %v1688_v30  ;;  %v1675_v0 = vsub.f32 %v11787_v4, %v1647_v6  ;;  %v1674_v58 = vsub.f32 %v11791_v54, %v1645_v50 }
 0x511   :  { %v1694_v44 = vmul.f32 1.442695, %v1675_v0  ;;  %v1692_v49 = vmul.f32 1.442695, %v1674_v58 }
 0x512   :  { %v1651_v31 = vpop.xlane.xlu1 %1650 }
 0x513   :  { %10192 = vpow2.f32 %v1694_v44  ;;  %v1677_v62 = vsub.f32 %v11797_v7, %v1651_v31 }
 0x514   :  { %10194 = vpow2.f32 %v1692_v49 }
 0x515   :  { %v1698_v10 = vmul.f32 1.442695, %v1677_v62 }
 0x516   :  { %v1649_v34 = vpop.xlane.xlu1 %1648  ;;  %v1653_v27 = vpop.xlane.xlu0 %1652 }
 0x517   :  { %v1676_v36 = vsub.f32 %v11802_v3, %v1649_v34  ;;  %v1678_v56 = vsub.f32 %v11806_v53, %v1653_v27  ;;  %v11908_v5 = vpop.f32.mrb[80].mxu0  ;;  %10196 = vpow2.f32 %v1698_v10 }
 0x518   :  { %v11910_v30 = vpop.eup %10188  ;;  %v11912_v1 = vpop.f32.mrb[81].mxu0 }
 0x519   :  { %v11914_v0 = vpop.eup %10190  ;;  %v1696_v44 = vmul.f32 1.442695, %v1676_v36  ;;  %1722 = vadd.xlane.f32.xlu1 %v11910_v30  ;;  %v1700_v62 = vmul.f32 1.442695, %v1678_v56  ;;  %v3503_v52 = vmul.f32 0.35355338, %v11912_v1 }
 0x51a   :  { %v1655_v31 = vpop.xlane.xlu1 %1654  ;;  %v3245_v4 = vpop.permute.xlu0 %3244  ;;  %1720 = vadd.xlane.f32.xlu0 %v11914_v0 }
 0x51b   :  { %10198 = vpow2.f32 %v1696_v44  ;;  %v1679_v27 = vsub.f32 %v11812_v48, %v1655_v31  ;;  %v11919_v49 = vpop.f32.mrb[82].mxu0  ;;  %8809 = vmatmul.mubr.msk.f32.gmra.mrb[86].mxu0 %vm13658_vm10, %v3245_v4 }
 0x51c   :  { %v11922_v25 = vpop.f32.mrb[83].mxu0  ;;  %10200 = vpow2.f32 %v1700_v62 }
 0x51d   :  { %v11924_v54 = vpop.eup %10192  ;;  %v1702_v7 = vmul.f32 1.442695, %v1679_v27  ;;  %v3505_v1 = vmul.f32 0.35355338, %v11922_v25 }
 0x51e   :  { %v1659_v3 = vpop.xlane.xlu1 %1658  ;;  %1726 = vadd.xlane.f32.xlu1 %v11924_v54  ;;  %v11932_v48 = vpop.eup %10194 }
 0x51f   :  { %10202 = vpow2.f32 %v1702_v7  ;;  %v1681_v53 = vsub.f32 %v11817_v32, %v1659_v3  ;;  %v11928_v58 = vpop.f32.mrb[84].mxu0 }
 0x520   :  { %v11930_v50 = vpop.f32.mrb[85].mxu0  ;;  %v3508_v25 = vmul.f32 0.35355338, %v11928_v58 }
 0x521   :  { %v1706_v6 = vmul.f32 1.442695, %v1681_v53  ;;  %v11936_v36 = vpop.eup %10196 }
 0x522   :  { %v1657_v10 = vpop.xlane.xlu1 %1656  ;;  %1724 = vadd.xlane.f32.xlu1 %v11932_v48 }
 0x523   :  { %10204 = vpow2.f32 %v1706_v6  ;;  %v1680_v34 = vsub.f32 %v11822_v46, %v1657_v10 }
 0x525   :  { %v11938_v56 = vpop.eup %10198  ;;  %v1704_v44 = vmul.f32 1.442695, %v1680_v34 }
 0x526   :  { %v1663_v62 = vpop.xlane.xlu1 %1662  ;;  %1728 = vadd.xlane.f32.xlu0 %v11938_v56  ;;  %1730 = vadd.xlane.f32.xlu1 %v11936_v36  ;;  %v11943_v31 = vpop.eup %10200 }
 0x527   :  { %10206 = vpow2.f32 %v1704_v44  ;;  %v1683_v32 = vsub.f32 %v11827_v38, %v1663_v62 }
 0x529   :  { %v11945_v4 = vpop.eup %10202  ;;  %v1710_v27 = vmul.f32 1.442695, %v1683_v32 }
 0x52a   :  { %v1661_v7 = vpop.xlane.xlu1 %1660  ;;  %1734 = vadd.xlane.f32.xlu0 %v11945_v4  ;;  %1732 = vadd.xlane.f32.xlu1 %v11943_v31 }
 0x52b   :  { %10208 = vpow2.f32 %v1710_v27  ;;  %v1682_v46 = vsub.f32 %v11832_v60, %v1661_v7 }
 0x52d   :  { %v11950_v3 = vpop.eup %10204  ;;  %v1708_v53 = vmul.f32 1.442695, %v1682_v46 }
 0x52e   :  { %v1667_v6 = vpop.xlane.xlu1 %1666  ;;  %1738 = vadd.xlane.f32.xlu0 %v11950_v3 }
 0x52f   :  { %10210 = vpow2.f32 %v1708_v53  ;;  %v1685_v38 = vsub.f32 %v11839_v51, %v1667_v6 }
 0x531   :  { %v11954_v10 = vpop.eup %10206  ;;  %v1714_v34 = vmul.f32 1.442695, %v1685_v38 }
 0x532   :  { %v1665_v44 = vpop.xlane.xlu1 %1664  ;;  %1736 = vadd.xlane.f32.xlu1 %v11954_v10 }
 0x533   :  { %10212 = vpow2.f32 %v1714_v34  ;;  %v1684_v62 = vsub.f32 %v11844_v20, %v1665_v44  ;;  %v2656_v20 = vmul.f32 0.35355338, %v11878_v42  ;;  %v2657_v42 = vmul.f32 0.35355338, %v11872_v15 }
 0x535   :  { %v11958_v32 = vpop.eup %10208  ;;  %v1712_v60 = vmul.f32 1.442695, %v1684_v62 }
 0x536   :  { %v1671_v27 = vpop.xlane.xlu1 %1670  ;;  %1742 = vadd.xlane.f32.xlu0 %v11958_v32 }
 0x537   :  { %10214 = vpow2.f32 %v1712_v60  ;;  %v1687_v7 = vsub.f32 %v11849_v16, %v1671_v27  ;;  %v11974_v16 = vsel %vm11190_vm15, %v2656_v20, -1e+09  ;;  %v2659_v60 = vmul.f32 0.35355338, %v11881_v8 }
 0x538   :  { %v11992_v27 = vsel %vm11206_vm5, %v2657_v42, -1e+09 }
 0x539   :  { %v11962_v46 = vpop.eup %10210  ;;  %v1718_v51 = vmul.f32 1.442695, %v1687_v7  ;;  %v2658_v7 = vmul.f32 0.35355338, %v11883_v55 }
 0x53a   :  { %1740 = vadd.xlane.f32.xlu1 %v11962_v46  ;;  %v1669_v53 = vpop.xlane.xlu1 %1668 }
 0x53b   :  { %10216 = vpow2.f32 %v1718_v51  ;;  %v1686_v6 = vsub.f32 %v11854_v40, %v1669_v53  ;;  %v11998_v51 = vsel %vm11231_vm12, %v2659_v60, -1e+09 }
 0x53d   :  { %v11966_v38 = vpop.eup %10212  ;;  %v1716_v34 = vmul.f32 1.442695, %v1686_v6 }
 0x53e   :  { %1746 = vadd.xlane.f32.xlu0 %v11966_v38 }
 0x53f   :  { %10218 = vpow2.f32 %v1716_v34  ;;  %v2661_v34 = vmul.f32 0.35355338, %v11885_v61 }
 0x541   :  { %v11970_v44 = vpop.eup %10214 }
 0x542   :  { %2692 = vmax.xlane.f32.xlu0 %v11974_v16  ;;  %1744 = vadd.xlane.f32.xlu1 %v11970_v44 }
 0x545   :  { %v11978_v62 = vpop.eup %10216 }
 0x546   :  { %1750 = vadd.xlane.f32.xlu0 %v11978_v62 }
 0x549   :  { %v11981_v40 = vpop.eup %10218 }
 0x54a   :  { %1748 = vadd.xlane.f32.xlu0 %v11981_v40 }
 0x553   :  { %3246 = vrot.lane.b32.xlu1 %v11010_v13, %s10503_s28  ;;  %v12004_v13 = vsel %vm11215_vm9, %v2658_v7, -1e+09 }
 0x557   :  { %v12018_v55 = vpop.xlane.xlu0 %2686 }
 0x558   :  { %v12016_v8 = vpop.xlane.xlu1 %2684 }
 0x55b   :  { %v12022_v53 = vpop.xlane.xlu0 %2690 }
 0x560   :  { %3248 = vrot.lane.b32.xlu0 %v11008_v11, %s10503_s28  ;;  %v2660_v11 = vmul.f32 0.35355338, %v11887_v57  ;;  %v12020_v57 = vpop.xlane.xlu1 %2688 }
 0x562   :  { %v12009_v15 = vsel %vm13642_vm1, %v2660_v11, -1e+09 }
 0x577   :  { %2694 = vmax.xlane.f32.xlu1 %v11992_v27 }
 0x57b   :  { %2698 = vmax.xlane.f32.xlu1 %v11998_v51 }
 0x57f   :  { %2696 = vmax.xlane.f32.xlu0 %v12004_v13 }
 0x583   :  { %2700 = vmax.xlane.f32.xlu0 %v12009_v15 }
 0x58c   :  { %3250 = vrot.lane.b32.xlu1 %v11020_v23, %s10503_s28  ;;  %v2663_v23 = vmul.f32 0.35355338, %v11889_v12 }
 0x58e   :  { %v12034_v61 = vsel %vm11281_vm0, %v2663_v23, -1e+09 }
 0x599   :  { %3252 = vrot.lane.b32.xlu0 %v11018_v22, %s10503_s28  ;;  %v12028_v22 = vsel %vm13640_vm2, %v2661_v34, -1e+09 }
 0x5a6   :  { %v1723_v6 = vpop.xlane.xlu1 %1722 }
 0x5a7   :  { %10220 = vrcp.f32 %v1723_v6  ;;  %v1721_v20 = vpop.xlane.xlu0 %1720  ;;  %v2662_v6 = vmul.f32 0.35355338, %v11891_v19 }
 0x5a8   :  { %10222 = vrcp.f32 %v1721_v20 }
 0x5a9   :  { %v12042_v9 = vsel %vm13645_vm3, %v2662_v6, -1e+09 }
 0x5ab   :  { %v1727_v42 = vpop.xlane.xlu1 %1726 }
 0x5ac   :  { %10224 = vrcp.f32 %v1727_v42  ;;  %v2664_v42 = vmul.f32 0.35355338, %v11895_v39 }
 0x5af   :  { %v1725_v60 = vpop.xlane.xlu1 %1724 }
 0x5b0   :  { %10226 = vrcp.f32 %v1725_v60  ;;  %2702 = vmax.xlane.f32.xlu1 %v12028_v22 }
 0x5b1   :  { %v10221_v7 = vpop.eup %10220 }
 0x5b2   :  { %v10223_v11 = vpop.eup %10222  ;;  %v1769_v34 = vmul.f32 %v10221_v7, %v11910_v30  ;;  %v12047_v30 = vsel %vm13649_vm4, %v2664_v42, -1e+09  ;;  %vm13659_vm4 = vmmov %vm13658_vm10 }
 0x5b3   :  { %v1729_v45 = vpop.xlane.xlu0 %1728  ;;  %v1731_v20 = vpop.xlane.xlu1 %1730  ;;  %v1768_v12 = vmul.f32 %v10223_v11, %v11914_v0 }
 0x5b4   :  { %10228 = vrcp.f32 %v1729_v45  ;;  %2706 = vmax.xlane.f32.xlu1 %v12034_v61 }
 0x5b5   :  { %10230 = vrcp.f32 %v1731_v20  ;;  %8553 = vmatprep.mubr.f32.mxu1 %v1768_v12 }
 0x5b6   :  { %8554 = vmatmul.mubr.f32.vlgmr.msra.gmra.mrb[32].mxu1 %v1769_v34  ;;  %v10225_v0 = vpop.eup %10224 }
 0x5b7   :  { %v1735_v60 = vpop.xlane.xlu0 %1734  ;;  %v1733_v19 = vpop.xlane.xlu1 %1732  ;;  %v1771_v39 = vmul.f32 %v10225_v0, %v11924_v54 }
 0x5b8   :  { %10232 = vrcp.f32 %v1735_v60  ;;  %2704 = vmax.xlane.f32.xlu0 %v12042_v9 }
 0x5b9   :  { %10234 = vrcp.f32 %v1733_v19 }
 0x5ba   :  { %v10227_v45 = vpop.eup %10226 }
 0x5bb   :  { %v1770_v23 = vmul.f32 %v10227_v45, %v11932_v48  ;;  %v1739_v7 = vpop.xlane.xlu0 %1738 }
 0x5bc   :  { %2708 = vmax.xlane.f32.xlu0 %v12047_v30  ;;  %10236 = vrcp.f32 %v1739_v7 }
 0x5bd   :  { %8556 = vmatprep.mubr.f32.mxu1 %v1770_v23 }
 0x5be   :  { %v10229_v11 = vpop.eup %10228  ;;  %8557 = vmatmul.mubr.f32.gmra.mrb[34].mxu1 %v1771_v39 }
 0x5bf   :  { %v10231_v6 = vpop.eup %10230  ;;  %v1737_v20 = vpop.xlane.xlu1 %1736  ;;  %v1772_v12 = vmul.f32 %v10229_v11, %v11938_v56 }
 0x5c0   :  { %10238 = vrcp.f32 %v1737_v20  ;;  %v1773_v34 = vmul.f32 %v10231_v6, %v11936_v36 }
 0x5c1   :  { %8559 = vmatprep.mubr.f32.mxu1 %v1772_v12 }
 0x5c2   :  { %v10233_v42 = vpop.eup %10232  ;;  %8560 = vmatmul.mubr.f32.gmra.mrb[36].mxu1 %v1773_v34 }
 0x5c3   :  { %v10235_v48 = vpop.eup %10234  ;;  %v1775_v60 = vmul.f32 %v10233_v42, %v11945_v4  ;;  %v1743_v19 = vpop.xlane.xlu0 %1742 }
 0x5c4   :  { %v1774_v54 = vmul.f32 %v10235_v48, %v11943_v31  ;;  %10240 = vrcp.f32 %v1743_v19  ;;  %v2665_v19 = vmul.f32 0.35355338, %v11893_v21 }
 0x5c5   :  { %3254 = vrot.lane.b32.xlu1 %v11024_v26, %s10503_s28 }
 0x5c6   :  { %8562 = vmatprep.mubr.f32.mxu1 %v1774_v54  ;;  %v10237_v56 = vpop.eup %10236 }
 0x5c7   :  { %8563 = vmatmul.mubr.f32.gmra.mrb[38].mxu1 %v1775_v60  ;;  %v1741_v0 = vpop.xlane.xlu1 %1740  ;;  %v1777_v7 = vmul.f32 %v10237_v56, %v11950_v3 }
 0x5c8   :  { %10242 = vrcp.f32 %v1741_v0  ;;  %v2667_v0 = vmul.f32 0.35355338, %v11897_v2 }
 0x5ca   :  { %v10239_v45 = vpop.eup %10238  ;;  %v12082_v56 = vsel %vm13651_vm6, %v2667_v0, -1e+09 }
 0x5cb   :  { %v1747_v36 = vpop.xlane.xlu0 %1746  ;;  %v1776_v23 = vmul.f32 %v10239_v45, %v11954_v10 }
 0x5cc   :  { %10244 = vrcp.f32 %v1747_v36  ;;  %v769_v36 = vld [vmem:[%s13661_s26 + $0x8] sm:$0xff] }
 0x5cd   :  { %8565 = vmatprep.mubr.f32.mxu1 %v1776_v23  ;;  %v13662_v23 = vld [vmem:[#allocation24_spill] sm:$0xff]  ;;  %8577 = vmatprep.subr.mxu1 %v769_v36 }
 0x5ce   :  { %8566 = vmatmul.mubr.f32.gmra.mrb[40].mxu1 %v1777_v7  ;;  %v10241_v26 = vpop.eup %10240  ;;  %v12114_v7 = vld [vmem:[%s13661_s26] sm:$0xff] }
 0x5cf   :  { %v12060_v4 = vpop.xlane.xlu0 %2692  ;;  %v1745_v31 = vpop.xlane.xlu1 %1744  ;;  %v1779_v3 = vmul.f32 %v10241_v26, %v11958_v32  ;;  %8578 = vmatpush3.msra.mxu1 %v769_v36 }
 0x5d0   :  { %10246 = vrcp.f32 %v1745_v31  ;;  %8603 = vmatprep.subr.mxu1 %v12114_v7 }
 0x5d2   :  { %v10243_v39 = vpop.eup %10242  ;;  %3256 = vrot.lane.b32.xlu0 %v11022_v24, %s10503_s28 }
 0x5d3   :  { %v1751_v11 = vpop.xlane.xlu0 %1750  ;;  %v3247_v6 = vpop.permute.xlu1 %3246  ;;  %v1778_v20 = vmul.f32 %v10243_v39, %v11962_v46  ;;  %v13664_v39 = vld [vmem:[#allocation26_spill] sm:$0xff] }
 0x5d4   :  { %8811 = vmatprep.mubr.msk.f32.mxu0 %vm13658_vm10, %v3247_v6  ;;  %10248 = vrcp.f32 %v1751_v11  ;;  %v13665_v11 = vld [vmem:[#allocation25_spill] sm:$0xff]  ;;  %vm13666_vm10 = vmmov %vm13659_vm4 }
 0x5d5   :  { %8568 = vmatprep.mubr.f32.mxu1 %v1778_v20 }
 0x5d6   :  { %8569 = vmatmul.mubr.f32.gmra.mrb[42].mxu1 %v1779_v3  ;;  %v10245_v12 = vpop.eup %10244  ;;  %v13667_v3 = vld [vmem:[#allocation35_spill] sm:$0xff] }
 0x5d7   :  { %v1749_v10 = vpop.xlane.xlu0 %1748  ;;  %v1781_v24 = vmul.f32 %v10245_v12, %v11966_v38  ;;  %v2666_v38 = vmul.f32 0.35355338, %v11899_v17  ;;  %v13668_v12 = vld [vmem:[#allocation36_spill] sm:$0xff] }
 0x5d8   :  { %10250 = vrcp.f32 %v1749_v10  ;;  %v2716_v10 = vsub.f32 %v13667_v3, %v12016_v8  ;;  %v13671_v3 = vld [vmem:[#allocation27_spill] sm:$0xff] }
 0x5d9   :  { %v12091_v2 = vsel %vm13653_vm11, %v2666_v38, -1e+09 }
 0x5da   :  { %v10247_v34 = vpop.eup %10246 }
 0x5db   :  { %v3249_v42 = vpop.permute.xlu0 %3248  ;;  %v1780_v48 = vmul.f32 %v10247_v34, %v11970_v44  ;;  %v12076_v44 = vsel %vm13647_vm14, %v2665_v19, -1e+09  ;;  %v2717_v34 = vsub.f32 %v13668_v12, %v12018_v55 }
 0x5dc   :  { %8812 = vmatmul.mubr.msk.f32.gmra.mrb[88].mxu0 %vm13659_vm4, %v3249_v42  ;;  %v2732_v42 = vmul.f32 1.442695, %v2716_v10 }
 0x5dd   :  { %8571 = vmatprep.mubr.f32.mxu1 %v1780_v48  ;;  %v2720_v48 = vsub.f32 %v11974_v16, %v12060_v4 }
 0x5de   :  { %8572 = vmatmul.mubr.f32.gmra.mrb[44].mxu1 %v1781_v24  ;;  %v10249_v46 = vpop.eup %10248  ;;  %v2734_v24 = vmul.f32 1.442695, %v2717_v34  ;;  %10252 = vpow2.f32 %v2732_v42  ;;  %v13673_v34 = vld [vmem:[#allocation28_spill] sm:$0xff] }
 0x5df   :  { %v1783_v54 = vmul.f32 %v10249_v46, %v11978_v62  ;;  %v13669_v46 = vld [vmem:[#allocation37_spill] sm:$0xff] }
 0x5e0   :  { %10254 = vpow2.f32 %v2734_v24 }
 0x5e2   :  { %v10251_v60 = vpop.eup %10250 }
 0x5e3   :  { %v1782_v32 = vmul.f32 %v10251_v60, %v11981_v40  ;;  %v13660_v40 = vld [vmem:[#allocation21_spill] sm:$0xff]  ;;  %v2719_v60 = vsub.f32 %v13669_v46, %v12022_v53 }
 0x5e5   :  { %8574 = vmatprep.mubr.f32.mxu1 %v1782_v32  ;;  %v2740_v32 = vmul.f32 1.442695, %v2720_v48  ;;  %v2738_v19 = vmul.f32 1.442695, %v2719_v60 }
 0x5e6   :  { %8575 = vmatmul.mubr.f32.gmra.mrb[46].mxu1 %v1783_v54  ;;  %v13670_v54 = vld [vmem:[#allocation38_spill] sm:$0xff] }
 0x5e7   :  { %v2718_v0 = vsub.f32 %v13670_v54, %v12020_v57  ;;  %10256 = vpow2.f32 %v2740_v32 }
 0x5e8   :  { %10258 = vpow2.f32 %v2738_v19  ;;  %v12134_v38 = vpop.eup %10252 }
 0x5e9   :  { %2710 = vmax.xlane.f32.xlu1 %v12076_v44  ;;  %v2736_v8 = vmul.f32 1.442695, %v2718_v0 }
 0x5ea   :  { %v12137_v4 = vpop.eup %10254 }
 0x5eb   :  { %10260 = vpow2.f32 %v2736_v8 }
 0x5ed   :  { %2714 = vmax.xlane.f32.xlu1 %v12082_v56 }
 0x5ee   :  { %v12085_v21 = vpop.f32.mrb[86].mxu0 }
 0x5ef   :  { %v12087_v62 = vpop.f32.mrb[87].mxu0 }
 0x5f1   :  { %2712 = vmax.xlane.f32.xlu0 %v12091_v2  ;;  %v12139_v53 = vpop.eup %10256 }
 0x5f2   :  { %v12143_v57 = vpop.eup %10258 }
 0x5fe   :  { %3258 = vrot.lane.b32.xlu1 %v11032_v28, %s10503_s28  ;;  %v13663_v28 = vld [vmem:[#allocation23_spill] sm:$0xff] }
 0x602   :  { %10038 = vrot.lane.b32.xlu1 %v11036_v33, %s10502_s7 }
 0x604   :  { %v2695_v17 = vpop.xlane.xlu1 %2694 }
 0x605   :  { %v2721_v55 = vsub.f32 %v11992_v27, %v2695_v17  ;;  %v12146_v27 = vpop.eup %10260 }
 0x606   :  { %10043 = vrot.lane.b32.xlu1 %v13578_v37, %s10502_s7 }
 0x607   :  { %3260 = vrot.lane.b32.xlu0 %v13660_v40, %s10503_s28  ;;  %v2742_v16 = vmul.f32 1.442695, %v2721_v55 }
 0x608   :  { %v12102_v45 = vpop.xlane.xlu1 %2698 }
 0x609   :  { %10262 = vpow2.f32 %v2742_v16  ;;  %v2723_v60 = vsub.f32 %v11998_v51, %v12102_v45 }
 0x60a   :  { %10053 = vrot.lane.b32.xlu1 %v13662_v23, %s10502_s7 }
 0x60b   :  { %10048 = vrot.lane.b32.xlu0 %v13663_v28, %s10502_s7  ;;  %v2746_v32 = vmul.f32 1.442695, %v2723_v60 }
 0x60c   :  { %v2697_v31 = vpop.xlane.xlu0 %2696  ;;  %v3251_v26 = vpop.permute.xlu1 %3250 }
 0x60d   :  { %8814 = vmatprep.mubr.msk.f32.mxu0 %vm13659_vm4, %v3251_v26  ;;  %v2722_v19 = vsub.f32 %v12004_v13, %v2697_v31 }
 0x60e   :  { %10063 = vrot.lane.b32.xlu1 %v13664_v39, %s10502_s7 }
 0x60f   :  { %10058 = vrot.lane.b32.xlu0 %v13665_v11, %s10502_s7  ;;  %v2744_v0 = vmul.f32 1.442695, %v2722_v19 }
 0x610   :  { %v2701_v6 = vpop.xlane.xlu0 %2700 }
 0x611   :  { %v2724_v42 = vsub.f32 %v12009_v15, %v2701_v6 }
 0x613   :  { %v12149_v17 = vpop.eup %10262  ;;  %v2748_v48 = vmul.f32 1.442695, %v2724_v42 }
 0x614   :  { %v3253_v20 = vpop.permute.xlu0 %3252 }
 0x615   :  { %8815 = vmatmul.mubr.msk.f32.gmra.mrb[90].mxu0 %vm13666_vm10, %v3253_v20  ;;  %vm13672_vm10 = vmmov %vm13659_vm4  ;;  %10264 = vpow2.f32 %v2748_v48  ;;  %v3507_v48 = vmul.f32 0.35355338, %v11930_v50 }
 0x61f   :  { %v12163_v54 = vpop.eup %10264 }
 0x62e   :  { %2764 = vadd.xlane.f32.xlu0 %v12134_v38 }
 0x632   :  { %2766 = vadd.xlane.f32.xlu1 %v12137_v4  ;;  %2772 = vadd.xlane.f32.xlu0 %v12139_v53 }
 0x636   :  { %2770 = vadd.xlane.f32.xlu1 %v12143_v57 }
 0x63a   :  { %2768 = vadd.xlane.f32.xlu1 %v12146_v27 }
 0x63d   :  { %v2703_v40 = vpop.xlane.xlu1 %2702 }
 0x63e   :  { %2774 = vadd.xlane.f32.xlu1 %v12149_v17  ;;  %v2725_v15 = vsub.f32 %v12028_v22, %v2703_v40 }
 0x641   :  { %v2707_v36 = vpop.xlane.xlu1 %2706 }
 0x642   :  { %v2727_v24 = vsub.f32 %v12034_v61, %v2707_v36  ;;  %v2750_v61 = vmul.f32 1.442695, %v2725_v15 }
 0x644   :  { %v2754_v46 = vmul.f32 1.442695, %v2727_v24 }
 0x645   :  { %v2705_v26 = vpop.xlane.xlu0 %2704  ;;  %v3255_v20 = vpop.permute.xlu1 %3254 }
 0x646   :  { %8817 = vmatprep.mubr.msk.f32.mxu0 %vm13659_vm4, %v3255_v20  ;;  %10266 = vpow2.f32 %v2754_v46  ;;  %v2726_v51 = vsub.f32 %v12042_v9, %v2705_v26 }
 0x647   :  { %10268 = vpow2.f32 %v2746_v32  ;;  %v12199_v32 = vsel %vm11190_vm15, %v3507_v48, -1e+09  ;;  %vm13676_vm15 = vmmov %vm13659_vm4 }
 0x648   :  { %10068 = vrot.lane.b32.xlu0 %v13671_v3, %s10502_s7  ;;  %10270 = vpow2.f32 %v2744_v0  ;;  %v2752_v45 = vmul.f32 1.442695, %v2726_v51 }
 0x649   :  { %v2709_v10 = vpop.xlane.xlu0 %2708  ;;  %10272 = vpow2.f32 %v2750_v61 }
 0x64a   :  { %v2728_v13 = vsub.f32 %v12047_v30, %v2709_v10  ;;  %10274 = vpow2.f32 %v2752_v45 }
 0x64c   :  { %v2756_v8 = vmul.f32 1.442695, %v2728_v13 }
 0x64d   :  { %v3257_v12 = vpop.permute.xlu0 %3256 }
 0x64e   :  { %8818 = vmatmul.mubr.msk.f32.gmra.mrb[92].mxu0 %vm13672_vm10, %v3257_v12  ;;  %10276 = vpow2.f32 %v2756_v8  ;;  %vm13674_vm10 = vmmov %vm13659_vm4  ;;  %v3504_v8 = vmul.f32 0.35355338, %v11908_v5 }
 0x64f   :  { %10073 = vrot.lane.b32.xlu1 %v13673_v34, %s10502_s7 }
 0x650   :  { %v12167_v6 = vpop.eup %10266 }
 0x651   :  { %v12172_v31 = vpop.eup %10268 }
 0x652   :  { %v12175_v55 = vpop.eup %10270 }
 0x653   :  { %v12179_v9 = vpop.eup %10272 }
 0x654   :  { %v12182_v30 = vpop.eup %10274 }
 0x658   :  { %v12188_v42 = vpop.eup %10276 }
 0x667   :  { %2780 = vadd.xlane.f32.xlu0 %v12163_v54 }
 0x66b   :  { %2786 = vadd.xlane.f32.xlu0 %v12167_v6 }
 0x673   :  { %2778 = vadd.xlane.f32.xlu1 %v12172_v31 }
 0x676   :  { %v2711_v22 = vpop.xlane.xlu1 %2710 }
 0x677   :  { %v2729_v16 = vsub.f32 %v12076_v44, %v2711_v22  ;;  %2776 = vadd.xlane.f32.xlu1 %v12175_v55 }
 0x679   :  { %v2758_v40 = vmul.f32 1.442695, %v2729_v16  ;;  %v12225_v16 = vsel %vm11140_vm8, %v3503_v52, -1e+09  ;;  %vm13682_vm8 = vmmov %vm13659_vm4 }
 0x67a   :  { %v2715_v36 = vpop.xlane.xlu1 %2714 }
 0x67b   :  { %10278 = vpow2.f32 %v2758_v40  ;;  %2782 = vadd.xlane.f32.xlu1 %v12179_v9  ;;  %v2731_v10 = vsub.f32 %v12082_v56, %v2715_v36 }
 0x67d   :  { %v2762_v46 = vmul.f32 1.442695, %v2731_v10  ;;  %v3506_v10 = vmul.f32 0.35355338, %v11919_v49  ;;  %v3510_v49 = vmul.f32 0.35355338, %v12085_v21 }
 0x67e   :  { %v2713_v26 = vpop.xlane.xlu0 %2712  ;;  %v3259_v20 = vpop.permute.xlu1 %3258 }
 0x67f   :  { %v2730_v12 = vsub.f32 %v12091_v2, %v2713_v26  ;;  %2784 = vadd.xlane.f32.xlu1 %v12182_v30  ;;  %8820 = vmatprep.mubr.msk.f32.mxu0 %vm13659_vm4, %v3259_v20  ;;  %v3509_v2 = vmul.f32 0.35355338, %v12087_v62  ;;  %v12233_v26 = vsel %vm11134_vm7, %v3504_v8, -1e+09  ;;  %v13703_v8 = vld [vmem:[#allocation51_spill] sm:$0xff] }
 0x681   :  { %v2760_v44 = vmul.f32 1.442695, %v2730_v12  ;;  %v12204_v61 = vsel %vm11215_vm9, %v3509_v2, -1e+09  ;;  %vm13677_vm9 = vmmov %vm13659_vm4  ;;  %v12255_v2 = vsel %vm11206_vm5, %v3508_v25, -1e+09 }
 0x682   :  { %v3261_v24 = vpop.permute.xlu0 %3260  ;;  %v10039_v56 = vpop.permute.xlu1 %10038  ;;  %vm13690_vm5 = vmmov %vm13659_vm4 }
 0x683   :  { %10280 = vpow2.f32 %v2760_v44  ;;  %2788 = vadd.xlane.f32.xlu1 %v12188_v42  ;;  %8821 = vmatmul.mubr.msk.f32.gmra.mrb[94].mxu0 %vm13674_vm10, %v3261_v24  ;;  %v10041_v50 = vunpack.i.h.bf16 %v10039_v56  ;;  %v10040_v19 = vunpack.i.l.bf16 %v10039_v56  ;;  %vm13675_vm10 = vmmov %vm13659_vm4  ;;  %v12241_v44 = vsel %vm11181_vm13, %v3505_v1, -1e+09  ;;  %v13684_v24 = vld [vmem:[#allocation33_spill] sm:$0xff] }
 0x684   :  { %10282 = vpow2.f32 %v2762_v46  ;;  %vm13685_vm7 = vnez %v13684_v24  ;;  %vm13687_vm13 = vmmov %vm13659_vm4 }
 0x685   :  { %v12193_v60 = vpop.eup %10278  ;;  %v12209_v14 = vpack.c.bf16 %v10041_v50, %v10040_v19  ;;  %v12247_v46 = vsel %vm13685_vm7, %v3506_v10, -1e+09  ;;  %v12260_v50 = vsel %vm11231_vm12, %v3510_v49, -1e+09  ;;  %vm13692_vm12 = vmmov %vm13659_vm4 }
 0x686   :  { %2790 = vadd.xlane.f32.xlu0 %v12193_v60  ;;  %v10049_v1 = vpop.permute.xlu0 %10048 }
 0x687   :  { %3543 = vmax.xlane.f32.xlu1 %v12199_v32  ;;  %v10050_v49 = vunpack.i.l.bf16 %v10049_v1 }
 0x689   :  { %v8555_v0 = vpop.f32.mrb[32].mxu1 }
 0x68a   :  { %v1914_v15 = vpop.f32.mrb[33].mxu1  ;;  %v10059_v25 = vpop.permute.xlu0 %10058 }
 0x68b   :  { %8579 = vmatprep.mubr.msk.f32.mxu1 %vm13659_vm4, %v1914_v15  ;;  %3547 = vmax.xlane.f32.xlu1 %v12204_v61 }
 0x68c   :  { %8580 = vmatmul.mubr.msk.f32.vlgmr.msra.gmra.mrb[48].mxu1 %vm13675_vm10, %v8555_v0  ;;  %vm13679_vm10 = vmmov %vm13659_vm4  ;;  %v10044_v0 = vpop.permute.xlu1 %10043 }
 0x68d   :  { %v12211_v62 = vpop.eup %10280  ;;  %8604 = vmatpush3.msra.mxu1 %v12114_v7  ;;  %v10046_v10 = vunpack.i.h.bf16 %v10044_v0  ;;  %v10045_v12 = vunpack.i.l.bf16 %v10044_v0 }
 0x68e   :  { %9480 = vmatprep.subr.bf16.mxu1 %v12209_v14  ;;  %2792 = vadd.xlane.f32.xlu0 %v12211_v62  ;;  %v12216_v51 = vpop.eup %10282 }
 0x691   :  { %v8558_v45 = vpop.f32.mrb[34].mxu1 }
 0x692   :  { %v1924_v13 = vpop.f32.mrb[35].mxu1  ;;  %2794 = vadd.xlane.f32.xlu0 %v12216_v51 }
 0x693   :  { %8582 = vmatprep.mubr.msk.f32.mxu1 %vm13676_vm15, %v1924_v13  ;;  %vm13681_vm15 = vmmov %vm13659_vm4 }
 0x694   :  { %8583 = vmatmul.mubr.msk.f32.gmra.mrb[50].mxu1 %vm13677_vm9, %v8558_v45  ;;  %vm13686_vm9 = vmmov %vm13659_vm4 }
 0x695   :  { %v8561_v22 = vpop.f32.mrb[36].mxu1 }
 0x696   :  { %v1934_v40 = vpop.f32.mrb[37].mxu1  ;;  %3535 = vmax.xlane.f32.xlu0 %v12225_v16 }
 0x697   :  { %8585 = vmatprep.mubr.msk.f32.mxu1 %vm13659_vm4, %v1934_v40  ;;  %v10054_v40 = vpop.permute.xlu1 %10053 }
 0x698   :  { %8586 = vmatmul.mubr.msk.f32.gmra.mrb[52].mxu1 %vm13679_vm10, %v8561_v22  ;;  %vm13688_vm10 = vmmov %vm13659_vm4 }
 0x69a   :  { %v8564_v20 = vpop.f32.mrb[38].mxu1  ;;  %3537 = vmax.xlane.f32.xlu0 %v12233_v26 }
 0x69b   :  { %v1944_v5 = vpop.f32.mrb[39].mxu1 }
 0x69c   :  { %8588 = vmatprep.mubr.msk.f32.mxu1 %vm13681_vm15, %v1944_v5  ;;  %v10064_v5 = vpop.permute.xlu1 %10063  ;;  %vm13693_vm15 = vmmov %vm13659_vm4 }
 0x69d   :  { %8589 = vmatmul.mubr.msk.f32.gmra.mrb[54].mxu1 %vm13682_vm8, %v8564_v20 }
 0x69e   :  { %3539 = vmax.xlane.f32.xlu0 %v12241_v44 }
 0x6a1   :  { %v8567_v48 = vpop.f32.mrb[40].mxu1 }
 0x6a2   :  { %v1954_v56 = vpop.f32.mrb[41].mxu1  ;;  %3541 = vmax.xlane.f32.xlu0 %v12247_v46 }
 0x6a3   :  { %8591 = vmatprep.mubr.msk.f32.mxu1 %vm13686_vm9, %v1954_v56  ;;  %v10051_v56 = vunpack.i.h.bf16 %v10049_v1 }
 0x6a4   :  { %8592 = vmatmul.mubr.msk.f32.gmra.mrb[56].mxu1 %vm13659_vm4, %v8567_v48  ;;  %v13695_v48 = vld [vmem:[#allocation47_spill] sm:$0xff] }
 0x6a6   :  { %3545 = vmax.xlane.f32.xlu0 %v12255_v2 }
 0x6a9   :  { %v8570_v58 = vpop.f32.mrb[42].mxu1 }
 0x6aa   :  { %v1964_v19 = vpop.f32.mrb[43].mxu1  ;;  %3549 = vmax.xlane.f32.xlu0 %v12260_v50 }
 0x6ab   :  { %8594 = vmatprep.mubr.msk.f32.mxu1 %vm13687_vm13, %v1964_v19  ;;  %v9483_v19 = vpack.c.bf16 %v10046_v10, %v10045_v12  ;;  %v13707_v12 = vld [vmem:[#allocation53_spill] sm:$0xff] }
 0x6ac   :  { %8595 = vmatmul.mubr.msk.f32.gmra.mrb[58].mxu1 %vm13688_vm10, %v8570_v58  ;;  %v13697_v58 = vld [vmem:[#allocation22_spill] sm:$0xff] }
 0x6af   :  { %v8813_v21 = vpop.f32.mrb[88].mxu0 }
 0x6b0   :  { %v3512_v15 = vmul.f32 0.35355338, %v8813_v21  ;;  %v3464_v35 = vpop.f32.mrb[89].mxu0 }
 0x6b1   :  { %v3511_v52 = vmul.f32 0.35355338, %v3464_v35  ;;  %v8573_v45 = vpop.f32.mrb[44].mxu1  ;;  %v10056_v35 = vunpack.i.h.bf16 %v10054_v40 }
 0x6b2   :  { %v1974_v13 = vpop.f32.mrb[45].mxu1  ;;  %v12267_v22 = vsel %vm13640_vm2, %v3512_v15, -1e+09  ;;  %vm13694_vm2 = vmmov %vm13659_vm4  ;;  %v13699_v15 = vld [vmem:[#allocation49_spill] sm:$0xff] }
 0x6b3   :  { %8597 = vmatprep.mubr.msk.f32.mxu1 %vm13690_vm5, %v1974_v13  ;;  %3553 = vmax.xlane.f32.xlu0 %v12267_v22  ;;  %v12273_v7 = vsel %vm13642_vm1, %v3511_v52, -1e+09  ;;  %vm13696_vm8 = vmmov %vm13694_vm2  ;;  %v10055_v52 = vunpack.i.l.bf16 %v10054_v40  ;;  %v9487_v13 = vpack.c.bf16 %v10051_v56, %v10050_v49  ;;  %v10065_v56 = vunpack.i.l.bf16 %v10064_v5  ;;  %v13709_v49 = vld [vmem:[#allocation52_spill] sm:$0xff] }
 0x6b4   :  { %8598 = vmatmul.mubr.msk.f32.gmra.mrb[60].mxu1 %vm13692_vm12, %v8573_v45  ;;  %3551 = vmax.xlane.f32.xlu1 %v12273_v7  ;;  %vm13698_vm1 = vmmov %vm13694_vm2  ;;  %v13701_v45 = vld [vmem:[#allocation48_spill] sm:$0xff] }
 0x6b5   :  { %vm13700_vm7 = vmmov %vm13698_vm1  ;;  %v9491_v10 = vpack.c.bf16 %v10056_v35, %v10055_v52  ;;  %v13713_v52 = vld [vmem:[#allocation54_spill] sm:$0xff] }
 0x6b6   :  { %vm13702_vm9 = vmmov %vm13698_vm1 }
 0x6b7   :  { %vm13704_vm4 = vmmov %vm13698_vm1 }
 0x6b8   :  { %vm13706_vm13 = vmmov %vm13698_vm1 }
 0x6b9   :  { %v8576_v36 = vpop.f32.mrb[46].mxu1  ;;  %vm13708_vm10 = vmmov %vm13698_vm1 }
 0x6ba   :  { %v1984_v20 = vpop.f32.mrb[47].mxu1  ;;  %vm13710_vm5 = vmmov %vm13698_vm1 }
 0x6bb   :  { %8600 = vmatprep.mubr.msk.f32.mxu1 %vm13693_vm15, %v1984_v20  ;;  %v2765_v21 = vpop.xlane.xlu0 %2764  ;;  %v13705_v20 = vld [vmem:[#allocation50_spill] sm:$0xff]  ;;  %vm13712_vm12 = vmmov %vm13698_vm1 }
 0x6bc   :  { %8601 = vmatmul.mubr.msk.f32.gmra.mrb[62].mxu1 %vm13694_vm2, %v8576_v36  ;;  %v10061_v36 = vunpack.i.h.bf16 %v10059_v25  ;;  %10284 = vrcp.f32 %v2765_v21  ;;  %vm13714_vm15 = vmmov %vm13698_vm1 }
 0x6bd   :  { %8605 = vmatprep.mubr.msk.f32.mxu1 %vm13696_vm8, %v13695_v48  ;;  %v10066_v48 = vunpack.i.h.bf16 %v10064_v5  ;;  %v13715_v5 = vld [vmem:[#allocation57_spill] sm:$0xff]  ;;  %vm13716_vm2 = vmmov %vm13698_vm1 }
 0x6be   :  { %vm13718_vm8 = vmmov %vm13698_vm1 }
 0x6bf   :  { %v2767_v24 = vpop.xlane.xlu1 %2766  ;;  %v2773_v18 = vpop.xlane.xlu0 %2772 }
 0x6c0   :  { %8606 = vmatmul.mubr.msk.f32.vlgmr.msra.gmra.mrb[48].mxu1 %vm13698_vm1, %v13697_v58  ;;  %10286 = vrcp.f32 %v2767_v24 }
 0x6c1   :  { %9482 = vmatpush3.bf16.msra.mxu1 %v12209_v14  ;;  %8608 = vmatprep.mubr.msk.f32.mxu1 %vm13700_vm7, %v13699_v15  ;;  %v10060_v14 = vunpack.i.l.bf16 %v10059_v25  ;;  %v13711_v15 = vld [vmem:[#allocation55_spill] sm:$0xff]  ;;  %vm13721_vm7 = vmmov %vm13698_vm1 }
 0x6c2   :  { %9484 = vmatprep.subr.bf16.mxu1 %v9483_v19 }
 0x6c3   :  { %v2771_v0 = vpop.xlane.xlu1 %2770  ;;  %v9495_v58 = vpack.c.bf16 %v10061_v36, %v10060_v14  ;;  %v13717_v14 = vld [vmem:[#allocation56_spill] sm:$0xff] }
 0x6c4   :  { %8609 = vmatmul.mubr.msk.f32.gmra.mrb[50].mxu1 %vm13702_vm9, %v13701_v45  ;;  %v9499_v45 = vpack.c.bf16 %v10066_v48, %v10065_v56  ;;  %vm13723_vm9 = vmmov %vm13698_vm1 }
 0x6c5   :  { %9486 = vmatpush3.bf16.msra.mxu1 %v9483_v19  ;;  %8611 = vmatprep.mubr.msk.f32.mxu1 %vm13704_vm4, %v13703_v8  ;;  %v10069_v19 = vpop.permute.xlu0 %10068  ;;  %vm13725_vm4 = vmmov %vm13698_vm1 }
 0x6c6   :  { %9488 = vmatprep.subr.bf16.mxu1 %v9487_v13  ;;  %v10071_v25 = vunpack.i.h.bf16 %v10069_v19  ;;  %v10070_v35 = vunpack.i.l.bf16 %v10069_v19  ;;  %v10285_v24 = vpop.eup %10284 }
 0x6c7   :  { %v2769_v1 = vpop.xlane.xlu1 %2768 }
 0x6c8   :  { %8612 = vmatmul.mubr.msk.f32.gmra.mrb[52].mxu1 %vm13706_vm13, %v13705_v20  ;;  %10288 = vrcp.f32 %v2769_v1  ;;  %v9503_v21 = vpack.c.bf16 %v10071_v25, %v10070_v35  ;;  %v13719_v20 = vld [vmem:[#allocation59_spill] sm:$0xff]  ;;  %v13722_v1 = vld [vmem:[#allocation61_spill] sm:$0xff]  ;;  %vm13731_vm13 = vmmov %vm13698_vm1 }
 0x6c9   :  { %9490 = vmatpush3.bf16.msra.mxu1 %v9487_v13  ;;  %8614 = vmatprep.mubr.msk.f32.mxu1 %vm13708_vm10, %v13707_v12  ;;  %10290 = vrcp.f32 %v2771_v0  ;;  %v2812_v0 = vmul.f32 %v10285_v24, %v12134_v38  ;;  %vm13732_vm10 = vmmov %vm13698_vm1 }
 0x6ca   :  { %9492 = vmatprep.subr.bf16.mxu1 %v9491_v10  ;;  %10292 = vrcp.f32 %v2773_v18  ;;  %v10287_v48 = vpop.eup %10286 }
 0x6cb   :  { %v2775_v40 = vpop.xlane.xlu1 %2774  ;;  %v2813_v18 = vmul.f32 %v10287_v48, %v12137_v4 }
 0x6cc   :  { %8615 = vmatmul.mubr.msk.f32.gmra.mrb[54].mxu1 %vm13710_vm5, %v13709_v49  ;;  %10294 = vrcp.f32 %v2775_v40  ;;  %v13724_v49 = vld [vmem:[#allocation60_spill] sm:$0xff]  ;;  %vm13733_vm5 = vmmov %vm13698_vm1 }
 0x6cd   :  { %9494 = vmatpush3.bf16.msra.mxu1 %v9491_v10  ;;  %8617 = vmatprep.mubr.msk.f32.mxu1 %vm13712_vm12, %v13711_v15  ;;  %v13720_v10 = vld [vmem:[#allocation58_spill] sm:$0xff]  ;;  %vm13734_vm12 = vmmov %vm13698_vm1 }
 0x6ce   :  { %9496 = vmatprep.subr.bf16.mxu1 %v9495_v58 }
 0x6cf   :  { %v10074_v13 = vpop.permute.xlu1 %10073 }
 0x6d0   :  { %8618 = vmatmul.mubr.msk.f32.gmra.mrb[56].mxu1 %vm13714_vm15, %v13713_v52  ;;  %v10076_v8 = vunpack.i.h.bf16 %v10074_v13  ;;  %v10075_v36 = vunpack.i.l.bf16 %v10074_v13  ;;  %vm13735_vm15 = vmmov %vm13698_vm1 }
 0x6d1   :  { %9498 = vmatpush3.bf16.msra.mxu1 %v9495_v58  ;;  %8620 = vmatprep.mubr.msk.f32.mxu1 %vm13716_vm2, %v13715_v5  ;;  %vm13736_vm2 = vmmov %vm13698_vm1 }
 0x6d2   :  { %9500 = vmatprep.subr.bf16.mxu1 %v9499_v45  ;;  %v9507_v12 = vpack.c.bf16 %v10076_v8, %v10075_v36  ;;  %v10289_v56 = vpop.eup %10288 }
 0x6d3   :  { %v10291_v58 = vpop.eup %10290  ;;  %v2814_v19 = vmul.f32 %v10289_v56, %v12146_v27 }
 0x6d4   :  { %8621 = vmatmul.mubr.msk.f32.gmra.mrb[58].mxu1 %vm13718_vm8, %v13717_v14  ;;  %v10293_v40 = vpop.eup %10292  ;;  %v2815_v15 = vmul.f32 %v10291_v58, %v12143_v57  ;;  %vm13737_vm8 = vmmov %vm13698_vm1 }
 0x6d5   :  { %9502 = vmatpush3.bf16.msra.mxu1 %v9499_v45  ;;  %8623 = vmatprep.mubr.msk.f32.mxu1 %vm13698_vm1, %v13719_v20  ;;  %v2816_v35 = vmul.f32 %v10293_v40, %v12139_v53 }
 0x6d6   :  { %9504 = vmatprep.subr.bf16.mxu1 %v9503_v21  ;;  %v10295_v25 = vpop.eup %10294 }
 0x6d7   :  { %v2817_v38 = vmul.f32 %v10295_v25, %v12149_v17 }
 0x6d8   :  { %8624 = vmatmul.mubr.msk.f32.gmra.mrb[60].mxu1 %vm13721_vm7, %v13720_v10  ;;  %vm13738_vm7 = vmmov %vm13698_vm1 }
 0x6d9   :  { %9506 = vmatpush3.bf16.msra.mxu1 %v9503_v21  ;;  %8626 = vmatprep.mubr.msk.f32.mxu1 %vm13723_vm9, %v13722_v1  ;;  %vm13739_vm9 = vmmov %vm13698_vm1 }
 0x6da   :  { %9508 = vmatprep.subr.bf16.mxu1 %v9507_v12 }
 0x6dc   :  { %8627 = vmatmul.mubr.msk.f32.gmra.mrb[62].mxu1 %vm13725_vm4, %v13724_v49  ;;  %vm13740_vm4 = vmmov %vm13698_vm1 }
 0x6dd   :  { %9510 = vmatpush3.bf16.msra.mxu1 %v9507_v12  ;;  %8717 = vmatprep.mubr.f32.mxu1 %v2812_v0 }
 0x6de   :  { %8741 = vmatprep.subr.mxu1 %v770_v59 }
 0x6e0   :  { %8718 = vmatmul.mubr.f32.vlgmr.msra.gmra.mrb[64].mxu1 %v2813_v18 }
 0x6e1   :  { %8720 = vmatprep.mubr.f32.mxu1 %v2814_v19  ;;  %8742 = vmatpush3.msra.mxu1 %v770_v59 }
 0x6e4   :  { %8721 = vmatmul.mubr.f32.gmra.mrb[66].mxu1 %v2815_v15 }
 0x6e5   :  { %8723 = vmatprep.mubr.f32.mxu1 %v2816_v35 }
 0x6e8   :  { %8724 = vmatmul.mubr.f32.gmra.mrb[68].mxu1 %v2817_v38  ;;  %v8816_v52 = vpop.f32.mrb[90].mxu0 }
 0x6e9   :  { %v3514_v45 = vmul.f32 0.35355338, %v8816_v52  ;;  %v3474_v13 = vpop.f32.mrb[91].mxu0 }
 0x6ea   :  { %v3513_v4 = vmul.f32 0.35355338, %v3474_v13 }
 0x6eb   :  { %v12320_v27 = vsel %vm11281_vm0, %v3514_v45, -1e+09  ;;  %vm13726_vm0 = vnez %v13648_v29 }
 0x6ec   :  { %3557 = vmax.xlane.f32.xlu0 %v12320_v27  ;;  %v12325_v57 = vsel %vm13645_vm3, %v3513_v4, -1e+09  ;;  %vm13727_vm3 = vmmov %vm13698_vm1 }
 0x6ed   :  { %3555 = vmax.xlane.f32.xlu1 %v12325_v57 }
 0x6f4   :  { %v2781_v53 = vpop.xlane.xlu0 %2780 }
 0x6f5   :  { %10296 = vrcp.f32 %v2781_v53 }
 0x6f8   :  { %v2787_v36 = vpop.xlane.xlu0 %2786 }
 0x6ff   :  { %v10297_v14 = vpop.eup %10296 }
 0x700   :  { %v2779_v5 = vpop.xlane.xlu1 %2778  ;;  %v2820_v12 = vmul.f32 %v10297_v14, %v12163_v54 }
 0x701   :  { %10298 = vrcp.f32 %v2779_v5 }
 0x704   :  { %v2777_v17 = vpop.xlane.xlu1 %2776 }
 0x705   :  { %10300 = vrcp.f32 %v2777_v17 }
 0x708   :  { %v2783_v8 = vpop.xlane.xlu1 %2782 }
 0x709   :  { %10302 = vrcp.f32 %v2783_v8 }
 0x70a   :  { %10304 = vrcp.f32 %v2787_v36 }
 0x70b   :  { %v10299_v21 = vpop.eup %10298 }
 0x70c   :  { %v2785_v47 = vpop.xlane.xlu1 %2784  ;;  %v2819_v10 = vmul.f32 %v10299_v21, %v12172_v31 }
 0x70d   :  { %10306 = vrcp.f32 %v2785_v47 }
 0x70f   :  { %v10301_v20 = vpop.eup %10300 }
 0x710   :  { %v2789_v43 = vpop.xlane.xlu1 %2788  ;;  %v2818_v24 = vmul.f32 %v10301_v20, %v12175_v55 }
 0x711   :  { %10308 = vrcp.f32 %v2789_v43 }
 0x712   :  { %8726 = vmatprep.mubr.f32.mxu1 %v2818_v24 }
 0x713   :  { %v10303_v1 = vpop.eup %10302  ;;  %v2791_v48 = vpop.xlane.xlu0 %2790  ;;  %8727 = vmatmul.mubr.f32.gmra.mrb[70].mxu1 %v2819_v10 }
 0x714   :  { %10310 = vrcp.f32 %v2791_v48  ;;  %8729 = vmatprep.mubr.f32.mxu1 %v2820_v12  ;;  %v2821_v0 = vmul.f32 %v10303_v1, %v12179_v9  ;;  %v10305_v56 = vpop.eup %10304  ;;  %v3544_v20 = vpop.xlane.xlu1 %3543 }
 0x715   :  { %v2823_v55 = vmul.f32 %v10305_v56, %v12167_v6 }
 0x717   :  { %v10307_v49 = vpop.eup %10306  ;;  %8730 = vmatmul.mubr.f32.gmra.mrb[72].mxu1 %v2821_v0 }
 0x718   :  { %v2822_v18 = vmul.f32 %v10307_v49, %v12182_v30  ;;  %v3548_v43 = vpop.xlane.xlu1 %3547  ;;  %v3571_v49 = vsub.f32 %v12199_v32, %v3544_v20 }
 0x71a   :  { %8732 = vmatprep.mubr.f32.mxu1 %v2822_v18 }
 0x71b   :  { %v10309_v58 = vpop.eup %10308  ;;  %v2793_v31 = vpop.xlane.xlu0 %2792  ;;  %8733 = vmatmul.mubr.f32.gmra.mrb[74].mxu1 %v2823_v55  ;;  %v3591_v55 = vmul.f32 1.442695, %v3571_v49 }
 0x71c   :  { %10312 = vrcp.f32 %v2793_v31  ;;  %v2824_v54 = vmul.f32 %v10309_v58, %v12188_v42  ;;  %v3573_v58 = vsub.f32 %v12204_v61, %v3548_v43 }
 0x71e   :  { %v10311_v19 = vpop.eup %10310  ;;  %8735 = vmatprep.mubr.f32.mxu1 %v2824_v54 }
 0x71f   :  { %v2795_v40 = vpop.xlane.xlu0 %2794  ;;  %v2825_v15 = vmul.f32 %v10311_v19, %v12193_v60  ;;  %v3595_v19 = vmul.f32 1.442695, %v3573_v58 }
 0x720   :  { %10314 = vrcp.f32 %v2795_v40 }
 0x721   :  { %8736 = vmatmul.mubr.f32.gmra.mrb[76].mxu1 %v2825_v15  ;;  %v8819_v9 = vpop.f32.mrb[92].mxu0 }
 0x722   :  { %v3516_v25 = vmul.f32 0.35355338, %v8819_v9  ;;  %v3484_v35 = vpop.f32.mrb[93].mxu0 }
 0x723   :  { %v3515_v30 = vmul.f32 0.35355338, %v3484_v35 }
 0x724   :  { %v12338_v6 = vsel %vm13647_vm14, %v3516_v25, -1e+09  ;;  %vm13728_vm14 = vmmov %vm13698_vm1 }
 0x725   :  { %3561 = vmax.xlane.f32.xlu0 %v12338_v6  ;;  %v12343_v42 = vsel %vm13726_vm0, %v3515_v30, -1e+09  ;;  %vm13741_vm0 = vmmov %vm13698_vm1 }
 0x726   :  { %v10313_v38 = vpop.eup %10312  ;;  %3559 = vmax.xlane.f32.xlu1 %v12343_v42 }
 0x727   :  { %v2826_v60 = vmul.f32 %v10313_v38, %v12211_v62 }
 0x729   :  { %8738 = vmatprep.mubr.f32.mxu1 %v2826_v60 }
 0x72a   :  { %v10315_v52 = vpop.eup %10314 }
 0x72b   :  { %v2827_v45 = vmul.f32 %v10315_v52, %v12216_v51  ;;  %v3536_v51 = vpop.xlane.xlu0 %3535 }
 0x72d   :  { %8739 = vmatmul.mubr.f32.gmra.mrb[78].mxu1 %v2827_v45 }
 0x72f   :  { %v3538_v41 = vpop.xlane.xlu0 %3537 }
 0x733   :  { %v3540_v63 = vpop.xlane.xlu0 %3539 }
 0x737   :  { %v3542_v17 = vpop.xlane.xlu0 %3541 }
 0x73b   :  { %v3546_v47 = vpop.xlane.xlu0 %3545 }
 0x73f   :  { %v3550_v31 = vpop.xlane.xlu0 %3549 }
 0x740   :  { %v3574_v40 = vsub.f32 %v12260_v50, %v3550_v31 }
 0x741   :  { %v3552_v12 = vpop.xlane.xlu1 %3551 }
 0x742   :  { %v3597_v15 = vmul.f32 1.442695, %v3574_v40  ;;  %v3575_v9 = vsub.f32 %v12273_v7, %v3552_v12 }
 0x743   :  { %v3554_v32 = vpop.xlane.xlu0 %3553 }
 0x744   :  { %v3576_v25 = vsub.f32 %v12267_v22, %v3554_v32  ;;  %v3599_v35 = vmul.f32 1.442695, %v3575_v9 }
 0x746   :  { %v3601_v61 = vmul.f32 1.442695, %v3576_v25 }
 0x756   :  { %v8822_v13 = vpop.f32.mrb[94].mxu0 }
 0x757   :  { %v3518_v29 = vmul.f32 0.35355338, %v8822_v13  ;;  %v3494_v4 = vpop.f32.mrb[95].mxu0 }
 0x758   :  { %v3517_v53 = vmul.f32 0.35355338, %v3494_v4 }
 0x759   :  { %v12353_v5 = vsel %vm13651_vm6, %v3518_v29, -1e+09  ;;  %vm13729_vm6 = vmmov %vm13698_vm1 }
 0x75a   :  { %3565 = vmax.xlane.f32.xlu0 %v12353_v5  ;;  %v12358_v62 = vsel %vm13653_vm11, %v3517_v53, -1e+09  ;;  %vm13730_vm11 = vmmov %vm13698_vm1 }
 0x75b   :  { %3563 = vmax.xlane.f32.xlu1 %v12358_v62 }
 0x76c   :  { %10078 = vrot.lane.b32.xlu1 %v11036_v33, %s10503_s28  ;;  %v3568_v33 = vsub.f32 %v12233_v26, %v3538_v41 }
 0x76e   :  { %v3585_v8 = vmul.f32 1.442695, %v3568_v33 }
 0x770   :  { %10083 = vrot.lane.b32.xlu0 %v13578_v37, %s10503_s28  ;;  %10088 = vrot.lane.b32.xlu1 %v13663_v28, %s10503_s28  ;;  %v3570_v37 = vsub.f32 %v12247_v46, %v3542_v17  ;;  %10316 = vpow2.f32 %v3585_v8  ;;  %v3569_v28 = vsub.f32 %v12241_v44, %v3540_v63 }
 0x772   :  { %v3589_v36 = vmul.f32 1.442695, %v3570_v37  ;;  %v3587_v14 = vmul.f32 1.442695, %v3569_v28 }
 0x774   :  { %10093 = vrot.lane.b32.xlu0 %v13662_v23, %s10503_s28  ;;  %10098 = vrot.lane.b32.xlu1 %v13665_v11, %s10503_s28  ;;  %v3567_v23 = vsub.f32 %v12225_v16, %v3536_v51  ;;  %10318 = vpow2.f32 %v3589_v36  ;;  %v3572_v11 = vsub.f32 %v12255_v2, %v3546_v47 }
 0x775   :  { %10320 = vpow2.f32 %v3587_v14 }
 0x776   :  { %v3583_v21 = vmul.f32 1.442695, %v3567_v23 }
 0x778   :  { %10103 = vrot.lane.b32.xlu1 %v13664_v39, %s10503_s28  ;;  %v3593_v39 = vmul.f32 1.442695, %v3572_v11  ;;  %10322 = vpow2.f32 %v3583_v21 }
 0x779   :  { %v3558_v50 = vpop.xlane.xlu0 %3557 }
 0x77a   :  { %v12378_v26 = vpop.eup %10316  ;;  %10324 = vpow2.f32 %v3593_v39  ;;  %v3556_v0 = vpop.xlane.xlu1 %3555  ;;  %v3578_v22 = vsub.f32 %v12320_v27, %v3558_v50 }
 0x77b   :  { %10326 = vpow2.f32 %v3591_v55 }
 0x77c   :  { %v3605_v59 = vmul.f32 1.442695, %v3578_v22 }
 0x77e   :  { %v12381_v46 = vpop.eup %10318 }
 0x77f   :  { %v12384_v44 = vpop.eup %10320 }
 0x782   :  { %v12386_v16 = vpop.eup %10322 }
 0x784   :  { %v12390_v2 = vpop.eup %10324 }
 0x785   :  { %v12409_v30 = vpop.eup %10326 }
 0x793   :  { %3617 = vadd.xlane.f32.xlu0 %v12378_v26 }
 0x797   :  { %3621 = vadd.xlane.f32.xlu0 %v12381_v46 }
 0x79b   :  { %3619 = vadd.xlane.f32.xlu0 %v12384_v44 }
 0x79c   :  { %3615 = vadd.xlane.f32.xlu1 %v12386_v16 }
 0x79f   :  { %3625 = vadd.xlane.f32.xlu0 %v12390_v2 }
 0x7ad   :  { %10108 = vrot.lane.b32.xlu1 %v13671_v3, %s10503_s28 }
 0x7b2   :  { %v3562_v52 = vpop.xlane.xlu0 %3561 }
 0x7b3   :  { %v8719_v24 = vpop.f32.mrb[64].mxu1  ;;  %v3560_v18 = vpop.xlane.xlu1 %3559 }
 0x7b4   :  { %v2942_v10 = vpop.f32.mrb[65].mxu1 }
 0x7b5   :  { %10113 = vrot.lane.b32.xlu0 %v13673_v34, %s10503_s28  ;;  %8743 = vmatprep.mubr.msk.f32.mxu1 %vm13727_vm3, %v2942_v10  ;;  %v3579_v34 = vsub.f32 %v12343_v42, %v3560_v18  ;;  %v3577_v42 = vsub.f32 %v12325_v57, %v3556_v0  ;;  %v3580_v57 = vsub.f32 %v12338_v6, %v3562_v52  ;;  %vm13742_vm3 = vmmov %vm13741_vm0 }
 0x7b6   :  { %8744 = vmatmul.mubr.msk.f32.vlgmr.msra.gmra.mrb[48].mxu1 %vm13728_vm14, %v8719_v24  ;;  %vm13743_vm14 = vmmov %vm13741_vm0 }
 0x7b7   :  { %v8722_v1 = vpop.f32.mrb[66].mxu1  ;;  %v3607_v54 = vmul.f32 1.442695, %v3579_v34  ;;  %v3603_v7 = vmul.f32 1.442695, %v3577_v42 }
 0x7b8   :  { %v2952_v48 = vpop.f32.mrb[67].mxu1  ;;  %v3609_v29 = vmul.f32 1.442695, %v3580_v57 }
 0x7b9   :  { %8746 = vmatprep.mubr.msk.f32.mxu1 %vm13729_vm6, %v2952_v48  ;;  %10328 = vpow2.f32 %v3607_v54  ;;  %vm13744_vm6 = vmmov %vm13741_vm0 }
 0x7ba   :  { %8747 = vmatmul.mubr.msk.f32.gmra.mrb[50].mxu1 %vm13730_vm11, %v8722_v1  ;;  %10330 = vpow2.f32 %v3595_v19  ;;  %vm13745_vm11 = vmmov %vm13741_vm0 }
 0x7bb   :  { %v8725_v56 = vpop.f32.mrb[68].mxu1  ;;  %10332 = vpow2.f32 %v3597_v15 }
 0x7bc   :  { %v2962_v3 = vpop.f32.mrb[69].mxu1  ;;  %10334 = vpow2.f32 %v3599_v35 }
 0x7bd   :  { %8749 = vmatprep.mubr.msk.f32.mxu1 %vm13731_vm13, %v2962_v3  ;;  %10336 = vpow2.f32 %v3601_v61  ;;  %vm13746_vm13 = vmmov %vm13741_vm0 }
 0x7be   :  { %8750 = vmatmul.mubr.msk.f32.gmra.mrb[52].mxu1 %vm13732_vm10, %v8725_v56  ;;  %10338 = vpow2.f32 %v3603_v7  ;;  %vm13747_vm10 = vmmov %vm13741_vm0 }
 0x7bf   :  { %10340 = vpow2.f32 %v3605_v59 }
 0x7c0   :  { %10342 = vpow2.f32 %v3609_v29 }
 0x7c3   :  { %v12413_v38 = vpop.eup %10328 }
 0x7c4   :  { %v12415_v60 = vpop.eup %10330 }
 0x7c5   :  { %v12420_v45 = vpop.eup %10332 }
 0x7c6   :  { %v12424_v13 = vpop.eup %10334 }
 0x7c7   :  { %v12427_v4 = vpop.eup %10336 }
 0x7c8   :  { %v12430_v27 = vpop.eup %10338 }
 0x7c9   :  { %v12433_v63 = vpop.eup %10340 }
 0x7ca   :  { %v12440_v23 = vpop.eup %10342 }
 0x7d1   :  { %3623 = vadd.xlane.f32.xlu1 %v12409_v30 }
 0x7d4   :  { %3639 = vadd.xlane.f32.xlu0 %v12413_v38 }
 0x7d5   :  { %3627 = vadd.xlane.f32.xlu1 %v12415_v60 }
 0x7d9   :  { %3629 = vadd.xlane.f32.xlu1 %v12420_v45 }
 0x7dd   :  { %3631 = vadd.xlane.f32.xlu1 %v12424_v13 }
 0x7e1   :  { %3633 = vadd.xlane.f32.xlu1 %v12427_v4 }
 0x7e5   :  { %3635 = vadd.xlane.f32.xlu1 %v12430_v27 }
 0x7e6   :  { %v8728_v53 = vpop.f32.mrb[70].mxu1 }
 0x7e7   :  { %v3566_v51 = vpop.xlane.xlu0 %3565  ;;  %v2972_v41 = vpop.f32.mrb[71].mxu1 }
 0x7e8   :  { %v3582_v6 = vsub.f32 %v12353_v5, %v3566_v51  ;;  %v3564_v33 = vpop.xlane.xlu1 %3563  ;;  %8752 = vmatprep.mubr.msk.f32.mxu1 %vm13733_vm5, %v2972_v41  ;;  %vm13748_vm5 = vmmov %vm13741_vm0 }
 0x7e9   :  { %v3581_v17 = vsub.f32 %v12358_v62, %v3564_v33  ;;  %3637 = vadd.xlane.f32.xlu1 %v12433_v63  ;;  %8753 = vmatmul.mubr.msk.f32.gmra.mrb[54].mxu1 %vm13734_vm12, %v8728_v53  ;;  %vm13749_vm12 = vmmov %vm13741_vm0 }
 0x7ea   :  { %v8731_v8 = vpop.f32.mrb[72].mxu1  ;;  %v3613_v47 = vmul.f32 1.442695, %v3582_v6 }
 0x7eb   :  { %v3611_v37 = vmul.f32 1.442695, %v3581_v17  ;;  %v10084_v28 = vpop.permute.xlu0 %10083  ;;  %v2982_v36 = vpop.f32.mrb[73].mxu1 }
 0x7ec   :  { %v10086_v14 = vunpack.i.h.bf16 %v10084_v28  ;;  %v10079_v11 = vpop.permute.xlu1 %10078  ;;  %8755 = vmatprep.mubr.msk.f32.mxu1 %vm13735_vm15, %v2982_v36  ;;  %v10085_v5 = vunpack.i.l.bf16 %v10084_v28  ;;  %vm13750_vm15 = vmmov %vm13741_vm0 }
 0x7ed   :  { %10344 = vpow2.f32 %v3611_v37  ;;  %v10081_v21 = vunpack.i.h.bf16 %v10079_v11  ;;  %v10080_v39 = vunpack.i.l.bf16 %v10079_v11  ;;  %3641 = vadd.xlane.f32.xlu1 %v12440_v23  ;;  %8756 = vmatmul.mubr.msk.f32.gmra.mrb[56].mxu1 %vm13736_vm2, %v8731_v8  ;;  %vm13751_vm2 = vmmov %vm13741_vm0 }
 0x7ee   :  { %v8734_v62 = vpop.f32.mrb[74].mxu1  ;;  %10346 = vpow2.f32 %v3613_v47  ;;  %v9563_v10 = vpack.c.bf16 %v10086_v14, %v10085_v5 }
 0x7ef   :  { %v2992_v20 = vpop.f32.mrb[75].mxu1  ;;  %v9559_v43 = vpack.c.bf16 %v10081_v21, %v10080_v39  ;;  %v10094_v48 = vpop.permute.xlu0 %10093 }
 0x7f0   :  { %v10089_v24 = vpop.permute.xlu1 %10088  ;;  %8758 = vmatprep.mubr.msk.f32.mxu1 %vm13737_vm8, %v2992_v20  ;;  %v10096_v3 = vunpack.i.h.bf16 %v10094_v48  ;;  %v10095_v49 = vunpack.i.l.bf16 %v10094_v48  ;;  %vm13752_vm8 = vmmov %vm13741_vm0 }
 0x7f1   :  { %v10091_v12 = vunpack.i.h.bf16 %v10089_v24  ;;  %v10090_v1 = vunpack.i.l.bf16 %v10089_v24  ;;  %8759 = vmatmul.mubr.msk.f32.gmra.mrb[58].mxu1 %vm13698_vm1, %v8734_v62  ;;  %9560 = vmatprep.subr.bf16.mxu1 %v9559_v43  ;;  %vm13753_vm1 = vmmov %vm13741_vm0 }
 0x7f2   :  { %9562 = vmatpush3.bf16.msra.mxu1 %v9559_v43  ;;  %v9571_v58 = vpack.c.bf16 %v10096_v3, %v10095_v49 }
 0x7f3   :  { %9564 = vmatprep.subr.bf16.mxu1 %v9563_v10  ;;  %v9567_v34 = vpack.c.bf16 %v10091_v12, %v10090_v1 }
 0x7f4   :  { %v10099_v0 = vpop.permute.xlu1 %10098  ;;  %v8737_v56 = vpop.f32.mrb[76].mxu1 }
 0x7f5   :  { %v3002_v18 = vpop.f32.mrb[77].mxu1  ;;  %v10101_v31 = vunpack.i.h.bf16 %v10099_v0  ;;  %v10100_v54 = vunpack.i.l.bf16 %v10099_v0 }
 0x7f6   :  { %8761 = vmatprep.mubr.msk.f32.mxu1 %vm13738_vm7, %v3002_v18  ;;  %9566 = vmatpush3.bf16.msra.mxu1 %v9563_v10  ;;  %vm13754_vm7 = vmmov %vm13741_vm0 }
 0x7f7   :  { %v12448_v55 = vpop.eup %10344  ;;  %8762 = vmatmul.mubr.msk.f32.gmra.mrb[60].mxu1 %vm13739_vm9, %v8737_v56  ;;  %9568 = vmatprep.subr.bf16.mxu1 %v9567_v34  ;;  %v9575_v32 = vpack.c.bf16 %v10101_v31, %v10100_v54  ;;  %vm13755_vm9 = vmmov %vm13741_vm0 }
 0x7f8   :  { %3643 = vadd.xlane.f32.xlu1 %v12448_v55  ;;  %v10104_v19 = vpop.permute.xlu1 %10103  ;;  %v12452_v40 = vpop.eup %10346 }
 0x7f9   :  { %v10106_v15 = vunpack.i.h.bf16 %v10104_v19  ;;  %v10105_v9 = vunpack.i.l.bf16 %v10104_v19 }
 0x7fa   :  { %9570 = vmatpush3.bf16.msra.mxu1 %v9567_v34 }
 0x7fb   :  { %9572 = vmatprep.subr.bf16.mxu1 %v9571_v58  ;;  %v9579_v61 = vpack.c.bf16 %v10106_v15, %v10105_v9 }
 0x7fc   :  { %3645 = vadd.xlane.f32.xlu1 %v12452_v40 }
 0x7fe   :  { %9574 = vmatpush3.bf16.msra.mxu1 %v9571_v58 }
 0x7ff   :  { %9576 = vmatprep.subr.bf16.mxu1 %v9575_v32 }
 0x800   :  { %v8740_v25 = vpop.f32.mrb[78].mxu1 }
 0x801   :  { %v3012_v35 = vpop.f32.mrb[79].mxu1 }
 0x802   :  { %8764 = vmatprep.mubr.msk.f32.mxu1 %vm13740_vm4, %v3012_v35  ;;  %9578 = vmatpush3.bf16.msra.mxu1 %v9575_v32  ;;  %vm13756_vm4 = vmmov %vm13741_vm0 }
 0x803   :  { %8765 = vmatmul.mubr.msk.f32.gmra.mrb[62].mxu1 %vm13741_vm0, %v8740_v25  ;;  %9580 = vmatprep.subr.bf16.mxu1 %v9579_v61 }
 0x806   :  { %9582 = vmatpush3.bf16.msra.mxu1 %v9579_v61 }
 0x820   :  { %v3618_v42 = vpop.xlane.xlu0 %3617 }
 0x824   :  { %v3622_v50 = vpop.xlane.xlu0 %3621 }
 0x828   :  { %v3620_v22 = vpop.xlane.xlu0 %3619 }
 0x829   :  { %v3616_v7 = vpop.xlane.xlu1 %3615 }
 0x82a   :  { %10348 = vrcp.f32 %v3616_v7 }
 0x82b   :  { %10350 = vrcp.f32 %v3618_v42 }
 0x82c   :  { %10352 = vrcp.f32 %v3620_v22  ;;  %v3626_v52 = vpop.xlane.xlu0 %3625 }
 0x82d   :  { %v10109_v59 = vpop.permute.xlu1 %10108  ;;  %10354 = vrcp.f32 %v3622_v50 }
 0x82e   :  { %v10111_v57 = vunpack.i.h.bf16 %v10109_v59  ;;  %v10110_v29 = vunpack.i.l.bf16 %v10109_v59  ;;  %10356 = vrcp.f32 %v3626_v52 }
 0x830   :  { %v10114_v53 = vpop.permute.xlu0 %10113  ;;  %v9583_v51 = vpack.c.bf16 %v10111_v57, %v10110_v29 }
 0x831   :  { %v10116_v41 = vunpack.i.h.bf16 %v10114_v53  ;;  %v10115_v6 = vunpack.i.l.bf16 %v10114_v53 }
 0x832   :  { %9584 = vmatprep.subr.bf16.mxu1 %v9583_v51 }
 0x833   :  { %v9587_v33 = vpack.c.bf16 %v10116_v41, %v10115_v6  ;;  %9586 = vmatpush3.bf16.msra.mxu1 %v9583_v51 }
 0x834   :  { %v10349_v17 = vpop.eup %10348 }
 0x835   :  { %v10351_v8 = vpop.eup %10350  ;;  %9588 = vmatprep.subr.bf16.mxu1 %v9587_v33  ;;  %v3663_v37 = vmul.f32 %v10349_v17, %v12386_v16  ;;  %v13757_v17 = vld [vmem:[#allocation7_spill] sm:$0xff] }
 0x836   :  { %v10353_v28 = vpop.eup %10352  ;;  %v3664_v36 = vmul.f32 %v10351_v8, %v12378_v26 }
 0x837   :  { %9590 = vmatpush3.bf16.msra.mxu1 %v9587_v33  ;;  %8855 = vmatprep.mubr.f32.mxu1 %v3663_v37  ;;  %v10355_v47 = vpop.eup %10354  ;;  %v3665_v14 = vmul.f32 %v10353_v28, %v12384_v44  ;;  %v13758_v37 = vld [vmem:[#allocation8_spill] sm:$0xff] }
 0x838   :  { %v3666_v11 = vmul.f32 %v10355_v47, %v12381_v46  ;;  %v10357_v16 = vpop.eup %10356  ;;  %v13760_v47 = vld [vmem:[#allocation5_spill] sm:$0xff] }
 0x839   :  { %v3668_v44 = vmul.f32 %v10357_v16, %v12390_v2 }
 0x83a   :  { %8856 = vmatmul.mubr.f32.vlgmr.msra.gmra.mrb[80].mxu1 %v3664_v36 }
 0x83b   :  { %8858 = vmatprep.mubr.f32.mxu1 %v3665_v14 }
 0x83e   :  { %8859 = vmatmul.mubr.f32.gmra.mrb[82].mxu1 %v3666_v11 }
 0x85e   :  { %v3624_v5 = vpop.xlane.xlu1 %3623 }
 0x85f   :  { %10358 = vrcp.f32 %v3624_v5  ;;  %v13762_v5 = vld [vmem:[#allocation6_spill] sm:$0xff] }
 0x861   :  { %v3640_v48 = vpop.xlane.xlu0 %3639 }
 0x862   :  { %v3628_v21 = vpop.xlane.xlu1 %3627 }
 0x863   :  { %10360 = vrcp.f32 %v3628_v21 }
 0x866   :  { %v3630_v39 = vpop.xlane.xlu1 %3629 }
 0x867   :  { %10362 = vrcp.f32 %v3630_v39 }
 0x869   :  { %v10359_v62 = vpop.eup %10358 }
 0x86a   :  { %v3632_v20 = vpop.xlane.xlu1 %3631  ;;  %v3667_v26 = vmul.f32 %v10359_v62, %v12409_v30 }
 0x86b   :  { %10364 = vrcp.f32 %v3632_v20  ;;  %v13765_v20 = vld [vmem:[#allocation10_spill] sm:$0xff] }
 0x86c   :  { %8861 = vmatprep.mubr.f32.mxu1 %v3667_v26 }
 0x86d   :  { %v10361_v43 = vpop.eup %10360  ;;  %8862 = vmatmul.mubr.f32.gmra.mrb[84].mxu1 %v3668_v44 }
 0x86e   :  { %v3634_v46 = vpop.xlane.xlu1 %3633  ;;  %v3669_v24 = vmul.f32 %v10361_v43, %v12415_v60  ;;  %v13766_v43 = vld [vmem:[#allocation9_spill] sm:$0xff] }
 0x86f   :  { %10366 = vrcp.f32 %v3634_v46 }
 0x870   :  { %8864 = vmatprep.mubr.f32.mxu1 %v3669_v24 }
 0x871   :  { %v10363_v10 = vpop.eup %10362 }
 0x872   :  { %v3636_v12 = vpop.xlane.xlu1 %3635  ;;  %v3670_v1 = vmul.f32 %v10363_v10, %v12420_v45 }
 0x873   :  { %10368 = vrcp.f32 %v3636_v12 }
 0x874   :  { %8865 = vmatmul.mubr.f32.gmra.mrb[86].mxu1 %v3670_v1  ;;  %10370 = vrcp.f32 %v3640_v48  ;;  %v13769_v1 = vld [vmem:[#allocation12_spill] sm:$0xff] }
 0x875   :  { %v10365_v0 = vpop.eup %10364 }
 0x876   :  { %v3638_v30 = vpop.xlane.xlu1 %3637  ;;  %v3671_v2 = vmul.f32 %v10365_v0, %v12424_v13 }
 0x877   :  { %10372 = vrcp.f32 %v3638_v30  ;;  %v13770_v30 = vld [vmem:[#allocation11_spill] sm:$0xff] }
 0x878   :  { %8867 = vmatprep.mubr.f32.mxu1 %v3671_v2 }
 0x879   :  { %v10367_v56 = vpop.eup %10366 }
 0x87a   :  { %v3642_v3 = vpop.xlane.xlu1 %3641  ;;  %v3672_v60 = vmul.f32 %v10367_v56, %v12427_v4 }
 0x87b   :  { %10374 = vrcp.f32 %v3642_v3 }
 0x87c   :  { %8868 = vmatmul.mubr.f32.gmra.mrb[88].mxu1 %v3672_v60 }
 0x87d   :  { %v10369_v49 = vpop.eup %10368 }
 0x87e   :  { %v3673_v18 = vmul.f32 %v10369_v49, %v12430_v27  ;;  %v10371_v45 = vpop.eup %10370  ;;  %v771_v27 = vld [vmem:[%s13661_s26 + $0x18] sm:$0xff] }
 0x87f   :  { %v3675_v31 = vmul.f32 %v10371_v45, %v12413_v38  ;;  %8879 = vmatprep.subr.mxu1 %v771_v27  ;;  %v13773_v49 = vld [vmem:[#allocation14_spill] sm:$0xff] }
 0x880   :  { %8870 = vmatprep.mubr.f32.mxu1 %v3673_v18  ;;  %8880 = vmatpush3.msra.mxu1 %v771_v27 }
 0x881   :  { %v10373_v34 = vpop.eup %10372 }
 0x882   :  { %v3674_v58 = vmul.f32 %v10373_v34, %v12433_v63  ;;  %v13774_v34 = vld [vmem:[#allocation13_spill] sm:$0xff] }
 0x884   :  { %8871 = vmatmul.mubr.f32.gmra.mrb[90].mxu1 %v3674_v58 }
 0x885   :  { %v10375_v13 = vpop.eup %10374  ;;  %v3644_v54 = vpop.xlane.xlu1 %3643  ;;  %8873 = vmatprep.mubr.f32.mxu1 %v3675_v31 }
 0x886   :  { %10376 = vrcp.f32 %v3644_v54  ;;  %v3676_v19 = vmul.f32 %v10375_v13, %v12440_v23 }
 0x888   :  { %8874 = vmatmul.mubr.f32.gmra.mrb[92].mxu1 %v3676_v19  ;;  %v13777_v19 = vld [vmem:[#allocation16_spill] sm:$0xff] }
 0x889   :  { %v3646_v4 = vpop.xlane.xlu1 %3645 }
 0x88a   :  { %10378 = vrcp.f32 %v3646_v4 }
 0x890   :  { %v10377_v15 = vpop.eup %10376 }
 0x891   :  { %v3677_v63 = vmul.f32 %v10377_v15, %v12448_v55  ;;  %v13778_v15 = vld [vmem:[#allocation15_spill] sm:$0xff] }
 0x893   :  { %8876 = vmatprep.mubr.f32.mxu1 %v3677_v63 }
 0x894   :  { %v10379_v38 = vpop.eup %10378 }
 0x895   :  { %v3678_v9 = vmul.f32 %v10379_v38, %v12452_v40 }
 0x897   :  { %8877 = vmatmul.mubr.f32.gmra.mrb[94].mxu1 %v3678_v9 }
 0x90d   :  { %v8857_v32 = vpop.f32.mrb[80].mxu1 }
 0x90e   :  { %v3793_v25 = vpop.f32.mrb[81].mxu1 }
 0x90f   :  { %8881 = vmatprep.mubr.msk.f32.mxu1 %vm13742_vm3, %v3793_v25  ;;  %vm13759_vm3 = vcmask 261120   ;;  %v13781_v25 = vld [vmem:[#allocation18_spill] sm:$0xff] }
 0x910   :  { %8882 = vmatmul.mubr.msk.f32.vlgmr.msra.gmra.mrb[48].mxu1 %vm13743_vm14, %v8857_v32  ;;  %vm13761_vm14 = vmmov %vm13759_vm3 }
 0x911   :  { %v8860_v23 = vpop.f32.mrb[82].mxu1 }
 0x912   :  { %v3803_v35 = vpop.f32.mrb[83].mxu1 }
 0x913   :  { %8884 = vmatprep.mubr.msk.f32.mxu1 %vm13744_vm6, %v3803_v35  ;;  %vm13763_vm6 = vmmov %vm13759_vm3 }
 0x914   :  { %8885 = vmatmul.mubr.msk.f32.gmra.mrb[50].mxu1 %vm13745_vm11, %v8860_v23  ;;  %vm13764_vm11 = vmmov %vm13759_vm3 }
 0x940   :  { %v8863_v61 = vpop.f32.mrb[84].mxu1 }
 0x941   :  { %v3813_v42 = vpop.f32.mrb[85].mxu1 }
 0x942   :  { %8887 = vmatprep.mubr.msk.f32.mxu1 %vm13746_vm13, %v3813_v42  ;;  %vm13767_vm13 = vmmov %vm13759_vm3 }
 0x943   :  { %8888 = vmatmul.mubr.msk.f32.gmra.mrb[52].mxu1 %vm13747_vm10, %v8863_v61  ;;  %vm13768_vm10 = vmmov %vm13759_vm3  ;;  %v13782_v61 = vld [vmem:[#allocation17_spill] sm:$0xff] }
 0x947   :  { %v8866_v55 = vpop.f32.mrb[86].mxu1 }
 0x948   :  { %v3823_v40 = vpop.f32.mrb[87].mxu1 }
 0x949   :  { %8890 = vmatprep.mubr.msk.f32.mxu1 %vm13748_vm5, %v3823_v40  ;;  %vm13771_vm5 = vmmov %vm13759_vm3 }
 0x94a   :  { %8891 = vmatmul.mubr.msk.f32.gmra.mrb[54].mxu1 %vm13749_vm12, %v8866_v55  ;;  %vm13772_vm12 = vmmov %vm13759_vm3 }
 0x94f   :  { %v8869_v50 = vpop.f32.mrb[88].mxu1 }
 0x950   :  { %v3833_v22 = vpop.f32.mrb[89].mxu1 }
 0x951   :  { %8893 = vmatprep.mubr.msk.f32.mxu1 %vm13750_vm15, %v3833_v22  ;;  %vm13775_vm15 = vmmov %vm13759_vm3  ;;  %v13785_v22 = vld [vmem:[#allocation20_spill] sm:$0xff] }
 0x952   :  { %8894 = vmatmul.mubr.msk.f32.gmra.mrb[56].mxu1 %vm13751_vm2, %v8869_v50  ;;  %vm13776_vm2 = vmmov %vm13759_vm3 }
 0x957   :  { %v8872_v7 = vpop.f32.mrb[90].mxu1 }
 0x958   :  { %v3843_v52 = vpop.f32.mrb[91].mxu1 }
 0x959   :  { %8896 = vmatprep.mubr.msk.f32.mxu1 %vm13752_vm8, %v3843_v52  ;;  %vm13779_vm8 = vmmov %vm13776_vm2 }
 0x95a   :  { %8897 = vmatmul.mubr.msk.f32.gmra.mrb[58].mxu1 %vm13753_vm1, %v8872_v7  ;;  %vm13780_vm1 = vmmov %vm13776_vm2 }
 0x95b   :  { %v8875_v59 = vpop.f32.mrb[92].mxu1 }
 0x95c   :  { %v3853_v57 = vpop.f32.mrb[93].mxu1 }
 0x95d   :  { %8899 = vmatprep.mubr.msk.f32.mxu1 %vm13754_vm7, %v3853_v57  ;;  %vm13783_vm7 = vmmov %vm13780_vm1 }
 0x95e   :  { %8900 = vmatmul.mubr.msk.f32.gmra.mrb[60].mxu1 %vm13755_vm9, %v8875_v59  ;;  %vm13784_vm9 = vmmov %vm13780_vm1  ;;  %v13786_v59 = vld [vmem:[#allocation19_spill] sm:$0xff] }
 0x96a   :  { %v8878_v29 = vpop.f32.mrb[94].mxu1 }
 0x96b   :  { %v3863_v53 = vpop.f32.mrb[95].mxu1 }
 0x96c   :  { %8902 = vmatprep.mubr.msk.f32.mxu1 %vm13756_vm4, %v3863_v53  ;;  %vm13787_vm4 = vmmov %vm13780_vm1 }
 0x96d   :  { %8903 = vmatmul.mubr.msk.f32.gmra.mrb[62].mxu1 %vm13741_vm0, %v8878_v29  ;;  %vm13788_vm0 = vmmov %vm13780_vm1 }
 0x9e3   :  { %v8883_v51 = vpop.f32.mrb[48].mxu1 }
 0x9e4   :  { %v3986_v41 = vpop.f32.mrb[49].mxu1  ;;  %v12503_v21 = vadd.f32 %v8883_v51, %v13762_v5 }
 0x9e5   :  { %v12498_v14 = vadd.f32 %v3986_v41, %v13760_v47 }
 0x9e6   :  { %v4102_v16 = vsel %vm13764_vm11, %v12503_v21, 0.0  ;;  %vm13792_vm11 = vmmov %vm13788_vm0 }
 0x9e7   :  { %v8886_v6 = vpop.f32.mrb[50].mxu1  ;;  %v4099_v39 = vsel %vm13763_vm6, %v12498_v14, 0.0  ;;  %vm13791_vm6 = vmmov %vm13788_vm0 }
 0x9e8   :  { %v3996_v33 = vpop.f32.mrb[51].mxu1  ;;  %v12494_v28 = vadd.f32 %v8886_v6, %v13758_v37 }
 0x9e9   :  { %v4083_v8 = vadd.f32 %v3996_v33, %v13757_v17 }
 0x9ea   :  { %v4108_v11 = vsel %vm13761_vm14, %v12494_v28, 0.0  ;;  %vm13790_vm14 = vmmov %vm13788_vm0 }
 0x9eb   :  { %v4105_v36 = vsel %vm13759_vm3, %v4083_v8, 0.0  ;;  %vm13789_vm3 = vmmov %vm13788_vm0 }
 0x9ec   :  { %4106 = vadd.xlane.f32.xlu1 %v4105_v36 }
 0x9f0   :  { %4109 = vadd.xlane.f32.xlu1 %v4108_v11 }
 0x9f4   :  { %4100 = vadd.xlane.f32.xlu1 %v4099_v39 }
 0x9f8   :  { %4103 = vadd.xlane.f32.xlu1 %v4102_v16 }
 0xa16   :  { %v8889_v62 = vpop.f32.mrb[52].mxu1 }
 0xa17   :  { %v12510_v26 = vadd.f32 %v8889_v62, %v13765_v20  ;;  %v4006_v44 = vpop.f32.mrb[53].mxu1 }
 0xa18   :  { %v12513_v46 = vadd.f32 %v4006_v44, %v13766_v43 }
 0xa19   :  { %v4114_v24 = vsel %vm13767_vm13, %v12510_v26, 0.0  ;;  %vm13793_vm13 = vmmov %vm13788_vm0 }
 0xa1a   :  { %4115 = vadd.xlane.f32.xlu1 %v4114_v24  ;;  %v4111_v10 = vsel %vm13768_vm10, %v12513_v46, 0.0  ;;  %vm13794_vm10 = vmmov %vm13788_vm0 }
 0xa1b   :  { %4112 = vadd.xlane.f32.xlu0 %v4111_v10  ;;  %v7613_v10 = vld [vmem:[%s13369_s11 + $0x20] sm:$0xff] }
 0xa1d   :  { %v8892_v12 = vpop.f32.mrb[54].mxu1 }
 0xa1e   :  { %v12520_v48 = vadd.f32 %v8892_v12, %v13769_v1  ;;  %v4016_v0 = vpop.f32.mrb[55].mxu1  ;;  %v7614_v12 = vld [vmem:[%s13369_s11 + $0x28] sm:$0xff] }
 0xa1f   :  { %v12523_v2 = vadd.f32 %v4016_v0, %v13770_v30  ;;  %v9591_v1 = vpack.c.bf16 %v7614_v12, %v7613_v10  ;;  %v7616_v0 = vld [vmem:[%s13369_s11 + $0x38] sm:$0xff] }
 0xa20   :  { %v4120_v56 = vsel %vm13771_vm5, %v12520_v48, 0.0  ;;  %vm13795_vm5 = vmmov %vm13788_vm0 }
 0xa21   :  { %4121 = vadd.xlane.f32.xlu1 %v4120_v56  ;;  %v4117_v3 = vsel %vm13772_vm12, %v12523_v2, 0.0  ;;  %9592 = vmatprep.subr.bf16.mxu0 %v9591_v1  ;;  %v4352_v56 = vld [vmem:[%s13369_s11] sm:$0xff]  ;;  %vm13796_vm12 = vmmov %vm13788_vm0 }
 0xa22   :  { %4118 = vadd.xlane.f32.xlu0 %v4117_v3  ;;  %9594 = vmatpush3.bf16.msra.mxu0 %v9591_v1  ;;  %v4353_v3 = vld [vmem:[%s13369_s11 + $0x8] sm:$0xff] }
 0xa25   :  { %v8895_v60 = vpop.f32.mrb[56].mxu1 }
 0xa26   :  { %v12530_v18 = vadd.f32 %v8895_v60, %v13773_v49  ;;  %v4026_v45 = vpop.f32.mrb[57].mxu1  ;;  %v12610_v49 = vpack.c.bf16 %v4353_v3, %v4352_v56 }
 0xa27   :  { %v12533_v58 = vadd.f32 %v4026_v45, %v13774_v34 }
 0xa28   :  { %v4126_v31 = vsel %vm13775_vm15, %v12530_v18, 0.0  ;;  %vm13797_vm15 = vmmov %vm13788_vm0 }
 0xa29   :  { %4127 = vadd.xlane.f32.xlu1 %v4126_v31  ;;  %v4123_v13 = vsel %vm13776_vm2, %v12533_v58, 0.0  ;;  %vm13798_vm2 = vmmov %vm13788_vm0 }
 0xa2a   :  { %4124 = vadd.xlane.f32.xlu0 %v4123_v13 }
 0xa2d   :  { %v8898_v54 = vpop.f32.mrb[58].mxu1 }
 0xa2e   :  { %v12540_v4 = vadd.f32 %v8898_v54, %v13777_v19  ;;  %v4036_v27 = vpop.f32.mrb[59].mxu1 }
 0xa2f   :  { %v12543_v63 = vadd.f32 %v4036_v27, %v13778_v15 }
 0xa30   :  { %v4132_v38 = vsel %vm13779_vm8, %v12540_v4, 0.0  ;;  %vm13799_vm8 = vmmov %vm13788_vm0 }
 0xa31   :  { %4133 = vadd.xlane.f32.xlu1 %v4132_v38  ;;  %v8901_v9 = vpop.f32.mrb[60].mxu1  ;;  %v4129_v32 = vsel %vm13780_vm1, %v12543_v63, 0.0  ;;  %vm13800_vm1 = vmmov %vm13788_vm0 }
 0xa32   :  { %v12550_v23 = vadd.f32 %v8901_v9, %v13781_v25  ;;  %4130 = vadd.xlane.f32.xlu0 %v4129_v32  ;;  %v4046_v35 = vpop.f32.mrb[61].mxu1 }
 0xa33   :  { %v12553_v42 = vadd.f32 %v4046_v35, %v13782_v61 }
 0xa34   :  { %v4138_v55 = vsel %vm13783_vm7, %v12550_v23, 0.0  ;;  %vm13801_vm7 = vmmov %vm13788_vm0 }
 0xa35   :  { %4139 = vadd.xlane.f32.xlu1 %v4138_v55  ;;  %v4135_v40 = vsel %vm13784_vm9, %v12553_v42, 0.0  ;;  %vm13802_vm9 = vmmov %vm13788_vm0 }
 0xa36   :  { %4136 = vadd.xlane.f32.xlu0 %v4135_v40 }
 0xa40   :  { %v8904_v50 = vpop.f32.mrb[62].mxu1 }
 0xa41   :  { %v12560_v7 = vadd.f32 %v8904_v50, %v13785_v22  ;;  %v4056_v52 = vpop.f32.mrb[63].mxu1 }
 0xa42   :  { %v12563_v57 = vadd.f32 %v4056_v52, %v13786_v59 }
 0xa43   :  { %v4144_v29 = vsel %vm13787_vm4, %v12560_v7, 0.0  ;;  %vm13803_vm4 = vmmov %vm13788_vm0 }
 0xa44   :  { %4145 = vadd.xlane.f32.xlu1 %v4144_v29  ;;  %v4141_v53 = vsel %vm13788_vm0, %v12563_v57, 0.0 }
 0xa45   :  { %4142 = vadd.xlane.f32.xlu0 %v4141_v53 }
 0xa79   :  { %v4107_v51 = vpop.xlane.xlu1 %4106 }
 0xa7a   :  { %v4150_v41 = vmul.f32 0.03125, %v4107_v51 }
 0xa7c   :  { %v12569_v6 = vsub.f32 %v4083_v8, %v4150_v41 }
 0xa7d   :  { %v4110_v33 = vpop.xlane.xlu1 %4109 }
 0xa7e   :  { %v4151_v17 = vmul.f32 0.03125, %v4110_v33  ;;  %v4182_v37 = vmul.f32 %v12569_v6, %v12569_v6 }
 0xa80   :  { %v12574_v36 = vsub.f32 %v12494_v28, %v4151_v17  ;;  %v4202_v47 = vsel %vm13789_vm3, %v4182_v37, 0.0  ;;  %vm13805_vm3 = vmmov %vm13788_vm0 }
 0xa81   :  { %v4101_v11 = vpop.xlane.xlu1 %4100  ;;  %4203 = vadd.xlane.f32.xlu0 %v4202_v47 }
 0xa82   :  { %v4148_v5 = vmul.f32 0.03125, %v4101_v11  ;;  %v4183_v39 = vmul.f32 %v12574_v36, %v12574_v36 }
 0xa84   :  { %v12580_v16 = vsub.f32 %v12498_v14, %v4148_v5  ;;  %v4205_v8 = vsel %vm13790_vm14, %v4183_v39, 0.0  ;;  %vm13806_vm14 = vmmov %vm13788_vm0 }
 0xa85   :  { %v4104_v62 = vpop.xlane.xlu1 %4103  ;;  %4206 = vadd.xlane.f32.xlu1 %v4205_v8 }
 0xa86   :  { %v4149_v20 = vmul.f32 0.03125, %v4104_v62  ;;  %v4180_v28 = vmul.f32 %v12580_v16, %v12580_v16 }
 0xa88   :  { %v12586_v44 = vsub.f32 %v12503_v21, %v4149_v20  ;;  %v4196_v43 = vsel %vm13791_vm6, %v4180_v28, 0.0  ;;  %v7615_v21 = vld [vmem:[%s13369_s11 + $0x30] sm:$0xff]  ;;  %vm13807_vm6 = vmmov %vm13788_vm0 }
 0xa89   :  { %4197 = vadd.xlane.f32.xlu0 %v4196_v43  ;;  %v9595_v30 = vpack.c.bf16 %v7616_v0, %v7615_v21 }
 0xa8a   :  { %v4181_v24 = vmul.f32 %v12586_v44, %v12586_v44 }
 0xa8b   :  { %9596 = vmatprep.subr.bf16.mxu0 %v9595_v30 }
 0xa8c   :  { %v4199_v14 = vsel %vm13792_vm11, %v4181_v24, 0.0  ;;  %9598 = vmatpush3.bf16.msra.mxu0 %v9595_v30  ;;  %vm13808_vm11 = vmmov %vm13788_vm0 }
 0xa8d   :  { %4200 = vadd.xlane.f32.xlu1 %v4199_v14  ;;  %9600 = vmatprep.subr.bf16.mxu0 %v12610_v49 }
 0xaa7   :  { %v4116_v60 = vpop.xlane.xlu1 %4115 }
 0xaa8   :  { %v4153_v45 = vmul.f32 0.03125, %v4116_v60  ;;  %v4113_v34 = vpop.xlane.xlu0 %4112 }
 0xaa9   :  { %v4152_v31 = vmul.f32 0.03125, %v4113_v34 }
 0xaaa   :  { %v12614_v13 = vsub.f32 %v12510_v26, %v4153_v45 }
 0xaab   :  { %v12617_v54 = vsub.f32 %v12513_v46, %v4152_v31  ;;  %v5051_v31 = vld [vmem:[%s13371_s13] sm:$0xff] }
 0xaac   :  { %v4185_v19 = vmul.f32 %v12614_v13, %v12614_v13 }
 0xaad   :  { %v4184_v27 = vmul.f32 %v12617_v54, %v12617_v54 }
 0xaae   :  { %v4122_v15 = vpop.xlane.xlu1 %4121  ;;  %v4211_v38 = vsel %vm13793_vm13, %v4185_v19, 0.0  ;;  %vm13809_vm13 = vmmov %vm13788_vm0 }
 0xaaf   :  { %v4155_v9 = vmul.f32 0.03125, %v4122_v15  ;;  %v4119_v32 = vpop.xlane.xlu0 %4118  ;;  %4212 = vadd.xlane.f32.xlu1 %v4211_v38  ;;  %v4208_v25 = vsel %vm13794_vm10, %v4184_v27, 0.0  ;;  %v5053_v27 = vld [vmem:[%s13371_s13 + $0x10] sm:$0xff]  ;;  %v5056_v15 = vld [vmem:[%s13371_s13 + $0x28] sm:$0xff]  ;;  %v5058_v38 = vld [vmem:[%s13371_s13 + $0x38] sm:$0xff] }
 0xab0   :  { %v4154_v35 = vmul.f32 0.03125, %v4119_v32  ;;  %4209 = vadd.xlane.f32.xlu0 %v4208_v25  ;;  %v9659_v32 = vpack.c.bf16 %v5058_v38, %v5056_v15  ;;  %v5055_v25 = vld [vmem:[%s13371_s13 + $0x20] sm:$0xff]  ;;  %vm13810_vm10 = vmmov %vm13788_vm0 }
 0xab1   :  { %v12626_v26 = vsub.f32 %v12520_v48, %v4155_v9  ;;  %v9657_v9 = vpack.c.bf16 %v5053_v27, %v5051_v31 }
 0xab2   :  { %v12629_v46 = vsub.f32 %v12523_v2, %v4154_v35  ;;  %v5057_v35 = vld [vmem:[%s13371_s13 + $0x30] sm:$0xff] }
 0xab3   :  { %v4187_v61 = vmul.f32 %v12626_v26, %v12626_v26 }
 0xab4   :  { %v4186_v55 = vmul.f32 %v12629_v46, %v12629_v46 }
 0xab5   :  { %v4217_v40 = vsel %vm13795_vm5, %v4187_v61, 0.0  ;;  %v9661_v61 = vpack.c.bf16 %v5057_v35, %v5055_v25  ;;  %vm13811_vm5 = vmmov %vm13788_vm0 }
 0xab6   :  { %v4128_v50 = vpop.xlane.xlu1 %4127  ;;  %4218 = vadd.xlane.f32.xlu1 %v4217_v40  ;;  %v4214_v22 = vsel %vm13796_vm12, %v4186_v55, 0.0  ;;  %vm13812_vm12 = vmmov %vm13788_vm0 }
 0xab7   :  { %v4157_v52 = vmul.f32 0.03125, %v4128_v50  ;;  %v4125_v59 = vpop.xlane.xlu0 %4124  ;;  %4215 = vadd.xlane.f32.xlu0 %v4214_v22 }
 0xab8   :  { %v4156_v48 = vmul.f32 0.03125, %v4125_v59 }
 0xab9   :  { %v12638_v29 = vsub.f32 %v12530_v18, %v4157_v52 }
 0xaba   :  { %v12641_v2 = vsub.f32 %v12533_v58, %v4156_v48 }
 0xabb   :  { %v4189_v53 = vmul.f32 %v12638_v29, %v12638_v29 }
 0xabc   :  { %v4188_v51 = vmul.f32 %v12641_v2, %v12641_v2 }
 0xabd   :  { %v4223_v41 = vsel %vm13797_vm15, %v4189_v53, 0.0  ;;  %vm13813_vm15 = vmmov %vm13788_vm0 }
 0xabe   :  { %v4134_v33 = vpop.xlane.xlu1 %4133  ;;  %4224 = vadd.xlane.f32.xlu1 %v4223_v41  ;;  %v4220_v17 = vsel %vm13798_vm2, %v4188_v51, 0.0  ;;  %vm13814_vm2 = vmmov %vm13788_vm0 }
 0xabf   :  { %v4159_v37 = vmul.f32 0.03125, %v4134_v33  ;;  %v4131_v47 = vpop.xlane.xlu0 %4130  ;;  %4221 = vadd.xlane.f32.xlu0 %v4220_v17 }
 0xac0   :  { %v4158_v18 = vmul.f32 0.03125, %v4131_v47 }
 0xac1   :  { %v12650_v11 = vsub.f32 %v12540_v4, %v4159_v37  ;;  %v12712_v37 = vld [vmem:[%s13804_s6] ss:$0 sm:$0xff] }
 0xac2   :  { %v12653_v58 = vsub.f32 %v12543_v63, %v4158_v18  ;;  %v4140_v5 = vpop.xlane.xlu1 %4139 }
 0xac3   :  { %v4161_v39 = vmul.f32 0.03125, %v4140_v5  ;;  %v4137_v8 = vpop.xlane.xlu0 %4136  ;;  %v4191_v62 = vmul.f32 %v12650_v11, %v12650_v11  ;;  %v12718_v5 = vld [vmem:[%s13368_s10] ss:$0 sm:$0xff] }
 0xac4   :  { %v4160_v20 = vmul.f32 0.03125, %v4137_v8  ;;  %v4190_v28 = vmul.f32 %v12653_v58, %v12653_v58 }
 0xac5   :  { %v12660_v43 = vsub.f32 %v12550_v23, %v4161_v39  ;;  %v4229_v24 = vsel %vm13799_vm8, %v4191_v62, 0.0  ;;  %vm13815_vm8 = vmmov %vm13788_vm0 }
 0xac6   :  { %v12664_v4 = vsub.f32 %v12553_v42, %v4160_v20  ;;  %4230 = vadd.xlane.f32.xlu1 %v4229_v24  ;;  %v4226_v63 = vsel %vm13800_vm1, %v4190_v28, 0.0  ;;  %v4354_v28 = vld [vmem:[%s13369_s11 + $0x10] sm:$0xff]  ;;  %vm13816_vm1 = vmmov %vm13788_vm0 }
 0xac7   :  { %4227 = vadd.xlane.f32.xlu0 %v4226_v63  ;;  %v4193_v14 = vmul.f32 %v12660_v43, %v12660_v43 }
 0xac8   :  { %v4192_v10 = vmul.f32 %v12664_v4, %v12664_v4 }
 0xac9   :  { %v4235_v12 = vsel %vm13801_vm7, %v4193_v14, 0.0  ;;  %vm13817_vm7 = vmmov %vm13788_vm0 }
 0xaca   :  { %4236 = vadd.xlane.f32.xlu1 %v4235_v12  ;;  %v4232_v23 = vsel %vm13802_vm9, %v4192_v10, 0.0  ;;  %v7621_v12 = vld [vmem:[%s13369_s11 + $0x40] sm:$0xff]  ;;  %vm13818_vm9 = vmmov %vm13788_vm0 }
 0xacb   :  { %4233 = vadd.xlane.f32.xlu0 %v4232_v23  ;;  %v7622_v23 = vld [vmem:[%s13369_s11 + $0x48] sm:$0xff] }
 0xad1   :  { %v4146_v1 = vpop.xlane.xlu1 %4145 }
 0xad2   :  { %v4163_v21 = vmul.f32 0.03125, %v4146_v1  ;;  %v4143_v42 = vpop.xlane.xlu0 %4142 }
 0xad3   :  { %v4162_v0 = vmul.f32 0.03125, %v4143_v42 }
 0xad4   :  { %v12674_v30 = vsub.f32 %v12560_v7, %v4163_v21  ;;  %v5052_v7 = vld [vmem:[%s13371_s13 + $0x8] sm:$0xff] }
 0xad5   :  { %v12677_v56 = vsub.f32 %v12563_v57, %v4162_v0  ;;  %v5054_v57 = vld [vmem:[%s13371_s13 + $0x18] sm:$0xff]  ;;  %v9607_v0 = vpack.c.bf16 %v7622_v23, %v7621_v12 }
 0xad6   :  { %v4195_v3 = vmul.f32 %v12674_v30, %v12674_v30  ;;  %v9655_v19 = vpack.c.bf16 %v5054_v57, %v5052_v7  ;;  %v7628_v7 = vld [vmem:[%s13369_s11 + $0x68] sm:$0xff] }
 0xad7   :  { %v4194_v60 = vmul.f32 %v12677_v56, %v12677_v56 }
 0xad8   :  { %v4241_v45 = vsel %vm13803_vm4, %v4195_v3, 0.0  ;;  %9656 = vmatprep.subr.bf16.mxu1 %v9655_v19  ;;  %v7623_v3 = vld [vmem:[%s13369_s11 + $0x50] sm:$0xff]  ;;  %vm13819_vm4 = vmmov %vm13788_vm0 }
 0xad9   :  { %4242 = vadd.xlane.f32.xlu1 %v4241_v45  ;;  %v4238_v34 = vsel %vm13788_vm0, %v4194_v60, 0.0  ;;  %9658 = vmatpush1.bf16.msra.mxu1 %v9657_v9  ;;  %v7624_v60 = vld [vmem:[%s13369_s11 + $0x58] sm:$0xff] }
 0xada   :  { %4239 = vadd.xlane.f32.xlu0 %v4238_v34  ;;  %9660 = vmatprep.subr.bf16.mxu1 %v9659_v32  ;;  %v7627_v34 = vld [vmem:[%s13369_s11 + $0x60] sm:$0xff] }
 0xadb   :  { %v9615_v57 = vpack.c.bf16 %v7628_v7, %v7627_v34 }
 0xadd   :  { %9662 = vmatpush1.bf16.msra.mxu1 %v9661_v61 }
 0xb0e   :  { %v4204_v55 = vpop.xlane.xlu0 %4203 }
 0xb0f   :  { %v4246_v40 = vmul.f32 0.03125, %v4204_v55 }
 0xb11   :  { %v4262_v50 = vadd.f32 1e-05, %v4246_v40 }
 0xb12   :  { %v4207_v22 = vpop.xlane.xlu1 %4206 }
 0xb13   :  { %10380 = vrsqrt.f32 %v4262_v50  ;;  %v4247_v52 = vmul.f32 0.03125, %v4207_v22 }
 0xb15   :  { %v4263_v59 = vadd.f32 1e-05, %v4247_v52 }
 0xb16   :  { %v4198_v48 = vpop.xlane.xlu0 %4197 }
 0xb17   :  { %10382 = vrsqrt.f32 %v4263_v59  ;;  %v4244_v53 = vmul.f32 0.03125, %v4198_v48 }
 0xb19   :  { %v4260_v51 = vadd.f32 1e-05, %v4244_v53 }
 0xb1a   :  { %v4201_v41 = vpop.xlane.xlu1 %4200 }
 0xb1b   :  { %10384 = vrsqrt.f32 %v4260_v51  ;;  %v4245_v33 = vmul.f32 0.03125, %v4201_v41 }
 0xb1d   :  { %v10381_v17 = vpop.eup %10380  ;;  %v4261_v47 = vadd.f32 1e-05, %v4245_v33 }
 0xb1e   :  { %v4294_v18 = vmul.f32 %v10381_v17, %v12569_v6  ;;  %v4355_v6 = vld [vmem:[%s13369_s11 + $0x18] sm:$0xff] }
 0xb1f   :  { %10386 = vrsqrt.f32 %v4261_v47  ;;  %v9603_v10 = vpack.c.bf16 %v4355_v6, %v4354_v28 }
 0xb20   :  { %v4316_v39 = vmul.f32 %v12712_v37, %v4294_v18 }
 0xb21   :  { %v10383_v8 = vpop.eup %10382 }
 0xb22   :  { %v4295_v62 = vmul.f32 %v10383_v8, %v12574_v36  ;;  %v4338_v20 = vadd.f32 %v12718_v5, %v4316_v39  ;;  %v7629_v39 = vld [vmem:[%s13369_s11 + $0x70] sm:$0xff]  ;;  %v7630_v8 = vld [vmem:[%s13369_s11 + $0x78] sm:$0xff] }
 0xb24   :  { %v4317_v24 = vmul.f32 %v12712_v37, %v4295_v62  ;;  %8913 = vmatprep.mubr.msk.f32.mxu0 %vm13805_vm3, %v4338_v20  ;;  %v9619_v20 = vpack.c.bf16 %v7630_v8, %v7629_v39  ;;  %v7648_v39 = vld [vmem:[%s13369_s11 + $0xd8] sm:$0xff]  ;;  %vm13820_vm3 = vmmov %vm13788_vm0 }
 0xb25   :  { %v10385_v63 = vpop.eup %10384 }
 0xb26   :  { %v4339_v14 = vadd.f32 %v12718_v5, %v4317_v24  ;;  %v4292_v36 = vmul.f32 %v10385_v63, %v12580_v16  ;;  %v7633_v63 = vld [vmem:[%s13369_s11 + $0x80] sm:$0xff] }
 0xb28   :  { %8914 = vmatmul.mubr.msk.f32.vlgmr.msra.gmra.mrb[96].mxu0 %vm13806_vm14, %v4339_v14  ;;  %v4314_v1 = vmul.f32 %v12712_v37, %v4292_v36  ;;  %v7634_v14 = vld [vmem:[%s13369_s11 + $0x88] sm:$0xff]  ;;  %vm10506_vm14 = vmmov 0  }
 0xb29   :  { %v10387_v21 = vpop.eup %10386  ;;  %9602 = vmatpush3.bf16.msra.mxu0 %v12610_v49 }
 0xb2a   :  { %v4293_v42 = vmul.f32 %v10387_v21, %v12586_v44  ;;  %9604 = vmatprep.subr.bf16.mxu0 %v9603_v10  ;;  %v4336_v16 = vadd.f32 %v12718_v5, %v4314_v1  ;;  %v9611_v44 = vpack.c.bf16 %v7624_v60, %v7623_v3  ;;  %v7635_v3 = vld [vmem:[%s13369_s11 + $0x90] sm:$0xff]  ;;  %v7636_v60 = vld [vmem:[%s13369_s11 + $0x98] sm:$0xff] }
 0xb2c   :  { %8924 = vmatprep.mubr.msk.f32.mxu0 %vm13807_vm6, %v4336_v16  ;;  %v4315_v45 = vmul.f32 %v12712_v37, %v4293_v42  ;;  %v9623_v42 = vpack.c.bf16 %v7634_v14, %v7633_v63  ;;  %vm13821_vm6 = vmmov %vm13788_vm0 }
 0xb2d   :  { %9606 = vmatpush3.bf16.msra.mxu0 %v9603_v10 }
 0xb2e   :  { %v4337_v49 = vadd.f32 %v12718_v5, %v4315_v45  ;;  %9608 = vmatprep.subr.bf16.mxu0 %v9607_v0 }
 0xb30   :  { %8925 = vmatmul.mubr.msk.f32.vlgmr.msra.gmra.mrb[96].mxu0 %vm13808_vm11, %v4337_v49  ;;  %vm13822_vm11 = vmmov %vm13788_vm0 }
 0xb31   :  { %9610 = vmatpush3.bf16.msra.mxu0 %v9607_v0 }
 0xb32   :  { %9612 = vmatprep.subr.bf16.mxu0 %v9611_v44 }
 0xb35   :  { %9614 = vmatpush3.bf16.msra.mxu0 %v9611_v44 }
 0xb36   :  { %9616 = vmatprep.subr.bf16.mxu0 %v9615_v57 }
 0xb3c   :  { %v4213_v31 = vpop.xlane.xlu1 %4212 }
 0xb3d   :  { %v4249_v19 = vmul.f32 0.03125, %v4213_v31  ;;  %v4210_v27 = vpop.xlane.xlu0 %4209  ;;  %v9627_v31 = vpack.c.bf16 %v7636_v60, %v7635_v3 }
 0xb3e   :  { %v4248_v15 = vmul.f32 0.03125, %v4210_v27 }
 0xb3f   :  { %v4265_v38 = vadd.f32 1e-05, %v4249_v19 }
 0xb40   :  { %v4264_v9 = vadd.f32 1e-05, %v4248_v15 }
 0xb41   :  { %10388 = vrsqrt.f32 %v4265_v38  ;;  %v7639_v38 = vld [vmem:[%s13369_s11 + $0xa0] sm:$0xff] }
 0xb42   :  { %10390 = vrsqrt.f32 %v4264_v9  ;;  %v7640_v9 = vld [vmem:[%s13369_s11 + $0xa8] sm:$0xff] }
 0xb43   :  { %v4219_v32 = vpop.xlane.xlu1 %4218 }
 0xb44   :  { %v4251_v25 = vmul.f32 0.03125, %v4219_v32  ;;  %v4216_v35 = vpop.xlane.xlu0 %4215 }
 0xb45   :  { %v4250_v61 = vmul.f32 0.03125, %v4216_v35  ;;  %v9631_v35 = vpack.c.bf16 %v7640_v9, %v7639_v38 }
 0xb46   :  { %v4267_v55 = vadd.f32 1e-05, %v4251_v25 }
 0xb47   :  { %v4266_v40 = vadd.f32 1e-05, %v4250_v61  ;;  %v7641_v61 = vld [vmem:[%s13369_s11 + $0xb0] sm:$0xff] }
 0xb48   :  { %10392 = vrsqrt.f32 %v4267_v55  ;;  %v7642_v55 = vld [vmem:[%s13369_s11 + $0xb8] sm:$0xff] }
 0xb49   :  { %10394 = vrsqrt.f32 %v4266_v40 }
 0xb4b   :  { %v10389_v50 = vpop.eup %10388  ;;  %v4225_v22 = vpop.xlane.xlu1 %4224 }
 0xb4c   :  { %v10391_v52 = vpop.eup %10390  ;;  %v4297_v59 = vmul.f32 %v10389_v50, %v12614_v13  ;;  %v4253_v48 = vmul.f32 0.03125, %v4225_v22  ;;  %v4222_v53 = vpop.xlane.xlu0 %4221  ;;  %v9635_v22 = vpack.c.bf16 %v7642_v55, %v7641_v61  ;;  %v10509_v61 = vmov 3   ;;  %v13828_v55 = vld [vmem:[#allocation29_spill] sm:$0xff] }
 0xb4d   :  { %v4252_v51 = vmul.f32 0.03125, %v4222_v53  ;;  %v4296_v41 = vmul.f32 %v10391_v52, %v12617_v54  ;;  %v7646_v53 = vld [vmem:[%s13369_s11 + $0xc8] sm:$0xff] }
 0xb4e   :  { %v4269_v33 = vadd.f32 1e-05, %v4253_v48  ;;  %v4319_v17 = vmul.f32 %v12712_v37, %v4297_v59  ;;  %v7645_v48 = vld [vmem:[%s13369_s11 + $0xc0] sm:$0xff] }
 0xb4f   :  { %v4268_v47 = vadd.f32 1e-05, %v4252_v51  ;;  %v4318_v18 = vmul.f32 %v12712_v37, %v4296_v41 }
 0xb50   :  { %10396 = vrsqrt.f32 %v4269_v33  ;;  %v4341_v54 = vadd.f32 %v12718_v5, %v4319_v17 }
 0xb51   :  { %10398 = vrsqrt.f32 %v4268_v47  ;;  %v4340_v13 = vadd.f32 %v12718_v5, %v4318_v18  ;;  %v9639_v47 = vpack.c.bf16 %v7646_v53, %v7645_v48  ;;  %v7647_v18 = vld [vmem:[%s13369_s11 + $0xd0] sm:$0xff]  ;;  %v5693_v53 = vsub.s32 2, %v13828_v55 }
 0xb52   :  { %v10393_v62 = vpop.eup %10392 }
 0xb53   :  { %v10395_v28 = vpop.eup %10394  ;;  %v4299_v6 = vmul.f32 %v10393_v62, %v12626_v26  ;;  %v4231_v24 = vpop.xlane.xlu1 %4230  ;;  %8935 = vmatprep.mubr.msk.f32.mxu0 %vm13809_vm13, %v4340_v13  ;;  %vm13823_vm13 = vmmov %vm13788_vm0 }
 0xb54   :  { %v4255_v10 = vmul.f32 0.03125, %v4231_v24  ;;  %8936 = vmatmul.mubr.msk.f32.vlgmr.msra.gmra.mrb[96].mxu0 %vm13810_vm10, %v4341_v54  ;;  %v4228_v36 = vpop.xlane.xlu0 %4227  ;;  %v4298_v12 = vmul.f32 %v10395_v28, %v12629_v46  ;;  %vm13824_vm10 = vmmov %vm13788_vm0 }
 0xb55   :  { %v4254_v23 = vmul.f32 0.03125, %v4228_v36  ;;  %9618 = vmatpush3.bf16.msra.mxu0 %v9615_v57  ;;  %v4321_v21 = vmul.f32 %v12712_v37, %v4299_v6  ;;  %v9643_v6 = vpack.c.bf16 %v7648_v39, %v7647_v18  ;;  %v7651_v36 = vld [vmem:[%s13369_s11 + $0xe0] sm:$0xff] }
 0xb56   :  { %v4271_v26 = vadd.f32 1e-05, %v4255_v10  ;;  %9620 = vmatprep.subr.bf16.mxu0 %v9619_v20  ;;  %v4320_v1 = vmul.f32 %v12712_v37, %v4298_v12 }
 0xb57   :  { %v4270_v16 = vadd.f32 1e-05, %v4254_v23  ;;  %v4237_v0 = vpop.xlane.xlu1 %4236  ;;  %v4343_v57 = vadd.f32 %v12718_v5, %v4321_v21 }
 0xb58   :  { %10400 = vrsqrt.f32 %v4271_v26  ;;  %v4257_v46 = vmul.f32 0.03125, %v4237_v0  ;;  %v4234_v45 = vpop.xlane.xlu0 %4233  ;;  %v4342_v49 = vadd.f32 %v12718_v5, %v4320_v1  ;;  %v7653_v26 = vld [vmem:[%s13369_s11 + $0xf0] sm:$0xff]  ;;  %v7654_v1 = vld [vmem:[%s13369_s11 + $0xf8] sm:$0xff] }
 0xb59   :  { %10402 = vrsqrt.f32 %v4270_v16  ;;  %v4256_v44 = vmul.f32 0.03125, %v4234_v45  ;;  %9622 = vmatpush3.bf16.msra.mxu0 %v9619_v20 }
 0xb5a   :  { %v10397_v34 = vpop.eup %10396  ;;  %v4273_v7 = vadd.f32 1e-05, %v4257_v46  ;;  %8946 = vmatprep.mubr.msk.f32.mxu0 %vm13811_vm5, %v4342_v49  ;;  %9624 = vmatprep.subr.bf16.mxu0 %v9623_v42  ;;  %vm13825_vm5 = vmmov %vm13788_vm0 }
 0xb5b   :  { %v10399_v19 = vpop.eup %10398  ;;  %v4301_v27 = vmul.f32 %v10397_v34, %v12638_v29  ;;  %v4272_v15 = vadd.f32 1e-05, %v4256_v44  ;;  %v10504_v34 = vmov 0.0  }
 0xb5c   :  { %10404 = vrsqrt.f32 %v4273_v7  ;;  %8947 = vmatmul.mubr.msk.f32.vlgmr.msra.gmra.mrb[96].mxu0 %vm13812_vm12, %v4343_v57  ;;  %v4300_v32 = vmul.f32 %v10399_v19, %v12641_v2  ;;  %5129 = vmatprep.mubr.f32.mxu1 %v10504_v34  ;;  %vm9665_vm12 = vmpackc.low %vm13825_vm5, %vm13825_vm5  ;;  %v5221_v57 = vld [vmem:[%s13373_s15] sm:$0xf] }
 0xb5d   :  { %10406 = vrsqrt.f32 %v4272_v15  ;;  %9626 = vmatpush3.bf16.msra.mxu0 %v9623_v42  ;;  %v4323_v29 = vmul.f32 %v12712_v37, %v4301_v27  ;;  %v9651_v42 = vpack.c.bf16 %v7654_v1, %v7653_v26 }
 0xb5e   :  { %9628 = vmatprep.subr.bf16.mxu0 %v9627_v31  ;;  %v4322_v25 = vmul.f32 %v12712_v37, %v4300_v32 }
 0xb5f   :  { %v4345_v50 = vadd.f32 %v12718_v5, %v4323_v29 }
 0xb60   :  { %v4344_v40 = vadd.f32 %v12718_v5, %v4322_v25  ;;  %v10508_v25 = vmov 2  }
 0xb61   :  { %9630 = vmatpush3.bf16.msra.mxu0 %v9627_v31  ;;  %v10507_v31 = vmov 1  }
 0xb62   :  { %v10401_v2 = vpop.eup %10400  ;;  %8957 = vmatprep.mubr.msk.f32.mxu0 %vm13813_vm15, %v4344_v40  ;;  %9632 = vmatprep.subr.bf16.mxu0 %v9631_v35  ;;  %vm13826_vm15 = vmmov %vm13788_vm0  ;;  %v5440_v40 = vsub.s32 1, %v13828_v55 }
 0xb63   :  { %v10403_v52 = vpop.eup %10402  ;;  %v4303_v59 = vmul.f32 %v10401_v2, %v12650_v11  ;;  %10117 = vset.pattern.permute.xlu1 %v10507_v31 }
 0xb64   :  { %8958 = vmatmul.mubr.msk.f32.vlgmr.msra.gmra.mrb[96].mxu0 %vm13814_vm2, %v4345_v50  ;;  %v4302_v51 = vmul.f32 %v10403_v52, %v12653_v58  ;;  %vm13827_vm2 = vmmov %vm13788_vm0  ;;  %v13829_v50 = vld [vmem:[#allocation30_spill] sm:$0xff]  ;;  %v12911_v52 = vld [vmem:[%s13370_s12] sm:$0xff] }
 0xb65   :  { %9634 = vmatpush3.bf16.msra.mxu0 %v9631_v35  ;;  %v4325_v11 = vmul.f32 %v12712_v37, %v4303_v59 }
 0xb66   :  { %v10405_v41 = vpop.eup %10404  ;;  %v4243_v33 = vpop.xlane.xlu1 %4242  ;;  %9636 = vmatprep.subr.bf16.mxu0 %v9635_v22  ;;  %v4324_v17 = vmul.f32 %v12712_v37, %v4302_v51 }
 0xb67   :  { %v10407_v8 = vpop.eup %10406  ;;  %v4259_v13 = vmul.f32 0.03125, %v4243_v33  ;;  %v4240_v58 = vpop.xlane.xlu0 %4239  ;;  %v4305_v24 = vmul.f32 %v10405_v41, %v12660_v43  ;;  %v4347_v14 = vadd.f32 %v12718_v5, %v4325_v11 }
 0xb68   :  { %v4258_v62 = vmul.f32 0.03125, %v4240_v58  ;;  %v4346_v54 = vadd.f32 %v12718_v5, %v4324_v17  ;;  %v4304_v20 = vmul.f32 %v10407_v8, %v12664_v4  ;;  %v7652_v4 = vld [vmem:[%s13369_s11 + $0xe8] sm:$0xff]  ;;  %v5869_v8 = vsub.s32 3, %v13828_v55 }
 0xb69   :  { %v4275_v28 = vadd.f32 1e-05, %v4259_v13  ;;  %9638 = vmatpush3.bf16.msra.mxu0 %v9635_v22  ;;  %v4327_v12 = vmul.f32 %v12712_v37, %v4305_v24  ;;  %v9647_v23 = vpack.c.bf16 %v7652_v4, %v7651_v36 }
 0xb6a   :  { %v4274_v63 = vadd.f32 1e-05, %v4258_v62  ;;  %8968 = vmatprep.mubr.msk.f32.mxu0 %vm13815_vm8, %v4346_v54  ;;  %9640 = vmatprep.subr.bf16.mxu0 %v9639_v47  ;;  %v4326_v10 = vmul.f32 %v12712_v37, %v4304_v20  ;;  %vm5343_vm8 = vcmp.gt.f32.partialorder %v12911_v52, 0.0 }
 0xb6b   :  { %10408 = vrsqrt.f32 %v4275_v28  ;;  %v4349_v21 = vadd.f32 %v12718_v5, %v4327_v12 }
 0xb6c   :  { %10410 = vrsqrt.f32 %v4274_v63  ;;  %8969 = vmatmul.mubr.msk.f32.vlgmr.msra.gmra.mrb[96].mxu0 %vm13816_vm1, %v4347_v14  ;;  %v4348_v43 = vadd.f32 %v12718_v5, %v4326_v10 }
 0xb6d   :  { %9642 = vmatpush3.bf16.msra.mxu0 %v9639_v47 }
 0xb6e   :  { %8979 = vmatprep.mubr.msk.f32.mxu0 %vm13817_vm7, %v4348_v43  ;;  %9644 = vmatprep.subr.bf16.mxu0 %v9643_v6 }
 0xb71   :  { %9646 = vmatpush3.bf16.msra.mxu0 %v9643_v6 }
 0xb72   :  { %9648 = vmatprep.subr.bf16.mxu0 %v9647_v23 }
 0xb74   :  { %8980 = vmatmul.mubr.msk.f32.vlgmr.msra.gmra.mrb[96].mxu0 %vm13818_vm9, %v4349_v21  ;;  %vm13830_vm9 = vcmask 64512  }
 0xb75   :  { %v10409_v16 = vpop.eup %10408  ;;  %9650 = vmatpush3.bf16.msra.mxu0 %v9647_v23 }
 0xb76   :  { %v10411_v0 = vpop.eup %10410  ;;  %v4307_v3 = vmul.f32 %v10409_v16, %v12674_v30  ;;  %9652 = vmatprep.subr.bf16.mxu0 %v9651_v42  ;;  %v5142_v30 = vld [vmem:[%s13372_s14] sm:$0xf] }
 0xb77   :  { %v4306_v60 = vmul.f32 %v10411_v0, %v12677_v56  ;;  %8993 = vmatprep.subr.msk.mxu1 %vm13820_vm3, %v5142_v30  ;;  %v10505_v56 = vmov 0.0|0.0  }
 0xb78   :  { %v4329_v46 = vmul.f32 %v12712_v37, %v4307_v3 }
 0xb79   :  { %9654 = vmatpush3.bf16.msra.mxu0 %v9651_v42  ;;  %v4328_v45 = vmul.f32 %v12712_v37, %v4306_v60 }
 0xb7a   :  { %v4351_v44 = vadd.f32 %v12718_v5, %v4329_v46  ;;  %9667 = vmatprep.subr.bf16.mxu0 %v10505_v56 }
 0xb7b   :  { %v4350_v49 = vadd.f32 %v12718_v5, %v4328_v45 }
 0xb7d   :  { %8990 = vmatprep.mubr.msk.f32.mxu0 %vm13819_vm4, %v4350_v49  ;;  %vm13831_vm4 = vmmov %vm13830_vm9 }
 0xb7e   :  { %8991 = vmatmul.mubr.msk.f32.vlgmr.msra.gmra.mrb[96].mxu0 %vm13788_vm0, %v4351_v44  ;;  %vm13832_vm3 = vmmov %vm13831_vm4 }
 0xb7f   :  { %9031 = vmatprep.mubr.msk.f32.mxu0 %vm10506_vm14, %v10504_v34  ;;  %vm13836_vm5 = vmmov %vm13832_vm3 }
 0xc51   :  { %v8992_v37 = vpop.f32.mrb[96].mxu0 }
 0xc52   :  { %v5040_v5 = vpop.f32.mrb[97].mxu0 }
 0xc53   :  { %v9664_v7 = vpack.c.bf16 %v8992_v37, %v5040_v5  ;;  %7657 = vmatmul.mubr.msk.f32.vlgmr.msra.gmra.mrb[96].mxu1 %vm13821_vm6, %v5040_v5 }
 0xc54   :  { %8994 = vmatpush3.xpose.msk.msra.mxu1 %vm13822_vm11, %v5142_v30  ;;  %5135 = vmatprep.mubr.f32.mxu1 %v10504_v34  ;;  %vm13833_vm11 = vmmov %vm13832_vm3 }
 0xc55   :  { %9663 = vmatprep.subr.bf16.mxu1 %v10505_v56 }
 0xc57   :  { %7658 = vmatmul.mubr.msk.f32.gmra.mrb[98].mxu1 %vm13823_vm13, %v8992_v37  ;;  %vm13834_vm13 = vmmov %vm13832_vm3 }
 0xc58   :  { %8995 = vmatprep.mubr.msk.f32.mxu1 %vm13824_vm10, %v5040_v5  ;;  %vm13835_vm10 = vmmov %vm13832_vm3 }
 0xc5b   :  { %8996 = vmatmul.mubr.msk.f32.vlgmr.msra.gmra.mrb[100].mxu1 %vm13826_vm15, %v8992_v37  ;;  %vm13838_vm15 = vmmov %vm13832_vm3 }
 0xc5c   :  { %9666 = vmatpush3.bf16.xpose.msk.msra.mxu1 %vm9665_vm12, %v9664_v7  ;;  %9002 = vmatprep.mubr.msk.f32.mxu1 %vm10506_vm14, %v10504_v34  ;;  %vm13837_vm12 = vmmov %vm13832_vm3 }
 0xc5d   :  { %9005 = vmatprep.subr.mxu1 %v10504_v34 }
 0xc63   :  { %9003 = vmatmul.mubr.msk.f32.vlgmr.msra.gmra.mrb[102].mxu1 %vm13827_vm2, %v5221_v57 }
 0xc64   :  { %9007 = vmatprep.mubr.msk.f32.mxu1 %vm10506_vm14, %v10504_v34 }
 0xd26   :  { %v12888_v19 = vpop.f32.mrb[96].mxu1 }
 0xd27   :  { %v12890_v27 = vpop.f32.mrb[97].mxu1  ;;  %9006 = vmatpush3.msra.mxu1 %v12888_v19 }
 0xd28   :  { %9010 = vmatprep.subr.mxu1 %v10504_v34 }
 0xd2a   :  { %v12894_v15 = vpop.f32.mrb[98].mxu1 }
 0xd2b   :  { %v12896_v38 = vpop.f32.mrb[99].mxu1 }
 0xd2e   :  { %v12898_v9 = vpop.f32.mrb[100].mxu1 }
 0xd2f   :  { %v5212_v32 = vpop.f32.mrb[101].mxu1 }
 0xd30   :  { %5435 = vperm.xlu1 %10117, %v5212_v32   ;;  %5332 = vperm.xlu0 %9875, %v5212_v32  }
 0xd34   :  { %10118 = vset.pattern.permute.xlu1 %v10508_v25 }
 0xd35   :  { %5688 = vperm.xlu1 %10118, %v5212_v32  }
 0xd36   :  { %v5291_v29 = vpop.f32.mrb[102].mxu1 }
 0xd37   :  { %v9004_v35 = vpop.f32.mrb[103].mxu1  ;;  %v12903_v2 = vrot.slane %v5291_v29, %v5440_v40  ;;  %v12906_v22 = vrot.slane %v5291_v29, %v13829_v50  ;;  %v12917_v11 = vrot.slane %v5291_v29, %v5693_v53  ;;  %v12927_v6 = vrot.slane %v5291_v29, %v5869_v8 }
 0xd39   :  { %10119 = vset.pattern.permute.xlu1 %v10509_v61 }
 0xd3a   :  { %5864 = vperm.xlu1 %10119, %v5212_v32  }
 0xd3e   :  { %10120 = vset.pattern.permute.xlu1 %v10507_v31 }
 0xdaf   :  { %v5436_v59 = vpop.permute.xlu1 %5435  ;;  %v5333_v48 = vpop.permute.xlu0 %5332 }
 0xdb0   :  { %v5442_v51 = vadd.f32 %v12903_v2, %v5436_v59  ;;  %v5339_v41 = vadd.f32 %v12906_v22, %v5333_v48 }
 0xdb2   :  { %vm5443_vm1 = vcmp.gt.f32.partialorder %v5442_v51, 0.0  ;;  %v5444_v33 = vmul.f32 0.01, %v5442_v51  ;;  %vm5340_vm7 = vcmp.gt.f32.partialorder %v5339_v41, 0.0  ;;  %v5341_v17 = vmul.f32 0.01, %v5339_v41 }
 0xdb4   :  { %v5689_v47 = vpop.permute.xlu1 %5688  ;;  %v5445_v18 = vsel %vm5443_vm1, %v5442_v51, %v5444_v33  ;;  %v5342_v39 = vsel %vm5340_vm7, %v5339_v41, %v5341_v17  ;;  %vm13839_vm1 = vmmov %vm13832_vm3 }
 0xdb5   :  { %v5695_v13 = vadd.f32 %v12917_v11, %v5689_v47  ;;  %v5446_v58 = vsel %vm5343_vm8, %v5445_v18, -1e+09  ;;  %v5344_v62 = vsel %vm5343_vm8, %v5342_v39, -1e+09 }
 0xdb6   :  { %v5447_v54 = vsel %vm13830_vm9, %v5446_v58, -inf  ;;  %v5345_v20 = vsel %vm13831_vm4, %v5344_v62, -inf  ;;  %vm13840_vm9 = vmmov %vm13839_vm1 }
 0xdb7   :  { %vm5696_vm0 = vcmp.gt.f32.partialorder %v5695_v13, 0.0  ;;  %v5697_v28 = vmul.f32 0.01, %v5695_v13  ;;  %5448 = vmax.xlane.f32.xlu1 %v5447_v54  ;;  %5346 = vmax.xlane.f32.xlu0 %v5345_v20  ;;  %vm13841_vm4 = vmmov %vm13839_vm1  ;;  %v5304_v20 = vld [vmem:[%s13374_s16 + $0x48] sm:$0xff] }
 0xdb9   :  { %v5865_v24 = vpop.permute.xlu1 %5864  ;;  %v5698_v63 = vsel %vm5696_vm0, %v5695_v13, %v5697_v28  ;;  %vm5540_vm0 = vcmask 523264  }
 0xdba   :  { %v5871_v14 = vadd.f32 %v12927_v6, %v5865_v24  ;;  %v5699_v10 = vsel %vm5343_vm8, %v5698_v63, -1e+09  ;;  %v5305_v24 = vld [vmem:[%s13374_s16 + $0x50] sm:$0xff]  ;;  %v5306_v63 = vld [vmem:[%s13374_s16 + $0x58] sm:$0xff] }
 0xdbb   :  { %v5700_v36 = vsel %vm13832_vm3, %v5699_v10, -inf }
 0xdbc   :  { %vm5872_vm6 = vcmp.gt.f32.partialorder %v5871_v14, 0.0  ;;  %v5873_v4 = vmul.f32 0.01, %v5871_v14  ;;  %5701 = vmax.xlane.f32.xlu0 %v5700_v36  ;;  %v5308_v36 = vld [vmem:[%s13374_s16 + $0x68] sm:$0xff] }
 0xdbe   :  { %v5874_v43 = vsel %vm5872_vm6, %v5871_v14, %v5873_v4  ;;  %v12984_v14 = vpack.c.bf16 %v5306_v63, %v5305_v24  ;;  %v5320_v24 = vld [vmem:[%s13374_s16 + $0xc8] sm:$0xff] }
 0xdbf   :  { %v5875_v12 = vsel %vm5343_vm8, %v5874_v43, -1e+09  ;;  %v5309_v43 = vld [vmem:[%s13374_s16 + $0x70] sm:$0xff] }
 0xdc0   :  { %v5876_v23 = vsel %vm13833_vm11, %v5875_v12, -inf }
 0xdc1   :  { %5877 = vmax.xlane.f32.xlu0 %v5876_v23 }
 0xe44   :  { %v5449_v26 = vpop.xlane.xlu1 %5448  ;;  %v5347_v1 = vpop.xlane.xlu0 %5346 }
 0xe45   :  { %v5450_v21 = vsub.f32 %v5446_v58, %v5449_v26  ;;  %v5348_v42 = vsub.f32 %v5344_v62, %v5347_v1 }
 0xe47   :  { %v5451_v16 = vmul.f32 1.442695, %v5450_v21  ;;  %v5349_v0 = vmul.f32 1.442695, %v5348_v42 }
 0xe49   :  { %10412 = vpow2.f32 %v5451_v16  ;;  %v5702_v3 = vpop.xlane.xlu0 %5701 }
 0xe4a   :  { %10414 = vpow2.f32 %v5349_v0  ;;  %v5703_v60 = vsub.f32 %v5699_v10, %v5702_v3  ;;  %v5307_v10 = vld [vmem:[%s13374_s16 + $0x60] sm:$0xff] }
 0xe4b   :  { %v12994_v4 = vpack.c.bf16 %v5308_v36, %v5307_v10  ;;  %v5321_v36 = vld [vmem:[%s13374_s16 + $0xd0] sm:$0xff] }
 0xe4c   :  { %v5704_v46 = vmul.f32 1.442695, %v5703_v60 }
 0xe4e   :  { %10416 = vpow2.f32 %v5704_v46  ;;  %v5878_v45 = vpop.xlane.xlu0 %5877 }
 0xe4f   :  { %v5879_v49 = vsub.f32 %v5875_v12, %v5878_v45  ;;  %v5310_v12 = vld [vmem:[%s13374_s16 + $0x78] sm:$0xff] }
 0xe50   :  { %v13004_v23 = vpack.c.bf16 %v5310_v12, %v5309_v43  ;;  %v5322_v43 = vld [vmem:[%s13374_s16 + $0xd8] sm:$0xff] }
 0xe51   :  { %v5880_v44 = vmul.f32 1.442695, %v5879_v49  ;;  %v5295_v49 = vld [vmem:[%s13374_s16] sm:$0xff] }
 0xe53   :  { %v10413_v30 = vpop.eup %10412  ;;  %10418 = vpow2.f32 %v5880_v44  ;;  %v5296_v44 = vld [vmem:[%s13374_s16 + $0x8] sm:$0xff] }
 0xe54   :  { %v10415_v37 = vpop.eup %10414  ;;  %v5453_v5 = vsel %vm13834_vm13, %v10413_v30, 0.0 }
 0xe55   :  { %5454 = vadd.xlane.f32.xlu1 %v5453_v5  ;;  %v5351_v7 = vsel %vm13835_vm10, %v10415_v37, 0.0  ;;  %v13018_v5 = vpack.c.bf16 %v5296_v44, %v5295_v49  ;;  %v13153_v44 = vld [vmem:[%s13370_s12 + $0x8] sm:$0xff] }
 0xe56   :  { %5352 = vadd.xlane.f32.xlu0 %v5351_v7  ;;  %v5297_v7 = vld [vmem:[%s13374_s16 + $0x10] sm:$0xff]  ;;  %vm6238_vm10 = vcmp.gt.f32.partialorder %v13153_v44, 0.0 }
 0xe58   :  { %v10417_v57 = vpop.eup %10416 }
 0xe59   :  { %v5706_v31 = vsel %vm13836_vm5, %v10417_v57, 0.0  ;;  %vm13842_vm5 = vcmask 261120  }
 0xe5a   :  { %5707 = vadd.xlane.f32.xlu1 %v5706_v31 }
 0xe5d   :  { %v10419_v32 = vpop.eup %10418 }
 0xe5e   :  { %v5882_v29 = vsel %vm13837_vm12, %v10419_v32, 0.0  ;;  %vm13843_vm12 = vmmov %vm13842_vm5 }
 0xe5f   :  { %5883 = vadd.xlane.f32.xlu1 %v5882_v29  ;;  %v5299_v29 = vld [vmem:[%s13374_s16 + $0x20] sm:$0xff] }
 0xe6c   :  { %5459 = vrot.lane.b32.xlu0 %v12888_v19, %s10510_s8 }
 0xe70   :  { %6231 = vperm.xlu0 %9875, %v12898_v9   ;;  %5888 = vrot.lane.b32.xlu1 %v12890_v27, %s10510_s8 }
 0xe74   :  { %6334 = vperm.xlu1 %10120, %v12898_v9   ;;  %10121 = vset.pattern.permute.xlu0 %v10508_v25 }
 0xe78   :  { %10122 = vset.pattern.permute.xlu1 %v10509_v61 }
 0xee2   :  { %v5455_v35 = vpop.xlane.xlu1 %5454 }
 0xee3   :  { %v5353_v55 = vpop.xlane.xlu0 %5352 }
 0xee4   :  { %10420 = vrcp.f32 %v5353_v55 }
 0xee5   :  { %10422 = vrcp.f32 %v5455_v35  ;;  %v5300_v35 = vld [vmem:[%s13374_s16 + $0x28] sm:$0xff] }
 0xee6   :  { %v13040_v55 = vpack.c.bf16 %v5300_v35, %v5299_v29 }
 0xee7   :  { %v5708_v40 = vpop.xlane.xlu1 %5707  ;;  %v5460_v59 = vpop.permute.xlu0 %5459 }
 0xee8   :  { %10424 = vrcp.f32 %v5708_v40  ;;  %v5301_v40 = vld [vmem:[%s13374_s16 + $0x30] sm:$0xff] }
 0xeec   :  { %v5884_v48 = vpop.xlane.xlu1 %5883 }
 0xeed   :  { %10426 = vrcp.f32 %v5884_v48 }
 0xeee   :  { %v10421_v19 = vpop.eup %10420 }
 0xeef   :  { %v5355_v53 = vmul.f32 %v10421_v19, %v10415_v37  ;;  %v6232_v51 = vpop.permute.xlu0 %6231  ;;  %v10423_v41 = vpop.eup %10422 }
 0xef0   :  { %v6234_v33 = vadd.f32 %v6232_v51, %v12906_v22  ;;  %v5889_v17 = vpop.permute.xlu1 %5888  ;;  %v5457_v47 = vmul.f32 %v10423_v41, %v10413_v30  ;;  %v5311_v51 = vld [vmem:[%s13374_s16 + $0x80] sm:$0xff]  ;;  %v5312_v41 = vld [vmem:[%s13374_s16 + $0x88] sm:$0xff] }
 0xef1   :  { %9008 = vmatmul.mubr.msk.f32.vlgmr.msra.gmra.mrb[104].mxu1 %vm13838_vm15, %v5355_v53  ;;  %vm13844_vm15 = vmmov %vm13842_vm5 }
 0xef2   :  { %vm6235_vm2 = vcmp.gt.f32.partialorder %v6234_v33, 0.0  ;;  %v6236_v25 = vmul.f32 0.01, %v6234_v33  ;;  %9011 = vmatpush3.msra.mxu1 %v5460_v59  ;;  %9012 = vmatprep.mubr.msk.f32.mxu1 %vm10506_vm14, %v10504_v34  ;;  %v10425_v18 = vpop.eup %10424  ;;  %v5302_v59 = vld [vmem:[%s13374_s16 + $0x38] sm:$0xff] }
 0xef3   :  { %9053 = vmatprep.subr.mxu1 %v10504_v34  ;;  %v5710_v22 = vmul.f32 %v10425_v18, %v10417_v57  ;;  %v5298_v57 = vld [vmem:[%s13374_s16 + $0x18] sm:$0xff]  ;;  %v13050_v19 = vpack.c.bf16 %v5302_v59, %v5301_v40 }
 0xef4   :  { %v6335_v39 = vpop.permute.xlu1 %6334  ;;  %v6237_v8 = vsel %vm6235_vm2, %v6234_v33, %v6236_v25  ;;  %v5313_v25 = vld [vmem:[%s13374_s16 + $0x90] sm:$0xff]  ;;  %vm13845_vm2 = vmmov %vm13839_vm1 }
 0xef5   :  { %v6337_v13 = vadd.f32 %v6335_v39, %v12903_v2  ;;  %9013 = vmatmul.mubr.msk.f32.vlgmr.msra.gmra.mrb[106].mxu1 %vm13839_vm1, %v5457_v47  ;;  %6240 = vrot.lane.b32.xlu1 %v6237_v8, %s10501_s29  ;;  %v5314_v47 = vld [vmem:[%s13374_s16 + $0x98] sm:$0xff]  ;;  %v5315_v8 = vld [vmem:[%s13374_s16 + $0xa0] sm:$0xff] }
 0xef6   :  { %9054 = vmatpush3.msra.mxu1 %v12890_v27  ;;  %9055 = vmatprep.mubr.msk.f32.mxu1 %vm10506_vm14, %v10504_v34  ;;  %v5303_v27 = vld [vmem:[%s13374_s16 + $0x40] sm:$0xff]  ;;  %v13072_v39 = vpack.c.bf16 %v5314_v47, %v5313_v25 }
 0xef7   :  { %vm6338_vm7 = vcmp.gt.f32.partialorder %v6337_v13, 0.0  ;;  %v6339_v58 = vmul.f32 0.01, %v6337_v13  ;;  %9077 = vmatprep.subr.mxu1 %v10504_v34  ;;  %v10427_v62 = vpop.eup %10426  ;;  %v12974_v28 = vpack.c.bf16 %v5304_v20, %v5303_v27  ;;  %v5319_v20 = vld [vmem:[%s13374_s16 + $0xc0] sm:$0xff] }
 0xef8   :  { %v5886_v2 = vmul.f32 %v10427_v62, %v10419_v32  ;;  %v13028_v32 = vpack.c.bf16 %v5298_v57, %v5297_v7  ;;  %v5318_v62 = vld [vmem:[%s13374_s16 + $0xb8] sm:$0xff]  ;;  %v13105_v10 = vpack.c.bf16 %v5320_v24, %v5319_v20 }
 0xef9   :  { %9056 = vmatmul.mubr.msk.f32.vlgmr.msra.gmra.mrb[108].mxu1 %vm13840_vm9, %v5710_v22  ;;  %v6340_v54 = vsel %vm6338_vm7, %v6337_v13, %v6339_v58  ;;  %9669 = vmatpush3.bf16.msra.mxu0 %v12974_v28  ;;  %v5316_v13 = vld [vmem:[%s13374_s16 + $0xa8] sm:$0xff]  ;;  %v5317_v58 = vld [vmem:[%s13374_s16 + $0xb0] sm:$0xff]  ;;  %vm13846_vm9 = vmmov %vm13839_vm1 }
 0xefa   :  { %9078 = vmatpush3.msra.mxu1 %v5889_v17  ;;  %6342 = vrot.lane.b32.xlu1 %v6340_v54, %s10501_s29  ;;  %v13061_v17 = vpack.c.bf16 %v5312_v41, %v5311_v51  ;;  %v13084_v22 = vpack.c.bf16 %v5316_v13, %v5315_v8 }
 0xefb   :  { %9079 = vmatprep.mubr.msk.f32.mxu1 %vm10506_vm14, %v10504_v34  ;;  %9101 = vmatprep.subr.mxu1 %v10504_v34 }
 0xefc   :  { %9670 = vmatprep.subr.bf16.mxu0 %v10505_v56 }
 0xefd   :  { %9080 = vmatmul.mubr.msk.f32.vlgmr.msra.gmra.mrb[110].mxu1 %vm13841_vm4, %v5886_v2  ;;  %9672 = vmatpush3.bf16.msra.mxu0 %v12984_v14  ;;  %v13094_v2 = vpack.c.bf16 %v5318_v62, %v5317_v58  ;;  %vm13848_vm4 = vmmov %vm13839_vm1 }
 0xefe   :  { %9103 = vmatprep.mubr.msk.f32.mxu1 %vm10506_vm14, %v10504_v34  ;;  %9673 = vmatprep.subr.bf16.mxu0 %v10505_v56 }
 0xf01   :  { %9675 = vmatpush3.bf16.msra.mxu0 %v12994_v4 }
 0xf02   :  { %9676 = vmatprep.subr.bf16.mxu0 %v10505_v56 }
 0xf05   :  { %9678 = vmatpush3.bf16.msra.mxu0 %v13004_v23 }
 0xf06   :  { %9679 = vmatprep.subr.bf16.mxu0 %v10505_v56 }
 0xf67   :  { %v6241_v7 = vpop.permute.xlu1 %6240 }
 0xf68   :  { %v6243_v35 = vsel %vm6238_vm10, %v6241_v7, -1e+09 }
 0xf69   :  { %v6244_v59 = vsel %vm13845_vm2, %v6243_v35, -inf }
 0xf6c   :  { %v6343_v40 = vpop.permute.xlu1 %6342 }
 0xfc4   :  { %v5425_v26 = vpop.f32.mrb[104].mxu1 }
 0xfc5   :  { %v9009_v1 = vpop.f32.mrb[105].mxu1  ;;  %v5430_v45 = vmul.f32 1.442695, %v5425_v26  ;;  %vm5429_vm6 = vcmp.gt.f32.partialorder %v5425_v26, 0.0 }
 0xfc6   :  { %v5323_v1 = vld [vmem:[%s13374_s16 + $0xe0] sm:$0xff] }
 0xfc8   :  { %v5531_v21 = vpop.f32.mrb[106].mxu1 }
 0xfc9   :  { %v5536_v42 = vmul.f32 1.442695, %v5531_v21  ;;  %v9014_v16 = vpop.f32.mrb[107].mxu1  ;;  %vm5535_vm3 = vcmp.gt.f32.partialorder %v5531_v21, 0.0 }
 0xfca   :  { %v5325_v16 = vld [vmem:[%s13374_s16 + $0xf0] sm:$0xff] }
 0xfcb   :  { %10428 = vpow2.f32 %v5536_v42 }
 0xfcc   :  { %v13008_v0 = vpop.f32.mrb[108].mxu1  ;;  %10430 = vpow2.f32 %v5430_v45 }
 0xfcd   :  { %v9057_v3 = vpop.f32.mrb[109].mxu1  ;;  %v5785_v53 = vmul.f32 1.442695, %v13008_v0  ;;  %vm5784_vm11 = vcmp.gt.f32.partialorder %v13008_v0, 0.0 }
 0xfcf   :  { %10432 = vpow2.f32 %v5785_v53 }
 0xfd0   :  { %v13010_v60 = vpop.f32.mrb[110].mxu1 }
 0xfd1   :  { %v9081_v46 = vpop.f32.mrb[111].mxu1  ;;  %v5965_v27 = vmul.f32 1.442695, %v13010_v60  ;;  %vm5964_vm13 = vcmp.gt.f32.partialorder %v13010_v60, 0.0 }
 0xfd3   :  { %10434 = vpow2.f32 %v5965_v27 }
 0xfd5   :  { %v10429_v30 = vpop.eup %10428 }
 0xfd6   :  { %v7668_v37 = vadd.f32 -1.0, %v10429_v30  ;;  %v10431_v48 = vpop.eup %10430  ;;  %v13158_v30 = vld [vmem:[%s13375_s17] ss:$0 sm:$0xff] }
 0xfd7   :  { %v7666_v33 = vadd.f32 -1.0, %v10431_v48  ;;  %v6345_v48 = vsel %vm6238_vm10, %v6343_v40, -1e+09 }
 0xfd8   :  { %v5539_v31 = vsel %vm5535_vm3, %v5531_v21, %v7668_v37  ;;  %v5324_v21 = vld [vmem:[%s13374_s16 + $0xe8] sm:$0xff]  ;;  %v6346_v53 = vsel %vm13839_vm1, %v6345_v48, -inf  ;;  %vm13849_vm3 = vmmov %vm13839_vm1 }
 0xfd9   :  { %9032 = vmatmul.mubr.msk.f32.vlgmr.msra.gmra.mrb[98].mxu0 %vm5540_vm0, %v5539_v31  ;;  %v5433_v18 = vsel %vm5429_vm6, %v5425_v26, %v7666_v33  ;;  %v10433_v54 = vpop.eup %10432  ;;  %v13118_v26 = vpack.c.bf16 %v5322_v43, %v5321_v36  ;;  %v13130_v42 = vpack.c.bf16 %v5324_v21, %v5323_v1  ;;  %v13166_v31 = vld [vmem:[%s13376_s18] sm:$0x1]  ;;  %vm13850_vm6 = vmmov %vm13839_vm1 }
 0xfda   :  { %9681 = vmatpush3.bf16.msra.mxu0 %v13018_v5  ;;  %9050 = vmatprep.mubr.msk.f32.mxu0 %vm10506_vm14, %v10504_v34  ;;  %v7672_v63 = vadd.f32 -1.0, %v10433_v54 }
 0xfdb   :  { %9682 = vmatprep.subr.bf16.mxu0 %v10505_v56 }
 0xfdc   :  { %v5788_v12 = vsel %vm5784_vm11, %v13008_v0, %v7672_v63  ;;  %v5326_v0 = vld [vmem:[%s13374_s16 + $0xf8] sm:$0xff]  ;;  %vm13851_vm11 = vmmov %vm13839_vm1 }
 0xfdd   :  { %v10435_v3 = vpop.eup %10434  ;;  %v13140_v46 = vpack.c.bf16 %v5326_v0, %v5325_v16 }
 0xfde   :  { %9684 = vmatpush3.bf16.msra.mxu0 %v13028_v32  ;;  %v7675_v45 = vadd.f32 -1.0, %v10435_v3 }
 0xfdf   :  { %9685 = vmatprep.subr.bf16.mxu0 %v10505_v56 }
 0xfe0   :  { %v5968_v49 = vsel %vm5964_vm13, %v13010_v60, %v7675_v45 }
 0xfe2   :  { %9687 = vmatpush3.bf16.msra.mxu0 %v13040_v55 }
 0xfe3   :  { %9688 = vmatprep.subr.bf16.mxu0 %v10505_v56 }
 0xfe6   :  { %9690 = vmatpush3.bf16.msra.mxu0 %v13050_v19 }
 0xfe7   :  { %9691 = vmatprep.subr.bf16.mxu0 %v10505_v56 }
 0xfe9   :  { %9051 = vmatmul.mubr.msk.f32.vlgmr.msra.gmra.mrb[98].mxu0 %vm5540_vm0, %v5433_v18 }
 0xfea   :  { %9693 = vmatpush3.bf16.msra.mxu0 %v13061_v17  ;;  %9074 = vmatprep.mubr.msk.f32.mxu0 %vm10506_vm14, %v10504_v34 }
 0xfeb   :  { %9694 = vmatprep.subr.bf16.mxu0 %v10505_v56 }
 0xfee   :  { %9696 = vmatpush3.bf16.msra.mxu0 %v13072_v39 }
 0xfef   :  { %9697 = vmatprep.subr.bf16.mxu0 %v10505_v56 }
 0xff2   :  { %9699 = vmatpush3.bf16.msra.mxu0 %v13084_v22 }
 0xff3   :  { %9700 = vmatprep.subr.bf16.mxu0 %v10505_v56 }
 0xff6   :  { %9702 = vmatpush3.bf16.msra.mxu0 %v13094_v2 }
 0xff7   :  { %9703 = vmatprep.subr.bf16.mxu0 %v10505_v56 }
 0xff9   :  { %9075 = vmatmul.mubr.msk.f32.vlgmr.msra.gmra.mrb[98].mxu0 %vm5540_vm0, %v5788_v12 }
 0xffa   :  { %9705 = vmatpush3.bf16.msra.mxu0 %v13105_v10  ;;  %9098 = vmatprep.mubr.msk.f32.mxu0 %vm10506_vm14, %v10504_v34 }
 0xffb   :  { %9706 = vmatprep.subr.bf16.mxu0 %v10505_v56 }
 0xffe   :  { %9708 = vmatpush3.bf16.msra.mxu0 %v13118_v26 }
 0xfff   :  { %9709 = vmatprep.subr.bf16.mxu0 %v10505_v56 }
0x1002   :  { %9711 = vmatpush3.bf16.msra.mxu0 %v13130_v42 }
0x1003   :  { %9712 = vmatprep.subr.bf16.mxu0 %v10505_v56 }
0x1006   :  { %9714 = vmatpush3.bf16.msra.mxu0 %v13140_v46 }
0x1007   :  { %9207 = vmatprep.subr.mxu0 %v10504_v34 }
0x1009   :  { %9099 = vmatmul.mubr.msk.f32.vlgmr.msra.gmra.mrb[98].mxu0 %vm5540_vm0, %v5968_v49 }
0x100a   :  { %9209 = vmatprep.mubr.msk.f32.mxu0 %vm10506_vm14, %v10504_v34 }
0x10dc   :  { %v6038_v37 = vpop.f32.mrb[98].mxu0 }
0x10dd   :  { %v6049_v60 = vmul.f32 %v13158_v30, %v6038_v37  ;;  %v9100_v57 = vpop.f32.mrb[99].mxu0  ;;  %9102 = vmatpush3.xpose.msk.msra.mxu1 %vm13842_vm5, %v6038_v37  ;;  %vm13852_vm5 = vmmov %vm13839_vm1 }
0x10de   :  { %9106 = vmatprep.subr.mxu1 %v10504_v34 }
0x10df   :  { %v6050_v29 = vsel %vm13843_vm12, %v6049_v60, 0.0  ;;  %vm13853_vm12 = vmmov %vm13839_vm1 }
0x10e0   :  { %9104 = vmatmul.mubr.msk.f32.vlgmr.msra.gmra.mrb[112].mxu1 %vm13844_vm15, %v13166_v31  ;;  %6051 = vadd.xlane.f32.xlu0 %v6050_v29 }
0x10e1   :  { %9107 = vmatpush3.msra.mxu1 %v6038_v37  ;;  %9108 = vmatprep.mubr.msk.f32.mxu1 %vm10506_vm14, %v10504_v34 }
0x10e2   :  { %9111 = vmatprep.subr.mxu1 %v10504_v34 }
0x10e4   :  { %6245 = vmax.xlane.f32.xlu0 %v6244_v59 }
0x10e8   :  { %6347 = vmax.xlane.f32.xlu0 %v6346_v53 }
0x116d   :  { %v6052_v25 = vpop.xlane.xlu0 %6051 }
0x1171   :  { %v6246_v62 = vpop.xlane.xlu0 %6245 }
0x1172   :  { %v6247_v54 = vsub.f32 %v6243_v35, %v6246_v62 }
0x1174   :  { %v6248_v63 = vmul.f32 1.442695, %v6247_v54 }
0x1175   :  { %v6348_v27 = vpop.xlane.xlu0 %6347 }
0x1176   :  { %v6349_v36 = vsub.f32 %v6345_v48, %v6348_v27 }
0x1178   :  { %v6350_v12 = vmul.f32 1.442695, %v6349_v36 }
0x11b3   :  { %v6125_v51 = vpop.f32.mrb[112].mxu1 }
0x11b4   :  { %v6132_v41 = vrot.slane %v6125_v51, %v13829_v50  ;;  %v9105_v33 = vpop.f32.mrb[113].mxu1 }
0x11b6   :  { %v6133_v47 = vadd.f32 %v6132_v41, %v6052_v25 }
0x11b8   :  { %v6135_v18 = vmul.f32 0.01, %v6133_v47  ;;  %vm6134_vm7 = vcmp.gt.f32.partialorder %v6133_v47, 0.0 }
0x11ba   :  { %v6136_v8 = vsel %vm6134_vm7, %v6133_v47, %v6135_v18  ;;  %vm13854_vm7 = vmmov %vm13849_vm3 }
0x11bb   :  { %v6137_v13 = vsel %vm5343_vm8, %v6136_v8, -1e+09  ;;  %vm13847_vm8 = vmmov %vm13839_vm1 }
0x11bc   :  { %v6138_v58 = vsel %vm13846_vm9, %v6137_v13, -inf  ;;  %vm13855_vm9 = vmmov %vm13849_vm3 }
0x11bd   :  { %6139 = vmax.xlane.f32.xlu1 %v6138_v58 }
0x11ce   :  { %6358 = vrot.lane.b32.xlu1 %v12894_v15, %s10510_s8 }
0x124a   :  { %v6140_v20 = vpop.xlane.xlu1 %6139 }
0x124b   :  { %v6141_v24 = vsub.f32 %v6137_v13, %v6140_v20 }
0x124d   :  { %v6142_v43 = vmul.f32 1.442695, %v6141_v24 }
0x124e   :  { %v6359_v40 = vpop.permute.xlu1 %6358 }
0x124f   :  { %10436 = vpow2.f32 %v6142_v43 }
0x1250   :  { %10438 = vpow2.f32 %v6248_v63 }
0x1251   :  { %10440 = vpow2.f32 %v6350_v12 }
0x1259   :  { %v10437_v52 = vpop.eup %10436 }
0x125a   :  { %v6144_v1 = vsel %vm13847_vm8, %v10437_v52, 0.0  ;;  %v10439_v21 = vpop.eup %10438  ;;  %vm13856_vm8 = vmmov %vm13849_vm3 }
0x125b   :  { %6145 = vadd.xlane.f32.xlu0 %v6144_v1  ;;  %v6250_v16 = vsel %vm13848_vm4, %v10439_v21, 0.0  ;;  %v10441_v0 = vpop.eup %10440  ;;  %vm13857_vm4 = vmmov %vm13849_vm3 }
0x125c   :  { %v6352_v3 = vsel %vm13849_vm3, %v10441_v0, 0.0 }
0x125f   :  { %6251 = vadd.xlane.f32.xlu0 %v6250_v16 }
0x1263   :  { %6353 = vadd.xlane.f32.xlu0 %v6352_v3 }
0x1279   :  { %6586 = vperm.xlu0 %10121, %v12898_v9  }
0x127d   :  { %10123 = vset.pattern.permute.xlu0 %v10509_v61 }
0x12e8   :  { %v6146_v45 = vpop.xlane.xlu0 %6145 }
0x12e9   :  { %10442 = vrcp.f32 %v6146_v45 }
0x12ec   :  { %v6252_v49 = vpop.xlane.xlu0 %6251 }
0x12ed   :  { %10444 = vrcp.f32 %v6252_v49 }
0x12f0   :  { %v6354_v37 = vpop.xlane.xlu0 %6353 }
0x12f1   :  { %10446 = vrcp.f32 %v6354_v37 }
0x12f3   :  { %v10443_v7 = vpop.eup %10442 }
0x12f4   :  { %v6148_v60 = vmul.f32 %v10443_v7, %v10437_v52 }
0x12f6   :  { %9109 = vmatmul.mubr.msk.f32.vlgmr.msra.gmra.mrb[114].mxu1 %vm13850_vm6, %v6148_v60  ;;  %vm13858_vm6 = vmmov %vm13857_vm4 }
0x12f7   :  { %v10445_v57 = vpop.eup %10444  ;;  %9112 = vmatpush3.msra.mxu1 %v12894_v15  ;;  %9113 = vmatprep.mubr.msk.f32.mxu1 %vm10506_vm14, %v10504_v34 }
0x12f8   :  { %v6254_v29 = vmul.f32 %v10445_v57, %v10439_v21  ;;  %v6587_v35 = vpop.permute.xlu0 %6586  ;;  %9116 = vmatprep.subr.mxu1 %v10504_v34 }
0x12f9   :  { %v6589_v61 = vadd.f32 %v6587_v35, %v12917_v11 }
0x12fa   :  { %9114 = vmatmul.mubr.msk.f32.vlgmr.msra.gmra.mrb[116].mxu1 %vm13851_vm11, %v6254_v29 }
0x12fb   :  { %v10447_v59 = vpop.eup %10446  ;;  %vm6590_vm13 = vcmp.gt.f32.partialorder %v6589_v61, 0.0  ;;  %v6591_v48 = vmul.f32 0.01, %v6589_v61  ;;  %9117 = vmatpush3.msra.mxu1 %v6359_v40  ;;  %9118 = vmatprep.mubr.msk.f32.mxu1 %vm10506_vm14, %v10504_v34 }
0x12fc   :  { %v6356_v15 = vmul.f32 %v10447_v59, %v10441_v0  ;;  %9715 = vmatprep.subr.bf16.mxu1 %v10505_v56 }
0x12fd   :  { %v6592_v53 = vsel %vm6590_vm13, %v6589_v61, %v6591_v48  ;;  %vm13859_vm13 = vcmask 261120  }
0x12fe   :  { %6594 = vrot.lane.b32.xlu1 %v6592_v53, %s10501_s29  ;;  %9119 = vmatmul.mubr.msk.f32.vlgmr.msra.gmra.mrb[118].mxu1 %vm13852_vm5, %v6356_v15  ;;  %vm13860_vm5 = vmmov %vm13859_vm13 }
0x12ff   :  { %9717 = vmatpush3.bf16.msra.mxu1 %v12974_v28  ;;  %9137 = vmatprep.mubr.msk.f32.mxu1 %vm10506_vm14, %v10504_v34 }
0x1300   :  { %9718 = vmatprep.subr.bf16.mxu1 %v10505_v56 }
0x1303   :  { %9720 = vmatpush3.bf16.msra.mxu1 %v12984_v14 }
0x1304   :  { %9721 = vmatprep.subr.bf16.mxu1 %v10505_v56 }
0x1307   :  { %9723 = vmatpush3.bf16.msra.mxu1 %v12994_v4 }
0x1308   :  { %9724 = vmatprep.subr.bf16.mxu1 %v10505_v56 }
0x130b   :  { %9726 = vmatpush3.bf16.msra.mxu1 %v13004_v23 }
0x130c   :  { %9727 = vmatprep.subr.bf16.mxu1 %v10505_v56 }
0x1370   :  { %v6595_v11 = vpop.permute.xlu1 %6594 }
0x1371   :  { %v6597_v28 = vsel %vm6238_vm10, %v6595_v11, -1e+09 }
0x1372   :  { %v6598_v51 = vsel %vm13853_vm12, %v6597_v28, -inf  ;;  %vm13861_vm12 = vmmov %vm13860_vm5 }
0x1373   :  { %6599 = vmax.xlane.f32.xlu1 %v6598_v51 }
0x1384   :  { %6762 = vperm.xlu1 %10122, %v12898_v9  }
0x13c9   :  { %v13218_v14 = vpop.f32.mrb[114].mxu1 }
0x13ca   :  { %v9110_v41 = vpop.f32.mrb[115].mxu1 }
0x13cd   :  { %v6324_v33 = vpop.f32.mrb[116].mxu1 }
0x13ce   :  { %v9115_v4 = vpop.f32.mrb[117].mxu1  ;;  %v6329_v23 = vmul.f32 1.442695, %v6324_v33  ;;  %vm6328_vm2 = vcmp.gt.f32.partialorder %v6324_v33, 0.0 }
0x13d1   :  { %v6430_v25 = vpop.f32.mrb[118].mxu1 }
0x13d2   :  { %v6435_v47 = vmul.f32 1.442695, %v6430_v25  ;;  %v9120_v18 = vpop.f32.mrb[119].mxu1  ;;  %vm6434_vm15 = vcmp.gt.f32.partialorder %v6430_v25, 0.0 }
0x13d4   :  { %10448 = vpow2.f32 %v6435_v47 }
0x13d5   :  { %10450 = vpow2.f32 %v6329_v23 }
0x13de   :  { %v10449_v8 = vpop.eup %10448 }
0x13df   :  { %v7686_v13 = vadd.f32 -1.0, %v10449_v8  ;;  %v10451_v9 = vpop.eup %10450 }
0x13e0   :  { %v7684_v62 = vadd.f32 -1.0, %v10451_v9 }
0x13e1   :  { %v6438_v58 = vsel %vm6434_vm15, %v6430_v25, %v7686_v13 }
0x13e2   :  { %9138 = vmatmul.mubr.msk.f32.vlgmr.msra.gmra.mrb[120].mxu1 %vm5540_vm0, %v6438_v58 }
0x13e3   :  { %9729 = vmatpush3.bf16.msra.mxu1 %v13018_v5  ;;  %9156 = vmatprep.mubr.msk.f32.mxu1 %vm10506_vm14, %v10504_v34  ;;  %v6332_v5 = vsel %vm6328_vm2, %v6324_v33, %v7684_v62  ;;  %vm13862_vm2 = vmmov %vm13857_vm4  ;;  %v7116_v62 = vld [vmem:[%s13377_s19] sm:$0xff] }
0x13e4   :  { %9730 = vmatprep.subr.bf16.mxu1 %v10505_v56 }
0x13e7   :  { %9732 = vmatpush3.bf16.msra.mxu1 %v13028_v32 }
0x13e8   :  { %9733 = vmatprep.subr.bf16.mxu1 %v10505_v56 }
0x13eb   :  { %9735 = vmatpush3.bf16.msra.mxu1 %v13040_v55 }
0x13ec   :  { %9736 = vmatprep.subr.bf16.mxu1 %v10505_v56 }
0x13ef   :  { %9738 = vmatpush3.bf16.msra.mxu1 %v13050_v19 }
0x13f0   :  { %9159 = vmatprep.subr.mxu1 %v10504_v34 }
0x13f2   :  { %9157 = vmatmul.mubr.msk.f32.vlgmr.msra.gmra.mrb[120].mxu1 %vm5540_vm0, %v6332_v5  ;;  %v7117_v5 = vld [vmem:[%s13377_s19 + $0x8] sm:$0xff] }
0x13f3   :  { %9160 = vmatpush3.msra.mxu1 %v12896_v38  ;;  %9161 = vmatprep.mubr.msk.f32.mxu1 %vm10506_vm14, %v10504_v34 }
0x13f4   :  { %9739 = vmatprep.subr.bf16.mxu1 %v10505_v56 }
0x1400   :  { %v6600_v32 = vpop.xlane.xlu1 %6599 }
0x1401   :  { %v6601_v55 = vsub.f32 %v6597_v28, %v6600_v32  ;;  %v9763_v32 = vpack.c.bf16 %v7117_v5, %v7116_v62 }
0x1403   :  { %v6602_v54 = vmul.f32 1.442695, %v6601_v55  ;;  %v7118_v55 = vld [vmem:[%s13377_s19 + $0x10] sm:$0xff] }
0x1404   :  { %v6763_v27 = vpop.permute.xlu1 %6762 }
0x1405   :  { %10452 = vpow2.f32 %v6602_v54  ;;  %v6765_v19 = vadd.f32 %v6763_v27, %v12927_v6  ;;  %v7210_v27 = vld [vmem:[%s13379_s21] sm:$0xff] }
0x1407   :  { %vm6766_vm1 = vcmp.gt.f32.partialorder %v6765_v19, 0.0  ;;  %v6767_v20 = vmul.f32 0.01, %v6765_v19 }
0x1409   :  { %v6768_v24 = vsel %vm6766_vm1, %v6765_v19, %v6767_v20  ;;  %vm13864_vm1 = vmmov %vm13862_vm2  ;;  %v7211_v19 = vld [vmem:[%s13379_s21 + $0x8] sm:$0xff] }
0x140a   :  { %6770 = vrot.lane.b32.xlu1 %v6768_v24, %s10501_s29  ;;  %v9771_v20 = vpack.c.bf16 %v7211_v19, %v7210_v27 }
0x140f   :  { %v10453_v63 = vpop.eup %10452 }
0x1410   :  { %v6604_v36 = vsel %vm13854_vm7, %v10453_v63, 0.0  ;;  %vm13865_vm7 = vmmov %vm13860_vm5 }
0x1411   :  { %6605 = vadd.xlane.f32.xlu0 %v6604_v36 }
0x147c   :  { %v6771_v43 = vpop.permute.xlu1 %6770 }
0x147d   :  { %v6773_v12 = vsel %vm6238_vm10, %v6771_v43, -1e+09  ;;  %v7212_v43 = vld [vmem:[%s13379_s21 + $0x10] sm:$0xff] }
0x147e   :  { %v6774_v52 = vsel %vm13855_vm9, %v6773_v12, -inf }
0x147f   :  { %6775 = vmax.xlane.f32.xlu1 %v6774_v52 }
0x149e   :  { %v6606_v1 = vpop.xlane.xlu0 %6605 }
0x149f   :  { %10454 = vrcp.f32 %v6606_v1 }
0x14a9   :  { %v10455_v21 = vpop.eup %10454 }
0x14aa   :  { %v6608_v6 = vmul.f32 %v10455_v21, %v10453_v63 }
0x14ac   :  { %9162 = vmatmul.mubr.msk.f32.vlgmr.msra.gmra.mrb[122].mxu1 %vm13856_vm8, %v6608_v6  ;;  %vm13866_vm8 = vmmov %vm13860_vm5 }
0x14ad   :  { %9741 = vmatpush3.bf16.msra.mxu1 %v13061_v17  ;;  %9180 = vmatprep.mubr.msk.f32.mxu1 %vm10506_vm14, %v10504_v34 }
0x14ae   :  { %9742 = vmatprep.subr.bf16.mxu1 %v10505_v56 }
0x14b1   :  { %9744 = vmatpush3.bf16.msra.mxu1 %v13072_v39 }
0x14b2   :  { %9745 = vmatprep.subr.bf16.mxu1 %v10505_v56 }
0x14b5   :  { %9747 = vmatpush3.bf16.msra.mxu1 %v13084_v22 }
0x14b6   :  { %9748 = vmatprep.subr.bf16.mxu1 %v10505_v56 }
0x14b9   :  { %9750 = vmatpush3.bf16.msra.mxu1 %v13094_v2 }
0x14ba   :  { %9183 = vmatprep.subr.mxu1 %v10504_v34 }
0x150c   :  { %v6776_v16 = vpop.xlane.xlu1 %6775 }
0x150d   :  { %v6777_v0 = vsub.f32 %v6773_v12, %v6776_v16  ;;  %v7213_v12 = vld [vmem:[%s13379_s21 + $0x18] sm:$0xff]  ;;  %v7214_v16 = vld [vmem:[%s13379_s21 + $0x20] sm:$0xff] }
0x150e   :  { %v9775_v21 = vpack.c.bf16 %v7213_v12, %v7212_v43 }
0x150f   :  { %v6778_v17 = vmul.f32 1.442695, %v6777_v0  ;;  %v7215_v0 = vld [vmem:[%s13379_s21 + $0x28] sm:$0xff] }
0x1511   :  { %10456 = vpow2.f32 %v6778_v17  ;;  %v9779_v17 = vpack.c.bf16 %v7215_v0, %v7214_v16 }
0x151b   :  { %v10457_v3 = vpop.eup %10456 }
0x151c   :  { %v6780_v45 = vsel %vm13857_vm4, %v10457_v3, 0.0  ;;  %vm13867_vm4 = vmmov %vm13860_vm5 }
0x151d   :  { %6781 = vadd.xlane.f32.xlu0 %v6780_v45  ;;  %v7217_v45 = vld [vmem:[%s13379_s21 + $0x38] sm:$0xff] }
0x1533   :  { %6786 = vrot.lane.b32.xlu0 %v12896_v38, %s10510_s8  ;;  %s10511_s8 = smov [#allocation2]  }
0x1534   :  { %s7359_s27 = sshll.u32 %s10511_s8, 4  ;;  %s7360_s27 = int_to_ptr.vmem [resolvable:$true] %s7359_s27 }
0x1535   :  { %s10476_s15 = scalar_lea.vmem %s7360_s27, 256  ;;  %p10481_p1 = scmp.lt.s32.totalorder %s7360_s27, %s7360_s27 }
0x1536   :  { %p10477_p0 = scmp.ne.s32.totalorder %s7360_s27, %s10476_s15  ;;  %p10482_p2 = scmp.lt.s32.totalorder %s10476_s15, %s10476_s15 }
0x1538   :  { %p10483_p3 = por %p10482_p2, %p10481_p1 }
0x153a   :  { %p10484_p4 = pnand %p10483_p3, %p10477_p0 }
0x157f   :  { %v6678_v39 = vpop.f32.mrb[122].mxu1 }
0x1580   :  { %v6683_v49 = vmul.f32 1.442695, %v6678_v39  ;;  %v9163_v22 = vpop.f32.mrb[123].mxu1  ;;  %vm6682_vm3 = vcmp.gt.f32.partialorder %v6678_v39, 0.0 }
0x1582   :  { %10458 = vpow2.f32 %v6683_v49  ;;  %v7699_v49 = vld [vmem:[%s13378_s20] ss:$0 sm:$0xff] }
0x158c   :  { %v10459_v37 = vpop.eup %10458 }
0x158d   :  { %v7690_v7 = vadd.f32 -1.0, %v10459_v37 }
0x158f   :  { %v6686_v2 = vsel %vm6682_vm3, %v6678_v39, %v7690_v7  ;;  %vm13868_vm3 = vmmov %vm13867_vm4 }
0x1590   :  { %9181 = vmatmul.mubr.msk.f32.vlgmr.msra.gmra.mrb[120].mxu1 %vm5540_vm0, %v6686_v2 }
0x1591   :  { %9185 = vmatprep.mubr.msk.f32.mxu1 %vm10506_vm14, %v10504_v34 }
0x15aa   :  { %v6782_v60 = vpop.xlane.xlu0 %6781 }
0x15ab   :  { %10460 = vrcp.f32 %v6782_v60 }
0x15ae   :  { %v6787_v57 = vpop.permute.xlu0 %6786 }
0x15af   :  { %9184 = vmatpush3.msra.mxu1 %v6787_v57 }
0x15b0   :  { %9751 = vmatprep.subr.bf16.mxu1 %v10505_v56 }
0x15b5   :  { %v10461_v38 = vpop.eup %10460 }
0x15b6   :  { %v6784_v29 = vmul.f32 %v10461_v38, %v10457_v3  ;;  %v7216_v3 = vld [vmem:[%s13379_s21 + $0x30] sm:$0xff]  ;;  %v7702_v38 = vld [vmem:[%s13380_s22] ss:$0 sm:$0xff] }
0x15b7   :  { %v9783_v39 = vpack.c.bf16 %v7217_v45, %v7216_v3 }
0x15b8   :  { %9186 = vmatmul.mubr.msk.f32.vlgmr.msra.gmra.mrb[124].mxu1 %vm13858_vm6, %v6784_v29 }
0x15b9   :  { %9753 = vmatpush3.bf16.msra.mxu1 %v13105_v10  ;;  %9204 = vmatprep.mubr.msk.f32.mxu1 %vm10506_vm14, %v10504_v34 }
0x15ba   :  { %9754 = vmatprep.subr.bf16.mxu1 %v10505_v56 }
0x15bd   :  { %9756 = vmatpush3.bf16.msra.mxu1 %v13118_v26 }
0x15be   :  { %9757 = vmatprep.subr.bf16.mxu1 %v10505_v56 }
0x15c1   :  { %9759 = vmatpush3.bf16.msra.mxu1 %v13130_v42 }
0x15c2   :  { %9760 = vmatprep.subr.bf16.mxu1 %v10505_v56 }
0x15c5   :  { %9762 = vmatpush3.bf16.msra.mxu1 %v13140_v46 }
0x168b   :  { %v6858_v35 = vpop.f32.mrb[124].mxu1 }
0x168c   :  { %v6863_v61 = vmul.f32 1.442695, %v6858_v35  ;;  %v9187_v40 = vpop.f32.mrb[125].mxu1  ;;  %vm6862_vm11 = vcmp.gt.f32.partialorder %v6858_v35, 0.0 }
0x168e   :  { %10462 = vpow2.f32 %v6863_v61 }
0x1698   :  { %v10463_v10 = vpop.eup %10462 }
0x1699   :  { %v7693_v59 = vadd.f32 -1.0, %v10463_v10 }
0x169b   :  { %v6866_v48 = vsel %vm6862_vm11, %v6858_v35, %v7693_v59 }
0x169c   :  { %9205 = vmatmul.mubr.msk.f32.vlgmr.msra.gmra.mrb[120].mxu1 %vm5540_vm0, %v6866_v48 }
0x176f   :  { %v6936_v15 = vpop.f32.mrb[120].mxu1 }
0x1770   :  { %v6941_v26 = vmul.f32 %v13158_v30, %v6936_v15  ;;  %v9206_v53 = vpop.f32.mrb[121].mxu1  ;;  %9208 = vmatpush3.xpose.msk.msra.mxu0 %vm13859_vm13, %v6936_v15 }
0x1771   :  { %9212 = vmatprep.subr.mxu0 %v10504_v34 }
0x1772   :  { %v6942_v56 = vsel %vm13860_vm5, %v6941_v26, 0.0 }
0x1773   :  { %9210 = vmatmul.mubr.msk.f32.vlgmr.msra.gmra.mrb[100].mxu0 %vm13861_vm12, %v13166_v31  ;;  %6943 = vadd.xlane.f32.xlu0 %v6942_v56 }
0x1774   :  { %9213 = vmatpush3.msra.mxu0 %v6936_v15  ;;  %9214 = vmatprep.mubr.msk.f32.mxu0 %vm10506_vm14, %v10504_v34  ;;  %vm13863_vm14 = vmmov %vm13862_vm2 }
0x1775   :  { %9764 = vmatprep.subr.bf16.mxu0 %v9763_v32 }
0x1800   :  { %v6944_v30 = vpop.xlane.xlu0 %6943 }
0x1846   :  { %v7014_v42 = vpop.f32.mrb[100].mxu0 }
0x1847   :  { %v7021_v46 = vrot.slane %v7014_v42, %v13829_v50  ;;  %v9211_v11 = vpop.f32.mrb[101].mxu0  ;;  %v6223_v50 = vmul.f32 1.442695, %v13218_v14 }
0x1849   :  { %v7022_v28 = vadd.f32 %v7021_v46, %v6944_v30 }
0x184b   :  { %v7024_v51 = vmul.f32 0.01, %v7022_v28  ;;  %vm7023_vm15 = vcmp.gt.f32.partialorder %v7022_v28, 0.0 }
0x184d   :  { %v7025_v41 = vsel %vm7023_vm15, %v7022_v28, %v7024_v51 }
0x184e   :  { %v7026_v33 = vsel %vm6238_vm10, %v7025_v41, -1e+09  ;;  %vm6222_vm10 = vcmp.gt.f32.partialorder %v13218_v14, 0.0 }
0x184f   :  { %v7027_v4 = vsel %vm13862_vm2, %v7026_v33, -inf }
0x1850   :  { %7028 = vmax.xlane.f32.xlu1 %v7027_v4 }
0x18dd   :  { %v7029_v31 = vpop.xlane.xlu1 %7028 }
0x18de   :  { %v7030_v25 = vsub.f32 %v7026_v33, %v7029_v31 }
0x18e0   :  { %v7031_v47 = vmul.f32 1.442695, %v7030_v25 }
0x18e2   :  { %10464 = vpow2.f32 %v7031_v47 }
0x18e3   :  { %10466 = vpow2.f32 %v6223_v50  ;;  %v7705_v50 = vld [vmem:[%s13381_s23] ss:$0 sm:$0xff] }
0x18ec   :  { %v10465_v34 = vpop.eup %10464 }
0x18ed   :  { %v7033_v18 = vsel %vm13863_vm14, %v10465_v34, 0.0  ;;  %v10467_v8 = vpop.eup %10466 }
0x18ee   :  { %7034 = vadd.xlane.f32.xlu1 %v7033_v18  ;;  %v7681_v13 = vadd.f32 -1.0, %v10467_v8  ;;  %v7706_v8 = vld [vmem:[%s13382_s24] ss:$0 sm:$0xff] }
0x18f0   :  { %v6226_v9 = vsel %vm6222_vm10, %v13218_v14, %v7681_v13  ;;  %v7119_v14 = vld [vmem:[%s13377_s19 + $0x18] sm:$0xff] }
0x18f1   :  { %v9767_v54 = vpack.c.bf16 %v7119_v14, %v7118_v55 }
0x197b   :  { %v7035_v23 = vpop.xlane.xlu1 %7034 }
0x197c   :  { %10468 = vrcp.f32 %v7035_v23 }
0x1986   :  { %v10469_v44 = vpop.eup %10468 }
0x1987   :  { %v7037_v58 = vmul.f32 %v10469_v44, %v10465_v34 }
0x1989   :  { %9215 = vmatmul.mubr.msk.f32.vlgmr.msra.gmra.mrb[102].mxu0 %vm13864_vm1, %v7037_v58 }
0x198a   :  { %9225 = vmatprep.mubr.msk.f32.mxu0 %vm13865_vm7, %v6226_v9  ;;  %9766 = vmatpush3.bf16.msra.mxu0 %v9763_v32 }
0x198b   :  { %9768 = vmatprep.subr.bf16.mxu0 %v9767_v54 }
0x198e   :  { %9770 = vmatpush3.bf16.msra.mxu0 %v9767_v54 }
0x198f   :  { %9772 = vmatprep.subr.bf16.mxu0 %v9771_v20 }
0x1a5c   :  { %v7107_v24 = vpop.f32.mrb[102].mxu0 }
0x1a5d   :  { %v7112_v63 = vmul.f32 1.442695, %v7107_v24  ;;  %v9216_v36 = vpop.f32.mrb[103].mxu0  ;;  %vm7111_vm9 = vcmp.gt.f32.partialorder %v7107_v24, 0.0 }
0x1a5f   :  { %10470 = vpow2.f32 %v7112_v63 }
0x1a69   :  { %v10471_v52 = vpop.eup %10470 }
0x1a6a   :  { %v7698_v1 = vadd.f32 -1.0, %v10471_v52 }
0x1a6c   :  { %v7115_v6 = vsel %vm7111_vm9, %v7107_v24, %v7698_v1 }
0x1a6d   :  { %9226 = vmatmul.mubr.msk.f32.vlgmr.msra.gmra.mrb[104].mxu0 %vm13866_vm8, %v7115_v6 }
0x1a6e   :  { %9774 = vmatpush3.bf16.msra.mxu0 %v9771_v20 }
0x1a6f   :  { %9776 = vmatprep.subr.bf16.mxu0 %v9775_v21 }
0x1a72   :  { %9778 = vmatpush3.bf16.msra.mxu0 %v9775_v21 }
0x1a73   :  { %9780 = vmatprep.subr.bf16.mxu0 %v9779_v17 }
0x1a76   :  { %9782 = vmatpush3.bf16.msra.mxu0 %v9779_v17 }
0x1a77   :  { %9784 = vmatprep.subr.bf16.mxu0 %v9783_v39 }
0x1a7a   :  { %9786 = vmatpush3.bf16.msra.mxu0 %v9783_v39 }
0x1b40   :  { %v9227_v22 = vpop.f32.mrb[104].mxu0 }
0x1b41   :  { %v7205_v37 = vadd.f32 %v9227_v22, %v7699_v49  ;;  %v7199_v7 = vpop.f32.mrb[105].mxu0 }
0x1b42   :  { %v7200_v2 = vadd.f32 %v7699_v49, %v7199_v7 }
0x1b43   :  { %v7209_v57 = vmax.f32 %v7205_v37, 0.0 }
0x1b44   :  { %v7208_v60 = vmax.f32 %v7200_v2, 0.0 }
0x1b46   :  { %9244 = vmatprep.mubr.msk.f32.mxu0 %vm5540_vm0, %v7208_v60 }
0x1b47   :  { %9245 = vmatmul.mubr.msk.f32.vlgmr.msra.gmra.mrb[106].mxu0 %vm5540_vm0, %v7209_v57  ;;  %vm13869_vm0 = vmmov %vm13868_vm3 }
0x1b48   :  { %vm13870_vm6 = vmmov %vm13869_vm0 }
0x1b49   :  { %vm13871_vm11 = vmmov %vm13869_vm0 }
0x1b4a   :  { %vm13872_vm13 = vmmov %vm13869_vm0 }
0x1c1a   :  { %v9246_v29 = vpop.f32.mrb[106].mxu0 }
0x1c1b   :  { %v7297_v35 = vpop.f32.mrb[107].mxu0  ;;  %v7303_v61 = vadd.f32 %v9246_v29, %v7702_v38 }
0x1c1c   :  { %v7298_v40 = vadd.f32 %v7702_v38, %v7297_v35 }
0x1c1d   :  { %v7307_v59 = vadd.f32 %v7303_v61, %v7115_v6 }
0x1c1e   :  { %v7306_v10 = vadd.f32 %v7298_v40, %v6226_v9 }
0x1c1f   :  { %v7313_v15 = vsel %vm13868_vm3, %v7307_v59, 0.0 }
0x1c20   :  { %v7310_v48 = vsel %vm13867_vm4, %v7306_v10, 0.0 }
0x1c21   :  { %7311 = vadd.xlane.f32.xlu1 %v7310_v48 }
0x1c25   :  { %7314 = vadd.xlane.f32.xlu1 %v7313_v15 }
0x1cae   :  { %v7312_v26 = vpop.xlane.xlu1 %7311 }
0x1caf   :  { %v7316_v53 = vmul.f32 0.03125, %v7312_v26 }
0x1cb1   :  { %v7318_v56 = vsub.f32 %v7306_v10, %v7316_v53 }
0x1cb2   :  { %v7315_v42 = vpop.xlane.xlu1 %7314 }
0x1cb3   :  { %v7317_v46 = vmul.f32 0.03125, %v7315_v42  ;;  %v7320_v11 = vmul.f32 %v7318_v56, %v7318_v56 }
0x1cb5   :  { %v7319_v30 = vsub.f32 %v7307_v59, %v7317_v46  ;;  %v7322_v28 = vsel %vm13869_vm0, %v7320_v11, 0.0 }
0x1cb6   :  { %7323 = vadd.xlane.f32.xlu1 %v7322_v28 }
0x1cb7   :  { %v7321_v51 = vmul.f32 %v7319_v30, %v7319_v30 }
0x1cb9   :  { %v7325_v41 = vsel %vm13870_vm6, %v7321_v51, 0.0 }
0x1cba   :  { %7326 = vadd.xlane.f32.xlu1 %v7325_v41 }
0x1d43   :  { %v7324_v33 = vpop.xlane.xlu1 %7323 }
0x1d44   :  { %v7328_v4 = vmul.f32 0.03125, %v7324_v33 }
0x1d46   :  { %v7330_v31 = vadd.f32 1e-05, %v7328_v4 }
0x1d47   :  { %v7327_v25 = vpop.xlane.xlu1 %7326 }
0x1d48   :  { %10472 = vrsqrt.f32 %v7330_v31  ;;  %v7329_v47 = vmul.f32 0.03125, %v7327_v25 }
0x1d4a   :  { %v7331_v34 = vadd.f32 1e-05, %v7329_v47 }
0x1d4c   :  { %10474 = vrsqrt.f32 %v7331_v34 }
0x1d52   :  { %v10473_v18 = vpop.eup %10472 }
0x1d53   :  { %v7334_v23 = vmul.f32 %v10473_v18, %v7318_v56 }
0x1d55   :  { %v7342_v13 = vmul.f32 %v7705_v50, %v7334_v23 }
0x1d56   :  { %v10475_v44 = vpop.eup %10474 }
0x1d57   :  { %v7335_v58 = vmul.f32 %v10475_v44, %v7319_v30  ;;  %v7350_v9 = vadd.f32 %v7706_v8, %v7342_v13 }
0x1d59   :  { %v7343_v62 = vmul.f32 %v7705_v50, %v7335_v58  ;;  %7352 = vst.msk [vmem:[#allocation2] sm:$0xff] %vm13871_vm11, %v7350_v9 }
0x1d5b   :  { %v7351_v5 = vadd.f32 %v7706_v8, %v7343_v62 }
0x1d5d   :  { %7353 = vst.msk [vmem:[#allocation2 + $0x8] sm:$0xff] %vm13872_vm13, %v7351_v5 }
0x1d5e   :  { %10487 = shalt.err (!%p10484_p4)
}
0x1d5f   :  { %s10488_s1 = scalar_lea.hbm %s13383_s25, 256 }
0x1d60   :  { %p10489_p5 = scmp.ne.s32.totalorder %s13383_s25, %s10488_s1  ;;  %p10492_p6 = scmp.lt.u32.totalorder %s10488_s1, %s13383_s25 }
0x1d62   :  { %p10494_p7 = pnand %p10492_p6, %p10489_p5 }
0x1d64   :  { %10497 = shalt.err (!%p10494_p7)
}
0x1d65   :  { %s10512_s5 = smov 128   ;;  %s10513_s6 = smov 8  }
0x1d66   :  { %7365 = dma.vmem_to_hbm [thread:$0]  %s7360_s27, 256, %s13383_s25, [#allocation3], %s10512_s5, %s10512_s5, %s10513_s6  }
0x1d67   :  { %10498 = dma.done.wait [#allocation3], 256  }
0x1d68   :  { %10499 = vsyncadd [#allocation3], 4294967040 }
0x1d69   :  { %7369 = vsyncpa [#allocation3], 1 }

</bundles_post_ra>
